<compile_context>
chip_gen: v7x
topology: tpu7x:2x2x1
jax: 0.10.0
libtpu: 0.0.40
codegen_flags: <defaults>
</compile_context>

<pallas_src>
import functools

import numpy as np
import jax
import jax.numpy as jnp
from jax.experimental import pallas as pl
from jax.experimental.pallas import tpu as pltpu


# ----------------------------------------------------------------------------
# Pallas kernel: per-(group, M-tile) matmul + bias + optional ReLU.
#   x: (G, M, K)  w: (G, K, N)  b: (G, 1, N)  ->  (G, M, N)
# K and N are carried untiled (full-extent block dims); only M is tiled.
# ----------------------------------------------------------------------------
def _gmm_bias_act_kernel(x_ref, w_ref, b_ref, o_ref, *, relu):
    x = x_ref[0]                                   # (TM, K)  bf16
    w = w_ref[0]                                   # (K,  N)  bf16
    acc = jnp.dot(x, w, preferred_element_type=jnp.float32)   # (TM, N) f32
    acc = acc + b_ref[0]                           # + (1, N) f32 broadcast
    if relu:
        acc = jnp.maximum(acc, 0.0)
    o_ref[0] = acc.astype(o_ref.dtype)


def _pick_tm(M, G):
    """Pick the M tile size.  Keep >=2 parallel grid steps when cheap."""
    if G > 1:
        # group axis already provides >= 2 parallel grid steps
        return M if M <= 512 else 512
    if M >= 256:
        return 128
    if M >= 16 and M % 16 == 0:
        return M // 2          # 2 M-tiles so a dual-TC chip isn't half idle
    return M


def grouped_matmul_bias_act(x, w, b, relu=False):
    """y[g] = act(x[g] @ w[g] + b[g]).

    x: (G, M, K) bf16, w: (G, K, N) bf16, b: (G, 1, N) f32 -> (G, M, N) bf16.
    """
    G, M, K = x.shape
    _, _, N = w.shape
    TM = _pick_tm(M, G)
    Mp = -(-M // TM) * TM
    if Mp != M:
        x = jnp.pad(x, ((0, 0), (0, Mp - M), (0, 0)))

    flops = 2 * G * Mp * K * N
    bytes_accessed = (2 * G * Mp * K) + (2 * G * K * N) + (4 * G * N) \
        + (2 * G * Mp * N)

    out = pl.pallas_call(
        functools.partial(_gmm_bias_act_kernel, relu=relu),
        out_shape=jax.ShapeDtypeStruct((G, Mp, N), jnp.bfloat16),
        grid_spec=pltpu.PrefetchScalarGridSpec(
            num_scalar_prefetch=0,
            grid=(G, Mp // TM),
            in_specs=[
                pl.BlockSpec((1, TM, K), lambda g, i: (g, i, 0)),
                pl.BlockSpec((1, K, N), lambda g, i: (g, 0, 0)),
                pl.BlockSpec((1, 1, N), lambda g, i: (g, 0, 0)),
            ],
            out_specs=pl.BlockSpec((1, TM, N), lambda g, i: (g, i, 0)),
        ),
        compiler_params=pltpu.CompilerParams(
            dimension_semantics=("parallel", "parallel")),
        cost_estimate=pl.CostEstimate(
            flops=flops, transcendentals=0, bytes_accessed=bytes_accessed),
    )(x, w, b)
    if Mp != M:
        out = out[:, :M, :]
    return out


# ----------------------------------------------------------------------------
# Conv / pooling / resize helpers (NHWC glue around the Pallas kernel).
# ----------------------------------------------------------------------------
def conv1x1(x, w, b, relu):
    """x: (N,H,W,Cin) bf16, w: (Cin, Cout) bf16, b: (Cout,) f32."""
    N, H, W, C = x.shape
    Cout = w.shape[1]
    y = grouped_matmul_bias_act(
        x.reshape(1, N * H * W, C),
        w.reshape(1, C, Cout),
        b.reshape(1, 1, Cout),
        relu=relu)
    return y.reshape(N, H, W, Cout)


def conv3x3_dilated_grouped(x, w, b, dilation, groups, relu):
    """Grouped 3x3 atrous conv, 'same' output size, as per-group matmuls.

    x: (N,H,W,C) bf16, w: (Cout, Cin//groups, 3, 3) bf16 (PyTorch layout),
    b: (Cout,) f32.
    """
    N, H, W, C = x.shape
    Cout = w.shape[0]
    G = groups
    cin_g, cout_g = C // G, Cout // G
    d = dilation

    xp = jnp.pad(x, ((0, 0), (d, d), (d, d), (0, 0)))
    taps = []
    for kh in range(3):
        for kw in range(3):
            taps.append(xp[:, kh * d:kh * d + H, kw * d:kw * d + W, :])
    pat = jnp.stack(taps, axis=3)                         # (N,H,W,9,C)
    pat = pat.reshape(N, H, W, 9, G, cin_g)
    pat = jnp.transpose(pat, (4, 0, 1, 2, 5, 3))          # (G,N,H,W,cin_g,9)
    pat = pat.reshape(G, N * H * W, cin_g * 9)

    wm = jnp.transpose(w.reshape(G, cout_g, cin_g * 9), (0, 2, 1))
    bm = b.reshape(G, 1, cout_g)

    y = grouped_matmul_bias_act(pat, wm, bm, relu=relu)   # (G, NHW, cout_g)
    y = jnp.transpose(y.reshape(G, N, H, W, cout_g), (1, 2, 3, 0, 4))
    return y.reshape(N, H, W, Cout)


def maxpool2x2(x):
    N, H, W, C = x.shape
    x = x[:, :H // 2 * 2, :W // 2 * 2, :]
    return x.reshape(N, H // 2, 2, W // 2, 2, C).max(axis=(2, 4))


def _interp_matrix(out_size, in_size):
    """Bilinear (align_corners=True) 1-D interpolation matrix (out, in)."""
    M = np.zeros((out_size, in_size), dtype=np.float32)
    if out_size == 1 or in_size == 1:
        M[:, 0] = 1.0
        return M
    scale = (in_size - 1) / (out_size - 1)
    for i in range(out_size):
        src = i * scale
        i0 = min(int(np.floor(src)), in_size - 1)
        i1 = min(i0 + 1, in_size - 1)
        f = src - i0
        M[i, i0] += 1.0 - f
        M[i, i1] += f
    return M


def bilinear_resize(x, Hout, Wout):
    """F.interpolate(mode='bilinear', align_corners=True) on NHWC.

    Spatial dims here are 2..16, so this is a tiny einsum kept in plain jnp.
    """
    N, H, W, C = x.shape
    if (H, W) == (Hout, Wout):
        return x
    Mh = jnp.asarray(_interp_matrix(Hout, H))             # (Hout, H)
    Mw = jnp.asarray(_interp_matrix(Wout, W))             # (Wout, W)
    y = jnp.einsum('ph,qw,nhwc->npqc', Mh, Mw, x.astype(jnp.float32))
    return y.astype(x.dtype)


# ----------------------------------------------------------------------------
# Dense Atrous Convs Block + JointNet forward (NHWC internally).
# ----------------------------------------------------------------------------
_DILATIONS = (1, 2, 3, 4)


def dacb_forward(p, x, group, downsample=True):
    feats = []
    cur = x
    for i in range(4):
        y = conv1x1(cur, p[f"w1_{i}"], p[f"b1_{i}"], relu=True)
        y = conv3x3_dilated_grouped(y, p[f"w3_{i}"], p[f"b3_{i}"],
                                    dilation=_DILATIONS[i], groups=group,
                                    relu=True)
        feats.append(y)
        cur = jnp.concatenate([cur, y], axis=-1)
    e = jnp.concatenate(feats, axis=-1)                   # 4 * growth_rate ch
    if downsample:
        e_d = conv1x1(e, p["wd"], p["bd"], relu=True)
        e_d = maxpool2x2(e_d)
        return e, e_d
    return e


def jointnet_forward(params, x_nchw, group=8):
    # Boundary: NCHW f32 -> NHWC bf16 (single transpose in, single out).
    x = jnp.transpose(x_nchw, (0, 2, 3, 1)).astype(jnp.bfloat16)

    e1, e1_d = dacb_forward(params["dacb1"], x, group)
    e2, e2_d = dacb_forward(params["dacb2"], e1_d, group)
    e3, e3_d = dacb_forward(params["dacb3"], e2_d, group)
    e4 = conv1x1(e3_d, params["bridge_w"], params["bridge_b"], relu=True)
    d4 = bilinear_resize(e4, e3.shape[1], e3.shape[2])
    d3 = conv1x1(jnp.concatenate([d4, e3], axis=-1),
                 params["dc1_w"], params["dc1_b"], relu=True)
    d3 = bilinear_resize(d3, e2.shape[1], e2.shape[2])
    d2 = conv1x1(jnp.concatenate([d3, e2], axis=-1),
                 params["dc2_w"], params["dc2_b"], relu=True)
    d2 = bilinear_resize(d2, e1.shape[1], e1.shape[2])
    d1 = dacb_forward(params["dacb_f"], jnp.concatenate([d2, e1], axis=-1),
                      group, downsample=False)
    out = conv1x1(d1, params["cls_w"], params["cls_b"], relu=False)

    # NHWC bf16 -> NCHW f32 at the boundary.
    return jnp.transpose(out, (0, 3, 1, 2)).astype(jnp.float32)


# ----------------------------------------------------------------------------
# Deterministic parameter initialization (weights bf16, biases f32).
# ----------------------------------------------------------------------------
def _init_dacb(key, in_ch, g, group, downsample=True):
    p = {}
    keys = jax.random.split(key, 9)
    cur = in_ch
    for i in range(4):
        p[f"w1_{i}"] = (0.05 * jax.random.normal(
            keys[2 * i], (cur, g), jnp.float32)).astype(jnp.bfloat16)
        p[f"b1_{i}"] = jnp.zeros((g,), jnp.float32)
        p[f"w3_{i}"] = (0.05 * jax.random.normal(
            keys[2 * i + 1], (g, g // group, 3, 3),
            jnp.float32)).astype(jnp.bfloat16)
        p[f"b3_{i}"] = jnp.zeros((g,), jnp.float32)
        cur += g
    if downsample:
        p["wd"] = (0.05 * jax.random.normal(
            keys[8], (4 * g, g), jnp.float32)).astype(jnp.bfloat16)
        p["bd"] = jnp.zeros((g,), jnp.float32)
    return p


def init_params(key, in_ch, out_ch, gr, group):
    k = jax.random.split(key, 9)
    f = lambda kk, shape: (0.05 * jax.random.normal(
        kk, shape, jnp.float32)).astype(jnp.bfloat16)
    params = {
        "dacb1": _init_dacb(k[0], in_ch, gr[0], group),
        "dacb2": _init_dacb(k[1], gr[0], gr[1], group),
        "dacb3": _init_dacb(k[2], gr[1], gr[2], group),
        "bridge_w": f(k[3], (gr[2], gr[3])),
        "bridge_b": jnp.zeros((gr[3],), jnp.float32),
        "dc1_w": f(k[4], (gr[2] * 4 + gr[3], gr[2])),
        "dc1_b": jnp.zeros((gr[2],), jnp.float32),
        "dc2_w": f(k[5], (gr[1] * 4 + gr[2], gr[1])),
        "dc2_b": jnp.zeros((gr[1],), jnp.float32),
        "dacb_f": _init_dacb(k[6], gr[0] * 4 + gr[1], gr[0], group,
                             downsample=False),
        "cls_w": f(k[7], (gr[0] * 4, out_ch)),
        "cls_b": jnp.zeros((out_ch,), jnp.float32),
    }
    return params


if __name__ == "__main__":
    key = jax.random.PRNGKey(0)
    kx, kp = jax.random.split(key)

    in_ch, out_ch = 4, 2
    growth_rates = [32, 64, 128, 256]
    group = 8

    x = jax.random.normal(kx, (2, in_ch, 16, 16), jnp.float32)
    params = init_params(kp, in_ch, out_ch, growth_rates, group)

    fwd = jax.jit(functools.partial(jointnet_forward, group=group))
    out = fwd(params, x)
    out = jax.block_until_ready(out)

    assert out.shape == (2, out_ch, 16, 16), out.shape
    assert jnp.all(jnp.isfinite(out))
    print("KERNEL_OK")
</pallas_src>

<mosaic_0001>
module attributes {stable_mosaic.version = 11 : i64} {
  func.func @_gmm_bias_act_kernel(%arg0: i32, %arg1: i32, %arg2: memref<1x128x4xbf16, #tpu.memory_space<vmem>>, %arg3: memref<1x4x32xbf16, #tpu.memory_space<vmem>>, %arg4: memref<1x1x32xf32, #tpu.memory_space<vmem>>, %arg5: memref<1x128x32xbf16, #tpu.memory_space<vmem>>) attributes {dimension_semantics = [#tpu.dimension_semantics<parallel>, #tpu.dimension_semantics<parallel>], iteration_bounds = array<i64: 1, 4>, scalar_prefetch = 0 : i64, scratch_operands = 0 : i64, tpu.core_type = #tpu.core_type<tc>, window_params = [{transform_indices = @transform_0, window_bounds = array<i64: 1, 128, 4>}, {transform_indices = @transform_1, window_bounds = array<i64: 1, 4, 32>}, {transform_indices = @transform_2, window_bounds = array<i64: 1, 1, 32>}, {transform_indices = @transform_3, window_bounds = array<i64: 1, 128, 32>}]} {
    %c0 = arith.constant 0 : index
    %c0_0 = arith.constant 0 : index
    %c0_1 = arith.constant 0 : index
    %0 = vector.load %arg2[%c0, %c0_0, %c0_1] : memref<1x128x4xbf16, #tpu.memory_space<vmem>>, vector<1x128x4xbf16>
    %1 = vector.shape_cast %0 : vector<1x128x4xbf16> to vector<128x4xbf16>
    %c0_2 = arith.constant 0 : index
    %c0_3 = arith.constant 0 : index
    %c0_4 = arith.constant 0 : index
    %2 = vector.load %arg3[%c0_2, %c0_3, %c0_4] : memref<1x4x32xbf16, #tpu.memory_space<vmem>>, vector<1x4x32xbf16>
    %3 = vector.shape_cast %2 : vector<1x4x32xbf16> to vector<4x32xbf16>
    %cst = arith.constant dense<0.000000e+00> : vector<128x32xf32>
    %4 = tpu.matmul %1, %3, %cst {dimension_numbers = #tpu.dot_dimension_numbers<[1], [0], [0], [1], [0, 0, 1, 1], [], []>} : vector<128x4xbf16>, vector<4x32xbf16>, vector<128x32xf32> -> vector<128x32xf32>
    %c0_5 = arith.constant 0 : index
    %c0_6 = arith.constant 0 : index
    %c0_7 = arith.constant 0 : index
    %5 = vector.load %arg4[%c0_5, %c0_6, %c0_7] : memref<1x1x32xf32, #tpu.memory_space<vmem>>, vector<1x1x32xf32>
    %6 = vector.shape_cast %5 : vector<1x1x32xf32> to vector<1x32xf32>
    %7 = vector.broadcast %6 : vector<1x32xf32> to vector<128x32xf32>
    %8 = arith.addf %4, %7 : vector<128x32xf32>
    %cst_8 = arith.constant 0.000000e+00 : f32
    %9 = vector.broadcast %cst_8 : f32 to vector<128x32xf32>
    %10 = arith.maximumf %8, %9 : vector<128x32xf32>
    %11 = arith.truncf %10 : vector<128x32xf32> to vector<128x32xbf16>
    %c0_9 = arith.constant 0 : index
    %c0_10 = arith.constant 0 : index
    %c0_11 = arith.constant 0 : index
    %12 = vector.load %arg5[%c0_9, %c0_10, %c0_11] : memref<1x128x32xbf16, #tpu.memory_space<vmem>>, vector<1x128x32xbf16>
    %13 = vector.shape_cast %12 : vector<1x128x32xbf16> to vector<128x32xbf16>
    %14 = vector.shape_cast %11 : vector<128x32xbf16> to vector<1x128x32xbf16>
    tpu.vector_store %arg5[%c0_9, %c0_10, %c0_11], %14 {strides = array<i32>} : memref<1x128x32xbf16, #tpu.memory_space<vmem>>, vector<1x128x32xbf16>,
    return
  }
  func.func @transform_0(%arg0: i32, %arg1: i32) -> (i32, i32, i32) {
    %c0_i32 = arith.constant 0 : i32
    %c0_i32_0 = arith.constant 0 : i32
    return %arg0, %arg1, %c0_i32 : i32, i32, i32
  }
  func.func @transform_1(%arg0: i32, %arg1: i32) -> (i32, i32, i32) {
    %c0_i32 = arith.constant 0 : i32
    %c0_i32_0 = arith.constant 0 : i32
    %c0_i32_1 = arith.constant 0 : i32
    return %arg0, %c0_i32, %c0_i32_0 : i32, i32, i32
  }
  func.func @transform_2(%arg0: i32, %arg1: i32) -> (i32, i32, i32) {
    %c0_i32 = arith.constant 0 : i32
    %c0_i32_0 = arith.constant 0 : i32
    %c0_i32_1 = arith.constant 0 : i32
    return %arg0, %c0_i32, %c0_i32_0 : i32, i32, i32
  }
  func.func @transform_3(%arg0: i32, %arg1: i32) -> (i32, i32, i32) {
    %c0_i32 = arith.constant 0 : i32
    %c0_i32_0 = arith.constant 0 : i32
    return %arg0, %arg1, %c0_i32 : i32, i32, i32
  }
}

module attributes {stable_mosaic.version = 11 : i64} {
  func.func @_gmm_bias_act_kernel(%arg0: i32, %arg1: i32, %arg2: memref<1x512x36xbf16, #tpu.memory_space<vmem>>, %arg3: memref<1x36x4xbf16, #tpu.memory_space<vmem>>, %arg4: memref<1x1x4xf32, #tpu.memory_space<vmem>>, %arg5: memref<1x512x4xbf16, #tpu.memory_space<vmem>>) attributes {dimension_semantics = [#tpu.dimension_semantics<parallel>, #tpu.dimension_semantics<parallel>], iteration_bounds = array<i64: 8, 1>, scalar_prefetch = 0 : i64, scratch_operands = 0 : i64, tpu.core_type = #tpu.core_type<tc>, window_params = [{transform_indices = @transform_0, window_bounds = array<i64: 1, 512, 36>}, {transform_indices = @transform_1, window_bounds = array<i64: 1, 36, 4>}, {transform_indices = @transform_2, window_bounds = array<i64: 1, 1, 4>}, {transform_indices = @transform_3, window_bounds = array<i64: 1, 512, 4>}]} {
    %c0 = arith.constant 0 : index
    %c0_0 = arith.constant 0 : index
    %c0_1 = arith.constant 0 : index
    %0 = vector.load %arg2[%c0, %c0_0, %c0_1] : memref<1x512x36xbf16, #tpu.memory_space<vmem>>, vector<1x512x36xbf16>
    %1 = vector.shape_cast %0 : vector<1x512x36xbf16> to vector<512x36xbf16>
    %c0_2 = arith.constant 0 : index
    %c0_3 = arith.constant 0 : index
    %c0_4 = arith.constant 0 : index
    %2 = vector.load %arg3[%c0_2, %c0_3, %c0_4] : memref<1x36x4xbf16, #tpu.memory_space<vmem>>, vector<1x36x4xbf16>
    %3 = vector.shape_cast %2 : vector<1x36x4xbf16> to vector<36x4xbf16>
    %cst = arith.constant dense<0.000000e+00> : vector<512x4xf32>
    %4 = tpu.matmul %1, %3, %cst {dimension_numbers = #tpu.dot_dimension_numbers<[1], [0], [0], [1], [0, 0, 1, 1], [], []>} : vector<512x36xbf16>, vector<36x4xbf16>, vector<512x4xf32> -> vector<512x4xf32>
    %c0_5 = arith.constant 0 : index
    %c0_6 = arith.constant 0 : index
    %c0_7 = arith.constant 0 : index
    %5 = vector.load %arg4[%c0_5, %c0_6, %c0_7] : memref<1x1x4xf32, #tpu.memory_space<vmem>>, vector<1x1x4xf32>
    %6 = vector.shape_cast %5 : vector<1x1x4xf32> to vector<1x4xf32>
    %7 = vector.broadcast %6 : vector<1x4xf32> to vector<512x4xf32>
    %8 = arith.addf %4, %7 : vector<512x4xf32>
    %cst_8 = arith.constant 0.000000e+00 : f32
    %9 = vector.broadcast %cst_8 : f32 to vector<512x4xf32>
    %10 = arith.maximumf %8, %9 : vector<512x4xf32>
    %11 = arith.truncf %10 : vector<512x4xf32> to vector<512x4xbf16>
    %c0_9 = arith.constant 0 : index
    %c0_10 = arith.constant 0 : index
    %c0_11 = arith.constant 0 : index
    %12 = vector.load %arg5[%c0_9, %c0_10, %c0_11] : memref<1x512x4xbf16, #tpu.memory_space<vmem>>, vector<1x512x4xbf16>
    %13 = vector.shape_cast %12 : vector<1x512x4xbf16> to vector<512x4xbf16>
    %14 = vector.shape_cast %11 : vector<512x4xbf16> to vector<1x512x4xbf16>
    tpu.vector_store %arg5[%c0_9, %c0_10, %c0_11], %14 {strides = array<i32>} : memref<1x512x4xbf16, #tpu.memory_space<vmem>>, vector<1x512x4xbf16>,
    return
  }
  func.func @transform_0(%arg0: i32, %arg1: i32) -> (i32, i32, i32) {
    %c0_i32 = arith.constant 0 : i32
    %c0_i32_0 = arith.constant 0 : i32
    return %arg0, %arg1, %c0_i32 : i32, i32, i32
  }
  func.func @transform_1(%arg0: i32, %arg1: i32) -> (i32, i32, i32) {
    %c0_i32 = arith.constant 0 : i32
    %c0_i32_0 = arith.constant 0 : i32
    %c0_i32_1 = arith.constant 0 : i32
    return %arg0, %c0_i32, %c0_i32_0 : i32, i32, i32
  }
  func.func @transform_2(%arg0: i32, %arg1: i32) -> (i32, i32, i32) {
    %c0_i32 = arith.constant 0 : i32
    %c0_i32_0 = arith.constant 0 : i32
    %c0_i32_1 = arith.constant 0 : i32
    return %arg0, %c0_i32, %c0_i32_0 : i32, i32, i32
  }
  func.func @transform_3(%arg0: i32, %arg1: i32) -> (i32, i32, i32) {
    %c0_i32 = arith.constant 0 : i32
    %c0_i32_0 = arith.constant 0 : i32
    return %arg0, %arg1, %c0_i32 : i32, i32, i32
  }
}

module attributes {stable_mosaic.version = 11 : i64} {
  func.func @_gmm_bias_act_kernel(%arg0: i32, %arg1: i32, %arg2: memref<1x128x36xbf16, #tpu.memory_space<vmem>>, %arg3: memref<1x36x32xbf16, #tpu.memory_space<vmem>>, %arg4: memref<1x1x32xf32, #tpu.memory_space<vmem>>, %arg5: memref<1x128x32xbf16, #tpu.memory_space<vmem>>) attributes {dimension_semantics = [#tpu.dimension_semantics<parallel>, #tpu.dimension_semantics<parallel>], iteration_bounds = array<i64: 1, 4>, scalar_prefetch = 0 : i64, scratch_operands = 0 : i64, tpu.core_type = #tpu.core_type<tc>, window_params = [{transform_indices = @transform_0, window_bounds = array<i64: 1, 128, 36>}, {transform_indices = @transform_1, window_bounds = array<i64: 1, 36, 32>}, {transform_indices = @transform_2, window_bounds = array<i64: 1, 1, 32>}, {transform_indices = @transform_3, window_bounds = array<i64: 1, 128, 32>}]} {
    %c0 = arith.constant 0 : index
    %c0_0 = arith.constant 0 : index
    %c0_1 = arith.constant 0 : index
    %0 = vector.load %arg2[%c0, %c0_0, %c0_1] : memref<1x128x36xbf16, #tpu.memory_space<vmem>>, vector<1x128x36xbf16>
    %1 = vector.shape_cast %0 : vector<1x128x36xbf16> to vector<128x36xbf16>
    %c0_2 = arith.constant 0 : index
    %c0_3 = arith.constant 0 : index
    %c0_4 = arith.constant 0 : index
    %2 = vector.load %arg3[%c0_2, %c0_3, %c0_4] : memref<1x36x32xbf16, #tpu.memory_space<vmem>>, vector<1x36x32xbf16>
    %3 = vector.shape_cast %2 : vector<1x36x32xbf16> to vector<36x32xbf16>
    %cst = arith.constant dense<0.000000e+00> : vector<128x32xf32>
    %4 = tpu.matmul %1, %3, %cst {dimension_numbers = #tpu.dot_dimension_numbers<[1], [0], [0], [1], [0, 0, 1, 1], [], []>} : vector<128x36xbf16>, vector<36x32xbf16>, vector<128x32xf32> -> vector<128x32xf32>
    %c0_5 = arith.constant 0 : index
    %c0_6 = arith.constant 0 : index
    %c0_7 = arith.constant 0 : index
    %5 = vector.load %arg4[%c0_5, %c0_6, %c0_7] : memref<1x1x32xf32, #tpu.memory_space<vmem>>, vector<1x1x32xf32>
    %6 = vector.shape_cast %5 : vector<1x1x32xf32> to vector<1x32xf32>
    %7 = vector.broadcast %6 : vector<1x32xf32> to vector<128x32xf32>
    %8 = arith.addf %4, %7 : vector<128x32xf32>
    %cst_8 = arith.constant 0.000000e+00 : f32
    %9 = vector.broadcast %cst_8 : f32 to vector<128x32xf32>
    %10 = arith.maximumf %8, %9 : vector<128x32xf32>
    %11 = arith.truncf %10 : vector<128x32xf32> to vector<128x32xbf16>
    %c0_9 = arith.constant 0 : index
    %c0_10 = arith.constant 0 : index
    %c0_11 = arith.constant 0 : index
    %12 = vector.load %arg5[%c0_9, %c0_10, %c0_11] : memref<1x128x32xbf16, #tpu.memory_space<vmem>>, vector<1x128x32xbf16>
    %13 = vector.shape_cast %12 : vector<1x128x32xbf16> to vector<128x32xbf16>
    %14 = vector.shape_cast %11 : vector<128x32xbf16> to vector<1x128x32xbf16>
    tpu.vector_store %arg5[%c0_9, %c0_10, %c0_11], %14 {strides = array<i32>} : memref<1x128x32xbf16, #tpu.memory_space<vmem>>, vector<1x128x32xbf16>,
    return
  }
  func.func @transform_0(%arg0: i32, %arg1: i32) -> (i32, i32, i32) {
    %c0_i32 = arith.constant 0 : i32
    %c0_i32_0 = arith.constant 0 : i32
    return %arg0, %arg1, %c0_i32 : i32, i32, i32
  }
  func.func @transform_1(%arg0: i32, %arg1: i32) -> (i32, i32, i32) {
    %c0_i32 = arith.constant 0 : i32
    %c0_i32_0 = arith.constant 0 : i32
    %c0_i32_1 = arith.constant 0 : i32
    return %arg0, %c0_i32, %c0_i32_0 : i32, i32, i32
  }
  func.func @transform_2(%arg0: i32, %arg1: i32) -> (i32, i32, i32) {
    %c0_i32 = arith.constant 0 : i32
    %c0_i32_0 = arith.constant 0 : i32
    %c0_i32_1 = arith.constant 0 : i32
    return %arg0, %c0_i32, %c0_i32_0 : i32, i32, i32
  }
  func.func @transform_3(%arg0: i32, %arg1: i32) -> (i32, i32, i32) {
    %c0_i32 = arith.constant 0 : i32
    %c0_i32_0 = arith.constant 0 : i32
    return %arg0, %arg1, %c0_i32 : i32, i32, i32
  }
}

module attributes {stable_mosaic.version = 11 : i64} {
  func.func @_gmm_bias_act_kernel(%arg0: i32, %arg1: i32, %arg2: memref<1x128x68xbf16, #tpu.memory_space<vmem>>, %arg3: memref<1x68x32xbf16, #tpu.memory_space<vmem>>, %arg4: memref<1x1x32xf32, #tpu.memory_space<vmem>>, %arg5: memref<1x128x32xbf16, #tpu.memory_space<vmem>>) attributes {dimension_semantics = [#tpu.dimension_semantics<parallel>, #tpu.dimension_semantics<parallel>], iteration_bounds = array<i64: 1, 4>, scalar_prefetch = 0 : i64, scratch_operands = 0 : i64, tpu.core_type = #tpu.core_type<tc>, window_params = [{transform_indices = @transform_0, window_bounds = array<i64: 1, 128, 68>}, {transform_indices = @transform_1, window_bounds = array<i64: 1, 68, 32>}, {transform_indices = @transform_2, window_bounds = array<i64: 1, 1, 32>}, {transform_indices = @transform_3, window_bounds = array<i64: 1, 128, 32>}]} {
    %c0 = arith.constant 0 : index
    %c0_0 = arith.constant 0 : index
    %c0_1 = arith.constant 0 : index
    %0 = vector.load %arg2[%c0, %c0_0, %c0_1] : memref<1x128x68xbf16, #tpu.memory_space<vmem>>, vector<1x128x68xbf16>
    %1 = vector.shape_cast %0 : vector<1x128x68xbf16> to vector<128x68xbf16>
    %c0_2 = arith.constant 0 : index
    %c0_3 = arith.constant 0 : index
    %c0_4 = arith.constant 0 : index
    %2 = vector.load %arg3[%c0_2, %c0_3, %c0_4] : memref<1x68x32xbf16, #tpu.memory_space<vmem>>, vector<1x68x32xbf16>
    %3 = vector.shape_cast %2 : vector<1x68x32xbf16> to vector<68x32xbf16>
    %cst = arith.constant dense<0.000000e+00> : vector<128x32xf32>
    %4 = tpu.matmul %1, %3, %cst {dimension_numbers = #tpu.dot_dimension_numbers<[1], [0], [0], [1], [0, 0, 1, 1], [], []>} : vector<128x68xbf16>, vector<68x32xbf16>, vector<128x32xf32> -> vector<128x32xf32>
    %c0_5 = arith.constant 0 : index
    %c0_6 = arith.constant 0 : index
    %c0_7 = arith.constant 0 : index
    %5 = vector.load %arg4[%c0_5, %c0_6, %c0_7] : memref<1x1x32xf32, #tpu.memory_space<vmem>>, vector<1x1x32xf32>
    %6 = vector.shape_cast %5 : vector<1x1x32xf32> to vector<1x32xf32>
    %7 = vector.broadcast %6 : vector<1x32xf32> to vector<128x32xf32>
    %8 = arith.addf %4, %7 : vector<128x32xf32>
    %cst_8 = arith.constant 0.000000e+00 : f32
    %9 = vector.broadcast %cst_8 : f32 to vector<128x32xf32>
    %10 = arith.maximumf %8, %9 : vector<128x32xf32>
    %11 = arith.truncf %10 : vector<128x32xf32> to vector<128x32xbf16>
    %c0_9 = arith.constant 0 : index
    %c0_10 = arith.constant 0 : index
    %c0_11 = arith.constant 0 : index
    %12 = vector.load %arg5[%c0_9, %c0_10, %c0_11] : memref<1x128x32xbf16, #tpu.memory_space<vmem>>, vector<1x128x32xbf16>
    %13 = vector.shape_cast %12 : vector<1x128x32xbf16> to vector<128x32xbf16>
    %14 = vector.shape_cast %11 : vector<128x32xbf16> to vector<1x128x32xbf16>
    tpu.vector_store %arg5[%c0_9, %c0_10, %c0_11], %14 {strides = array<i32>} : memref<1x128x32xbf16, #tpu.memory_space<vmem>>, vector<1x128x32xbf16>,
    return
  }
  func.func @transform_0(%arg0: i32, %arg1: i32) -> (i32, i32, i32) {
    %c0_i32 = arith.constant 0 : i32
    %c0_i32_0 = arith.constant 0 : i32
    return %arg0, %arg1, %c0_i32 : i32, i32, i32
  }
  func.func @transform_1(%arg0: i32, %arg1: i32) -> (i32, i32, i32) {
    %c0_i32 = arith.constant 0 : i32
    %c0_i32_0 = arith.constant 0 : i32
    %c0_i32_1 = arith.constant 0 : i32
    return %arg0, %c0_i32, %c0_i32_0 : i32, i32, i32
  }
  func.func @transform_2(%arg0: i32, %arg1: i32) -> (i32, i32, i32) {
    %c0_i32 = arith.constant 0 : i32
    %c0_i32_0 = arith.constant 0 : i32
    %c0_i32_1 = arith.constant 0 : i32
    return %arg0, %c0_i32, %c0_i32_0 : i32, i32, i32
  }
  func.func @transform_3(%arg0: i32, %arg1: i32) -> (i32, i32, i32) {
    %c0_i32 = arith.constant 0 : i32
    %c0_i32_0 = arith.constant 0 : i32
    return %arg0, %arg1, %c0_i32 : i32, i32, i32
  }
}

module attributes {stable_mosaic.version = 11 : i64} {
  func.func @_gmm_bias_act_kernel(%arg0: i32, %arg1: i32, %arg2: memref<1x128x100xbf16, #tpu.memory_space<vmem>>, %arg3: memref<1x100x32xbf16, #tpu.memory_space<vmem>>, %arg4: memref<1x1x32xf32, #tpu.memory_space<vmem>>, %arg5: memref<1x128x32xbf16, #tpu.memory_space<vmem>>) attributes {dimension_semantics = [#tpu.dimension_semantics<parallel>, #tpu.dimension_semantics<parallel>], iteration_bounds = array<i64: 1, 4>, scalar_prefetch = 0 : i64, scratch_operands = 0 : i64, tpu.core_type = #tpu.core_type<tc>, window_params = [{transform_indices = @transform_0, window_bounds = array<i64: 1, 128, 100>}, {transform_indices = @transform_1, window_bounds = array<i64: 1, 100, 32>}, {transform_indices = @transform_2, window_bounds = array<i64: 1, 1, 32>}, {transform_indices = @transform_3, window_bounds = array<i64: 1, 128, 32>}]} {
    %c0 = arith.constant 0 : index
    %c0_0 = arith.constant 0 : index
    %c0_1 = arith.constant 0 : index
    %0 = vector.load %arg2[%c0, %c0_0, %c0_1] : memref<1x128x100xbf16, #tpu.memory_space<vmem>>, vector<1x128x100xbf16>
    %1 = vector.shape_cast %0 : vector<1x128x100xbf16> to vector<128x100xbf16>
    %c0_2 = arith.constant 0 : index
    %c0_3 = arith.constant 0 : index
    %c0_4 = arith.constant 0 : index
    %2 = vector.load %arg3[%c0_2, %c0_3, %c0_4] : memref<1x100x32xbf16, #tpu.memory_space<vmem>>, vector<1x100x32xbf16>
    %3 = vector.shape_cast %2 : vector<1x100x32xbf16> to vector<100x32xbf16>
    %cst = arith.constant dense<0.000000e+00> : vector<128x32xf32>
    %4 = tpu.matmul %1, %3, %cst {dimension_numbers = #tpu.dot_dimension_numbers<[1], [0], [0], [1], [0, 0, 1, 1], [], []>} : vector<128x100xbf16>, vector<100x32xbf16>, vector<128x32xf32> -> vector<128x32xf32>
    %c0_5 = arith.constant 0 : index
    %c0_6 = arith.constant 0 : index
    %c0_7 = arith.constant 0 : index
    %5 = vector.load %arg4[%c0_5, %c0_6, %c0_7] : memref<1x1x32xf32, #tpu.memory_space<vmem>>, vector<1x1x32xf32>
    %6 = vector.shape_cast %5 : vector<1x1x32xf32> to vector<1x32xf32>
    %7 = vector.broadcast %6 : vector<1x32xf32> to vector<128x32xf32>
    %8 = arith.addf %4, %7 : vector<128x32xf32>
    %cst_8 = arith.constant 0.000000e+00 : f32
    %9 = vector.broadcast %cst_8 : f32 to vector<128x32xf32>
    %10 = arith.maximumf %8, %9 : vector<128x32xf32>
    %11 = arith.truncf %10 : vector<128x32xf32> to vector<128x32xbf16>
    %c0_9 = arith.constant 0 : index
    %c0_10 = arith.constant 0 : index
    %c0_11 = arith.constant 0 : index
    %12 = vector.load %arg5[%c0_9, %c0_10, %c0_11] : memref<1x128x32xbf16, #tpu.memory_space<vmem>>, vector<1x128x32xbf16>
    %13 = vector.shape_cast %12 : vector<1x128x32xbf16> to vector<128x32xbf16>
    %14 = vector.shape_cast %11 : vector<128x32xbf16> to vector<1x128x32xbf16>
    tpu.vector_store %arg5[%c0_9, %c0_10, %c0_11], %14 {strides = array<i32>} : memref<1x128x32xbf16, #tpu.memory_space<vmem>>, vector<1x128x32xbf16>,
    return
  }
  func.func @transform_0(%arg0: i32, %arg1: i32) -> (i32, i32, i32) {
    %c0_i32 = arith.constant 0 : i32
    %c0_i32_0 = arith.constant 0 : i32
    return %arg0, %arg1, %c0_i32 : i32, i32, i32
  }
  func.func @transform_1(%arg0: i32, %arg1: i32) -> (i32, i32, i32) {
    %c0_i32 = arith.constant 0 : i32
    %c0_i32_0 = arith.constant 0 : i32
    %c0_i32_1 = arith.constant 0 : i32
    return %arg0, %c0_i32, %c0_i32_0 : i32, i32, i32
  }
  func.func @transform_2(%arg0: i32, %arg1: i32) -> (i32, i32, i32) {
    %c0_i32 = arith.constant 0 : i32
    %c0_i32_0 = arith.constant 0 : i32
    %c0_i32_1 = arith.constant 0 : i32
    return %arg0, %c0_i32, %c0_i32_0 : i32, i32, i32
  }
  func.func @transform_3(%arg0: i32, %arg1: i32) -> (i32, i32, i32) {
    %c0_i32 = arith.constant 0 : i32
    %c0_i32_0 = arith.constant 0 : i32
    return %arg0, %arg1, %c0_i32 : i32, i32, i32
  }
}

module attributes {stable_mosaic.version = 11 : i64} {
  func.func @_gmm_bias_act_kernel(%arg0: i32, %arg1: i32, %arg2: memref<1x128x128xbf16, #tpu.memory_space<vmem>>, %arg3: memref<1x128x32xbf16, #tpu.memory_space<vmem>>, %arg4: memref<1x1x32xf32, #tpu.memory_space<vmem>>, %arg5: memref<1x128x32xbf16, #tpu.memory_space<vmem>>) attributes {dimension_semantics = [#tpu.dimension_semantics<parallel>, #tpu.dimension_semantics<parallel>], iteration_bounds = array<i64: 1, 4>, scalar_prefetch = 0 : i64, scratch_operands = 0 : i64, tpu.core_type = #tpu.core_type<tc>, window_params = [{transform_indices = @transform_0, window_bounds = array<i64: 1, 128, 128>}, {transform_indices = @transform_1, window_bounds = array<i64: 1, 128, 32>}, {transform_indices = @transform_2, window_bounds = array<i64: 1, 1, 32>}, {transform_indices = @transform_3, window_bounds = array<i64: 1, 128, 32>}]} {
    %c0 = arith.constant 0 : index
    %c0_0 = arith.constant 0 : index
    %c0_1 = arith.constant 0 : index
    %0 = vector.load %arg2[%c0, %c0_0, %c0_1] : memref<1x128x128xbf16, #tpu.memory_space<vmem>>, vector<1x128x128xbf16>
    %1 = vector.shape_cast %0 : vector<1x128x128xbf16> to vector<128x128xbf16>
    %c0_2 = arith.constant 0 : index
    %c0_3 = arith.constant 0 : index
    %c0_4 = arith.constant 0 : index
    %2 = vector.load %arg3[%c0_2, %c0_3, %c0_4] : memref<1x128x32xbf16, #tpu.memory_space<vmem>>, vector<1x128x32xbf16>
    %3 = vector.shape_cast %2 : vector<1x128x32xbf16> to vector<128x32xbf16>
    %cst = arith.constant dense<0.000000e+00> : vector<128x32xf32>
    %4 = tpu.matmul %1, %3, %cst {dimension_numbers = #tpu.dot_dimension_numbers<[1], [0], [0], [1], [0, 0, 1, 1], [], []>} : vector<128x128xbf16>, vector<128x32xbf16>, vector<128x32xf32> -> vector<128x32xf32>
    %c0_5 = arith.constant 0 : index
    %c0_6 = arith.constant 0 : index
    %c0_7 = arith.constant 0 : index
    %5 = vector.load %arg4[%c0_5, %c0_6, %c0_7] : memref<1x1x32xf32, #tpu.memory_space<vmem>>, vector<1x1x32xf32>
    %6 = vector.shape_cast %5 : vector<1x1x32xf32> to vector<1x32xf32>
    %7 = vector.broadcast %6 : vector<1x32xf32> to vector<128x32xf32>
    %8 = arith.addf %4, %7 : vector<128x32xf32>
    %cst_8 = arith.constant 0.000000e+00 : f32
    %9 = vector.broadcast %cst_8 : f32 to vector<128x32xf32>
    %10 = arith.maximumf %8, %9 : vector<128x32xf32>
    %11 = arith.truncf %10 : vector<128x32xf32> to vector<128x32xbf16>
    %c0_9 = arith.constant 0 : index
    %c0_10 = arith.constant 0 : index
    %c0_11 = arith.constant 0 : index
    %12 = vector.load %arg5[%c0_9, %c0_10, %c0_11] : memref<1x128x32xbf16, #tpu.memory_space<vmem>>, vector<1x128x32xbf16>
    %13 = vector.shape_cast %12 : vector<1x128x32xbf16> to vector<128x32xbf16>
    %14 = vector.shape_cast %11 : vector<128x32xbf16> to vector<1x128x32xbf16>
    tpu.vector_store %arg5[%c0_9, %c0_10, %c0_11], %14 {strides = array<i32>} : memref<1x128x32xbf16, #tpu.memory_space<vmem>>, vector<1x128x32xbf16>,
    return
  }
  func.func @transform_0(%arg0: i32, %arg1: i32) -> (i32, i32, i32) {
    %c0_i32 = arith.constant 0 : i32
    %c0_i32_0 = arith.constant 0 : i32
    return %arg0, %arg1, %c0_i32 : i32, i32, i32
  }
  func.func @transform_1(%arg0: i32, %arg1: i32) -> (i32, i32, i32) {
    %c0_i32 = arith.constant 0 : i32
    %c0_i32_0 = arith.constant 0 : i32
    %c0_i32_1 = arith.constant 0 : i32
    return %arg0, %c0_i32, %c0_i32_0 : i32, i32, i32
  }
  func.func @transform_2(%arg0: i32, %arg1: i32) -> (i32, i32, i32) {
    %c0_i32 = arith.constant 0 : i32
    %c0_i32_0 = arith.constant 0 : i32
    %c0_i32_1 = arith.constant 0 : i32
    return %arg0, %c0_i32, %c0_i32_0 : i32, i32, i32
  }
  func.func @transform_3(%arg0: i32, %arg1: i32) -> (i32, i32, i32) {
    %c0_i32 = arith.constant 0 : i32
    %c0_i32_0 = arith.constant 0 : i32
    return %arg0, %arg1, %c0_i32 : i32, i32, i32
  }
}

module attributes {stable_mosaic.version = 11 : i64} {
  func.func @_gmm_bias_act_kernel(%arg0: i32, %arg1: i32, %arg2: memref<1x64x32xbf16, #tpu.memory_space<vmem>>, %arg3: memref<1x32x64xbf16, #tpu.memory_space<vmem>>, %arg4: memref<1x1x64xf32, #tpu.memory_space<vmem>>, %arg5: memref<1x64x64xbf16, #tpu.memory_space<vmem>>) attributes {dimension_semantics = [#tpu.dimension_semantics<parallel>, #tpu.dimension_semantics<parallel>], iteration_bounds = array<i64: 1, 2>, scalar_prefetch = 0 : i64, scratch_operands = 0 : i64, tpu.core_type = #tpu.core_type<tc>, window_params = [{transform_indices = @transform_0, window_bounds = array<i64: 1, 64, 32>}, {transform_indices = @transform_1, window_bounds = array<i64: 1, 32, 64>}, {transform_indices = @transform_2, window_bounds = array<i64: 1, 1, 64>}, {transform_indices = @transform_3, window_bounds = array<i64: 1, 64, 64>}]} {
    %c0 = arith.constant 0 : index
    %c0_0 = arith.constant 0 : index
    %c0_1 = arith.constant 0 : index
    %0 = vector.load %arg2[%c0, %c0_0, %c0_1] : memref<1x64x32xbf16, #tpu.memory_space<vmem>>, vector<1x64x32xbf16>
    %1 = vector.shape_cast %0 : vector<1x64x32xbf16> to vector<64x32xbf16>
    %c0_2 = arith.constant 0 : index
    %c0_3 = arith.constant 0 : index
    %c0_4 = arith.constant 0 : index
    %2 = vector.load %arg3[%c0_2, %c0_3, %c0_4] : memref<1x32x64xbf16, #tpu.memory_space<vmem>>, vector<1x32x64xbf16>
    %3 = vector.shape_cast %2 : vector<1x32x64xbf16> to vector<32x64xbf16>
    %cst = arith.constant dense<0.000000e+00> : vector<64x64xf32>
    %4 = tpu.matmul %1, %3, %cst {dimension_numbers = #tpu.dot_dimension_numbers<[1], [0], [0], [1], [0, 0, 1, 1], [], []>} : vector<64x32xbf16>, vector<32x64xbf16>, vector<64x64xf32> -> vector<64x64xf32>
    %c0_5 = arith.constant 0 : index
    %c0_6 = arith.constant 0 : index
    %c0_7 = arith.constant 0 : index
    %5 = vector.load %arg4[%c0_5, %c0_6, %c0_7] : memref<1x1x64xf32, #tpu.memory_space<vmem>>, vector<1x1x64xf32>
    %6 = vector.shape_cast %5 : vector<1x1x64xf32> to vector<1x64xf32>
    %7 = vector.broadcast %6 : vector<1x64xf32> to vector<64x64xf32>
    %8 = arith.addf %4, %7 : vector<64x64xf32>
    %cst_8 = arith.constant 0.000000e+00 : f32
    %9 = vector.broadcast %cst_8 : f32 to vector<64x64xf32>
    %10 = arith.maximumf %8, %9 : vector<64x64xf32>
    %11 = arith.truncf %10 : vector<64x64xf32> to vector<64x64xbf16>
    %c0_9 = arith.constant 0 : index
    %c0_10 = arith.constant 0 : index
    %c0_11 = arith.constant 0 : index
    %12 = vector.load %arg5[%c0_9, %c0_10, %c0_11] : memref<1x64x64xbf16, #tpu.memory_space<vmem>>, vector<1x64x64xbf16>
    %13 = vector.shape_cast %12 : vector<1x64x64xbf16> to vector<64x64xbf16>
    %14 = vector.shape_cast %11 : vector<64x64xbf16> to vector<1x64x64xbf16>
    tpu.vector_store %arg5[%c0_9, %c0_10, %c0_11], %14 {strides = array<i32>} : memref<1x64x64xbf16, #tpu.memory_space<vmem>>, vector<1x64x64xbf16>,
    return
  }
  func.func @transform_0(%arg0: i32, %arg1: i32) -> (i32, i32, i32) {
    %c0_i32 = arith.constant 0 : i32
    %c0_i32_0 = arith.constant 0 : i32
    return %arg0, %arg1, %c0_i32 : i32, i32, i32
  }
  func.func @transform_1(%arg0: i32, %arg1: i32) -> (i32, i32, i32) {
    %c0_i32 = arith.constant 0 : i32
    %c0_i32_0 = arith.constant 0 : i32
    %c0_i32_1 = arith.constant 0 : i32
    return %arg0, %c0_i32, %c0_i32_0 : i32, i32, i32
  }
  func.func @transform_2(%arg0: i32, %arg1: i32) -> (i32, i32, i32) {
    %c0_i32 = arith.constant 0 : i32
    %c0_i32_0 = arith.constant 0 : i32
    %c0_i32_1 = arith.constant 0 : i32
    return %arg0, %c0_i32, %c0_i32_0 : i32, i32, i32
  }
  func.func @transform_3(%arg0: i32, %arg1: i32) -> (i32, i32, i32) {
    %c0_i32 = arith.constant 0 : i32
    %c0_i32_0 = arith.constant 0 : i32
    return %arg0, %arg1, %c0_i32 : i32, i32, i32
  }
}

module attributes {stable_mosaic.version = 11 : i64} {
  func.func @_gmm_bias_act_kernel(%arg0: i32, %arg1: i32, %arg2: memref<1x128x72xbf16, #tpu.memory_space<vmem>>, %arg3: memref<1x72x8xbf16, #tpu.memory_space<vmem>>, %arg4: memref<1x1x8xf32, #tpu.memory_space<vmem>>, %arg5: memref<1x128x8xbf16, #tpu.memory_space<vmem>>) attributes {dimension_semantics = [#tpu.dimension_semantics<parallel>, #tpu.dimension_semantics<parallel>], iteration_bounds = array<i64: 8, 1>, scalar_prefetch = 0 : i64, scratch_operands = 0 : i64, tpu.core_type = #tpu.core_type<tc>, window_params = [{transform_indices = @transform_0, window_bounds = array<i64: 1, 128, 72>}, {transform_indices = @transform_1, window_bounds = array<i64: 1, 72, 8>}, {transform_indices = @transform_2, window_bounds = array<i64: 1, 1, 8>}, {transform_indices = @transform_3, window_bounds = array<i64: 1, 128, 8>}]} {
    %c0 = arith.constant 0 : index
    %c0_0 = arith.constant 0 : index
    %c0_1 = arith.constant 0 : index
    %0 = vector.load %arg2[%c0, %c0_0, %c0_1] : memref<1x128x72xbf16, #tpu.memory_space<vmem>>, vector<1x128x72xbf16>
    %1 = vector.shape_cast %0 : vector<1x128x72xbf16> to vector<128x72xbf16>
    %c0_2 = arith.constant 0 : index
    %c0_3 = arith.constant 0 : index
    %c0_4 = arith.constant 0 : index
    %2 = vector.load %arg3[%c0_2, %c0_3, %c0_4] : memref<1x72x8xbf16, #tpu.memory_space<vmem>>, vector<1x72x8xbf16>
    %3 = vector.shape_cast %2 : vector<1x72x8xbf16> to vector<72x8xbf16>
    %cst = arith.constant dense<0.000000e+00> : vector<128x8xf32>
    %4 = tpu.matmul %1, %3, %cst {dimension_numbers = #tpu.dot_dimension_numbers<[1], [0], [0], [1], [0, 0, 1, 1], [], []>} : vector<128x72xbf16>, vector<72x8xbf16>, vector<128x8xf32> -> vector<128x8xf32>
    %c0_5 = arith.constant 0 : index
    %c0_6 = arith.constant 0 : index
    %c0_7 = arith.constant 0 : index
    %5 = vector.load %arg4[%c0_5, %c0_6, %c0_7] : memref<1x1x8xf32, #tpu.memory_space<vmem>>, vector<1x1x8xf32>
    %6 = vector.shape_cast %5 : vector<1x1x8xf32> to vector<1x8xf32>
    %7 = vector.broadcast %6 : vector<1x8xf32> to vector<128x8xf32>
    %8 = arith.addf %4, %7 : vector<128x8xf32>
    %cst_8 = arith.constant 0.000000e+00 : f32
    %9 = vector.broadcast %cst_8 : f32 to vector<128x8xf32>
    %10 = arith.maximumf %8, %9 : vector<128x8xf32>
    %11 = arith.truncf %10 : vector<128x8xf32> to vector<128x8xbf16>
    %c0_9 = arith.constant 0 : index
    %c0_10 = arith.constant 0 : index
    %c0_11 = arith.constant 0 : index
    %12 = vector.load %arg5[%c0_9, %c0_10, %c0_11] : memref<1x128x8xbf16, #tpu.memory_space<vmem>>, vector<1x128x8xbf16>
    %13 = vector.shape_cast %12 : vector<1x128x8xbf16> to vector<128x8xbf16>
    %14 = vector.shape_cast %11 : vector<128x8xbf16> to vector<1x128x8xbf16>
    tpu.vector_store %arg5[%c0_9, %c0_10, %c0_11], %14 {strides = array<i32>} : memref<1x128x8xbf16, #tpu.memory_space<vmem>>, vector<1x128x8xbf16>,
    return
  }
  func.func @transform_0(%arg0: i32, %arg1: i32) -> (i32, i32, i32) {
    %c0_i32 = arith.constant 0 : i32
    %c0_i32_0 = arith.constant 0 : i32
    return %arg0, %arg1, %c0_i32 : i32, i32, i32
  }
  func.func @transform_1(%arg0: i32, %arg1: i32) -> (i32, i32, i32) {
    %c0_i32 = arith.constant 0 : i32
    %c0_i32_0 = arith.constant 0 : i32
    %c0_i32_1 = arith.constant 0 : i32
    return %arg0, %c0_i32, %c0_i32_0 : i32, i32, i32
  }
  func.func @transform_2(%arg0: i32, %arg1: i32) -> (i32, i32, i32) {
    %c0_i32 = arith.constant 0 : i32
    %c0_i32_0 = arith.constant 0 : i32
    %c0_i32_1 = arith.constant 0 : i32
    return %arg0, %c0_i32, %c0_i32_0 : i32, i32, i32
  }
  func.func @transform_3(%arg0: i32, %arg1: i32) -> (i32, i32, i32) {
    %c0_i32 = arith.constant 0 : i32
    %c0_i32_0 = arith.constant 0 : i32
    return %arg0, %arg1, %c0_i32 : i32, i32, i32
  }
}

module attributes {stable_mosaic.version = 11 : i64} {
  func.func @_gmm_bias_act_kernel(%arg0: i32, %arg1: i32, %arg2: memref<1x64x96xbf16, #tpu.memory_space<vmem>>, %arg3: memref<1x96x64xbf16, #tpu.memory_space<vmem>>, %arg4: memref<1x1x64xf32, #tpu.memory_space<vmem>>, %arg5: memref<1x64x64xbf16, #tpu.memory_space<vmem>>) attributes {dimension_semantics = [#tpu.dimension_semantics<parallel>, #tpu.dimension_semantics<parallel>], iteration_bounds = array<i64: 1, 2>, scalar_prefetch = 0 : i64, scratch_operands = 0 : i64, tpu.core_type = #tpu.core_type<tc>, window_params = [{transform_indices = @transform_0, window_bounds = array<i64: 1, 64, 96>}, {transform_indices = @transform_1, window_bounds = array<i64: 1, 96, 64>}, {transform_indices = @transform_2, window_bounds = array<i64: 1, 1, 64>}, {transform_indices = @transform_3, window_bounds = array<i64: 1, 64, 64>}]} {
    %c0 = arith.constant 0 : index
    %c0_0 = arith.constant 0 : index
    %c0_1 = arith.constant 0 : index
    %0 = vector.load %arg2[%c0, %c0_0, %c0_1] : memref<1x64x96xbf16, #tpu.memory_space<vmem>>, vector<1x64x96xbf16>
    %1 = vector.shape_cast %0 : vector<1x64x96xbf16> to vector<64x96xbf16>
    %c0_2 = arith.constant 0 : index
    %c0_3 = arith.constant 0 : index
    %c0_4 = arith.constant 0 : index
    %2 = vector.load %arg3[%c0_2, %c0_3, %c0_4] : memref<1x96x64xbf16, #tpu.memory_space<vmem>>, vector<1x96x64xbf16>
    %3 = vector.shape_cast %2 : vector<1x96x64xbf16> to vector<96x64xbf16>
    %cst = arith.constant dense<0.000000e+00> : vector<64x64xf32>
    %4 = tpu.matmul %1, %3, %cst {dimension_numbers = #tpu.dot_dimension_numbers<[1], [0], [0], [1], [0, 0, 1, 1], [], []>} : vector<64x96xbf16>, vector<96x64xbf16>, vector<64x64xf32> -> vector<64x64xf32>
    %c0_5 = arith.constant 0 : index
    %c0_6 = arith.constant 0 : index
    %c0_7 = arith.constant 0 : index
    %5 = vector.load %arg4[%c0_5, %c0_6, %c0_7] : memref<1x1x64xf32, #tpu.memory_space<vmem>>, vector<1x1x64xf32>
    %6 = vector.shape_cast %5 : vector<1x1x64xf32> to vector<1x64xf32>
    %7 = vector.broadcast %6 : vector<1x64xf32> to vector<64x64xf32>
    %8 = arith.addf %4, %7 : vector<64x64xf32>
    %cst_8 = arith.constant 0.000000e+00 : f32
    %9 = vector.broadcast %cst_8 : f32 to vector<64x64xf32>
    %10 = arith.maximumf %8, %9 : vector<64x64xf32>
    %11 = arith.truncf %10 : vector<64x64xf32> to vector<64x64xbf16>
    %c0_9 = arith.constant 0 : index
    %c0_10 = arith.constant 0 : index
    %c0_11 = arith.constant 0 : index
    %12 = vector.load %arg5[%c0_9, %c0_10, %c0_11] : memref<1x64x64xbf16, #tpu.memory_space<vmem>>, vector<1x64x64xbf16>
    %13 = vector.shape_cast %12 : vector<1x64x64xbf16> to vector<64x64xbf16>
    %14 = vector.shape_cast %11 : vector<64x64xbf16> to vector<1x64x64xbf16>
    tpu.vector_store %arg5[%c0_9, %c0_10, %c0_11], %14 {strides = array<i32>} : memref<1x64x64xbf16, #tpu.memory_space<vmem>>, vector<1x64x64xbf16>,
    return
  }
  func.func @transform_0(%arg0: i32, %arg1: i32) -> (i32, i32, i32) {
    %c0_i32 = arith.constant 0 : i32
    %c0_i32_0 = arith.constant 0 : i32
    return %arg0, %arg1, %c0_i32 : i32, i32, i32
  }
  func.func @transform_1(%arg0: i32, %arg1: i32) -> (i32, i32, i32) {
    %c0_i32 = arith.constant 0 : i32
    %c0_i32_0 = arith.constant 0 : i32
    %c0_i32_1 = arith.constant 0 : i32
    return %arg0, %c0_i32, %c0_i32_0 : i32, i32, i32
  }
  func.func @transform_2(%arg0: i32, %arg1: i32) -> (i32, i32, i32) {
    %c0_i32 = arith.constant 0 : i32
    %c0_i32_0 = arith.constant 0 : i32
    %c0_i32_1 = arith.constant 0 : i32
    return %arg0, %c0_i32, %c0_i32_0 : i32, i32, i32
  }
  func.func @transform_3(%arg0: i32, %arg1: i32) -> (i32, i32, i32) {
    %c0_i32 = arith.constant 0 : i32
    %c0_i32_0 = arith.constant 0 : i32
    return %arg0, %arg1, %c0_i32 : i32, i32, i32
  }
}

module attributes {stable_mosaic.version = 11 : i64} {
  func.func @_gmm_bias_act_kernel(%arg0: i32, %arg1: i32, %arg2: memref<1x64x160xbf16, #tpu.memory_space<vmem>>, %arg3: memref<1x160x64xbf16, #tpu.memory_space<vmem>>, %arg4: memref<1x1x64xf32, #tpu.memory_space<vmem>>, %arg5: memref<1x64x64xbf16, #tpu.memory_space<vmem>>) attributes {dimension_semantics = [#tpu.dimension_semantics<parallel>, #tpu.dimension_semantics<parallel>], iteration_bounds = array<i64: 1, 2>, scalar_prefetch = 0 : i64, scratch_operands = 0 : i64, tpu.core_type = #tpu.core_type<tc>, window_params = [{transform_indices = @transform_0, window_bounds = array<i64: 1, 64, 160>}, {transform_indices = @transform_1, window_bounds = array<i64: 1, 160, 64>}, {transform_indices = @transform_2, window_bounds = array<i64: 1, 1, 64>}, {transform_indices = @transform_3, window_bounds = array<i64: 1, 64, 64>}]} {
    %c0 = arith.constant 0 : index
    %c0_0 = arith.constant 0 : index
    %c0_1 = arith.constant 0 : index
    %0 = vector.load %arg2[%c0, %c0_0, %c0_1] : memref<1x64x160xbf16, #tpu.memory_space<vmem>>, vector<1x64x160xbf16>
    %1 = vector.shape_cast %0 : vector<1x64x160xbf16> to vector<64x160xbf16>
    %c0_2 = arith.constant 0 : index
    %c0_3 = arith.constant 0 : index
    %c0_4 = arith.constant 0 : index
    %2 = vector.load %arg3[%c0_2, %c0_3, %c0_4] : memref<1x160x64xbf16, #tpu.memory_space<vmem>>, vector<1x160x64xbf16>
    %3 = vector.shape_cast %2 : vector<1x160x64xbf16> to vector<160x64xbf16>
    %cst = arith.constant dense<0.000000e+00> : vector<64x64xf32>
    %4 = tpu.matmul %1, %3, %cst {dimension_numbers = #tpu.dot_dimension_numbers<[1], [0], [0], [1], [0, 0, 1, 1], [], []>} : vector<64x160xbf16>, vector<160x64xbf16>, vector<64x64xf32> -> vector<64x64xf32>
    %c0_5 = arith.constant 0 : index
    %c0_6 = arith.constant 0 : index
    %c0_7 = arith.constant 0 : index
    %5 = vector.load %arg4[%c0_5, %c0_6, %c0_7] : memref<1x1x64xf32, #tpu.memory_space<vmem>>, vector<1x1x64xf32>
    %6 = vector.shape_cast %5 : vector<1x1x64xf32> to vector<1x64xf32>
    %7 = vector.broadcast %6 : vector<1x64xf32> to vector<64x64xf32>
    %8 = arith.addf %4, %7 : vector<64x64xf32>
    %cst_8 = arith.constant 0.000000e+00 : f32
    %9 = vector.broadcast %cst_8 : f32 to vector<64x64xf32>
    %10 = arith.maximumf %8, %9 : vector<64x64xf32>
    %11 = arith.truncf %10 : vector<64x64xf32> to vector<64x64xbf16>
    %c0_9 = arith.constant 0 : index
    %c0_10 = arith.constant 0 : index
    %c0_11 = arith.constant 0 : index
    %12 = vector.load %arg5[%c0_9, %c0_10, %c0_11] : memref<1x64x64xbf16, #tpu.memory_space<vmem>>, vector<1x64x64xbf16>
    %13 = vector.shape_cast %12 : vector<1x64x64xbf16> to vector<64x64xbf16>
    %14 = vector.shape_cast %11 : vector<64x64xbf16> to vector<1x64x64xbf16>
    tpu.vector_store %arg5[%c0_9, %c0_10, %c0_11], %14 {strides = array<i32>} : memref<1x64x64xbf16, #tpu.memory_space<vmem>>, vector<1x64x64xbf16>,
    return
  }
  func.func @transform_0(%arg0: i32, %arg1: i32) -> (i32, i32, i32) {
    %c0_i32 = arith.constant 0 : i32
    %c0_i32_0 = arith.constant 0 : i32
    return %arg0, %arg1, %c0_i32 : i32, i32, i32
  }
  func.func @transform_1(%arg0: i32, %arg1: i32) -> (i32, i32, i32) {
    %c0_i32 = arith.constant 0 : i32
    %c0_i32_0 = arith.constant 0 : i32
    %c0_i32_1 = arith.constant 0 : i32
    return %arg0, %c0_i32, %c0_i32_0 : i32, i32, i32
  }
  func.func @transform_2(%arg0: i32, %arg1: i32) -> (i32, i32, i32) {
    %c0_i32 = arith.constant 0 : i32
    %c0_i32_0 = arith.constant 0 : i32
    %c0_i32_1 = arith.constant 0 : i32
    return %arg0, %c0_i32, %c0_i32_0 : i32, i32, i32
  }
  func.func @transform_3(%arg0: i32, %arg1: i32) -> (i32, i32, i32) {
    %c0_i32 = arith.constant 0 : i32
    %c0_i32_0 = arith.constant 0 : i32
    return %arg0, %arg1, %c0_i32 : i32, i32, i32
  }
}

module attributes {stable_mosaic.version = 11 : i64} {
  func.func @_gmm_bias_act_kernel(%arg0: i32, %arg1: i32, %arg2: memref<1x64x224xbf16, #tpu.memory_space<vmem>>, %arg3: memref<1x224x64xbf16, #tpu.memory_space<vmem>>, %arg4: memref<1x1x64xf32, #tpu.memory_space<vmem>>, %arg5: memref<1x64x64xbf16, #tpu.memory_space<vmem>>) attributes {dimension_semantics = [#tpu.dimension_semantics<parallel>, #tpu.dimension_semantics<parallel>], iteration_bounds = array<i64: 1, 2>, scalar_prefetch = 0 : i64, scratch_operands = 0 : i64, tpu.core_type = #tpu.core_type<tc>, window_params = [{transform_indices = @transform_0, window_bounds = array<i64: 1, 64, 224>}, {transform_indices = @transform_1, window_bounds = array<i64: 1, 224, 64>}, {transform_indices = @transform_2, window_bounds = array<i64: 1, 1, 64>}, {transform_indices = @transform_3, window_bounds = array<i64: 1, 64, 64>}]} {
    %c0 = arith.constant 0 : index
    %c0_0 = arith.constant 0 : index
    %c0_1 = arith.constant 0 : index
    %0 = vector.load %arg2[%c0, %c0_0, %c0_1] : memref<1x64x224xbf16, #tpu.memory_space<vmem>>, vector<1x64x224xbf16>
    %1 = vector.shape_cast %0 : vector<1x64x224xbf16> to vector<64x224xbf16>
    %c0_2 = arith.constant 0 : index
    %c0_3 = arith.constant 0 : index
    %c0_4 = arith.constant 0 : index
    %2 = vector.load %arg3[%c0_2, %c0_3, %c0_4] : memref<1x224x64xbf16, #tpu.memory_space<vmem>>, vector<1x224x64xbf16>
    %3 = vector.shape_cast %2 : vector<1x224x64xbf16> to vector<224x64xbf16>
    %cst = arith.constant dense<0.000000e+00> : vector<64x64xf32>
    %4 = tpu.matmul %1, %3, %cst {dimension_numbers = #tpu.dot_dimension_numbers<[1], [0], [0], [1], [0, 0, 1, 1], [], []>} : vector<64x224xbf16>, vector<224x64xbf16>, vector<64x64xf32> -> vector<64x64xf32>
    %c0_5 = arith.constant 0 : index
    %c0_6 = arith.constant 0 : index
    %c0_7 = arith.constant 0 : index
    %5 = vector.load %arg4[%c0_5, %c0_6, %c0_7] : memref<1x1x64xf32, #tpu.memory_space<vmem>>, vector<1x1x64xf32>
    %6 = vector.shape_cast %5 : vector<1x1x64xf32> to vector<1x64xf32>
    %7 = vector.broadcast %6 : vector<1x64xf32> to vector<64x64xf32>
    %8 = arith.addf %4, %7 : vector<64x64xf32>
    %cst_8 = arith.constant 0.000000e+00 : f32
    %9 = vector.broadcast %cst_8 : f32 to vector<64x64xf32>
    %10 = arith.maximumf %8, %9 : vector<64x64xf32>
    %11 = arith.truncf %10 : vector<64x64xf32> to vector<64x64xbf16>
    %c0_9 = arith.constant 0 : index
    %c0_10 = arith.constant 0 : index
    %c0_11 = arith.constant 0 : index
    %12 = vector.load %arg5[%c0_9, %c0_10, %c0_11] : memref<1x64x64xbf16, #tpu.memory_space<vmem>>, vector<1x64x64xbf16>
    %13 = vector.shape_cast %12 : vector<1x64x64xbf16> to vector<64x64xbf16>
    %14 = vector.shape_cast %11 : vector<64x64xbf16> to vector<1x64x64xbf16>
    tpu.vector_store %arg5[%c0_9, %c0_10, %c0_11], %14 {strides = array<i32>} : memref<1x64x64xbf16, #tpu.memory_space<vmem>>, vector<1x64x64xbf16>,
    return
  }
  func.func @transform_0(%arg0: i32, %arg1: i32) -> (i32, i32, i32) {
    %c0_i32 = arith.constant 0 : i32
    %c0_i32_0 = arith.constant 0 : i32
    return %arg0, %arg1, %c0_i32 : i32, i32, i32
  }
  func.func @transform_1(%arg0: i32, %arg1: i32) -> (i32, i32, i32) {
    %c0_i32 = arith.constant 0 : i32
    %c0_i32_0 = arith.constant 0 : i32
    %c0_i32_1 = arith.constant 0 : i32
    return %arg0, %c0_i32, %c0_i32_0 : i32, i32, i32
  }
  func.func @transform_2(%arg0: i32, %arg1: i32) -> (i32, i32, i32) {
    %c0_i32 = arith.constant 0 : i32
    %c0_i32_0 = arith.constant 0 : i32
    %c0_i32_1 = arith.constant 0 : i32
    return %arg0, %c0_i32, %c0_i32_0 : i32, i32, i32
  }
  func.func @transform_3(%arg0: i32, %arg1: i32) -> (i32, i32, i32) {
    %c0_i32 = arith.constant 0 : i32
    %c0_i32_0 = arith.constant 0 : i32
    return %arg0, %arg1, %c0_i32 : i32, i32, i32
  }
}

module attributes {stable_mosaic.version = 11 : i64} {
  func.func @_gmm_bias_act_kernel(%arg0: i32, %arg1: i32, %arg2: memref<1x64x256xbf16, #tpu.memory_space<vmem>>, %arg3: memref<1x256x64xbf16, #tpu.memory_space<vmem>>, %arg4: memref<1x1x64xf32, #tpu.memory_space<vmem>>, %arg5: memref<1x64x64xbf16, #tpu.memory_space<vmem>>) attributes {dimension_semantics = [#tpu.dimension_semantics<parallel>, #tpu.dimension_semantics<parallel>], iteration_bounds = array<i64: 1, 2>, scalar_prefetch = 0 : i64, scratch_operands = 0 : i64, tpu.core_type = #tpu.core_type<tc>, window_params = [{transform_indices = @transform_0, window_bounds = array<i64: 1, 64, 256>}, {transform_indices = @transform_1, window_bounds = array<i64: 1, 256, 64>}, {transform_indices = @transform_2, window_bounds = array<i64: 1, 1, 64>}, {transform_indices = @transform_3, window_bounds = array<i64: 1, 64, 64>}]} {
    %c0 = arith.constant 0 : index
    %c0_0 = arith.constant 0 : index
    %c0_1 = arith.constant 0 : index
    %0 = vector.load %arg2[%c0, %c0_0, %c0_1] : memref<1x64x256xbf16, #tpu.memory_space<vmem>>, vector<1x64x256xbf16>
    %1 = vector.shape_cast %0 : vector<1x64x256xbf16> to vector<64x256xbf16>
    %c0_2 = arith.constant 0 : index
    %c0_3 = arith.constant 0 : index
    %c0_4 = arith.constant 0 : index
    %2 = vector.load %arg3[%c0_2, %c0_3, %c0_4] : memref<1x256x64xbf16, #tpu.memory_space<vmem>>, vector<1x256x64xbf16>
    %3 = vector.shape_cast %2 : vector<1x256x64xbf16> to vector<256x64xbf16>
    %cst = arith.constant dense<0.000000e+00> : vector<64x64xf32>
    %4 = tpu.matmul %1, %3, %cst {dimension_numbers = #tpu.dot_dimension_numbers<[1], [0], [0], [1], [0, 0, 1, 1], [], []>} : vector<64x256xbf16>, vector<256x64xbf16>, vector<64x64xf32> -> vector<64x64xf32>
    %c0_5 = arith.constant 0 : index
    %c0_6 = arith.constant 0 : index
    %c0_7 = arith.constant 0 : index
    %5 = vector.load %arg4[%c0_5, %c0_6, %c0_7] : memref<1x1x64xf32, #tpu.memory_space<vmem>>, vector<1x1x64xf32>
    %6 = vector.shape_cast %5 : vector<1x1x64xf32> to vector<1x64xf32>
    %7 = vector.broadcast %6 : vector<1x64xf32> to vector<64x64xf32>
    %8 = arith.addf %4, %7 : vector<64x64xf32>
    %cst_8 = arith.constant 0.000000e+00 : f32
    %9 = vector.broadcast %cst_8 : f32 to vector<64x64xf32>
    %10 = arith.maximumf %8, %9 : vector<64x64xf32>
    %11 = arith.truncf %10 : vector<64x64xf32> to vector<64x64xbf16>
    %c0_9 = arith.constant 0 : index
    %c0_10 = arith.constant 0 : index
    %c0_11 = arith.constant 0 : index
    %12 = vector.load %arg5[%c0_9, %c0_10, %c0_11] : memref<1x64x64xbf16, #tpu.memory_space<vmem>>, vector<1x64x64xbf16>
    %13 = vector.shape_cast %12 : vector<1x64x64xbf16> to vector<64x64xbf16>
    %14 = vector.shape_cast %11 : vector<64x64xbf16> to vector<1x64x64xbf16>
    tpu.vector_store %arg5[%c0_9, %c0_10, %c0_11], %14 {strides = array<i32>} : memref<1x64x64xbf16, #tpu.memory_space<vmem>>, vector<1x64x64xbf16>,
    return
  }
  func.func @transform_0(%arg0: i32, %arg1: i32) -> (i32, i32, i32) {
    %c0_i32 = arith.constant 0 : i32
    %c0_i32_0 = arith.constant 0 : i32
    return %arg0, %arg1, %c0_i32 : i32, i32, i32
  }
  func.func @transform_1(%arg0: i32, %arg1: i32) -> (i32, i32, i32) {
    %c0_i32 = arith.constant 0 : i32
    %c0_i32_0 = arith.constant 0 : i32
    %c0_i32_1 = arith.constant 0 : i32
    return %arg0, %c0_i32, %c0_i32_0 : i32, i32, i32
  }
  func.func @transform_2(%arg0: i32, %arg1: i32) -> (i32, i32, i32) {
    %c0_i32 = arith.constant 0 : i32
    %c0_i32_0 = arith.constant 0 : i32
    %c0_i32_1 = arith.constant 0 : i32
    return %arg0, %c0_i32, %c0_i32_0 : i32, i32, i32
  }
  func.func @transform_3(%arg0: i32, %arg1: i32) -> (i32, i32, i32) {
    %c0_i32 = arith.constant 0 : i32
    %c0_i32_0 = arith.constant 0 : i32
    return %arg0, %arg1, %c0_i32 : i32, i32, i32
  }
}

module attributes {stable_mosaic.version = 11 : i64} {
  func.func @_gmm_bias_act_kernel(%arg0: i32, %arg1: i32, %arg2: memref<1x16x64xbf16, #tpu.memory_space<vmem>>, %arg3: memref<1x64x128xbf16, #tpu.memory_space<vmem>>, %arg4: memref<1x1x128xf32, #tpu.memory_space<vmem>>, %arg5: memref<1x16x128xbf16, #tpu.memory_space<vmem>>) attributes {dimension_semantics = [#tpu.dimension_semantics<parallel>, #tpu.dimension_semantics<parallel>], iteration_bounds = array<i64: 1, 2>, scalar_prefetch = 0 : i64, scratch_operands = 0 : i64, tpu.core_type = #tpu.core_type<tc>, window_params = [{transform_indices = @transform_0, window_bounds = array<i64: 1, 16, 64>}, {transform_indices = @transform_1, window_bounds = array<i64: 1, 64, 128>}, {transform_indices = @transform_2, window_bounds = array<i64: 1, 1, 128>}, {transform_indices = @transform_3, window_bounds = array<i64: 1, 16, 128>}]} {
    %c0 = arith.constant 0 : index
    %c0_0 = arith.constant 0 : index
    %c0_1 = arith.constant 0 : index
    %0 = vector.load %arg2[%c0, %c0_0, %c0_1] : memref<1x16x64xbf16, #tpu.memory_space<vmem>>, vector<1x16x64xbf16>
    %1 = vector.shape_cast %0 : vector<1x16x64xbf16> to vector<16x64xbf16>
    %c0_2 = arith.constant 0 : index
    %c0_3 = arith.constant 0 : index
    %c0_4 = arith.constant 0 : index
    %2 = vector.load %arg3[%c0_2, %c0_3, %c0_4] : memref<1x64x128xbf16, #tpu.memory_space<vmem>>, vector<1x64x128xbf16>
    %3 = vector.shape_cast %2 : vector<1x64x128xbf16> to vector<64x128xbf16>
    %cst = arith.constant dense<0.000000e+00> : vector<16x128xf32>
    %4 = tpu.matmul %1, %3, %cst {dimension_numbers = #tpu.dot_dimension_numbers<[1], [0], [0], [1], [0, 0, 1, 1], [], []>} : vector<16x64xbf16>, vector<64x128xbf16>, vector<16x128xf32> -> vector<16x128xf32>
    %c0_5 = arith.constant 0 : index
    %c0_6 = arith.constant 0 : index
    %c0_7 = arith.constant 0 : index
    %5 = vector.load %arg4[%c0_5, %c0_6, %c0_7] : memref<1x1x128xf32, #tpu.memory_space<vmem>>, vector<1x1x128xf32>
    %6 = vector.shape_cast %5 : vector<1x1x128xf32> to vector<1x128xf32>
    %7 = vector.broadcast %6 : vector<1x128xf32> to vector<16x128xf32>
    %8 = arith.addf %4, %7 : vector<16x128xf32>
    %cst_8 = arith.constant 0.000000e+00 : f32
    %9 = vector.broadcast %cst_8 : f32 to vector<16x128xf32>
    %10 = arith.maximumf %8, %9 : vector<16x128xf32>
    %11 = arith.truncf %10 : vector<16x128xf32> to vector<16x128xbf16>
    %c0_9 = arith.constant 0 : index
    %c0_10 = arith.constant 0 : index
    %c0_11 = arith.constant 0 : index
    %12 = vector.load %arg5[%c0_9, %c0_10, %c0_11] : memref<1x16x128xbf16, #tpu.memory_space<vmem>>, vector<1x16x128xbf16>
    %13 = vector.shape_cast %12 : vector<1x16x128xbf16> to vector<16x128xbf16>
    %14 = vector.shape_cast %11 : vector<16x128xbf16> to vector<1x16x128xbf16>
    tpu.vector_store %arg5[%c0_9, %c0_10, %c0_11], %14 {strides = array<i32>} : memref<1x16x128xbf16, #tpu.memory_space<vmem>>, vector<1x16x128xbf16>,
    return
  }
  func.func @transform_0(%arg0: i32, %arg1: i32) -> (i32, i32, i32) {
    %c0_i32 = arith.constant 0 : i32
    %c0_i32_0 = arith.constant 0 : i32
    return %arg0, %arg1, %c0_i32 : i32, i32, i32
  }
  func.func @transform_1(%arg0: i32, %arg1: i32) -> (i32, i32, i32) {
    %c0_i32 = arith.constant 0 : i32
    %c0_i32_0 = arith.constant 0 : i32
    %c0_i32_1 = arith.constant 0 : i32
    return %arg0, %c0_i32, %c0_i32_0 : i32, i32, i32
  }
  func.func @transform_2(%arg0: i32, %arg1: i32) -> (i32, i32, i32) {
    %c0_i32 = arith.constant 0 : i32
    %c0_i32_0 = arith.constant 0 : i32
    %c0_i32_1 = arith.constant 0 : i32
    return %arg0, %c0_i32, %c0_i32_0 : i32, i32, i32
  }
  func.func @transform_3(%arg0: i32, %arg1: i32) -> (i32, i32, i32) {
    %c0_i32 = arith.constant 0 : i32
    %c0_i32_0 = arith.constant 0 : i32
    return %arg0, %arg1, %c0_i32 : i32, i32, i32
  }
}

module attributes {stable_mosaic.version = 11 : i64} {
  func.func @_gmm_bias_act_kernel(%arg0: i32, %arg1: i32, %arg2: memref<1x32x144xbf16, #tpu.memory_space<vmem>>, %arg3: memref<1x144x16xbf16, #tpu.memory_space<vmem>>, %arg4: memref<1x1x16xf32, #tpu.memory_space<vmem>>, %arg5: memref<1x32x16xbf16, #tpu.memory_space<vmem>>) attributes {dimension_semantics = [#tpu.dimension_semantics<parallel>, #tpu.dimension_semantics<parallel>], iteration_bounds = array<i64: 8, 1>, scalar_prefetch = 0 : i64, scratch_operands = 0 : i64, tpu.core_type = #tpu.core_type<tc>, window_params = [{transform_indices = @transform_0, window_bounds = array<i64: 1, 32, 144>}, {transform_indices = @transform_1, window_bounds = array<i64: 1, 144, 16>}, {transform_indices = @transform_2, window_bounds = array<i64: 1, 1, 16>}, {transform_indices = @transform_3, window_bounds = array<i64: 1, 32, 16>}]} {
    %c0 = arith.constant 0 : index
    %c0_0 = arith.constant 0 : index
    %c0_1 = arith.constant 0 : index
    %0 = vector.load %arg2[%c0, %c0_0, %c0_1] : memref<1x32x144xbf16, #tpu.memory_space<vmem>>, vector<1x32x144xbf16>
    %1 = vector.shape_cast %0 : vector<1x32x144xbf16> to vector<32x144xbf16>
    %c0_2 = arith.constant 0 : index
    %c0_3 = arith.constant 0 : index
    %c0_4 = arith.constant 0 : index
    %2 = vector.load %arg3[%c0_2, %c0_3, %c0_4] : memref<1x144x16xbf16, #tpu.memory_space<vmem>>, vector<1x144x16xbf16>
    %3 = vector.shape_cast %2 : vector<1x144x16xbf16> to vector<144x16xbf16>
    %cst = arith.constant dense<0.000000e+00> : vector<32x16xf32>
    %4 = tpu.matmul %1, %3, %cst {dimension_numbers = #tpu.dot_dimension_numbers<[1], [0], [0], [1], [0, 0, 1, 1], [], []>} : vector<32x144xbf16>, vector<144x16xbf16>, vector<32x16xf32> -> vector<32x16xf32>
    %c0_5 = arith.constant 0 : index
    %c0_6 = arith.constant 0 : index
    %c0_7 = arith.constant 0 : index
    %5 = vector.load %arg4[%c0_5, %c0_6, %c0_7] : memref<1x1x16xf32, #tpu.memory_space<vmem>>, vector<1x1x16xf32>
    %6 = vector.shape_cast %5 : vector<1x1x16xf32> to vector<1x16xf32>
    %7 = vector.broadcast %6 : vector<1x16xf32> to vector<32x16xf32>
    %8 = arith.addf %4, %7 : vector<32x16xf32>
    %cst_8 = arith.constant 0.000000e+00 : f32
    %9 = vector.broadcast %cst_8 : f32 to vector<32x16xf32>
    %10 = arith.maximumf %8, %9 : vector<32x16xf32>
    %11 = arith.truncf %10 : vector<32x16xf32> to vector<32x16xbf16>
    %c0_9 = arith.constant 0 : index
    %c0_10 = arith.constant 0 : index
    %c0_11 = arith.constant 0 : index
    %12 = vector.load %arg5[%c0_9, %c0_10, %c0_11] : memref<1x32x16xbf16, #tpu.memory_space<vmem>>, vector<1x32x16xbf16>
    %13 = vector.shape_cast %12 : vector<1x32x16xbf16> to vector<32x16xbf16>
    %14 = vector.shape_cast %11 : vector<32x16xbf16> to vector<1x32x16xbf16>
    tpu.vector_store %arg5[%c0_9, %c0_10, %c0_11], %14 {strides = array<i32>} : memref<1x32x16xbf16, #tpu.memory_space<vmem>>, vector<1x32x16xbf16>,
    return
  }
  func.func @transform_0(%arg0: i32, %arg1: i32) -> (i32, i32, i32) {
    %c0_i32 = arith.constant 0 : i32
    %c0_i32_0 = arith.constant 0 : i32
    return %arg0, %arg1, %c0_i32 : i32, i32, i32
  }
  func.func @transform_1(%arg0: i32, %arg1: i32) -> (i32, i32, i32) {
    %c0_i32 = arith.constant 0 : i32
    %c0_i32_0 = arith.constant 0 : i32
    %c0_i32_1 = arith.constant 0 : i32
    return %arg0, %c0_i32, %c0_i32_0 : i32, i32, i32
  }
  func.func @transform_2(%arg0: i32, %arg1: i32) -> (i32, i32, i32) {
    %c0_i32 = arith.constant 0 : i32
    %c0_i32_0 = arith.constant 0 : i32
    %c0_i32_1 = arith.constant 0 : i32
    return %arg0, %c0_i32, %c0_i32_0 : i32, i32, i32
  }
  func.func @transform_3(%arg0: i32, %arg1: i32) -> (i32, i32, i32) {
    %c0_i32 = arith.constant 0 : i32
    %c0_i32_0 = arith.constant 0 : i32
    return %arg0, %arg1, %c0_i32 : i32, i32, i32
  }
}

module attributes {stable_mosaic.version = 11 : i64} {
  func.func @_gmm_bias_act_kernel(%arg0: i32, %arg1: i32, %arg2: memref<1x16x192xbf16, #tpu.memory_space<vmem>>, %arg3: memref<1x192x128xbf16, #tpu.memory_space<vmem>>, %arg4: memref<1x1x128xf32, #tpu.memory_space<vmem>>, %arg5: memref<1x16x128xbf16, #tpu.memory_space<vmem>>) attributes {dimension_semantics = [#tpu.dimension_semantics<parallel>, #tpu.dimension_semantics<parallel>], iteration_bounds = array<i64: 1, 2>, scalar_prefetch = 0 : i64, scratch_operands = 0 : i64, tpu.core_type = #tpu.core_type<tc>, window_params = [{transform_indices = @transform_0, window_bounds = array<i64: 1, 16, 192>}, {transform_indices = @transform_1, window_bounds = array<i64: 1, 192, 128>}, {transform_indices = @transform_2, window_bounds = array<i64: 1, 1, 128>}, {transform_indices = @transform_3, window_bounds = array<i64: 1, 16, 128>}]} {
    %c0 = arith.constant 0 : index
    %c0_0 = arith.constant 0 : index
    %c0_1 = arith.constant 0 : index
    %0 = vector.load %arg2[%c0, %c0_0, %c0_1] : memref<1x16x192xbf16, #tpu.memory_space<vmem>>, vector<1x16x192xbf16>
    %1 = vector.shape_cast %0 : vector<1x16x192xbf16> to vector<16x192xbf16>
    %c0_2 = arith.constant 0 : index
    %c0_3 = arith.constant 0 : index
    %c0_4 = arith.constant 0 : index
    %2 = vector.load %arg3[%c0_2, %c0_3, %c0_4] : memref<1x192x128xbf16, #tpu.memory_space<vmem>>, vector<1x192x128xbf16>
    %3 = vector.shape_cast %2 : vector<1x192x128xbf16> to vector<192x128xbf16>
    %cst = arith.constant dense<0.000000e+00> : vector<16x128xf32>
    %4 = tpu.matmul %1, %3, %cst {dimension_numbers = #tpu.dot_dimension_numbers<[1], [0], [0], [1], [0, 0, 1, 1], [], []>} : vector<16x192xbf16>, vector<192x128xbf16>, vector<16x128xf32> -> vector<16x128xf32>
    %c0_5 = arith.constant 0 : index
    %c0_6 = arith.constant 0 : index
    %c0_7 = arith.constant 0 : index
    %5 = vector.load %arg4[%c0_5, %c0_6, %c0_7] : memref<1x1x128xf32, #tpu.memory_space<vmem>>, vector<1x1x128xf32>
    %6 = vector.shape_cast %5 : vector<1x1x128xf32> to vector<1x128xf32>
    %7 = vector.broadcast %6 : vector<1x128xf32> to vector<16x128xf32>
    %8 = arith.addf %4, %7 : vector<16x128xf32>
    %cst_8 = arith.constant 0.000000e+00 : f32
    %9 = vector.broadcast %cst_8 : f32 to vector<16x128xf32>
    %10 = arith.maximumf %8, %9 : vector<16x128xf32>
    %11 = arith.truncf %10 : vector<16x128xf32> to vector<16x128xbf16>
    %c0_9 = arith.constant 0 : index
    %c0_10 = arith.constant 0 : index
    %c0_11 = arith.constant 0 : index
    %12 = vector.load %arg5[%c0_9, %c0_10, %c0_11] : memref<1x16x128xbf16, #tpu.memory_space<vmem>>, vector<1x16x128xbf16>
    %13 = vector.shape_cast %12 : vector<1x16x128xbf16> to vector<16x128xbf16>
    %14 = vector.shape_cast %11 : vector<16x128xbf16> to vector<1x16x128xbf16>
    tpu.vector_store %arg5[%c0_9, %c0_10, %c0_11], %14 {strides = array<i32>} : memref<1x16x128xbf16, #tpu.memory_space<vmem>>, vector<1x16x128xbf16>,
    return
  }
  func.func @transform_0(%arg0: i32, %arg1: i32) -> (i32, i32, i32) {
    %c0_i32 = arith.constant 0 : i32
    %c0_i32_0 = arith.constant 0 : i32
    return %arg0, %arg1, %c0_i32 : i32, i32, i32
  }
  func.func @transform_1(%arg0: i32, %arg1: i32) -> (i32, i32, i32) {
    %c0_i32 = arith.constant 0 : i32
    %c0_i32_0 = arith.constant 0 : i32
    %c0_i32_1 = arith.constant 0 : i32
    return %arg0, %c0_i32, %c0_i32_0 : i32, i32, i32
  }
  func.func @transform_2(%arg0: i32, %arg1: i32) -> (i32, i32, i32) {
    %c0_i32 = arith.constant 0 : i32
    %c0_i32_0 = arith.constant 0 : i32
    %c0_i32_1 = arith.constant 0 : i32
    return %arg0, %c0_i32, %c0_i32_0 : i32, i32, i32
  }
  func.func @transform_3(%arg0: i32, %arg1: i32) -> (i32, i32, i32) {
    %c0_i32 = arith.constant 0 : i32
    %c0_i32_0 = arith.constant 0 : i32
    return %arg0, %arg1, %c0_i32 : i32, i32, i32
  }
}

module attributes {stable_mosaic.version = 11 : i64} {
  func.func @_gmm_bias_act_kernel(%arg0: i32, %arg1: i32, %arg2: memref<1x16x320xbf16, #tpu.memory_space<vmem>>, %arg3: memref<1x320x128xbf16, #tpu.memory_space<vmem>>, %arg4: memref<1x1x128xf32, #tpu.memory_space<vmem>>, %arg5: memref<1x16x128xbf16, #tpu.memory_space<vmem>>) attributes {dimension_semantics = [#tpu.dimension_semantics<parallel>, #tpu.dimension_semantics<parallel>], iteration_bounds = array<i64: 1, 2>, scalar_prefetch = 0 : i64, scratch_operands = 0 : i64, tpu.core_type = #tpu.core_type<tc>, window_params = [{transform_indices = @transform_0, window_bounds = array<i64: 1, 16, 320>}, {transform_indices = @transform_1, window_bounds = array<i64: 1, 320, 128>}, {transform_indices = @transform_2, window_bounds = array<i64: 1, 1, 128>}, {transform_indices = @transform_3, window_bounds = array<i64: 1, 16, 128>}]} {
    %c0 = arith.constant 0 : index
    %c0_0 = arith.constant 0 : index
    %c0_1 = arith.constant 0 : index
    %0 = vector.load %arg2[%c0, %c0_0, %c0_1] : memref<1x16x320xbf16, #tpu.memory_space<vmem>>, vector<1x16x320xbf16>
    %1 = vector.shape_cast %0 : vector<1x16x320xbf16> to vector<16x320xbf16>
    %c0_2 = arith.constant 0 : index
    %c0_3 = arith.constant 0 : index
    %c0_4 = arith.constant 0 : index
    %2 = vector.load %arg3[%c0_2, %c0_3, %c0_4] : memref<1x320x128xbf16, #tpu.memory_space<vmem>>, vector<1x320x128xbf16>
    %3 = vector.shape_cast %2 : vector<1x320x128xbf16> to vector<320x128xbf16>
    %cst = arith.constant dense<0.000000e+00> : vector<16x128xf32>
    %4 = tpu.matmul %1, %3, %cst {dimension_numbers = #tpu.dot_dimension_numbers<[1], [0], [0], [1], [0, 0, 1, 1], [], []>} : vector<16x320xbf16>, vector<320x128xbf16>, vector<16x128xf32> -> vector<16x128xf32>
    %c0_5 = arith.constant 0 : index
    %c0_6 = arith.constant 0 : index
    %c0_7 = arith.constant 0 : index
    %5 = vector.load %arg4[%c0_5, %c0_6, %c0_7] : memref<1x1x128xf32, #tpu.memory_space<vmem>>, vector<1x1x128xf32>
    %6 = vector.shape_cast %5 : vector<1x1x128xf32> to vector<1x128xf32>
    %7 = vector.broadcast %6 : vector<1x128xf32> to vector<16x128xf32>
    %8 = arith.addf %4, %7 : vector<16x128xf32>
    %cst_8 = arith.constant 0.000000e+00 : f32
    %9 = vector.broadcast %cst_8 : f32 to vector<16x128xf32>
    %10 = arith.maximumf %8, %9 : vector<16x128xf32>
    %11 = arith.truncf %10 : vector<16x128xf32> to vector<16x128xbf16>
    %c0_9 = arith.constant 0 : index
    %c0_10 = arith.constant 0 : index
    %c0_11 = arith.constant 0 : index
    %12 = vector.load %arg5[%c0_9, %c0_10, %c0_11] : memref<1x16x128xbf16, #tpu.memory_space<vmem>>, vector<1x16x128xbf16>
    %13 = vector.shape_cast %12 : vector<1x16x128xbf16> to vector<16x128xbf16>
    %14 = vector.shape_cast %11 : vector<16x128xbf16> to vector<1x16x128xbf16>
    tpu.vector_store %arg5[%c0_9, %c0_10, %c0_11], %14 {strides = array<i32>} : memref<1x16x128xbf16, #tpu.memory_space<vmem>>, vector<1x16x128xbf16>,
    return
  }
  func.func @transform_0(%arg0: i32, %arg1: i32) -> (i32, i32, i32) {
    %c0_i32 = arith.constant 0 : i32
    %c0_i32_0 = arith.constant 0 : i32
    return %arg0, %arg1, %c0_i32 : i32, i32, i32
  }
  func.func @transform_1(%arg0: i32, %arg1: i32) -> (i32, i32, i32) {
    %c0_i32 = arith.constant 0 : i32
    %c0_i32_0 = arith.constant 0 : i32
    %c0_i32_1 = arith.constant 0 : i32
    return %arg0, %c0_i32, %c0_i32_0 : i32, i32, i32
  }
  func.func @transform_2(%arg0: i32, %arg1: i32) -> (i32, i32, i32) {
    %c0_i32 = arith.constant 0 : i32
    %c0_i32_0 = arith.constant 0 : i32
    %c0_i32_1 = arith.constant 0 : i32
    return %arg0, %c0_i32, %c0_i32_0 : i32, i32, i32
  }
  func.func @transform_3(%arg0: i32, %arg1: i32) -> (i32, i32, i32) {
    %c0_i32 = arith.constant 0 : i32
    %c0_i32_0 = arith.constant 0 : i32
    return %arg0, %arg1, %c0_i32 : i32, i32, i32
  }
}

module attributes {stable_mosaic.version = 11 : i64} {
  func.func @_gmm_bias_act_kernel(%arg0: i32, %arg1: i32, %arg2: memref<1x16x448xbf16, #tpu.memory_space<vmem>>, %arg3: memref<1x448x128xbf16, #tpu.memory_space<vmem>>, %arg4: memref<1x1x128xf32, #tpu.memory_space<vmem>>, %arg5: memref<1x16x128xbf16, #tpu.memory_space<vmem>>) attributes {dimension_semantics = [#tpu.dimension_semantics<parallel>, #tpu.dimension_semantics<parallel>], iteration_bounds = array<i64: 1, 2>, scalar_prefetch = 0 : i64, scratch_operands = 0 : i64, tpu.core_type = #tpu.core_type<tc>, window_params = [{transform_indices = @transform_0, window_bounds = array<i64: 1, 16, 448>}, {transform_indices = @transform_1, window_bounds = array<i64: 1, 448, 128>}, {transform_indices = @transform_2, window_bounds = array<i64: 1, 1, 128>}, {transform_indices = @transform_3, window_bounds = array<i64: 1, 16, 128>}]} {
    %c0 = arith.constant 0 : index
    %c0_0 = arith.constant 0 : index
    %c0_1 = arith.constant 0 : index
    %0 = vector.load %arg2[%c0, %c0_0, %c0_1] : memref<1x16x448xbf16, #tpu.memory_space<vmem>>, vector<1x16x448xbf16>
    %1 = vector.shape_cast %0 : vector<1x16x448xbf16> to vector<16x448xbf16>
    %c0_2 = arith.constant 0 : index
    %c0_3 = arith.constant 0 : index
    %c0_4 = arith.constant 0 : index
    %2 = vector.load %arg3[%c0_2, %c0_3, %c0_4] : memref<1x448x128xbf16, #tpu.memory_space<vmem>>, vector<1x448x128xbf16>
    %3 = vector.shape_cast %2 : vector<1x448x128xbf16> to vector<448x128xbf16>
    %cst = arith.constant dense<0.000000e+00> : vector<16x128xf32>
    %4 = tpu.matmul %1, %3, %cst {dimension_numbers = #tpu.dot_dimension_numbers<[1], [0], [0], [1], [0, 0, 1, 1], [], []>} : vector<16x448xbf16>, vector<448x128xbf16>, vector<16x128xf32> -> vector<16x128xf32>
    %c0_5 = arith.constant 0 : index
    %c0_6 = arith.constant 0 : index
    %c0_7 = arith.constant 0 : index
    %5 = vector.load %arg4[%c0_5, %c0_6, %c0_7] : memref<1x1x128xf32, #tpu.memory_space<vmem>>, vector<1x1x128xf32>
    %6 = vector.shape_cast %5 : vector<1x1x128xf32> to vector<1x128xf32>
    %7 = vector.broadcast %6 : vector<1x128xf32> to vector<16x128xf32>
    %8 = arith.addf %4, %7 : vector<16x128xf32>
    %cst_8 = arith.constant 0.000000e+00 : f32
    %9 = vector.broadcast %cst_8 : f32 to vector<16x128xf32>
    %10 = arith.maximumf %8, %9 : vector<16x128xf32>
    %11 = arith.truncf %10 : vector<16x128xf32> to vector<16x128xbf16>
    %c0_9 = arith.constant 0 : index
    %c0_10 = arith.constant 0 : index
    %c0_11 = arith.constant 0 : index
    %12 = vector.load %arg5[%c0_9, %c0_10, %c0_11] : memref<1x16x128xbf16, #tpu.memory_space<vmem>>, vector<1x16x128xbf16>
    %13 = vector.shape_cast %12 : vector<1x16x128xbf16> to vector<16x128xbf16>
    %14 = vector.shape_cast %11 : vector<16x128xbf16> to vector<1x16x128xbf16>
    tpu.vector_store %arg5[%c0_9, %c0_10, %c0_11], %14 {strides = array<i32>} : memref<1x16x128xbf16, #tpu.memory_space<vmem>>, vector<1x16x128xbf16>,
    return
  }
  func.func @transform_0(%arg0: i32, %arg1: i32) -> (i32, i32, i32) {
    %c0_i32 = arith.constant 0 : i32
    %c0_i32_0 = arith.constant 0 : i32
    return %arg0, %arg1, %c0_i32 : i32, i32, i32
  }
  func.func @transform_1(%arg0: i32, %arg1: i32) -> (i32, i32, i32) {
    %c0_i32 = arith.constant 0 : i32
    %c0_i32_0 = arith.constant 0 : i32
    %c0_i32_1 = arith.constant 0 : i32
    return %arg0, %c0_i32, %c0_i32_0 : i32, i32, i32
  }
  func.func @transform_2(%arg0: i32, %arg1: i32) -> (i32, i32, i32) {
    %c0_i32 = arith.constant 0 : i32
    %c0_i32_0 = arith.constant 0 : i32
    %c0_i32_1 = arith.constant 0 : i32
    return %arg0, %c0_i32, %c0_i32_0 : i32, i32, i32
  }
  func.func @transform_3(%arg0: i32, %arg1: i32) -> (i32, i32, i32) {
    %c0_i32 = arith.constant 0 : i32
    %c0_i32_0 = arith.constant 0 : i32
    return %arg0, %arg1, %c0_i32 : i32, i32, i32
  }
}

module attributes {stable_mosaic.version = 11 : i64} {
  func.func @_gmm_bias_act_kernel(%arg0: i32, %arg1: i32, %arg2: memref<1x16x512xbf16, #tpu.memory_space<vmem>>, %arg3: memref<1x512x128xbf16, #tpu.memory_space<vmem>>, %arg4: memref<1x1x128xf32, #tpu.memory_space<vmem>>, %arg5: memref<1x16x128xbf16, #tpu.memory_space<vmem>>) attributes {dimension_semantics = [#tpu.dimension_semantics<parallel>, #tpu.dimension_semantics<parallel>], iteration_bounds = array<i64: 1, 2>, scalar_prefetch = 0 : i64, scratch_operands = 0 : i64, tpu.core_type = #tpu.core_type<tc>, window_params = [{transform_indices = @transform_0, window_bounds = array<i64: 1, 16, 512>}, {transform_indices = @transform_1, window_bounds = array<i64: 1, 512, 128>}, {transform_indices = @transform_2, window_bounds = array<i64: 1, 1, 128>}, {transform_indices = @transform_3, window_bounds = array<i64: 1, 16, 128>}]} {
    %c0 = arith.constant 0 : index
    %c0_0 = arith.constant 0 : index
    %c0_1 = arith.constant 0 : index
    %0 = vector.load %arg2[%c0, %c0_0, %c0_1] : memref<1x16x512xbf16, #tpu.memory_space<vmem>>, vector<1x16x512xbf16>
    %1 = vector.shape_cast %0 : vector<1x16x512xbf16> to vector<16x512xbf16>
    %c0_2 = arith.constant 0 : index
    %c0_3 = arith.constant 0 : index
    %c0_4 = arith.constant 0 : index
    %2 = vector.load %arg3[%c0_2, %c0_3, %c0_4] : memref<1x512x128xbf16, #tpu.memory_space<vmem>>, vector<1x512x128xbf16>
    %3 = vector.shape_cast %2 : vector<1x512x128xbf16> to vector<512x128xbf16>
    %cst = arith.constant dense<0.000000e+00> : vector<16x128xf32>
    %4 = tpu.matmul %1, %3, %cst {dimension_numbers = #tpu.dot_dimension_numbers<[1], [0], [0], [1], [0, 0, 1, 1], [], []>} : vector<16x512xbf16>, vector<512x128xbf16>, vector<16x128xf32> -> vector<16x128xf32>
    %c0_5 = arith.constant 0 : index
    %c0_6 = arith.constant 0 : index
    %c0_7 = arith.constant 0 : index
    %5 = vector.load %arg4[%c0_5, %c0_6, %c0_7] : memref<1x1x128xf32, #tpu.memory_space<vmem>>, vector<1x1x128xf32>
    %6 = vector.shape_cast %5 : vector<1x1x128xf32> to vector<1x128xf32>
    %7 = vector.broadcast %6 : vector<1x128xf32> to vector<16x128xf32>
    %8 = arith.addf %4, %7 : vector<16x128xf32>
    %cst_8 = arith.constant 0.000000e+00 : f32
    %9 = vector.broadcast %cst_8 : f32 to vector<16x128xf32>
    %10 = arith.maximumf %8, %9 : vector<16x128xf32>
    %11 = arith.truncf %10 : vector<16x128xf32> to vector<16x128xbf16>
    %c0_9 = arith.constant 0 : index
    %c0_10 = arith.constant 0 : index
    %c0_11 = arith.constant 0 : index
    %12 = vector.load %arg5[%c0_9, %c0_10, %c0_11] : memref<1x16x128xbf16, #tpu.memory_space<vmem>>, vector<1x16x128xbf16>
    %13 = vector.shape_cast %12 : vector<1x16x128xbf16> to vector<16x128xbf16>
    %14 = vector.shape_cast %11 : vector<16x128xbf16> to vector<1x16x128xbf16>
    tpu.vector_store %arg5[%c0_9, %c0_10, %c0_11], %14 {strides = array<i32>} : memref<1x16x128xbf16, #tpu.memory_space<vmem>>, vector<1x16x128xbf16>,
    return
  }
  func.func @transform_0(%arg0: i32, %arg1: i32) -> (i32, i32, i32) {
    %c0_i32 = arith.constant 0 : i32
    %c0_i32_0 = arith.constant 0 : i32
    return %arg0, %arg1, %c0_i32 : i32, i32, i32
  }
  func.func @transform_1(%arg0: i32, %arg1: i32) -> (i32, i32, i32) {
    %c0_i32 = arith.constant 0 : i32
    %c0_i32_0 = arith.constant 0 : i32
    %c0_i32_1 = arith.constant 0 : i32
    return %arg0, %c0_i32, %c0_i32_0 : i32, i32, i32
  }
  func.func @transform_2(%arg0: i32, %arg1: i32) -> (i32, i32, i32) {
    %c0_i32 = arith.constant 0 : i32
    %c0_i32_0 = arith.constant 0 : i32
    %c0_i32_1 = arith.constant 0 : i32
    return %arg0, %c0_i32, %c0_i32_0 : i32, i32, i32
  }
  func.func @transform_3(%arg0: i32, %arg1: i32) -> (i32, i32, i32) {
    %c0_i32 = arith.constant 0 : i32
    %c0_i32_0 = arith.constant 0 : i32
    return %arg0, %arg1, %c0_i32 : i32, i32, i32
  }
}

module attributes {stable_mosaic.version = 11 : i64} {
  func.func @_gmm_bias_act_kernel(%arg0: i32, %arg1: i32, %arg2: memref<1x8x128xbf16, #tpu.memory_space<vmem>>, %arg3: memref<1x128x256xbf16, #tpu.memory_space<vmem>>, %arg4: memref<1x1x256xf32, #tpu.memory_space<vmem>>, %arg5: memref<1x8x256xbf16, #tpu.memory_space<vmem>>) attributes {dimension_semantics = [#tpu.dimension_semantics<parallel>, #tpu.dimension_semantics<parallel>], iteration_bounds = array<i64: 1, 1>, scalar_prefetch = 0 : i64, scratch_operands = 0 : i64, tpu.core_type = #tpu.core_type<tc>, window_params = [{transform_indices = @transform_0, window_bounds = array<i64: 1, 8, 128>}, {transform_indices = @transform_1, window_bounds = array<i64: 1, 128, 256>}, {transform_indices = @transform_2, window_bounds = array<i64: 1, 1, 256>}, {transform_indices = @transform_3, window_bounds = array<i64: 1, 8, 256>}]} {
    %c0 = arith.constant 0 : index
    %c0_0 = arith.constant 0 : index
    %c0_1 = arith.constant 0 : index
    %0 = vector.load %arg2[%c0, %c0_0, %c0_1] : memref<1x8x128xbf16, #tpu.memory_space<vmem>>, vector<1x8x128xbf16>
    %1 = vector.shape_cast %0 : vector<1x8x128xbf16> to vector<8x128xbf16>
    %c0_2 = arith.constant 0 : index
    %c0_3 = arith.constant 0 : index
    %c0_4 = arith.constant 0 : index
    %2 = vector.load %arg3[%c0_2, %c0_3, %c0_4] : memref<1x128x256xbf16, #tpu.memory_space<vmem>>, vector<1x128x256xbf16>
    %3 = vector.shape_cast %2 : vector<1x128x256xbf16> to vector<128x256xbf16>
    %cst = arith.constant dense<0.000000e+00> : vector<8x256xf32>
    %4 = tpu.matmul %1, %3, %cst {dimension_numbers = #tpu.dot_dimension_numbers<[1], [0], [0], [1], [0, 0, 1, 1], [], []>} : vector<8x128xbf16>, vector<128x256xbf16>, vector<8x256xf32> -> vector<8x256xf32>
    %c0_5 = arith.constant 0 : index
    %c0_6 = arith.constant 0 : index
    %c0_7 = arith.constant 0 : index
    %5 = vector.load %arg4[%c0_5, %c0_6, %c0_7] : memref<1x1x256xf32, #tpu.memory_space<vmem>>, vector<1x1x256xf32>
    %6 = vector.shape_cast %5 : vector<1x1x256xf32> to vector<1x256xf32>
    %7 = vector.broadcast %6 : vector<1x256xf32> to vector<8x256xf32>
    %8 = arith.addf %4, %7 : vector<8x256xf32>
    %cst_8 = arith.constant 0.000000e+00 : f32
    %9 = vector.broadcast %cst_8 : f32 to vector<8x256xf32>
    %10 = arith.maximumf %8, %9 : vector<8x256xf32>
    %11 = arith.truncf %10 : vector<8x256xf32> to vector<8x256xbf16>
    %c0_9 = arith.constant 0 : index
    %c0_10 = arith.constant 0 : index
    %c0_11 = arith.constant 0 : index
    %12 = vector.load %arg5[%c0_9, %c0_10, %c0_11] : memref<1x8x256xbf16, #tpu.memory_space<vmem>>, vector<1x8x256xbf16>
    %13 = vector.shape_cast %12 : vector<1x8x256xbf16> to vector<8x256xbf16>
    %14 = vector.shape_cast %11 : vector<8x256xbf16> to vector<1x8x256xbf16>
    tpu.vector_store %arg5[%c0_9, %c0_10, %c0_11], %14 {strides = array<i32>} : memref<1x8x256xbf16, #tpu.memory_space<vmem>>, vector<1x8x256xbf16>,
    return
  }
  func.func @transform_0(%arg0: i32, %arg1: i32) -> (i32, i32, i32) {
    %c0_i32 = arith.constant 0 : i32
    %c0_i32_0 = arith.constant 0 : i32
    return %arg0, %arg1, %c0_i32 : i32, i32, i32
  }
  func.func @transform_1(%arg0: i32, %arg1: i32) -> (i32, i32, i32) {
    %c0_i32 = arith.constant 0 : i32
    %c0_i32_0 = arith.constant 0 : i32
    %c0_i32_1 = arith.constant 0 : i32
    return %arg0, %c0_i32, %c0_i32_0 : i32, i32, i32
  }
  func.func @transform_2(%arg0: i32, %arg1: i32) -> (i32, i32, i32) {
    %c0_i32 = arith.constant 0 : i32
    %c0_i32_0 = arith.constant 0 : i32
    %c0_i32_1 = arith.constant 0 : i32
    return %arg0, %c0_i32, %c0_i32_0 : i32, i32, i32
  }
  func.func @transform_3(%arg0: i32, %arg1: i32) -> (i32, i32, i32) {
    %c0_i32 = arith.constant 0 : i32
    %c0_i32_0 = arith.constant 0 : i32
    return %arg0, %arg1, %c0_i32 : i32, i32, i32
  }
}

module attributes {stable_mosaic.version = 11 : i64} {
  func.func @_gmm_bias_act_kernel(%arg0: i32, %arg1: i32, %arg2: memref<1x16x768xbf16, #tpu.memory_space<vmem>>, %arg3: memref<1x768x128xbf16, #tpu.memory_space<vmem>>, %arg4: memref<1x1x128xf32, #tpu.memory_space<vmem>>, %arg5: memref<1x16x128xbf16, #tpu.memory_space<vmem>>) attributes {dimension_semantics = [#tpu.dimension_semantics<parallel>, #tpu.dimension_semantics<parallel>], iteration_bounds = array<i64: 1, 2>, scalar_prefetch = 0 : i64, scratch_operands = 0 : i64, tpu.core_type = #tpu.core_type<tc>, window_params = [{transform_indices = @transform_0, window_bounds = array<i64: 1, 16, 768>}, {transform_indices = @transform_1, window_bounds = array<i64: 1, 768, 128>}, {transform_indices = @transform_2, window_bounds = array<i64: 1, 1, 128>}, {transform_indices = @transform_3, window_bounds = array<i64: 1, 16, 128>}]} {
    %c0 = arith.constant 0 : index
    %c0_0 = arith.constant 0 : index
    %c0_1 = arith.constant 0 : index
    %0 = vector.load %arg2[%c0, %c0_0, %c0_1] : memref<1x16x768xbf16, #tpu.memory_space<vmem>>, vector<1x16x768xbf16>
    %1 = vector.shape_cast %0 : vector<1x16x768xbf16> to vector<16x768xbf16>
    %c0_2 = arith.constant 0 : index
    %c0_3 = arith.constant 0 : index
    %c0_4 = arith.constant 0 : index
    %2 = vector.load %arg3[%c0_2, %c0_3, %c0_4] : memref<1x768x128xbf16, #tpu.memory_space<vmem>>, vector<1x768x128xbf16>
    %3 = vector.shape_cast %2 : vector<1x768x128xbf16> to vector<768x128xbf16>
    %cst = arith.constant dense<0.000000e+00> : vector<16x128xf32>
    %4 = tpu.matmul %1, %3, %cst {dimension_numbers = #tpu.dot_dimension_numbers<[1], [0], [0], [1], [0, 0, 1, 1], [], []>} : vector<16x768xbf16>, vector<768x128xbf16>, vector<16x128xf32> -> vector<16x128xf32>
    %c0_5 = arith.constant 0 : index
    %c0_6 = arith.constant 0 : index
    %c0_7 = arith.constant 0 : index
    %5 = vector.load %arg4[%c0_5, %c0_6, %c0_7] : memref<1x1x128xf32, #tpu.memory_space<vmem>>, vector<1x1x128xf32>
    %6 = vector.shape_cast %5 : vector<1x1x128xf32> to vector<1x128xf32>
    %7 = vector.broadcast %6 : vector<1x128xf32> to vector<16x128xf32>
    %8 = arith.addf %4, %7 : vector<16x128xf32>
    %cst_8 = arith.constant 0.000000e+00 : f32
    %9 = vector.broadcast %cst_8 : f32 to vector<16x128xf32>
    %10 = arith.maximumf %8, %9 : vector<16x128xf32>
    %11 = arith.truncf %10 : vector<16x128xf32> to vector<16x128xbf16>
    %c0_9 = arith.constant 0 : index
    %c0_10 = arith.constant 0 : index
    %c0_11 = arith.constant 0 : index
    %12 = vector.load %arg5[%c0_9, %c0_10, %c0_11] : memref<1x16x128xbf16, #tpu.memory_space<vmem>>, vector<1x16x128xbf16>
    %13 = vector.shape_cast %12 : vector<1x16x128xbf16> to vector<16x128xbf16>
    %14 = vector.shape_cast %11 : vector<16x128xbf16> to vector<1x16x128xbf16>
    tpu.vector_store %arg5[%c0_9, %c0_10, %c0_11], %14 {strides = array<i32>} : memref<1x16x128xbf16, #tpu.memory_space<vmem>>, vector<1x16x128xbf16>,
    return
  }
  func.func @transform_0(%arg0: i32, %arg1: i32) -> (i32, i32, i32) {
    %c0_i32 = arith.constant 0 : i32
    %c0_i32_0 = arith.constant 0 : i32
    return %arg0, %arg1, %c0_i32 : i32, i32, i32
  }
  func.func @transform_1(%arg0: i32, %arg1: i32) -> (i32, i32, i32) {
    %c0_i32 = arith.constant 0 : i32
    %c0_i32_0 = arith.constant 0 : i32
    %c0_i32_1 = arith.constant 0 : i32
    return %arg0, %c0_i32, %c0_i32_0 : i32, i32, i32
  }
  func.func @transform_2(%arg0: i32, %arg1: i32) -> (i32, i32, i32) {
    %c0_i32 = arith.constant 0 : i32
    %c0_i32_0 = arith.constant 0 : i32
    %c0_i32_1 = arith.constant 0 : i32
    return %arg0, %c0_i32, %c0_i32_0 : i32, i32, i32
  }
  func.func @transform_3(%arg0: i32, %arg1: i32) -> (i32, i32, i32) {
    %c0_i32 = arith.constant 0 : i32
    %c0_i32_0 = arith.constant 0 : i32
    return %arg0, %arg1, %c0_i32 : i32, i32, i32
  }
}

module attributes {stable_mosaic.version = 11 : i64} {
  func.func @_gmm_bias_act_kernel(%arg0: i32, %arg1: i32, %arg2: memref<1x64x384xbf16, #tpu.memory_space<vmem>>, %arg3: memref<1x384x64xbf16, #tpu.memory_space<vmem>>, %arg4: memref<1x1x64xf32, #tpu.memory_space<vmem>>, %arg5: memref<1x64x64xbf16, #tpu.memory_space<vmem>>) attributes {dimension_semantics = [#tpu.dimension_semantics<parallel>, #tpu.dimension_semantics<parallel>], iteration_bounds = array<i64: 1, 2>, scalar_prefetch = 0 : i64, scratch_operands = 0 : i64, tpu.core_type = #tpu.core_type<tc>, window_params = [{transform_indices = @transform_0, window_bounds = array<i64: 1, 64, 384>}, {transform_indices = @transform_1, window_bounds = array<i64: 1, 384, 64>}, {transform_indices = @transform_2, window_bounds = array<i64: 1, 1, 64>}, {transform_indices = @transform_3, window_bounds = array<i64: 1, 64, 64>}]} {
    %c0 = arith.constant 0 : index
    %c0_0 = arith.constant 0 : index
    %c0_1 = arith.constant 0 : index
    %0 = vector.load %arg2[%c0, %c0_0, %c0_1] : memref<1x64x384xbf16, #tpu.memory_space<vmem>>, vector<1x64x384xbf16>
    %1 = vector.shape_cast %0 : vector<1x64x384xbf16> to vector<64x384xbf16>
    %c0_2 = arith.constant 0 : index
    %c0_3 = arith.constant 0 : index
    %c0_4 = arith.constant 0 : index
    %2 = vector.load %arg3[%c0_2, %c0_3, %c0_4] : memref<1x384x64xbf16, #tpu.memory_space<vmem>>, vector<1x384x64xbf16>
    %3 = vector.shape_cast %2 : vector<1x384x64xbf16> to vector<384x64xbf16>
    %cst = arith.constant dense<0.000000e+00> : vector<64x64xf32>
    %4 = tpu.matmul %1, %3, %cst {dimension_numbers = #tpu.dot_dimension_numbers<[1], [0], [0], [1], [0, 0, 1, 1], [], []>} : vector<64x384xbf16>, vector<384x64xbf16>, vector<64x64xf32> -> vector<64x64xf32>
    %c0_5 = arith.constant 0 : index
    %c0_6 = arith.constant 0 : index
    %c0_7 = arith.constant 0 : index
    %5 = vector.load %arg4[%c0_5, %c0_6, %c0_7] : memref<1x1x64xf32, #tpu.memory_space<vmem>>, vector<1x1x64xf32>
    %6 = vector.shape_cast %5 : vector<1x1x64xf32> to vector<1x64xf32>
    %7 = vector.broadcast %6 : vector<1x64xf32> to vector<64x64xf32>
    %8 = arith.addf %4, %7 : vector<64x64xf32>
    %cst_8 = arith.constant 0.000000e+00 : f32
    %9 = vector.broadcast %cst_8 : f32 to vector<64x64xf32>
    %10 = arith.maximumf %8, %9 : vector<64x64xf32>
    %11 = arith.truncf %10 : vector<64x64xf32> to vector<64x64xbf16>
    %c0_9 = arith.constant 0 : index
    %c0_10 = arith.constant 0 : index
    %c0_11 = arith.constant 0 : index
    %12 = vector.load %arg5[%c0_9, %c0_10, %c0_11] : memref<1x64x64xbf16, #tpu.memory_space<vmem>>, vector<1x64x64xbf16>
    %13 = vector.shape_cast %12 : vector<1x64x64xbf16> to vector<64x64xbf16>
    %14 = vector.shape_cast %11 : vector<64x64xbf16> to vector<1x64x64xbf16>
    tpu.vector_store %arg5[%c0_9, %c0_10, %c0_11], %14 {strides = array<i32>} : memref<1x64x64xbf16, #tpu.memory_space<vmem>>, vector<1x64x64xbf16>,
    return
  }
  func.func @transform_0(%arg0: i32, %arg1: i32) -> (i32, i32, i32) {
    %c0_i32 = arith.constant 0 : i32
    %c0_i32_0 = arith.constant 0 : i32
    return %arg0, %arg1, %c0_i32 : i32, i32, i32
  }
  func.func @transform_1(%arg0: i32, %arg1: i32) -> (i32, i32, i32) {
    %c0_i32 = arith.constant 0 : i32
    %c0_i32_0 = arith.constant 0 : i32
    %c0_i32_1 = arith.constant 0 : i32
    return %arg0, %c0_i32, %c0_i32_0 : i32, i32, i32
  }
  func.func @transform_2(%arg0: i32, %arg1: i32) -> (i32, i32, i32) {
    %c0_i32 = arith.constant 0 : i32
    %c0_i32_0 = arith.constant 0 : i32
    %c0_i32_1 = arith.constant 0 : i32
    return %arg0, %c0_i32, %c0_i32_0 : i32, i32, i32
  }
  func.func @transform_3(%arg0: i32, %arg1: i32) -> (i32, i32, i32) {
    %c0_i32 = arith.constant 0 : i32
    %c0_i32_0 = arith.constant 0 : i32
    return %arg0, %arg1, %c0_i32 : i32, i32, i32
  }
}

module attributes {stable_mosaic.version = 11 : i64} {
  func.func @_gmm_bias_act_kernel(%arg0: i32, %arg1: i32, %arg2: memref<1x128x192xbf16, #tpu.memory_space<vmem>>, %arg3: memref<1x192x32xbf16, #tpu.memory_space<vmem>>, %arg4: memref<1x1x32xf32, #tpu.memory_space<vmem>>, %arg5: memref<1x128x32xbf16, #tpu.memory_space<vmem>>) attributes {dimension_semantics = [#tpu.dimension_semantics<parallel>, #tpu.dimension_semantics<parallel>], iteration_bounds = array<i64: 1, 4>, scalar_prefetch = 0 : i64, scratch_operands = 0 : i64, tpu.core_type = #tpu.core_type<tc>, window_params = [{transform_indices = @transform_0, window_bounds = array<i64: 1, 128, 192>}, {transform_indices = @transform_1, window_bounds = array<i64: 1, 192, 32>}, {transform_indices = @transform_2, window_bounds = array<i64: 1, 1, 32>}, {transform_indices = @transform_3, window_bounds = array<i64: 1, 128, 32>}]} {
    %c0 = arith.constant 0 : index
    %c0_0 = arith.constant 0 : index
    %c0_1 = arith.constant 0 : index
    %0 = vector.load %arg2[%c0, %c0_0, %c0_1] : memref<1x128x192xbf16, #tpu.memory_space<vmem>>, vector<1x128x192xbf16>
    %1 = vector.shape_cast %0 : vector<1x128x192xbf16> to vector<128x192xbf16>
    %c0_2 = arith.constant 0 : index
    %c0_3 = arith.constant 0 : index
    %c0_4 = arith.constant 0 : index
    %2 = vector.load %arg3[%c0_2, %c0_3, %c0_4] : memref<1x192x32xbf16, #tpu.memory_space<vmem>>, vector<1x192x32xbf16>
    %3 = vector.shape_cast %2 : vector<1x192x32xbf16> to vector<192x32xbf16>
    %cst = arith.constant dense<0.000000e+00> : vector<128x32xf32>
    %4 = tpu.matmul %1, %3, %cst {dimension_numbers = #tpu.dot_dimension_numbers<[1], [0], [0], [1], [0, 0, 1, 1], [], []>} : vector<128x192xbf16>, vector<192x32xbf16>, vector<128x32xf32> -> vector<128x32xf32>
    %c0_5 = arith.constant 0 : index
    %c0_6 = arith.constant 0 : index
    %c0_7 = arith.constant 0 : index
    %5 = vector.load %arg4[%c0_5, %c0_6, %c0_7] : memref<1x1x32xf32, #tpu.memory_space<vmem>>, vector<1x1x32xf32>
    %6 = vector.shape_cast %5 : vector<1x1x32xf32> to vector<1x32xf32>
    %7 = vector.broadcast %6 : vector<1x32xf32> to vector<128x32xf32>
    %8 = arith.addf %4, %7 : vector<128x32xf32>
    %cst_8 = arith.constant 0.000000e+00 : f32
    %9 = vector.broadcast %cst_8 : f32 to vector<128x32xf32>
    %10 = arith.maximumf %8, %9 : vector<128x32xf32>
    %11 = arith.truncf %10 : vector<128x32xf32> to vector<128x32xbf16>
    %c0_9 = arith.constant 0 : index
    %c0_10 = arith.constant 0 : index
    %c0_11 = arith.constant 0 : index
    %12 = vector.load %arg5[%c0_9, %c0_10, %c0_11] : memref<1x128x32xbf16, #tpu.memory_space<vmem>>, vector<1x128x32xbf16>
    %13 = vector.shape_cast %12 : vector<1x128x32xbf16> to vector<128x32xbf16>
    %14 = vector.shape_cast %11 : vector<128x32xbf16> to vector<1x128x32xbf16>
    tpu.vector_store %arg5[%c0_9, %c0_10, %c0_11], %14 {strides = array<i32>} : memref<1x128x32xbf16, #tpu.memory_space<vmem>>, vector<1x128x32xbf16>,
    return
  }
  func.func @transform_0(%arg0: i32, %arg1: i32) -> (i32, i32, i32) {
    %c0_i32 = arith.constant 0 : i32
    %c0_i32_0 = arith.constant 0 : i32
    return %arg0, %arg1, %c0_i32 : i32, i32, i32
  }
  func.func @transform_1(%arg0: i32, %arg1: i32) -> (i32, i32, i32) {
    %c0_i32 = arith.constant 0 : i32
    %c0_i32_0 = arith.constant 0 : i32
    %c0_i32_1 = arith.constant 0 : i32
    return %arg0, %c0_i32, %c0_i32_0 : i32, i32, i32
  }
  func.func @transform_2(%arg0: i32, %arg1: i32) -> (i32, i32, i32) {
    %c0_i32 = arith.constant 0 : i32
    %c0_i32_0 = arith.constant 0 : i32
    %c0_i32_1 = arith.constant 0 : i32
    return %arg0, %c0_i32, %c0_i32_0 : i32, i32, i32
  }
  func.func @transform_3(%arg0: i32, %arg1: i32) -> (i32, i32, i32) {
    %c0_i32 = arith.constant 0 : i32
    %c0_i32_0 = arith.constant 0 : i32
    return %arg0, %arg1, %c0_i32 : i32, i32, i32
  }
}

module attributes {stable_mosaic.version = 11 : i64} {
  func.func @_gmm_bias_act_kernel(%arg0: i32, %arg1: i32, %arg2: memref<1x128x224xbf16, #tpu.memory_space<vmem>>, %arg3: memref<1x224x32xbf16, #tpu.memory_space<vmem>>, %arg4: memref<1x1x32xf32, #tpu.memory_space<vmem>>, %arg5: memref<1x128x32xbf16, #tpu.memory_space<vmem>>) attributes {dimension_semantics = [#tpu.dimension_semantics<parallel>, #tpu.dimension_semantics<parallel>], iteration_bounds = array<i64: 1, 4>, scalar_prefetch = 0 : i64, scratch_operands = 0 : i64, tpu.core_type = #tpu.core_type<tc>, window_params = [{transform_indices = @transform_0, window_bounds = array<i64: 1, 128, 224>}, {transform_indices = @transform_1, window_bounds = array<i64: 1, 224, 32>}, {transform_indices = @transform_2, window_bounds = array<i64: 1, 1, 32>}, {transform_indices = @transform_3, window_bounds = array<i64: 1, 128, 32>}]} {
    %c0 = arith.constant 0 : index
    %c0_0 = arith.constant 0 : index
    %c0_1 = arith.constant 0 : index
    %0 = vector.load %arg2[%c0, %c0_0, %c0_1] : memref<1x128x224xbf16, #tpu.memory_space<vmem>>, vector<1x128x224xbf16>
    %1 = vector.shape_cast %0 : vector<1x128x224xbf16> to vector<128x224xbf16>
    %c0_2 = arith.constant 0 : index
    %c0_3 = arith.constant 0 : index
    %c0_4 = arith.constant 0 : index
    %2 = vector.load %arg3[%c0_2, %c0_3, %c0_4] : memref<1x224x32xbf16, #tpu.memory_space<vmem>>, vector<1x224x32xbf16>
    %3 = vector.shape_cast %2 : vector<1x224x32xbf16> to vector<224x32xbf16>
    %cst = arith.constant dense<0.000000e+00> : vector<128x32xf32>
    %4 = tpu.matmul %1, %3, %cst {dimension_numbers = #tpu.dot_dimension_numbers<[1], [0], [0], [1], [0, 0, 1, 1], [], []>} : vector<128x224xbf16>, vector<224x32xbf16>, vector<128x32xf32> -> vector<128x32xf32>
    %c0_5 = arith.constant 0 : index
    %c0_6 = arith.constant 0 : index
    %c0_7 = arith.constant 0 : index
    %5 = vector.load %arg4[%c0_5, %c0_6, %c0_7] : memref<1x1x32xf32, #tpu.memory_space<vmem>>, vector<1x1x32xf32>
    %6 = vector.shape_cast %5 : vector<1x1x32xf32> to vector<1x32xf32>
    %7 = vector.broadcast %6 : vector<1x32xf32> to vector<128x32xf32>
    %8 = arith.addf %4, %7 : vector<128x32xf32>
    %cst_8 = arith.constant 0.000000e+00 : f32
    %9 = vector.broadcast %cst_8 : f32 to vector<128x32xf32>
    %10 = arith.maximumf %8, %9 : vector<128x32xf32>
    %11 = arith.truncf %10 : vector<128x32xf32> to vector<128x32xbf16>
    %c0_9 = arith.constant 0 : index
    %c0_10 = arith.constant 0 : index
    %c0_11 = arith.constant 0 : index
    %12 = vector.load %arg5[%c0_9, %c0_10, %c0_11] : memref<1x128x32xbf16, #tpu.memory_space<vmem>>, vector<1x128x32xbf16>
    %13 = vector.shape_cast %12 : vector<1x128x32xbf16> to vector<128x32xbf16>
    %14 = vector.shape_cast %11 : vector<128x32xbf16> to vector<1x128x32xbf16>
    tpu.vector_store %arg5[%c0_9, %c0_10, %c0_11], %14 {strides = array<i32>} : memref<1x128x32xbf16, #tpu.memory_space<vmem>>, vector<1x128x32xbf16>,
    return
  }
  func.func @transform_0(%arg0: i32, %arg1: i32) -> (i32, i32, i32) {
    %c0_i32 = arith.constant 0 : i32
    %c0_i32_0 = arith.constant 0 : i32
    return %arg0, %arg1, %c0_i32 : i32, i32, i32
  }
  func.func @transform_1(%arg0: i32, %arg1: i32) -> (i32, i32, i32) {
    %c0_i32 = arith.constant 0 : i32
    %c0_i32_0 = arith.constant 0 : i32
    %c0_i32_1 = arith.constant 0 : i32
    return %arg0, %c0_i32, %c0_i32_0 : i32, i32, i32
  }
  func.func @transform_2(%arg0: i32, %arg1: i32) -> (i32, i32, i32) {
    %c0_i32 = arith.constant 0 : i32
    %c0_i32_0 = arith.constant 0 : i32
    %c0_i32_1 = arith.constant 0 : i32
    return %arg0, %c0_i32, %c0_i32_0 : i32, i32, i32
  }
  func.func @transform_3(%arg0: i32, %arg1: i32) -> (i32, i32, i32) {
    %c0_i32 = arith.constant 0 : i32
    %c0_i32_0 = arith.constant 0 : i32
    return %arg0, %arg1, %c0_i32 : i32, i32, i32
  }
}

module attributes {stable_mosaic.version = 11 : i64} {
  func.func @_gmm_bias_act_kernel(%arg0: i32, %arg1: i32, %arg2: memref<1x128x256xbf16, #tpu.memory_space<vmem>>, %arg3: memref<1x256x32xbf16, #tpu.memory_space<vmem>>, %arg4: memref<1x1x32xf32, #tpu.memory_space<vmem>>, %arg5: memref<1x128x32xbf16, #tpu.memory_space<vmem>>) attributes {dimension_semantics = [#tpu.dimension_semantics<parallel>, #tpu.dimension_semantics<parallel>], iteration_bounds = array<i64: 1, 4>, scalar_prefetch = 0 : i64, scratch_operands = 0 : i64, tpu.core_type = #tpu.core_type<tc>, window_params = [{transform_indices = @transform_0, window_bounds = array<i64: 1, 128, 256>}, {transform_indices = @transform_1, window_bounds = array<i64: 1, 256, 32>}, {transform_indices = @transform_2, window_bounds = array<i64: 1, 1, 32>}, {transform_indices = @transform_3, window_bounds = array<i64: 1, 128, 32>}]} {
    %c0 = arith.constant 0 : index
    %c0_0 = arith.constant 0 : index
    %c0_1 = arith.constant 0 : index
    %0 = vector.load %arg2[%c0, %c0_0, %c0_1] : memref<1x128x256xbf16, #tpu.memory_space<vmem>>, vector<1x128x256xbf16>
    %1 = vector.shape_cast %0 : vector<1x128x256xbf16> to vector<128x256xbf16>
    %c0_2 = arith.constant 0 : index
    %c0_3 = arith.constant 0 : index
    %c0_4 = arith.constant 0 : index
    %2 = vector.load %arg3[%c0_2, %c0_3, %c0_4] : memref<1x256x32xbf16, #tpu.memory_space<vmem>>, vector<1x256x32xbf16>
    %3 = vector.shape_cast %2 : vector<1x256x32xbf16> to vector<256x32xbf16>
    %cst = arith.constant dense<0.000000e+00> : vector<128x32xf32>
    %4 = tpu.matmul %1, %3, %cst {dimension_numbers = #tpu.dot_dimension_numbers<[1], [0], [0], [1], [0, 0, 1, 1], [], []>} : vector<128x256xbf16>, vector<256x32xbf16>, vector<128x32xf32> -> vector<128x32xf32>
    %c0_5 = arith.constant 0 : index
    %c0_6 = arith.constant 0 : index
    %c0_7 = arith.constant 0 : index
    %5 = vector.load %arg4[%c0_5, %c0_6, %c0_7] : memref<1x1x32xf32, #tpu.memory_space<vmem>>, vector<1x1x32xf32>
    %6 = vector.shape_cast %5 : vector<1x1x32xf32> to vector<1x32xf32>
    %7 = vector.broadcast %6 : vector<1x32xf32> to vector<128x32xf32>
    %8 = arith.addf %4, %7 : vector<128x32xf32>
    %cst_8 = arith.constant 0.000000e+00 : f32
    %9 = vector.broadcast %cst_8 : f32 to vector<128x32xf32>
    %10 = arith.maximumf %8, %9 : vector<128x32xf32>
    %11 = arith.truncf %10 : vector<128x32xf32> to vector<128x32xbf16>
    %c0_9 = arith.constant 0 : index
    %c0_10 = arith.constant 0 : index
    %c0_11 = arith.constant 0 : index
    %12 = vector.load %arg5[%c0_9, %c0_10, %c0_11] : memref<1x128x32xbf16, #tpu.memory_space<vmem>>, vector<1x128x32xbf16>
    %13 = vector.shape_cast %12 : vector<1x128x32xbf16> to vector<128x32xbf16>
    %14 = vector.shape_cast %11 : vector<128x32xbf16> to vector<1x128x32xbf16>
    tpu.vector_store %arg5[%c0_9, %c0_10, %c0_11], %14 {strides = array<i32>} : memref<1x128x32xbf16, #tpu.memory_space<vmem>>, vector<1x128x32xbf16>,
    return
  }
  func.func @transform_0(%arg0: i32, %arg1: i32) -> (i32, i32, i32) {
    %c0_i32 = arith.constant 0 : i32
    %c0_i32_0 = arith.constant 0 : i32
    return %arg0, %arg1, %c0_i32 : i32, i32, i32
  }
  func.func @transform_1(%arg0: i32, %arg1: i32) -> (i32, i32, i32) {
    %c0_i32 = arith.constant 0 : i32
    %c0_i32_0 = arith.constant 0 : i32
    %c0_i32_1 = arith.constant 0 : i32
    return %arg0, %c0_i32, %c0_i32_0 : i32, i32, i32
  }
  func.func @transform_2(%arg0: i32, %arg1: i32) -> (i32, i32, i32) {
    %c0_i32 = arith.constant 0 : i32
    %c0_i32_0 = arith.constant 0 : i32
    %c0_i32_1 = arith.constant 0 : i32
    return %arg0, %c0_i32, %c0_i32_0 : i32, i32, i32
  }
  func.func @transform_3(%arg0: i32, %arg1: i32) -> (i32, i32, i32) {
    %c0_i32 = arith.constant 0 : i32
    %c0_i32_0 = arith.constant 0 : i32
    return %arg0, %arg1, %c0_i32 : i32, i32, i32
  }
}

module attributes {stable_mosaic.version = 11 : i64} {
  func.func @_gmm_bias_act_kernel(%arg0: i32, %arg1: i32, %arg2: memref<1x128x288xbf16, #tpu.memory_space<vmem>>, %arg3: memref<1x288x32xbf16, #tpu.memory_space<vmem>>, %arg4: memref<1x1x32xf32, #tpu.memory_space<vmem>>, %arg5: memref<1x128x32xbf16, #tpu.memory_space<vmem>>) attributes {dimension_semantics = [#tpu.dimension_semantics<parallel>, #tpu.dimension_semantics<parallel>], iteration_bounds = array<i64: 1, 4>, scalar_prefetch = 0 : i64, scratch_operands = 0 : i64, tpu.core_type = #tpu.core_type<tc>, window_params = [{transform_indices = @transform_0, window_bounds = array<i64: 1, 128, 288>}, {transform_indices = @transform_1, window_bounds = array<i64: 1, 288, 32>}, {transform_indices = @transform_2, window_bounds = array<i64: 1, 1, 32>}, {transform_indices = @transform_3, window_bounds = array<i64: 1, 128, 32>}]} {
    %c0 = arith.constant 0 : index
    %c0_0 = arith.constant 0 : index
    %c0_1 = arith.constant 0 : index
    %0 = vector.load %arg2[%c0, %c0_0, %c0_1] : memref<1x128x288xbf16, #tpu.memory_space<vmem>>, vector<1x128x288xbf16>
    %1 = vector.shape_cast %0 : vector<1x128x288xbf16> to vector<128x288xbf16>
    %c0_2 = arith.constant 0 : index
    %c0_3 = arith.constant 0 : index
    %c0_4 = arith.constant 0 : index
    %2 = vector.load %arg3[%c0_2, %c0_3, %c0_4] : memref<1x288x32xbf16, #tpu.memory_space<vmem>>, vector<1x288x32xbf16>
    %3 = vector.shape_cast %2 : vector<1x288x32xbf16> to vector<288x32xbf16>
    %cst = arith.constant dense<0.000000e+00> : vector<128x32xf32>
    %4 = tpu.matmul %1, %3, %cst {dimension_numbers = #tpu.dot_dimension_numbers<[1], [0], [0], [1], [0, 0, 1, 1], [], []>} : vector<128x288xbf16>, vector<288x32xbf16>, vector<128x32xf32> -> vector<128x32xf32>
    %c0_5 = arith.constant 0 : index
    %c0_6 = arith.constant 0 : index
    %c0_7 = arith.constant 0 : index
    %5 = vector.load %arg4[%c0_5, %c0_6, %c0_7] : memref<1x1x32xf32, #tpu.memory_space<vmem>>, vector<1x1x32xf32>
    %6 = vector.shape_cast %5 : vector<1x1x32xf32> to vector<1x32xf32>
    %7 = vector.broadcast %6 : vector<1x32xf32> to vector<128x32xf32>
    %8 = arith.addf %4, %7 : vector<128x32xf32>
    %cst_8 = arith.constant 0.000000e+00 : f32
    %9 = vector.broadcast %cst_8 : f32 to vector<128x32xf32>
    %10 = arith.maximumf %8, %9 : vector<128x32xf32>
    %11 = arith.truncf %10 : vector<128x32xf32> to vector<128x32xbf16>
    %c0_9 = arith.constant 0 : index
    %c0_10 = arith.constant 0 : index
    %c0_11 = arith.constant 0 : index
    %12 = vector.load %arg5[%c0_9, %c0_10, %c0_11] : memref<1x128x32xbf16, #tpu.memory_space<vmem>>, vector<1x128x32xbf16>
    %13 = vector.shape_cast %12 : vector<1x128x32xbf16> to vector<128x32xbf16>
    %14 = vector.shape_cast %11 : vector<128x32xbf16> to vector<1x128x32xbf16>
    tpu.vector_store %arg5[%c0_9, %c0_10, %c0_11], %14 {strides = array<i32>} : memref<1x128x32xbf16, #tpu.memory_space<vmem>>, vector<1x128x32xbf16>,
    return
  }
  func.func @transform_0(%arg0: i32, %arg1: i32) -> (i32, i32, i32) {
    %c0_i32 = arith.constant 0 : i32
    %c0_i32_0 = arith.constant 0 : i32
    return %arg0, %arg1, %c0_i32 : i32, i32, i32
  }
  func.func @transform_1(%arg0: i32, %arg1: i32) -> (i32, i32, i32) {
    %c0_i32 = arith.constant 0 : i32
    %c0_i32_0 = arith.constant 0 : i32
    %c0_i32_1 = arith.constant 0 : i32
    return %arg0, %c0_i32, %c0_i32_0 : i32, i32, i32
  }
  func.func @transform_2(%arg0: i32, %arg1: i32) -> (i32, i32, i32) {
    %c0_i32 = arith.constant 0 : i32
    %c0_i32_0 = arith.constant 0 : i32
    %c0_i32_1 = arith.constant 0 : i32
    return %arg0, %c0_i32, %c0_i32_0 : i32, i32, i32
  }
  func.func @transform_3(%arg0: i32, %arg1: i32) -> (i32, i32, i32) {
    %c0_i32 = arith.constant 0 : i32
    %c0_i32_0 = arith.constant 0 : i32
    return %arg0, %arg1, %c0_i32 : i32, i32, i32
  }
}

module attributes {stable_mosaic.version = 11 : i64} {
  func.func @_gmm_bias_act_kernel(%arg0: i32, %arg1: i32, %arg2: memref<1x128x128xbf16, #tpu.memory_space<vmem>>, %arg3: memref<1x128x2xbf16, #tpu.memory_space<vmem>>, %arg4: memref<1x1x2xf32, #tpu.memory_space<vmem>>, %arg5: memref<1x128x2xbf16, #tpu.memory_space<vmem>>) attributes {dimension_semantics = [#tpu.dimension_semantics<parallel>, #tpu.dimension_semantics<parallel>], iteration_bounds = array<i64: 1, 4>, scalar_prefetch = 0 : i64, scratch_operands = 0 : i64, tpu.core_type = #tpu.core_type<tc>, window_params = [{transform_indices = @transform_0, window_bounds = array<i64: 1, 128, 128>}, {transform_indices = @transform_1, window_bounds = array<i64: 1, 128, 2>}, {transform_indices = @transform_2, window_bounds = array<i64: 1, 1, 2>}, {transform_indices = @transform_3, window_bounds = array<i64: 1, 128, 2>}]} {
    %c0 = arith.constant 0 : index
    %c0_0 = arith.constant 0 : index
    %c0_1 = arith.constant 0 : index
    %0 = vector.load %arg2[%c0, %c0_0, %c0_1] : memref<1x128x128xbf16, #tpu.memory_space<vmem>>, vector<1x128x128xbf16>
    %1 = vector.shape_cast %0 : vector<1x128x128xbf16> to vector<128x128xbf16>
    %c0_2 = arith.constant 0 : index
    %c0_3 = arith.constant 0 : index
    %c0_4 = arith.constant 0 : index
    %2 = vector.load %arg3[%c0_2, %c0_3, %c0_4] : memref<1x128x2xbf16, #tpu.memory_space<vmem>>, vector<1x128x2xbf16>
    %3 = vector.shape_cast %2 : vector<1x128x2xbf16> to vector<128x2xbf16>
    %cst = arith.constant dense<0.000000e+00> : vector<128x2xf32>
    %4 = tpu.matmul %1, %3, %cst {dimension_numbers = #tpu.dot_dimension_numbers<[1], [0], [0], [1], [0, 0, 1, 1], [], []>} : vector<128x128xbf16>, vector<128x2xbf16>, vector<128x2xf32> -> vector<128x2xf32>
    %c0_5 = arith.constant 0 : index
    %c0_6 = arith.constant 0 : index
    %c0_7 = arith.constant 0 : index
    %5 = vector.load %arg4[%c0_5, %c0_6, %c0_7] : memref<1x1x2xf32, #tpu.memory_space<vmem>>, vector<1x1x2xf32>
    %6 = vector.shape_cast %5 : vector<1x1x2xf32> to vector<1x2xf32>
    %7 = vector.broadcast %6 : vector<1x2xf32> to vector<128x2xf32>
    %8 = arith.addf %4, %7 : vector<128x2xf32>
    %9 = arith.truncf %8 : vector<128x2xf32> to vector<128x2xbf16>
    %c0_8 = arith.constant 0 : index
    %c0_9 = arith.constant 0 : index
    %c0_10 = arith.constant 0 : index
    %10 = vector.load %arg5[%c0_8, %c0_9, %c0_10] : memref<1x128x2xbf16, #tpu.memory_space<vmem>>, vector<1x128x2xbf16>
    %11 = vector.shape_cast %10 : vector<1x128x2xbf16> to vector<128x2xbf16>
    %12 = vector.shape_cast %9 : vector<128x2xbf16> to vector<1x128x2xbf16>
    tpu.vector_store %arg5[%c0_8, %c0_9, %c0_10], %12 {strides = array<i32>} : memref<1x128x2xbf16, #tpu.memory_space<vmem>>, vector<1x128x2xbf16>,
    return
  }
  func.func @transform_0(%arg0: i32, %arg1: i32) -> (i32, i32, i32) {
    %c0_i32 = arith.constant 0 : i32
    %c0_i32_0 = arith.constant 0 : i32
    return %arg0, %arg1, %c0_i32 : i32, i32, i32
  }
  func.func @transform_1(%arg0: i32, %arg1: i32) -> (i32, i32, i32) {
    %c0_i32 = arith.constant 0 : i32
    %c0_i32_0 = arith.constant 0 : i32
    %c0_i32_1 = arith.constant 0 : i32
    return %arg0, %c0_i32, %c0_i32_0 : i32, i32, i32
  }
  func.func @transform_2(%arg0: i32, %arg1: i32) -> (i32, i32, i32) {
    %c0_i32 = arith.constant 0 : i32
    %c0_i32_0 = arith.constant 0 : i32
    %c0_i32_1 = arith.constant 0 : i32
    return %arg0, %c0_i32, %c0_i32_0 : i32, i32, i32
  }
  func.func @transform_3(%arg0: i32, %arg1: i32) -> (i32, i32, i32) {
    %c0_i32 = arith.constant 0 : i32
    %c0_i32_0 = arith.constant 0 : i32
    return %arg0, %arg1, %c0_i32 : i32, i32, i32
  }
}

</mosaic_0001>

<bundles_post_ra>
// kernel: jointnet_forward.39
= control target key start
LH: loop header
LB: loop body
LE: loop exit
PB: predicated region body
PF: predicated region fallthrough
CT: control target
= control target key end

     0   :  { %8 = vsyncpa [#allocation3], 0  ;;  %s1089_s0 = inlined_call_operand.vmem [shape: bf16[1,512,4], index: 0, kind: input, shape index: {}]   ;;  %s1090_s1 = inlined_call_operand.hbm [shape: bf16[1,4,32], index: 1, kind: input, shape index: {}]   ;;  %s1091_s2 = inlined_call_operand.hbm [shape: f32[1,1,32], index: 2, kind: input, shape index: {}]   ;;  %s1092_s3 = inlined_call_operand.vmem [shape: bf16[1,512,32], index: 3, kind: output, shape index: {}]  }
   0x1   :  { %9 = vsyncpa [#allocation5], 0  ;;  %s909_s12 = smov 0   ;;  %s911_s13 = smov 0  }
   0x2   :  { %s913_s14 = smov 0  }
   0x3 LB: > { %s651_s15 = sadd.s32 4294967295, %s885_s14   ;;  %s24_s16 = sadd.s32 1, %s881_s13  ;;  %s885_s14 = sphi %s913_s14, %s15_s14   ;;  %s881_s13 = sphi %s911_s13, %s1102_s13   ;;  %s877_s12 = sphi %s909_s12, %s1101_s12  }
   0x4   : > { %p25_p0 = scmp.ge.s32.totalorder %s24_s16, 4  ;;  %p653_p1 = scmp.ge.s32.totalorder %s885_s14, 1 }
   0x5   : > { %p140_p2 = scmp.lt.s32.totalorder %s885_s14, 5  ;;  %p934_p4 = scmp.eq.s32.totalorder %s651_s15, 0 }
   0x6   : > { %s1104_s16 = smov (%p25_p0, %s24_s16), 0  ;;  %s887_s19 = smov [#allocation2]  }
   0x7   : > { %p930_p3 = pnand %p653_p1, %p140_p2  ;;  %s155_s20 = sshll.u32 %s887_s19, 4  ;;  %s156_s20 = int_to_ptr.vmem [resolvable:$true] %s155_s20 }
   0x8   : > { %s1097_s18 = scalar_select %p934_p4, 1, 0 }
   0x9   : > { %s1096_s17 = scalar_select %p930_p3, 1, 0 }
   0xa   : > { %p754_p5 = pneg %p930_p3  ;;  %s888_s21 = smov [#allocation4]  }
   0xb   : > { %s168_s22 = sshll.u32 %s888_s21, 4  ;;  %s799_s26 = scalar_lea.hbm %s1090_s1, 32  ;;  %s946_s22 = int_to_ptr.vmem [resolvable:$true] %s168_s22 }
   0xc   : > { %p942_p6 = pnand %p934_p4, %p754_p5  ;;  %p800_p7 = scmp.ne.s32.totalorder %s1090_s1, %s799_s26 }
   0xd   : > { %p806_p11 = scmp.lt.u32.totalorder %s799_s26, %s1090_s1 }
   0xe   : > { %p801_p8 = pneg %p942_p6 }
  0x10   : > { %p802_p9 = pnand %p801_p8, %p800_p7 }
  0x12   : > { %p803_p10 = pneg %p802_p9 }
  0x14   : > { %p808_p12 = pnand %p806_p11, %p803_p10 }
  0x16   : > { %811 = shalt.err (!%p808_p12)
}
  0x17   : > { %s812_s4 = scalar_lea.vmem %s156_s20, 32  ;;  %p820_p2 = scmp.lt.s32.totalorder %s156_s20, %s156_s20 }
  0x18   : > { %p813_p13 = scmp.ne.s32.totalorder %s156_s20, %s812_s4  ;;  %p821_p5 = scmp.lt.s32.totalorder %s812_s4, %s812_s4 }
  0x1a   : > { %p815_p0 = pnand %p813_p13, %p801_p8  ;;  %p822_p4 = por %p821_p5, %p820_p2 }
  0x1c   : > { %p816_p1 = pneg %p815_p0 }
  0x1e   : > { %p823_p3 = pnand %p822_p4, %p816_p1 }
  0x20   : > { %826 = shalt.err (!%p823_p3)
}
  0x21   : > { %757 = dma.hbm_to_vmem [thread:$0]  (!%p942_p6), %s1090_s1, 32, %s156_s20, [#allocation3]  }
  0x22   : > { %s827_s9 = scalar_lea.hbm %s1091_s2, 16 }
  0x23   : > { %p828_p7 = scmp.ne.s32.totalorder %s1091_s2, %s827_s9  ;;  %p834_p3 = scmp.lt.u32.totalorder %s827_s9, %s1091_s2 }
  0x25   : > { %p830_p9 = pnand %p828_p7, %p801_p8 }
  0x27   : > { %p831_p4 = pneg %p830_p9 }
  0x29   : > { %p836_p10 = pnand %p834_p3, %p831_p4 }
  0x2b   : > { %839 = shalt.err (!%p836_p10)
}
  0x2c   : > { %s840_s20 = scalar_lea.vmem %s946_s22, 16  ;;  %s847_s21 = scalar_lea.vmem %s946_s22, 32 }
  0x2d   : > { %p841_p11 = scmp.ne.s32.totalorder %s946_s22, %s840_s20  ;;  %p848_p0 = scmp.lt.s32.totalorder %s946_s22, %s946_s22 }
  0x2e   : > { %p849_p1 = scmp.lt.s32.totalorder %s847_s21, %s840_s20 }
  0x2f   : > { %p843_p12 = pnand %p841_p11, %p801_p8 }
  0x30   : > { %p850_p2 = por %p849_p1, %p848_p0 }
  0x31   : > { %p844_p13 = pneg %p843_p12 }
  0x33   : > { %p851_p5 = pnand %p850_p2, %p844_p13 }
  0x35   : > { %854 = shalt.err (!%p851_p5)
}
  0x36   : > { %760 = dma.hbm_to_vmem [thread:$0]  (!%p942_p6), %s1091_s2, 16, %s946_s22, [#allocation5]  }
  0x37   : > { %p1099_p7 = scmp.ne.s32.totalorder %s1096_s17, 0 }
  0x38   : > { %p1100_p8 = scmp.ne.s32.totalorder (!%p1099_p7), %s1097_s18, 0 }
  0x39   : > { %194 = sbr.rel (%p1099_p7) target bundleno = 306 (0x132), region = 32 }
  0x40   : > { %868 = dma.done.wait (%p1100_p8), [#allocation3], 32  }
  0x41   : > { %870 = vsyncadd (%p1100_p8), [#allocation3], 4294967264 }
  0x42   : > { %872 = dma.done.wait (%p1100_p8), [#allocation5], 16  }
  0x43   : > { %874 = vsyncadd (%p1100_p8), [#allocation5], 4294967280  ;;  %s660_s23 = sshll.u32 %s877_s12, 4  ;;  %vm340_vm0 = vcmask 1041408   ;;  %vm315_vm1 = vcmask 31744   ;;  %vm521_vm2 = vcmask 257024  }
  0x44   : > { %p233_p9 = scmp.lt.s32.totalorder %s660_s23, 63  ;;  %v267_v0 = vld [vmem:[#allocation2] sm:$0x3]  ;;  %v1023_v10 = vld [vmem:[#allocation4] ss:$0 sm:$0xff] }
  0x45   : > { %744 = vmatprep.subr.msk.bf16.mxu0 %vm340_vm0, %v267_v0  ;;  %745 = vmatprep.subr.msk.bf16.mxu1 %vm340_vm0, %v267_v0  ;;  %v342_v1 = vsel %vm340_vm0, %v267_v0, 0 }
  0x46   : > { %s1106_s23 = smov (!%p233_p9, %s660_s23), 63  ;;  %725 = vmatpush3.bf16.msra.mxu0 %v342_v1  ;;  %743 = vmatpush3.bf16.msra.mxu1 %v342_v1 }
  0x47   : > { %s661_s17 = sshll.u32 %s1106_s23, 2 }
  0x48   : > { %s238_s27 = scalar_lea.vmem %s1089_s0, %s661_s17  ;;  %s1035_s28 = scalar_lea.vmem %s1092_s3, %s661_s17 }
  0x49   : > { %v791_v2 = vld [vmem:[%s238_s27] sm:$0xff]   ;;  %v793_v4 = vld [vmem:[%s238_s27 + $0x8] sm:$0xff]   ;;  %v795_v6 = vld [vmem:[%s238_s27 + $0x10] sm:$0xff]  }
  0x4a   : > { %v792_v3 = vld [vmem:[%s238_s27 + $0x20] sm:$0xff]   ;;  %726 = vmatprep.mubr.msk.bf16.mxu0 %vm315_vm1, %v791_v2  ;;  %v794_v5 = vld [vmem:[%s238_s27 + $0x28] sm:$0xff]   ;;  %v796_v7 = vld [vmem:[%s238_s27 + $0x30] sm:$0xff]  }
  0x4b   : > { %734 = vmatprep.mubr.msk.bf16.mxu1 %vm315_vm1, %v792_v3  ;;  %727 = vmatmul.mubr.msk.bf16.vlgmr.msra.gmra.mrb[0].mxu0 %vm315_vm1, %v793_v4  ;;  %v797_v8 = vld [vmem:[%s238_s27 + $0x18] sm:$0xff]  }
  0x4c   : > { %735 = vmatmul.mubr.msk.bf16.vlgmr.msra.gmra.mrb[0].mxu1 %vm315_vm1, %v794_v5  ;;  %730 = vmatprep.mubr.msk.bf16.mxu0 %vm315_vm1, %v795_v6  ;;  %v798_v9 = vld [vmem:[%s238_s27 + $0x38] sm:$0xff]  }
  0x4d   : > { %738 = vmatprep.mubr.msk.bf16.mxu1 %vm315_vm1, %v796_v7 }
  0x53   : > { %731 = vmatmul.mubr.msk.bf16.gmra.mrb[4].mxu0 %vm315_vm1, %v797_v8 }
  0x54   : > { %739 = vmatmul.mubr.msk.bf16.gmra.mrb[4].mxu1 %vm315_vm1, %v798_v9 }
 0x11e   : > { %v728_v11 = vpop.f32.mrb[0].mxu0 }
 0x11f   : > { %v387_v12 = vadd.f32 %v728_v11, %v1023_v10  ;;  %v736_v13 = vpop.f32.mrb[0].mxu1  ;;  %v378_v14 = vpop.f32.mrb[1].mxu0 }
 0x120   : > { %v419_v15 = vadd.f32 %v736_v13, %v1023_v10  ;;  %v379_v16 = vadd.f32 %v1023_v10, %v378_v14  ;;  %v410_v17 = vpop.f32.mrb[1].mxu1  ;;  %v729_v18 = vpop.f32.mrb[2].mxu0 }
 0x121   : > { %v443_v19 = vmax.f32 %v387_v12, 0.0  ;;  %v411_v20 = vadd.f32 %v1023_v10, %v410_v17  ;;  %v390_v21 = vadd.f32 %v729_v18, %v1023_v10  ;;  %v737_v22 = vpop.f32.mrb[2].mxu1  ;;  %v381_v23 = vpop.f32.mrb[3].mxu0 }
 0x122   : > { %v451_v24 = vmax.f32 %v419_v15, 0.0  ;;  %v441_v25 = vmax.f32 %v379_v16, 0.0  ;;  %v422_v26 = vadd.f32 %v737_v22, %v1023_v10  ;;  %v382_v27 = vadd.f32 %v1023_v10, %v381_v23  ;;  %v413_v28 = vpop.f32.mrb[3].mxu1 }
 0x123   : > { %v701_v29 = vpack.c.bf16 %v443_v19, %v443_v19  ;;  %v449_v30 = vmax.f32 %v411_v20, 0.0  ;;  %v444_v31 = vmax.f32 %v390_v21, 0.0  ;;  %v414_v32 = vadd.f32 %v1023_v10, %v413_v28 }
 0x124   : > { %v709_v33 = vpack.c.bf16 %v451_v24, %v451_v24  ;;  %v699_v34 = vpack.c.bf16 %v441_v25, %v441_v25  ;;  %v452_v35 = vmax.f32 %v422_v26, 0.0  ;;  %v442_v36 = vmax.f32 %v382_v27, 0.0 }
 0x125   : > { %524 = vst.msk [vmem:[%s1035_s28 + $0x8] sm:$0xf] %vm521_vm2, %v701_v29  ;;  %v707_v37 = vpack.c.bf16 %v449_v30, %v449_v30  ;;  %v702_v38 = vpack.c.bf16 %v444_v31, %v444_v31  ;;  %v450_v39 = vmax.f32 %v414_v32, 0.0 }
 0x126   : > { %532 = vst.msk [vmem:[%s1035_s28 + $0x28] sm:$0xf] %vm521_vm2, %v709_v33  ;;  %522 = vst.msk [vmem:[%s1035_s28] sm:$0xf] %vm521_vm2, %v699_v34  ;;  %v710_v40 = vpack.c.bf16 %v452_v35, %v452_v35  ;;  %v700_v41 = vpack.c.bf16 %v442_v36, %v442_v36  ;;  %v732_v42 = vpop.f32.mrb[4].mxu0 }
 0x127   : > { %530 = vst.msk [vmem:[%s1035_s28 + $0x20] sm:$0xf] %vm521_vm2, %v707_v37  ;;  %525 = vst.msk [vmem:[%s1035_s28 + $0xc] sm:$0xf] %vm521_vm2, %v702_v38  ;;  %v708_v43 = vpack.c.bf16 %v450_v39, %v450_v39  ;;  %v403_v44 = vadd.f32 %v732_v42, %v1023_v10  ;;  %v740_v45 = vpop.f32.mrb[4].mxu1  ;;  %v394_v46 = vpop.f32.mrb[5].mxu0 }
 0x128   : > { %533 = vst.msk [vmem:[%s1035_s28 + $0x2c] sm:$0xf] %vm521_vm2, %v710_v40  ;;  %523 = vst.msk [vmem:[%s1035_s28 + $0x4] sm:$0xf] %vm521_vm2, %v700_v41  ;;  %v435_v47 = vadd.f32 %v740_v45, %v1023_v10  ;;  %v395_v48 = vadd.f32 %v1023_v10, %v394_v46  ;;  %v426_v49 = vpop.f32.mrb[5].mxu1  ;;  %v733_v50 = vpop.f32.mrb[6].mxu0 }
 0x129   : > { %531 = vst.msk [vmem:[%s1035_s28 + $0x24] sm:$0xf] %vm521_vm2, %v708_v43  ;;  %v447_v51 = vmax.f32 %v403_v44, 0.0  ;;  %v427_v52 = vadd.f32 %v1023_v10, %v426_v49  ;;  %v406_v53 = vadd.f32 %v733_v50, %v1023_v10  ;;  %v741_v54 = vpop.f32.mrb[6].mxu1  ;;  %v397_v55 = vpop.f32.mrb[7].mxu0 }
 0x12a   : > { %v455_v56 = vmax.f32 %v435_v47, 0.0  ;;  %v445_v57 = vmax.f32 %v395_v48, 0.0  ;;  %v438_v58 = vadd.f32 %v741_v54, %v1023_v10  ;;  %v398_v59 = vadd.f32 %v1023_v10, %v397_v55  ;;  %v429_v60 = vpop.f32.mrb[7].mxu1 }
 0x12b   : > { %v705_v61 = vpack.c.bf16 %v447_v51, %v447_v51  ;;  %v453_v62 = vmax.f32 %v427_v52, 0.0  ;;  %v448_v63 = vmax.f32 %v406_v53, 0.0  ;;  %v430_v0 = vadd.f32 %v1023_v10, %v429_v60 }
 0x12c   : > { %v713_v1 = vpack.c.bf16 %v455_v56, %v455_v56  ;;  %v703_v2 = vpack.c.bf16 %v445_v57, %v445_v57  ;;  %v456_v3 = vmax.f32 %v438_v58, 0.0  ;;  %v446_v4 = vmax.f32 %v398_v59, 0.0 }
 0x12d   : > { %528 = vst.msk [vmem:[%s1035_s28 + $0x18] sm:$0xf] %vm521_vm2, %v705_v61  ;;  %v711_v5 = vpack.c.bf16 %v453_v62, %v453_v62  ;;  %v706_v6 = vpack.c.bf16 %v448_v63, %v448_v63  ;;  %v454_v7 = vmax.f32 %v430_v0, 0.0 }
 0x12e   : > { %536 = vst.msk [vmem:[%s1035_s28 + $0x38] sm:$0xf] %vm521_vm2, %v713_v1  ;;  %526 = vst.msk [vmem:[%s1035_s28 + $0x10] sm:$0xf] %vm521_vm2, %v703_v2  ;;  %v714_v8 = vpack.c.bf16 %v456_v3, %v456_v3  ;;  %v704_v9 = vpack.c.bf16 %v446_v4, %v446_v4 }
 0x12f   : > { %534 = vst.msk [vmem:[%s1035_s28 + $0x30] sm:$0xf] %vm521_vm2, %v711_v5  ;;  %529 = vst.msk [vmem:[%s1035_s28 + $0x1c] sm:$0xf] %vm521_vm2, %v706_v6  ;;  %v712_v10 = vpack.c.bf16 %v454_v7, %v454_v7 }
 0x130   : > { %537 = vst.msk [vmem:[%s1035_s28 + $0x3c] sm:$0xf] %vm521_vm2, %v714_v8  ;;  %527 = vst.msk [vmem:[%s1035_s28 + $0x14] sm:$0xf] %vm521_vm2, %v704_v9 }
 0x131   : > { %535 = vst.msk [vmem:[%s1035_s28 + $0x34] sm:$0xf] %vm521_vm2, %v712_v10 }
 0x132 PF: > { %s15_s14 = sadd.s32 1, %s885_s14   ;;  %s1101_s12 = smov %s881_s13 }
 0x133   : > { %p12_p6 = scmp.ge.s32.totalorder %s15_s14, 6   ;;  %s1102_s13 = smov %s1104_s16 }
 0x135   :  { %14 = sbr.rel (!%p12_p6) target bundleno = 3 (0x3), region = 73 }
 0x13c   :  { %568 = vsyncpa [#allocation3], 1 }
 0x13d   :  { %570 = vsyncpa [#allocation3 + $0x1], 1 }
 0x13e   :  { %571 = vsyncpa [#allocation5], 1 }

// kernel: jointnet_forward.40
= control target key start
LH: loop header
LB: loop body
LE: loop exit
PB: predicated region body
PF: predicated region fallthrough
CT: control target
= control target key end

     0   :  { %s1806_s12 = smov 0   ;;  %s1808_s13 = smov 0   ;;  %s2116_s0 = inlined_call_operand.vmem [shape: bf16[8,512,36], index: 0, kind: input, shape index: {}]   ;;  %s2117_s1 = inlined_call_operand.vmem [shape: bf16[8,36,4], index: 1, kind: input, shape index: {}]   ;;  %s2118_s2 = inlined_call_operand.vmem [shape: f32[8,1,4], index: 2, kind: input, shape index: {}]   ;;  %s2119_s3 = inlined_call_operand.vmem [shape: bf16[8,512,4], index: 3, kind: output, shape index: {}]  }
   0x1   :  { %s1810_s14 = smov 0  }
   0x2 LB: > { %s25_s15 = sadd.s32 1, %s1780_s13  ;;  %p1383_p0 = scmp.ge.s32.totalorder %s1784_s14, 1  ;;  %s1784_s14 = sphi %s1810_s14, %s13_s14   ;;  %s1780_s13 = sphi %s1808_s13, %s2121_s13   ;;  %s1776_s12 = sphi %s1806_s12, %s2120_s12  }
   0x3   : > { %p27_p1 = scmp.ge.s32.totalorder %s25_s15, 8  ;;  %p176_p2 = scmp.lt.s32.totalorder %s1784_s14, 9 }
   0x5   : > { %s2123_s15 = smov (%p27_p1, %s25_s15), 0  ;;  %p177_p3 = pnand %p1383_p0, %p176_p2 }
   0x6   : > { %p217_p4 = scmp.lt.s32.totalorder (!%p177_p3), %s1776_s12, 7  ;;  %vm496_vm0 = vcmask (!%p177_p3), 293888   ;;  %vm593_vm1 = vcmask (!%p177_p3), 1041408   ;;  %vm1206_vm2 = vcmask (!%p177_p3), 27648  }
   0x7   : > { %180 = sbr.rel (%p177_p3) target bundleno = 309 (0x135), region = 32 }
   0xe   : > { %s2125_s12 = smov (!%p217_p4, %s1776_s12), 7 }
   0xf   : > { %s1523_s16 = sshll.u32 %s2125_s12, 8  ;;  %s1702_s17 = smul.u32 20, %s2125_s12 }
  0x10   : > { %s1833_s20 = scalar_lea.vmem %s2116_s0, %s1523_s16  ;;  %s233_s26 = scalar_lea.vmem %s2118_s2, %s2125_s12 }
  0x11   : > { %s230_s23 = scalar_lea.vmem %s2117_s1, %s1702_s17  ;;  %v1730_v3 = vld [vmem:[%s1833_s20] sm:$0xff]   ;;  %v1732_v6 = vld [vmem:[%s1833_s20 + $0x8] sm:$0xff]   ;;  %v1734_v8 = vld [vmem:[%s1833_s20 + $0x10] sm:$0xff]   ;;  %s1919_s29 = scalar_lea.vmem %s2119_s3, %s1523_s16 }
  0x12   : > { %v1727_v0 = vld [vmem:[%s230_s23] sm:$0xff]   ;;  %v1728_v1 = vld [vmem:[%s230_s23 + $0x8] sm:$0xff]   ;;  %v1729_v2 = vld [vmem:[%s230_s23 + $0x10] ss:$0 sps:$4 sm:$0x33]   ;;  %1630 = vmatprep.mubr.msk.bf16.mxu0 %vm496_vm0, %v1730_v3 }
  0x13   : > { %1624 = vmatprep.subr.bf16.mxu0 %v1727_v0  ;;  %1694 = vmatprep.subr.bf16.mxu1 %v1727_v0  ;;  %v1731_v4 = vld [vmem:[%s1833_s20 + $0x80] sm:$0xff]   ;;  %v595_v5 = vsel %vm593_vm1, %v1729_v2, 0  ;;  %v1733_v7 = vld [vmem:[%s1833_s20 + $0x88] sm:$0xff]   ;;  %v1735_v9 = vld [vmem:[%s1833_s20 + $0x90] sm:$0xff]  }
  0x14   : > { %1625 = vmatpush3.bf16.msra.mxu0 %v1727_v0  ;;  %1697 = vmatpush3.bf16.msra.mxu1 %v1727_v0  ;;  %v1736_v10 = vld [vmem:[%s1833_s20 + $0x18] sm:$0xff]   ;;  %v1738_v12 = vld [vmem:[%s1833_s20 + $0x20] sm:$0xff]   ;;  %v1740_v14 = vld [vmem:[%s1833_s20 + $0x28] sm:$0xff]  }
  0x15   : > { %1626 = vmatprep.subr.bf16.mxu0 %v1728_v1  ;;  %1695 = vmatprep.subr.bf16.mxu1 %v1728_v1  ;;  %v1737_v11 = vld [vmem:[%s1833_s20 + $0x98] sm:$0xff]   ;;  %v1739_v13 = vld [vmem:[%s1833_s20 + $0xa0] sm:$0xff]   ;;  %v1741_v15 = vld [vmem:[%s1833_s20 + $0xa8] sm:$0xff]  }
  0x16   : > { %1662 = vmatprep.mubr.msk.bf16.mxu1 %vm496_vm0, %v1731_v4  ;;  %v1742_v16 = vld [vmem:[%s1833_s20 + $0x30] sm:$0xff]   ;;  %v1744_v18 = vld [vmem:[%s1833_s20 + $0x38] sm:$0xff]   ;;  %v1746_v20 = vld [vmem:[%s1833_s20 + $0x40] sm:$0xff]  }
  0x17   : > { %v1743_v17 = vld [vmem:[%s1833_s20 + $0xb0] sm:$0xff]   ;;  %v1745_v19 = vld [vmem:[%s1833_s20 + $0xb8] sm:$0xff]   ;;  %v1747_v21 = vld [vmem:[%s1833_s20 + $0xc0] sm:$0xff]  }
  0x18   : > { %1627 = vmatpush3.bf16.msra.mxu0 %v1728_v1  ;;  %1698 = vmatpush3.bf16.msra.mxu1 %v1728_v1  ;;  %v1748_v22 = vld [vmem:[%s1833_s20 + $0x48] sm:$0xff]   ;;  %v1750_v24 = vld [vmem:[%s1833_s20 + $0x50] sm:$0xff]   ;;  %v1752_v26 = vld [vmem:[%s1833_s20 + $0x58] sm:$0xff]  }
  0x19   : > { %1700 = vmatprep.subr.msk.bf16.mxu0 %vm593_vm1, %v1729_v2  ;;  %1701 = vmatprep.subr.msk.bf16.mxu1 %vm593_vm1, %v1729_v2  ;;  %v1749_v23 = vld [vmem:[%s1833_s20 + $0xc8] sm:$0xff]   ;;  %v1751_v25 = vld [vmem:[%s1833_s20 + $0xd0] sm:$0xff]   ;;  %v1753_v27 = vld [vmem:[%s1833_s20 + $0xd8] sm:$0xff]  }
  0x1a   : > { %v1754_v28 = vld [vmem:[%s1833_s20 + $0x60] sm:$0xff]   ;;  %v1756_v30 = vld [vmem:[%s1833_s20 + $0x68] sm:$0xff]   ;;  %v1758_v32 = vld [vmem:[%s1833_s20 + $0x70] sm:$0xff]  }
  0x1b   : > { %v1755_v29 = vld [vmem:[%s1833_s20 + $0xe0] sm:$0xff]   ;;  %v1757_v31 = vld [vmem:[%s1833_s20 + $0xe8] sm:$0xff]   ;;  %v1759_v33 = vld [vmem:[%s1833_s20 + $0xf0] sm:$0xff]  }
  0x1c   : > { %1629 = vmatpush3.bf16.msra.mxu0 %v595_v5  ;;  %1699 = vmatpush3.bf16.msra.mxu1 %v595_v5  ;;  %v1760_v34 = vld [vmem:[%s1833_s20 + $0x78] sm:$0xff]   ;;  %v1906_v36 = vld [vmem:[%s233_s26] ss:$0 sm:$0xff] }
  0x1d   : > { %v1761_v35 = vld [vmem:[%s1833_s20 + $0xf8] sm:$0xff]  }
  0x1f   : > { %1631 = vmatmul.mubr.msk.bf16.vlgmr.msra.gmra.mrb[0].mxu0 %vm496_vm0, %v1732_v6  ;;  %1663 = vmatmul.mubr.msk.bf16.vlgmr.msra.gmra.mrb[0].mxu1 %vm496_vm0, %v1733_v7 }
  0x20   : > { %1634 = vmatprep.mubr.msk.bf16.mxu0 %vm496_vm0, %v1734_v8  ;;  %1666 = vmatprep.mubr.msk.bf16.mxu1 %vm496_vm0, %v1735_v9 }
  0x27   : > { %1635 = vmatmul.mubr.msk.bf16.gmra.mrb[4].mxu0 %vm496_vm0, %v1736_v10  ;;  %1667 = vmatmul.mubr.msk.bf16.gmra.mrb[4].mxu1 %vm496_vm0, %v1737_v11 }
  0x28   : > { %1638 = vmatprep.mubr.msk.bf16.mxu0 %vm496_vm0, %v1738_v12  ;;  %1670 = vmatprep.mubr.msk.bf16.mxu1 %vm496_vm0, %v1739_v13 }
  0x2f   : > { %1639 = vmatmul.mubr.msk.bf16.gmra.mrb[8].mxu0 %vm496_vm0, %v1740_v14  ;;  %1671 = vmatmul.mubr.msk.bf16.gmra.mrb[8].mxu1 %vm496_vm0, %v1741_v15 }
  0x30   : > { %1642 = vmatprep.mubr.msk.bf16.mxu0 %vm496_vm0, %v1742_v16  ;;  %1674 = vmatprep.mubr.msk.bf16.mxu1 %vm496_vm0, %v1743_v17 }
  0x37   : > { %1643 = vmatmul.mubr.msk.bf16.gmra.mrb[12].mxu0 %vm496_vm0, %v1744_v18  ;;  %1675 = vmatmul.mubr.msk.bf16.gmra.mrb[12].mxu1 %vm496_vm0, %v1745_v19 }
  0x38   : > { %1646 = vmatprep.mubr.msk.bf16.mxu0 %vm496_vm0, %v1746_v20  ;;  %1678 = vmatprep.mubr.msk.bf16.mxu1 %vm496_vm0, %v1747_v21 }
  0x3f   : > { %1647 = vmatmul.mubr.msk.bf16.gmra.mrb[16].mxu0 %vm496_vm0, %v1748_v22  ;;  %1679 = vmatmul.mubr.msk.bf16.gmra.mrb[16].mxu1 %vm496_vm0, %v1749_v23 }
  0x40   : > { %1650 = vmatprep.mubr.msk.bf16.mxu0 %vm496_vm0, %v1750_v24  ;;  %1682 = vmatprep.mubr.msk.bf16.mxu1 %vm496_vm0, %v1751_v25 }
  0x47   : > { %1651 = vmatmul.mubr.msk.bf16.gmra.mrb[20].mxu0 %vm496_vm0, %v1752_v26  ;;  %1683 = vmatmul.mubr.msk.bf16.gmra.mrb[20].mxu1 %vm496_vm0, %v1753_v27 }
  0x48   : > { %1654 = vmatprep.mubr.msk.bf16.mxu0 %vm496_vm0, %v1754_v28  ;;  %1686 = vmatprep.mubr.msk.bf16.mxu1 %vm496_vm0, %v1755_v29 }
  0x4f   : > { %1655 = vmatmul.mubr.msk.bf16.gmra.mrb[24].mxu0 %vm496_vm0, %v1756_v30  ;;  %1687 = vmatmul.mubr.msk.bf16.gmra.mrb[24].mxu1 %vm496_vm0, %v1757_v31 }
  0x50   : > { %1658 = vmatprep.mubr.msk.bf16.mxu0 %vm496_vm0, %v1758_v32  ;;  %1690 = vmatprep.mubr.msk.bf16.mxu1 %vm496_vm0, %v1759_v33 }
  0x57   : > { %1659 = vmatmul.mubr.msk.bf16.gmra.mrb[28].mxu0 %vm496_vm0, %v1760_v34  ;;  %1691 = vmatmul.mubr.msk.bf16.gmra.mrb[28].mxu1 %vm496_vm0, %v1761_v35 }
  0xf2   : > { %v1632_v37 = vpop.f32.mrb[0].mxu0  ;;  %v1664_v38 = vpop.f32.mrb[0].mxu1 }
  0xf3   : > { %v640_v39 = vadd.f32 %v1632_v37, %v1906_v36  ;;  %v768_v40 = vadd.f32 %v1664_v38, %v1906_v36  ;;  %v631_v41 = vpop.f32.mrb[1].mxu0  ;;  %v759_v42 = vpop.f32.mrb[1].mxu1 }
  0xf4   : > { %v632_v43 = vadd.f32 %v1906_v36, %v631_v41  ;;  %v760_v44 = vadd.f32 %v1906_v36, %v759_v42  ;;  %v1633_v45 = vpop.f32.mrb[2].mxu0  ;;  %v1665_v46 = vpop.f32.mrb[2].mxu1 }
  0xf5   : > { %v888_v47 = vmax.f32 %v640_v39, 0.0  ;;  %v920_v48 = vmax.f32 %v768_v40, 0.0  ;;  %v643_v49 = vadd.f32 %v1633_v45, %v1906_v36  ;;  %v771_v50 = vadd.f32 %v1665_v46, %v1906_v36  ;;  %v634_v51 = vpop.f32.mrb[3].mxu0  ;;  %v762_v52 = vpop.f32.mrb[3].mxu1 }
  0xf6   : > { %v886_v53 = vmax.f32 %v632_v43, 0.0  ;;  %v918_v54 = vmax.f32 %v760_v44, 0.0  ;;  %v635_v55 = vadd.f32 %v1906_v36, %v634_v51  ;;  %v763_v56 = vadd.f32 %v1906_v36, %v762_v52 }
  0xf7   : > { %v1527_v57 = vpack.c.bf16 %v888_v47, %v888_v47  ;;  %v1559_v58 = vpack.c.bf16 %v920_v48, %v920_v48  ;;  %v889_v59 = vmax.f32 %v643_v49, 0.0  ;;  %v921_v60 = vmax.f32 %v771_v50, 0.0 }
  0xf8   : > { %v1525_v61 = vpack.c.bf16 %v886_v53, %v886_v53  ;;  %v1557_v62 = vpack.c.bf16 %v918_v54, %v918_v54  ;;  %v887_v63 = vmax.f32 %v635_v55, 0.0  ;;  %v919_v0 = vmax.f32 %v763_v56, 0.0 }
  0xf9   : > { %1209 = vst.msk [vmem:[%s1919_s29 + $0x8] sm:$0xf] %vm1206_vm2, %v1527_v57  ;;  %1241 = vst.msk [vmem:[%s1919_s29 + $0x88] sm:$0xf] %vm1206_vm2, %v1559_v58  ;;  %v1528_v1 = vpack.c.bf16 %v889_v59, %v889_v59  ;;  %v1560_v2 = vpack.c.bf16 %v921_v60, %v921_v60 }
  0xfa   : > { %1207 = vst.msk [vmem:[%s1919_s29] sm:$0xf] %vm1206_vm2, %v1525_v61  ;;  %1239 = vst.msk [vmem:[%s1919_s29 + $0x80] sm:$0xf] %vm1206_vm2, %v1557_v62  ;;  %v1526_v3 = vpack.c.bf16 %v887_v63, %v887_v63  ;;  %v1558_v4 = vpack.c.bf16 %v919_v0, %v919_v0  ;;  %v1636_v5 = vpop.f32.mrb[4].mxu0  ;;  %v1668_v6 = vpop.f32.mrb[4].mxu1 }
  0xfb   : > { %1210 = vst.msk [vmem:[%s1919_s29 + $0xc] sm:$0xf] %vm1206_vm2, %v1528_v1  ;;  %1242 = vst.msk [vmem:[%s1919_s29 + $0x8c] sm:$0xf] %vm1206_vm2, %v1560_v2  ;;  %v656_v7 = vadd.f32 %v1636_v5, %v1906_v36  ;;  %v784_v8 = vadd.f32 %v1668_v6, %v1906_v36  ;;  %v647_v9 = vpop.f32.mrb[5].mxu0  ;;  %v775_v10 = vpop.f32.mrb[5].mxu1 }
  0xfc   : > { %1208 = vst.msk [vmem:[%s1919_s29 + $0x4] sm:$0xf] %vm1206_vm2, %v1526_v3  ;;  %1240 = vst.msk [vmem:[%s1919_s29 + $0x84] sm:$0xf] %vm1206_vm2, %v1558_v4  ;;  %v648_v11 = vadd.f32 %v1906_v36, %v647_v9  ;;  %v776_v12 = vadd.f32 %v1906_v36, %v775_v10  ;;  %v1637_v13 = vpop.f32.mrb[6].mxu0  ;;  %v1669_v14 = vpop.f32.mrb[6].mxu1 }
  0xfd   : > { %v892_v15 = vmax.f32 %v656_v7, 0.0  ;;  %v924_v16 = vmax.f32 %v784_v8, 0.0  ;;  %v659_v17 = vadd.f32 %v1637_v13, %v1906_v36  ;;  %v787_v18 = vadd.f32 %v1669_v14, %v1906_v36  ;;  %v650_v19 = vpop.f32.mrb[7].mxu0  ;;  %v778_v20 = vpop.f32.mrb[7].mxu1 }
  0xfe   : > { %v890_v21 = vmax.f32 %v648_v11, 0.0  ;;  %v922_v22 = vmax.f32 %v776_v12, 0.0  ;;  %v651_v23 = vadd.f32 %v1906_v36, %v650_v19  ;;  %v779_v24 = vadd.f32 %v1906_v36, %v778_v20 }
  0xff   : > { %v1531_v25 = vpack.c.bf16 %v892_v15, %v892_v15  ;;  %v1563_v26 = vpack.c.bf16 %v924_v16, %v924_v16  ;;  %v893_v27 = vmax.f32 %v659_v17, 0.0  ;;  %v925_v28 = vmax.f32 %v787_v18, 0.0 }
 0x100   : > { %v1529_v29 = vpack.c.bf16 %v890_v21, %v890_v21  ;;  %v1561_v30 = vpack.c.bf16 %v922_v22, %v922_v22  ;;  %v891_v31 = vmax.f32 %v651_v23, 0.0  ;;  %v923_v32 = vmax.f32 %v779_v24, 0.0 }
 0x101   : > { %1213 = vst.msk [vmem:[%s1919_s29 + $0x18] sm:$0xf] %vm1206_vm2, %v1531_v25  ;;  %1245 = vst.msk [vmem:[%s1919_s29 + $0x98] sm:$0xf] %vm1206_vm2, %v1563_v26  ;;  %v1532_v33 = vpack.c.bf16 %v893_v27, %v893_v27  ;;  %v1564_v34 = vpack.c.bf16 %v925_v28, %v925_v28 }
 0x102   : > { %1211 = vst.msk [vmem:[%s1919_s29 + $0x10] sm:$0xf] %vm1206_vm2, %v1529_v29  ;;  %1243 = vst.msk [vmem:[%s1919_s29 + $0x90] sm:$0xf] %vm1206_vm2, %v1561_v30  ;;  %v1530_v35 = vpack.c.bf16 %v891_v31, %v891_v31  ;;  %v1562_v37 = vpack.c.bf16 %v923_v32, %v923_v32  ;;  %v1640_v38 = vpop.f32.mrb[8].mxu0  ;;  %v1672_v39 = vpop.f32.mrb[8].mxu1 }
 0x103   : > { %1214 = vst.msk [vmem:[%s1919_s29 + $0x1c] sm:$0xf] %vm1206_vm2, %v1532_v33  ;;  %1246 = vst.msk [vmem:[%s1919_s29 + $0x9c] sm:$0xf] %vm1206_vm2, %v1564_v34  ;;  %v672_v40 = vadd.f32 %v1640_v38, %v1906_v36  ;;  %v800_v41 = vadd.f32 %v1672_v39, %v1906_v36  ;;  %v663_v42 = vpop.f32.mrb[9].mxu0  ;;  %v791_v43 = vpop.f32.mrb[9].mxu1 }
 0x104   : > { %1212 = vst.msk [vmem:[%s1919_s29 + $0x14] sm:$0xf] %vm1206_vm2, %v1530_v35  ;;  %1244 = vst.msk [vmem:[%s1919_s29 + $0x94] sm:$0xf] %vm1206_vm2, %v1562_v37  ;;  %v664_v44 = vadd.f32 %v1906_v36, %v663_v42  ;;  %v792_v45 = vadd.f32 %v1906_v36, %v791_v43  ;;  %v1641_v46 = vpop.f32.mrb[10].mxu0  ;;  %v1673_v47 = vpop.f32.mrb[10].mxu1 }
 0x105   : > { %v896_v48 = vmax.f32 %v672_v40, 0.0  ;;  %v928_v49 = vmax.f32 %v800_v41, 0.0  ;;  %v675_v50 = vadd.f32 %v1641_v46, %v1906_v36  ;;  %v803_v51 = vadd.f32 %v1673_v47, %v1906_v36  ;;  %v666_v52 = vpop.f32.mrb[11].mxu0  ;;  %v794_v53 = vpop.f32.mrb[11].mxu1 }
 0x106   : > { %v894_v54 = vmax.f32 %v664_v44, 0.0  ;;  %v926_v55 = vmax.f32 %v792_v45, 0.0  ;;  %v667_v56 = vadd.f32 %v1906_v36, %v666_v52  ;;  %v795_v57 = vadd.f32 %v1906_v36, %v794_v53 }
 0x107   : > { %v1535_v58 = vpack.c.bf16 %v896_v48, %v896_v48  ;;  %v1567_v59 = vpack.c.bf16 %v928_v49, %v928_v49  ;;  %v897_v60 = vmax.f32 %v675_v50, 0.0  ;;  %v929_v61 = vmax.f32 %v803_v51, 0.0 }
 0x108   : > { %v1533_v62 = vpack.c.bf16 %v894_v54, %v894_v54  ;;  %v1565_v63 = vpack.c.bf16 %v926_v55, %v926_v55  ;;  %v895_v0 = vmax.f32 %v667_v56, 0.0  ;;  %v927_v1 = vmax.f32 %v795_v57, 0.0 }
 0x109   : > { %1217 = vst.msk [vmem:[%s1919_s29 + $0x28] sm:$0xf] %vm1206_vm2, %v1535_v58  ;;  %1249 = vst.msk [vmem:[%s1919_s29 + $0xa8] sm:$0xf] %vm1206_vm2, %v1567_v59  ;;  %v1536_v2 = vpack.c.bf16 %v897_v60, %v897_v60  ;;  %v1568_v3 = vpack.c.bf16 %v929_v61, %v929_v61 }
 0x10a   : > { %1215 = vst.msk [vmem:[%s1919_s29 + $0x20] sm:$0xf] %vm1206_vm2, %v1533_v62  ;;  %1247 = vst.msk [vmem:[%s1919_s29 + $0xa0] sm:$0xf] %vm1206_vm2, %v1565_v63  ;;  %v1534_v4 = vpack.c.bf16 %v895_v0, %v895_v0  ;;  %v1566_v5 = vpack.c.bf16 %v927_v1, %v927_v1  ;;  %v1644_v6 = vpop.f32.mrb[12].mxu0  ;;  %v1676_v7 = vpop.f32.mrb[12].mxu1 }
 0x10b   : > { %1218 = vst.msk [vmem:[%s1919_s29 + $0x2c] sm:$0xf] %vm1206_vm2, %v1536_v2  ;;  %1250 = vst.msk [vmem:[%s1919_s29 + $0xac] sm:$0xf] %vm1206_vm2, %v1568_v3  ;;  %v688_v8 = vadd.f32 %v1644_v6, %v1906_v36  ;;  %v816_v9 = vadd.f32 %v1676_v7, %v1906_v36  ;;  %v679_v10 = vpop.f32.mrb[13].mxu0  ;;  %v807_v11 = vpop.f32.mrb[13].mxu1 }
 0x10c   : > { %1216 = vst.msk [vmem:[%s1919_s29 + $0x24] sm:$0xf] %vm1206_vm2, %v1534_v4  ;;  %1248 = vst.msk [vmem:[%s1919_s29 + $0xa4] sm:$0xf] %vm1206_vm2, %v1566_v5  ;;  %v680_v12 = vadd.f32 %v1906_v36, %v679_v10  ;;  %v808_v13 = vadd.f32 %v1906_v36, %v807_v11  ;;  %v1645_v14 = vpop.f32.mrb[14].mxu0  ;;  %v1677_v15 = vpop.f32.mrb[14].mxu1 }
 0x10d   : > { %v900_v16 = vmax.f32 %v688_v8, 0.0  ;;  %v932_v17 = vmax.f32 %v816_v9, 0.0  ;;  %v691_v18 = vadd.f32 %v1645_v14, %v1906_v36  ;;  %v819_v19 = vadd.f32 %v1677_v15, %v1906_v36  ;;  %v682_v20 = vpop.f32.mrb[15].mxu0  ;;  %v810_v21 = vpop.f32.mrb[15].mxu1 }
 0x10e   : > { %v898_v22 = vmax.f32 %v680_v12, 0.0  ;;  %v930_v23 = vmax.f32 %v808_v13, 0.0  ;;  %v683_v24 = vadd.f32 %v1906_v36, %v682_v20  ;;  %v811_v25 = vadd.f32 %v1906_v36, %v810_v21 }
 0x10f   : > { %v1539_v26 = vpack.c.bf16 %v900_v16, %v900_v16  ;;  %v1571_v27 = vpack.c.bf16 %v932_v17, %v932_v17  ;;  %v901_v28 = vmax.f32 %v691_v18, 0.0  ;;  %v933_v29 = vmax.f32 %v819_v19, 0.0 }
 0x110   : > { %v1537_v30 = vpack.c.bf16 %v898_v22, %v898_v22  ;;  %v1569_v31 = vpack.c.bf16 %v930_v23, %v930_v23  ;;  %v899_v32 = vmax.f32 %v683_v24, 0.0  ;;  %v931_v33 = vmax.f32 %v811_v25, 0.0 }
 0x111   : > { %1221 = vst.msk [vmem:[%s1919_s29 + $0x38] sm:$0xf] %vm1206_vm2, %v1539_v26  ;;  %1253 = vst.msk [vmem:[%s1919_s29 + $0xb8] sm:$0xf] %vm1206_vm2, %v1571_v27  ;;  %v1540_v34 = vpack.c.bf16 %v901_v28, %v901_v28  ;;  %v1572_v35 = vpack.c.bf16 %v933_v29, %v933_v29 }
 0x112   : > { %1219 = vst.msk [vmem:[%s1919_s29 + $0x30] sm:$0xf] %vm1206_vm2, %v1537_v30  ;;  %1251 = vst.msk [vmem:[%s1919_s29 + $0xb0] sm:$0xf] %vm1206_vm2, %v1569_v31  ;;  %v1538_v37 = vpack.c.bf16 %v899_v32, %v899_v32  ;;  %v1570_v38 = vpack.c.bf16 %v931_v33, %v931_v33  ;;  %v1648_v39 = vpop.f32.mrb[16].mxu0  ;;  %v1680_v40 = vpop.f32.mrb[16].mxu1 }
 0x113   : > { %1222 = vst.msk [vmem:[%s1919_s29 + $0x3c] sm:$0xf] %vm1206_vm2, %v1540_v34  ;;  %1254 = vst.msk [vmem:[%s1919_s29 + $0xbc] sm:$0xf] %vm1206_vm2, %v1572_v35  ;;  %v704_v41 = vadd.f32 %v1648_v39, %v1906_v36  ;;  %v832_v42 = vadd.f32 %v1680_v40, %v1906_v36  ;;  %v695_v43 = vpop.f32.mrb[17].mxu0  ;;  %v823_v44 = vpop.f32.mrb[17].mxu1 }
 0x114   : > { %1220 = vst.msk [vmem:[%s1919_s29 + $0x34] sm:$0xf] %vm1206_vm2, %v1538_v37  ;;  %1252 = vst.msk [vmem:[%s1919_s29 + $0xb4] sm:$0xf] %vm1206_vm2, %v1570_v38  ;;  %v696_v45 = vadd.f32 %v1906_v36, %v695_v43  ;;  %v824_v46 = vadd.f32 %v1906_v36, %v823_v44  ;;  %v1649_v47 = vpop.f32.mrb[18].mxu0  ;;  %v1681_v48 = vpop.f32.mrb[18].mxu1 }
 0x115   : > { %v904_v49 = vmax.f32 %v704_v41, 0.0  ;;  %v936_v50 = vmax.f32 %v832_v42, 0.0  ;;  %v707_v51 = vadd.f32 %v1649_v47, %v1906_v36  ;;  %v835_v52 = vadd.f32 %v1681_v48, %v1906_v36  ;;  %v698_v53 = vpop.f32.mrb[19].mxu0  ;;  %v826_v54 = vpop.f32.mrb[19].mxu1 }
 0x116   : > { %v902_v55 = vmax.f32 %v696_v45, 0.0  ;;  %v934_v56 = vmax.f32 %v824_v46, 0.0  ;;  %v699_v57 = vadd.f32 %v1906_v36, %v698_v53  ;;  %v827_v58 = vadd.f32 %v1906_v36, %v826_v54 }
 0x117   : > { %v1543_v59 = vpack.c.bf16 %v904_v49, %v904_v49  ;;  %v1575_v60 = vpack.c.bf16 %v936_v50, %v936_v50  ;;  %v905_v61 = vmax.f32 %v707_v51, 0.0  ;;  %v937_v62 = vmax.f32 %v835_v52, 0.0 }
 0x118   : > { %v1541_v63 = vpack.c.bf16 %v902_v55, %v902_v55  ;;  %v1573_v0 = vpack.c.bf16 %v934_v56, %v934_v56  ;;  %v903_v1 = vmax.f32 %v699_v57, 0.0  ;;  %v935_v2 = vmax.f32 %v827_v58, 0.0 }
 0x119   : > { %1225 = vst.msk [vmem:[%s1919_s29 + $0x48] sm:$0xf] %vm1206_vm2, %v1543_v59  ;;  %1257 = vst.msk [vmem:[%s1919_s29 + $0xc8] sm:$0xf] %vm1206_vm2, %v1575_v60  ;;  %v1544_v3 = vpack.c.bf16 %v905_v61, %v905_v61  ;;  %v1576_v4 = vpack.c.bf16 %v937_v62, %v937_v62 }
 0x11a   : > { %1223 = vst.msk [vmem:[%s1919_s29 + $0x40] sm:$0xf] %vm1206_vm2, %v1541_v63  ;;  %1255 = vst.msk [vmem:[%s1919_s29 + $0xc0] sm:$0xf] %vm1206_vm2, %v1573_v0  ;;  %v1542_v5 = vpack.c.bf16 %v903_v1, %v903_v1  ;;  %v1574_v6 = vpack.c.bf16 %v935_v2, %v935_v2  ;;  %v1652_v7 = vpop.f32.mrb[20].mxu0  ;;  %v1684_v8 = vpop.f32.mrb[20].mxu1 }
 0x11b   : > { %1226 = vst.msk [vmem:[%s1919_s29 + $0x4c] sm:$0xf] %vm1206_vm2, %v1544_v3  ;;  %1258 = vst.msk [vmem:[%s1919_s29 + $0xcc] sm:$0xf] %vm1206_vm2, %v1576_v4  ;;  %v720_v9 = vadd.f32 %v1652_v7, %v1906_v36  ;;  %v848_v10 = vadd.f32 %v1684_v8, %v1906_v36  ;;  %v711_v11 = vpop.f32.mrb[21].mxu0  ;;  %v839_v12 = vpop.f32.mrb[21].mxu1 }
 0x11c   : > { %1224 = vst.msk [vmem:[%s1919_s29 + $0x44] sm:$0xf] %vm1206_vm2, %v1542_v5  ;;  %1256 = vst.msk [vmem:[%s1919_s29 + $0xc4] sm:$0xf] %vm1206_vm2, %v1574_v6  ;;  %v712_v13 = vadd.f32 %v1906_v36, %v711_v11  ;;  %v840_v14 = vadd.f32 %v1906_v36, %v839_v12  ;;  %v1653_v15 = vpop.f32.mrb[22].mxu0  ;;  %v1685_v16 = vpop.f32.mrb[22].mxu1 }
 0x11d   : > { %v908_v17 = vmax.f32 %v720_v9, 0.0  ;;  %v940_v18 = vmax.f32 %v848_v10, 0.0  ;;  %v723_v19 = vadd.f32 %v1653_v15, %v1906_v36  ;;  %v851_v20 = vadd.f32 %v1685_v16, %v1906_v36  ;;  %v714_v21 = vpop.f32.mrb[23].mxu0  ;;  %v842_v22 = vpop.f32.mrb[23].mxu1 }
 0x11e   : > { %v906_v23 = vmax.f32 %v712_v13, 0.0  ;;  %v938_v24 = vmax.f32 %v840_v14, 0.0  ;;  %v715_v25 = vadd.f32 %v1906_v36, %v714_v21  ;;  %v843_v26 = vadd.f32 %v1906_v36, %v842_v22 }
 0x11f   : > { %v1547_v27 = vpack.c.bf16 %v908_v17, %v908_v17  ;;  %v1579_v28 = vpack.c.bf16 %v940_v18, %v940_v18  ;;  %v909_v29 = vmax.f32 %v723_v19, 0.0  ;;  %v941_v30 = vmax.f32 %v851_v20, 0.0 }
 0x120   : > { %v1545_v31 = vpack.c.bf16 %v906_v23, %v906_v23  ;;  %v1577_v32 = vpack.c.bf16 %v938_v24, %v938_v24  ;;  %v907_v33 = vmax.f32 %v715_v25, 0.0  ;;  %v939_v34 = vmax.f32 %v843_v26, 0.0 }
 0x121   : > { %1229 = vst.msk [vmem:[%s1919_s29 + $0x58] sm:$0xf] %vm1206_vm2, %v1547_v27  ;;  %1261 = vst.msk [vmem:[%s1919_s29 + $0xd8] sm:$0xf] %vm1206_vm2, %v1579_v28  ;;  %v1548_v35 = vpack.c.bf16 %v909_v29, %v909_v29  ;;  %v1580_v37 = vpack.c.bf16 %v941_v30, %v941_v30 }
 0x122   : > { %1227 = vst.msk [vmem:[%s1919_s29 + $0x50] sm:$0xf] %vm1206_vm2, %v1545_v31  ;;  %1259 = vst.msk [vmem:[%s1919_s29 + $0xd0] sm:$0xf] %vm1206_vm2, %v1577_v32  ;;  %v1546_v38 = vpack.c.bf16 %v907_v33, %v907_v33  ;;  %v1578_v39 = vpack.c.bf16 %v939_v34, %v939_v34  ;;  %v1656_v40 = vpop.f32.mrb[24].mxu0  ;;  %v1688_v41 = vpop.f32.mrb[24].mxu1 }
 0x123   : > { %1230 = vst.msk [vmem:[%s1919_s29 + $0x5c] sm:$0xf] %vm1206_vm2, %v1548_v35  ;;  %1262 = vst.msk [vmem:[%s1919_s29 + $0xdc] sm:$0xf] %vm1206_vm2, %v1580_v37  ;;  %v736_v42 = vadd.f32 %v1656_v40, %v1906_v36  ;;  %v864_v43 = vadd.f32 %v1688_v41, %v1906_v36  ;;  %v727_v44 = vpop.f32.mrb[25].mxu0  ;;  %v855_v45 = vpop.f32.mrb[25].mxu1 }
 0x124   : > { %1228 = vst.msk [vmem:[%s1919_s29 + $0x54] sm:$0xf] %vm1206_vm2, %v1546_v38  ;;  %1260 = vst.msk [vmem:[%s1919_s29 + $0xd4] sm:$0xf] %vm1206_vm2, %v1578_v39  ;;  %v728_v46 = vadd.f32 %v1906_v36, %v727_v44  ;;  %v856_v47 = vadd.f32 %v1906_v36, %v855_v45  ;;  %v1657_v48 = vpop.f32.mrb[26].mxu0  ;;  %v1689_v49 = vpop.f32.mrb[26].mxu1 }
 0x125   : > { %v912_v50 = vmax.f32 %v736_v42, 0.0  ;;  %v944_v51 = vmax.f32 %v864_v43, 0.0  ;;  %v739_v52 = vadd.f32 %v1657_v48, %v1906_v36  ;;  %v867_v53 = vadd.f32 %v1689_v49, %v1906_v36  ;;  %v730_v54 = vpop.f32.mrb[27].mxu0  ;;  %v858_v55 = vpop.f32.mrb[27].mxu1 }
 0x126   : > { %v910_v56 = vmax.f32 %v728_v46, 0.0  ;;  %v942_v57 = vmax.f32 %v856_v47, 0.0  ;;  %v731_v58 = vadd.f32 %v1906_v36, %v730_v54  ;;  %v859_v59 = vadd.f32 %v1906_v36, %v858_v55 }
 0x127   : > { %v1551_v60 = vpack.c.bf16 %v912_v50, %v912_v50  ;;  %v1583_v61 = vpack.c.bf16 %v944_v51, %v944_v51  ;;  %v913_v62 = vmax.f32 %v739_v52, 0.0  ;;  %v945_v63 = vmax.f32 %v867_v53, 0.0 }
 0x128   : > { %v1549_v0 = vpack.c.bf16 %v910_v56, %v910_v56  ;;  %v1581_v1 = vpack.c.bf16 %v942_v57, %v942_v57  ;;  %v911_v2 = vmax.f32 %v731_v58, 0.0  ;;  %v943_v3 = vmax.f32 %v859_v59, 0.0 }
 0x129   : > { %1233 = vst.msk [vmem:[%s1919_s29 + $0x68] sm:$0xf] %vm1206_vm2, %v1551_v60  ;;  %1265 = vst.msk [vmem:[%s1919_s29 + $0xe8] sm:$0xf] %vm1206_vm2, %v1583_v61  ;;  %v1552_v4 = vpack.c.bf16 %v913_v62, %v913_v62  ;;  %v1584_v5 = vpack.c.bf16 %v945_v63, %v945_v63 }
 0x12a   : > { %1231 = vst.msk [vmem:[%s1919_s29 + $0x60] sm:$0xf] %vm1206_vm2, %v1549_v0  ;;  %1263 = vst.msk [vmem:[%s1919_s29 + $0xe0] sm:$0xf] %vm1206_vm2, %v1581_v1  ;;  %v1550_v6 = vpack.c.bf16 %v911_v2, %v911_v2  ;;  %v1582_v7 = vpack.c.bf16 %v943_v3, %v943_v3  ;;  %v1660_v8 = vpop.f32.mrb[28].mxu0  ;;  %v1692_v9 = vpop.f32.mrb[28].mxu1 }
 0x12b   : > { %1234 = vst.msk [vmem:[%s1919_s29 + $0x6c] sm:$0xf] %vm1206_vm2, %v1552_v4  ;;  %1266 = vst.msk [vmem:[%s1919_s29 + $0xec] sm:$0xf] %vm1206_vm2, %v1584_v5  ;;  %v752_v10 = vadd.f32 %v1660_v8, %v1906_v36  ;;  %v880_v11 = vadd.f32 %v1692_v9, %v1906_v36  ;;  %v743_v12 = vpop.f32.mrb[29].mxu0  ;;  %v871_v13 = vpop.f32.mrb[29].mxu1 }
 0x12c   : > { %1232 = vst.msk [vmem:[%s1919_s29 + $0x64] sm:$0xf] %vm1206_vm2, %v1550_v6  ;;  %1264 = vst.msk [vmem:[%s1919_s29 + $0xe4] sm:$0xf] %vm1206_vm2, %v1582_v7  ;;  %v744_v14 = vadd.f32 %v1906_v36, %v743_v12  ;;  %v872_v15 = vadd.f32 %v1906_v36, %v871_v13  ;;  %v1661_v16 = vpop.f32.mrb[30].mxu0  ;;  %v1693_v17 = vpop.f32.mrb[30].mxu1 }
 0x12d   : > { %v916_v18 = vmax.f32 %v752_v10, 0.0  ;;  %v948_v19 = vmax.f32 %v880_v11, 0.0  ;;  %v755_v20 = vadd.f32 %v1661_v16, %v1906_v36  ;;  %v883_v21 = vadd.f32 %v1693_v17, %v1906_v36  ;;  %v746_v22 = vpop.f32.mrb[31].mxu0  ;;  %v874_v23 = vpop.f32.mrb[31].mxu1 }
 0x12e   : > { %v914_v24 = vmax.f32 %v744_v14, 0.0  ;;  %v946_v25 = vmax.f32 %v872_v15, 0.0  ;;  %v747_v26 = vadd.f32 %v1906_v36, %v746_v22  ;;  %v875_v27 = vadd.f32 %v1906_v36, %v874_v23 }
 0x12f   : > { %v1555_v28 = vpack.c.bf16 %v916_v18, %v916_v18  ;;  %v1587_v29 = vpack.c.bf16 %v948_v19, %v948_v19  ;;  %v917_v30 = vmax.f32 %v755_v20, 0.0  ;;  %v949_v31 = vmax.f32 %v883_v21, 0.0 }
 0x130   : > { %v1553_v32 = vpack.c.bf16 %v914_v24, %v914_v24  ;;  %v1585_v33 = vpack.c.bf16 %v946_v25, %v946_v25  ;;  %v915_v34 = vmax.f32 %v747_v26, 0.0  ;;  %v947_v35 = vmax.f32 %v875_v27, 0.0 }
 0x131   : > { %1237 = vst.msk [vmem:[%s1919_s29 + $0x78] sm:$0xf] %vm1206_vm2, %v1555_v28  ;;  %1269 = vst.msk [vmem:[%s1919_s29 + $0xf8] sm:$0xf] %vm1206_vm2, %v1587_v29  ;;  %v1556_v37 = vpack.c.bf16 %v917_v30, %v917_v30  ;;  %v1588_v38 = vpack.c.bf16 %v949_v31, %v949_v31 }
 0x132   : > { %1235 = vst.msk [vmem:[%s1919_s29 + $0x70] sm:$0xf] %vm1206_vm2, %v1553_v32  ;;  %1267 = vst.msk [vmem:[%s1919_s29 + $0xf0] sm:$0xf] %vm1206_vm2, %v1585_v33  ;;  %v1554_v36 = vpack.c.bf16 %v915_v34, %v915_v34  ;;  %v1586_v39 = vpack.c.bf16 %v947_v35, %v947_v35 }
 0x133   : > { %1238 = vst.msk [vmem:[%s1919_s29 + $0x7c] sm:$0xf] %vm1206_vm2, %v1556_v37  ;;  %1270 = vst.msk [vmem:[%s1919_s29 + $0xfc] sm:$0xf] %vm1206_vm2, %v1588_v38 }
 0x134   : > { %1236 = vst.msk [vmem:[%s1919_s29 + $0x74] sm:$0xf] %vm1206_vm2, %v1554_v36  ;;  %1268 = vst.msk [vmem:[%s1919_s29 + $0xf4] sm:$0xf] %vm1206_vm2, %v1586_v39 }
 0x135 PF: > { %s13_s14 = sadd.s32 1, %s1784_s14   ;;  %s2120_s12 = smov %s1780_s13 }
 0x136   : > { %p10_p5 = scmp.ge.s32.totalorder %s13_s14, 10   ;;  %s2121_s13 = smov %s2123_s15 }
 0x138   :  { %12 = sbr.rel (!%p10_p5) target bundleno = 2 (0x2), region = 68 }

// kernel: jointnet_forward.41
= control target key start
LH: loop header
LB: loop body
LE: loop exit
PB: predicated region body
PF: predicated region fallthrough
CT: control target
= control target key end

     0   :  { %s850_s12 = smov 0   ;;  %s852_s13 = smov 0   ;;  %s944_s0 = inlined_call_operand.vmem [shape: bf16[1,512,36], index: 0, kind: input, shape index: {}]   ;;  %s945_s1 = inlined_call_operand.vmem [shape: bf16[1,36,32], index: 1, kind: input, shape index: {}]   ;;  %s946_s2 = inlined_call_operand.vmem [shape: f32[1,1,32], index: 2, kind: input, shape index: {}]   ;;  %s947_s3 = inlined_call_operand.vmem [shape: bf16[1,512,32], index: 3, kind: output, shape index: {}]  }
   0x1   :  { %s854_s14 = smov 0  }
   0x2 LB: > { %s22_s15 = sadd.s32 1, %s824_s13  ;;  %p671_p0 = scmp.ge.s32.totalorder %s828_s14, 1  ;;  %s828_s14 = sphi %s854_s14, %s13_s14   ;;  %s824_s13 = sphi %s852_s13, %s949_s13   ;;  %s820_s12 = sphi %s850_s12, %s948_s12  }
   0x3   : > { %p23_p1 = scmp.ge.s32.totalorder %s22_s15, 4  ;;  %p176_p2 = scmp.lt.s32.totalorder %s828_s14, 5 }
   0x5   : > { %s951_s15 = smov (%p23_p1, %s22_s15), 0  ;;  %p177_p3 = pnand %p671_p0, %p176_p2 }
   0x6   : > { %v795_v0 = vld [vmem:[%s945_s1] sm:$0xff] (!%p177_p3)   ;;  %v796_v1 = vld [vmem:[%s945_s1 + $0x8] sm:$0xff] (!%p177_p3)   ;;  %s672_s20 = sshll.u32 (!%p177_p3), %s820_s12, 4  ;;  %v797_v2 = vld [vmem:[%s945_s1 + $0x10] ss:$0 sps:$4 sm:$0x33] (!%p177_p3)  }
   0x7   : > { %180 = sbr.rel (%p177_p3) target bundleno = 250 (0xfa), region = 32  ;;  %741 = vmatprep.subr.bf16.mxu0 (!%p177_p3), %v795_v0  ;;  %763 = vmatprep.subr.bf16.mxu1 (!%p177_p3), %v795_v0  ;;  %p219_p4 = scmp.lt.s32.totalorder (!%p177_p3), %s672_s20, 63  ;;  %vm353_vm0 = vcmask (!%p177_p3), 1041408   ;;  %vm328_vm1 = vcmask (!%p177_p3), 293888   ;;  %v676_v12 = vld [vmem:[%s946_s2] ss:$0 sm:$0xff] (!%p177_p3) }
   0x8   : > { %742 = vmatpush3.bf16.msra.mxu0 (!%p177_p3), %v795_v0  ;;  %766 = vmatpush3.bf16.msra.mxu1 (!%p177_p3), %v795_v0  ;;  %v355_v3 = vsel (!%p177_p3), %vm353_vm0, %v797_v2, 0  ;;  %vm534_vm2 = vcmask (!%p177_p3), 257024  }
   0x9   : > { %743 = vmatprep.subr.bf16.mxu0 (!%p177_p3), %v796_v1  ;;  %764 = vmatprep.subr.bf16.mxu1 (!%p177_p3), %v796_v1 }
   0xc   : > { %744 = vmatpush3.bf16.msra.mxu0 (!%p177_p3), %v796_v1  ;;  %767 = vmatpush3.bf16.msra.mxu1 (!%p177_p3), %v796_v1 }
   0xd   : > { %769 = vmatprep.subr.msk.bf16.mxu0 (!%p177_p3), %vm353_vm0, %v797_v2  ;;  %770 = vmatprep.subr.msk.bf16.mxu1 (!%p177_p3), %vm353_vm0, %v797_v2 }
   0xe   : > { %s953_s20 = smov (!%p219_p4, %s672_s20), 63 }
   0xf   : > { %s673_s23 = sshll.u32 %s953_s20, 2 }
  0x10   : > { %s224_s26 = scalar_lea.vmem %s944_s0, %s673_s23  ;;  %746 = vmatpush3.bf16.msra.mxu0 %v355_v3  ;;  %768 = vmatpush3.bf16.msra.mxu1 %v355_v3  ;;  %s901_s4 = scalar_lea.vmem %s947_s3, %s673_s23 }
  0x11   : > { %v798_v4 = vld [vmem:[%s224_s26] sm:$0xff]   ;;  %v800_v6 = vld [vmem:[%s224_s26 + $0x8] sm:$0xff]   ;;  %v802_v8 = vld [vmem:[%s224_s26 + $0x10] sm:$0xff]  }
  0x12   : > { %v799_v5 = vld [vmem:[%s224_s26 + $0x20] sm:$0xff]   ;;  %747 = vmatprep.mubr.msk.bf16.mxu0 %vm328_vm1, %v798_v4  ;;  %v801_v7 = vld [vmem:[%s224_s26 + $0x28] sm:$0xff]   ;;  %v803_v9 = vld [vmem:[%s224_s26 + $0x30] sm:$0xff]  }
  0x13   : > { %755 = vmatprep.mubr.msk.bf16.mxu1 %vm328_vm1, %v799_v5  ;;  %748 = vmatmul.mubr.msk.bf16.vlgmr.msra.gmra.mrb[0].mxu0 %vm328_vm1, %v800_v6  ;;  %v804_v10 = vld [vmem:[%s224_s26 + $0x18] sm:$0xff]  }
  0x14   : > { %756 = vmatmul.mubr.msk.bf16.vlgmr.msra.gmra.mrb[0].mxu1 %vm328_vm1, %v801_v7  ;;  %751 = vmatprep.mubr.msk.bf16.mxu0 %vm328_vm1, %v802_v8  ;;  %v805_v11 = vld [vmem:[%s224_s26 + $0x38] sm:$0xff]  }
  0x15   : > { %759 = vmatprep.mubr.msk.bf16.mxu1 %vm328_vm1, %v803_v9 }
  0x1b   : > { %752 = vmatmul.mubr.msk.bf16.gmra.mrb[4].mxu0 %vm328_vm1, %v804_v10 }
  0x1c   : > { %760 = vmatmul.mubr.msk.bf16.gmra.mrb[4].mxu1 %vm328_vm1, %v805_v11 }
  0xe6   : > { %v749_v13 = vpop.f32.mrb[0].mxu0 }
  0xe7   : > { %v757_v14 = vpop.f32.mrb[0].mxu1  ;;  %v400_v15 = vadd.f32 %v749_v13, %v676_v12  ;;  %v391_v17 = vpop.f32.mrb[1].mxu0 }
  0xe8   : > { %v432_v16 = vadd.f32 %v757_v14, %v676_v12  ;;  %v423_v18 = vpop.f32.mrb[1].mxu1  ;;  %v392_v19 = vadd.f32 %v676_v12, %v391_v17  ;;  %v750_v21 = vpop.f32.mrb[2].mxu0 }
  0xe9   : > { %v424_v20 = vadd.f32 %v676_v12, %v423_v18  ;;  %v758_v22 = vpop.f32.mrb[2].mxu1  ;;  %v456_v23 = vmax.f32 %v400_v15, 0.0  ;;  %v403_v25 = vadd.f32 %v750_v21, %v676_v12  ;;  %v394_v27 = vpop.f32.mrb[3].mxu0 }
  0xea   : > { %v464_v24 = vmax.f32 %v432_v16, 0.0  ;;  %v435_v26 = vadd.f32 %v758_v22, %v676_v12  ;;  %v426_v28 = vpop.f32.mrb[3].mxu1  ;;  %v454_v29 = vmax.f32 %v392_v19, 0.0  ;;  %v395_v31 = vadd.f32 %v676_v12, %v394_v27 }
  0xeb   : > { %v462_v30 = vmax.f32 %v424_v20, 0.0  ;;  %v427_v32 = vadd.f32 %v676_v12, %v426_v28  ;;  %v716_v33 = vpack.c.bf16 %v456_v23, %v456_v23  ;;  %v457_v35 = vmax.f32 %v403_v25, 0.0 }
  0xec   : > { %v724_v34 = vpack.c.bf16 %v464_v24, %v464_v24  ;;  %v465_v36 = vmax.f32 %v435_v26, 0.0  ;;  %v714_v37 = vpack.c.bf16 %v454_v29, %v454_v29  ;;  %v455_v39 = vmax.f32 %v395_v31, 0.0 }
  0xed   : > { %v722_v38 = vpack.c.bf16 %v462_v30, %v462_v30  ;;  %v463_v40 = vmax.f32 %v427_v32, 0.0  ;;  %537 = vst.msk [vmem:[%s901_s4 + $0x8] sm:$0xf] %vm534_vm2, %v716_v33  ;;  %v717_v41 = vpack.c.bf16 %v457_v35, %v457_v35 }
  0xee   : > { %545 = vst.msk [vmem:[%s901_s4 + $0x28] sm:$0xf] %vm534_vm2, %v724_v34  ;;  %v725_v42 = vpack.c.bf16 %v465_v36, %v465_v36  ;;  %535 = vst.msk [vmem:[%s901_s4] sm:$0xf] %vm534_vm2, %v714_v37  ;;  %v715_v43 = vpack.c.bf16 %v455_v39, %v455_v39  ;;  %v753_v45 = vpop.f32.mrb[4].mxu0 }
  0xef   : > { %543 = vst.msk [vmem:[%s901_s4 + $0x20] sm:$0xf] %vm534_vm2, %v722_v38  ;;  %v723_v44 = vpack.c.bf16 %v463_v40, %v463_v40  ;;  %v761_v46 = vpop.f32.mrb[4].mxu1  ;;  %538 = vst.msk [vmem:[%s901_s4 + $0xc] sm:$0xf] %vm534_vm2, %v717_v41  ;;  %v416_v47 = vadd.f32 %v753_v45, %v676_v12  ;;  %v407_v49 = vpop.f32.mrb[5].mxu0 }
  0xf0   : > { %546 = vst.msk [vmem:[%s901_s4 + $0x2c] sm:$0xf] %vm534_vm2, %v725_v42  ;;  %v448_v48 = vadd.f32 %v761_v46, %v676_v12  ;;  %v439_v50 = vpop.f32.mrb[5].mxu1  ;;  %536 = vst.msk [vmem:[%s901_s4 + $0x4] sm:$0xf] %vm534_vm2, %v715_v43  ;;  %v408_v51 = vadd.f32 %v676_v12, %v407_v49  ;;  %v754_v53 = vpop.f32.mrb[6].mxu0 }
  0xf1   : > { %544 = vst.msk [vmem:[%s901_s4 + $0x24] sm:$0xf] %vm534_vm2, %v723_v44  ;;  %v440_v52 = vadd.f32 %v676_v12, %v439_v50  ;;  %v762_v54 = vpop.f32.mrb[6].mxu1  ;;  %v460_v55 = vmax.f32 %v416_v47, 0.0  ;;  %v419_v57 = vadd.f32 %v754_v53, %v676_v12  ;;  %v410_v59 = vpop.f32.mrb[7].mxu0 }
  0xf2   : > { %v468_v56 = vmax.f32 %v448_v48, 0.0  ;;  %v451_v58 = vadd.f32 %v762_v54, %v676_v12  ;;  %v442_v60 = vpop.f32.mrb[7].mxu1  ;;  %v458_v61 = vmax.f32 %v408_v51, 0.0  ;;  %v411_v63 = vadd.f32 %v676_v12, %v410_v59 }
  0xf3   : > { %v466_v62 = vmax.f32 %v440_v52, 0.0  ;;  %v443_v0 = vadd.f32 %v676_v12, %v442_v60  ;;  %v720_v1 = vpack.c.bf16 %v460_v55, %v460_v55  ;;  %v461_v3 = vmax.f32 %v419_v57, 0.0 }
  0xf4   : > { %v728_v2 = vpack.c.bf16 %v468_v56, %v468_v56  ;;  %v469_v4 = vmax.f32 %v451_v58, 0.0  ;;  %v718_v5 = vpack.c.bf16 %v458_v61, %v458_v61  ;;  %v459_v7 = vmax.f32 %v411_v63, 0.0 }
  0xf5   : > { %v726_v6 = vpack.c.bf16 %v466_v62, %v466_v62  ;;  %v467_v8 = vmax.f32 %v443_v0, 0.0  ;;  %541 = vst.msk [vmem:[%s901_s4 + $0x18] sm:$0xf] %vm534_vm2, %v720_v1  ;;  %v721_v9 = vpack.c.bf16 %v461_v3, %v461_v3 }
  0xf6   : > { %549 = vst.msk [vmem:[%s901_s4 + $0x38] sm:$0xf] %vm534_vm2, %v728_v2  ;;  %v729_v10 = vpack.c.bf16 %v469_v4, %v469_v4  ;;  %539 = vst.msk [vmem:[%s901_s4 + $0x10] sm:$0xf] %vm534_vm2, %v718_v5  ;;  %v719_v11 = vpack.c.bf16 %v459_v7, %v459_v7 }
  0xf7   : > { %547 = vst.msk [vmem:[%s901_s4 + $0x30] sm:$0xf] %vm534_vm2, %v726_v6  ;;  %v727_v12 = vpack.c.bf16 %v467_v8, %v467_v8  ;;  %542 = vst.msk [vmem:[%s901_s4 + $0x1c] sm:$0xf] %vm534_vm2, %v721_v9 }
  0xf8   : > { %550 = vst.msk [vmem:[%s901_s4 + $0x3c] sm:$0xf] %vm534_vm2, %v729_v10  ;;  %540 = vst.msk [vmem:[%s901_s4 + $0x14] sm:$0xf] %vm534_vm2, %v719_v11 }
  0xf9   : > { %548 = vst.msk [vmem:[%s901_s4 + $0x34] sm:$0xf] %vm534_vm2, %v727_v12 }
  0xfa PF: > { %s13_s14 = sadd.s32 1, %s828_s14   ;;  %s948_s12 = smov %s824_s13 }
  0xfb   : > { %p10_p5 = scmp.ge.s32.totalorder %s13_s14, 6   ;;  %s949_s13 = smov %s951_s15 }
  0xfd   :  { %12 = sbr.rel (!%p10_p5) target bundleno = 2 (0x2), region = 68 }

// kernel: jointnet_forward.43
= control target key start
LH: loop header
LB: loop body
LE: loop exit
PB: predicated region body
PF: predicated region fallthrough
CT: control target
= control target key end

     0   :  { %s880_s12 = smov 0   ;;  %s882_s13 = smov 0   ;;  %s980_s0 = inlined_call_operand.vmem [shape: bf16[1,512,68], index: 0, kind: input, shape index: {}]   ;;  %s981_s1 = inlined_call_operand.vmem [shape: bf16[1,68,32], index: 1, kind: input, shape index: {}]   ;;  %s982_s2 = inlined_call_operand.vmem [shape: f32[1,1,32], index: 2, kind: input, shape index: {}]   ;;  %s983_s3 = inlined_call_operand.vmem [shape: bf16[1,512,32], index: 3, kind: output, shape index: {}]  }
   0x1   :  { %s884_s14 = smov 0  }
   0x2 LB: > { %s22_s15 = sadd.s32 1, %s854_s13  ;;  %p687_p0 = scmp.ge.s32.totalorder %s858_s14, 1  ;;  %s858_s14 = sphi %s884_s14, %s13_s14   ;;  %s854_s13 = sphi %s882_s13, %s985_s13   ;;  %s850_s12 = sphi %s880_s12, %s984_s12  }
   0x3   : > { %p23_p1 = scmp.ge.s32.totalorder %s22_s15, 4  ;;  %p176_p2 = scmp.lt.s32.totalorder %s858_s14, 5 }
   0x5   : > { %s987_s15 = smov (%p23_p1, %s22_s15), 0  ;;  %p177_p3 = pnand %p687_p0, %p176_p2 }
   0x6   : > { %v823_v0 = vld [vmem:[%s981_s1] sm:$0xff] (!%p177_p3)   ;;  %v824_v1 = vld [vmem:[%s981_s1 + $0x8] sm:$0xff] (!%p177_p3)   ;;  %s688_s20 = sshll.u32 (!%p177_p3), %s850_s12, 4  ;;  %v825_v2 = vld [vmem:[%s981_s1 + $0x10] sm:$0xff] (!%p177_p3)   ;;  %vm344_vm0 = vcmask (!%p177_p3), 556032   ;;  %vm369_vm1 = vcmask (!%p177_p3), 1041408  }
   0x7   : > { %180 = sbr.rel (%p177_p3) target bundleno = 257 (0x101), region = 32  ;;  %761 = vmatprep.subr.bf16.mxu0 (!%p177_p3), %v823_v0  ;;  %787 = vmatprep.subr.bf16.mxu1 (!%p177_p3), %v823_v0  ;;  %p219_p4 = scmp.lt.s32.totalorder (!%p177_p3), %s688_s20, 63  ;;  %v826_v3 = vld [vmem:[%s981_s1 + $0x18] sm:$0xff] (!%p177_p3)   ;;  %v827_v6 = vld [vmem:[%s981_s1 + $0x20] ss:$0 sps:$4 sm:$0x33] (!%p177_p3)  }
   0x8   : > { %762 = vmatpush3.bf16.msra.mxu0 (!%p177_p3), %v823_v0  ;;  %792 = vmatpush3.bf16.msra.mxu1 (!%p177_p3), %v823_v0  ;;  %v371_v7 = vsel (!%p177_p3), %vm369_vm1, %v827_v6, 0  ;;  %v692_v14 = vld [vmem:[%s982_s2] ss:$0 sm:$0xff] (!%p177_p3)  ;;  %vm550_vm2 = vcmask (!%p177_p3), 257024  }
   0x9   : > { %763 = vmatprep.subr.bf16.mxu0 (!%p177_p3), %v824_v1  ;;  %788 = vmatprep.subr.bf16.mxu1 (!%p177_p3), %v824_v1 }
   0xc   : > { %764 = vmatpush3.bf16.msra.mxu0 (!%p177_p3), %v824_v1  ;;  %793 = vmatpush3.bf16.msra.mxu1 (!%p177_p3), %v824_v1 }
   0xd   : > { %765 = vmatprep.subr.bf16.mxu0 (!%p177_p3), %v825_v2  ;;  %789 = vmatprep.subr.bf16.mxu1 (!%p177_p3), %v825_v2 }
   0xe   : > { %s989_s20 = smov (!%p219_p4, %s688_s20), 63 }
   0xf   : > { %s689_s23 = sshll.u32 %s989_s20, 2 }
  0x10   : > { %s224_s28 = scalar_lea.vmem %s980_s0, %s689_s23  ;;  %766 = vmatpush3.bf16.msra.mxu0 %v825_v2  ;;  %794 = vmatpush3.bf16.msra.mxu1 %v825_v2  ;;  %s937_s8 = scalar_lea.vmem %s983_s3, %s689_s23 }
  0x11   : > { %v828_v4 = vld [vmem:[%s224_s28] sm:$0xff]   ;;  %767 = vmatprep.subr.bf16.mxu0 %v826_v3  ;;  %790 = vmatprep.subr.bf16.mxu1 %v826_v3  ;;  %v830_v8 = vld [vmem:[%s224_s28 + $0x8] sm:$0xff]   ;;  %v832_v10 = vld [vmem:[%s224_s28 + $0x10] sm:$0xff]  }
  0x12   : > { %v829_v5 = vld [vmem:[%s224_s28 + $0x20] sm:$0xff]   ;;  %771 = vmatprep.mubr.msk.bf16.mxu0 %vm344_vm0, %v828_v4  ;;  %v831_v9 = vld [vmem:[%s224_s28 + $0x28] sm:$0xff]   ;;  %v833_v11 = vld [vmem:[%s224_s28 + $0x30] sm:$0xff]  }
  0x13   : > { %779 = vmatprep.mubr.msk.bf16.mxu1 %vm344_vm0, %v829_v5  ;;  %v834_v12 = vld [vmem:[%s224_s28 + $0x18] sm:$0xff]  }
  0x14   : > { %768 = vmatpush3.bf16.msra.mxu0 %v826_v3  ;;  %795 = vmatpush3.bf16.msra.mxu1 %v826_v3  ;;  %v835_v13 = vld [vmem:[%s224_s28 + $0x38] sm:$0xff]  }
  0x15   : > { %797 = vmatprep.subr.msk.bf16.mxu0 %vm369_vm1, %v827_v6  ;;  %798 = vmatprep.subr.msk.bf16.mxu1 %vm369_vm1, %v827_v6 }
  0x18   : > { %770 = vmatpush3.bf16.msra.mxu0 %v371_v7  ;;  %796 = vmatpush3.bf16.msra.mxu1 %v371_v7 }
  0x1b   : > { %772 = vmatmul.mubr.msk.bf16.vlgmr.msra.gmra.mrb[0].mxu0 %vm344_vm0, %v830_v8  ;;  %780 = vmatmul.mubr.msk.bf16.vlgmr.msra.gmra.mrb[0].mxu1 %vm344_vm0, %v831_v9 }
  0x1c   : > { %775 = vmatprep.mubr.msk.bf16.mxu0 %vm344_vm0, %v832_v10  ;;  %783 = vmatprep.mubr.msk.bf16.mxu1 %vm344_vm0, %v833_v11 }
  0x23   : > { %776 = vmatmul.mubr.msk.bf16.gmra.mrb[4].mxu0 %vm344_vm0, %v834_v12  ;;  %784 = vmatmul.mubr.msk.bf16.gmra.mrb[4].mxu1 %vm344_vm0, %v835_v13 }
  0xee   : > { %v773_v15 = vpop.f32.mrb[0].mxu0  ;;  %v781_v16 = vpop.f32.mrb[0].mxu1 }
  0xef   : > { %v416_v17 = vadd.f32 %v773_v15, %v692_v14  ;;  %v448_v18 = vadd.f32 %v781_v16, %v692_v14  ;;  %v407_v19 = vpop.f32.mrb[1].mxu0  ;;  %v439_v20 = vpop.f32.mrb[1].mxu1 }
  0xf0   : > { %v408_v21 = vadd.f32 %v692_v14, %v407_v19  ;;  %v440_v22 = vadd.f32 %v692_v14, %v439_v20  ;;  %v774_v23 = vpop.f32.mrb[2].mxu0  ;;  %v782_v24 = vpop.f32.mrb[2].mxu1 }
  0xf1   : > { %v472_v25 = vmax.f32 %v416_v17, 0.0  ;;  %v480_v26 = vmax.f32 %v448_v18, 0.0  ;;  %v419_v27 = vadd.f32 %v774_v23, %v692_v14  ;;  %v451_v28 = vadd.f32 %v782_v24, %v692_v14  ;;  %v410_v29 = vpop.f32.mrb[3].mxu0  ;;  %v442_v30 = vpop.f32.mrb[3].mxu1 }
  0xf2   : > { %v470_v31 = vmax.f32 %v408_v21, 0.0  ;;  %v478_v32 = vmax.f32 %v440_v22, 0.0  ;;  %v411_v33 = vadd.f32 %v692_v14, %v410_v29  ;;  %v443_v34 = vadd.f32 %v692_v14, %v442_v30 }
  0xf3   : > { %v734_v35 = vpack.c.bf16 %v472_v25, %v472_v25  ;;  %v742_v36 = vpack.c.bf16 %v480_v26, %v480_v26  ;;  %v473_v37 = vmax.f32 %v419_v27, 0.0  ;;  %v481_v38 = vmax.f32 %v451_v28, 0.0 }
  0xf4   : > { %v732_v39 = vpack.c.bf16 %v470_v31, %v470_v31  ;;  %v740_v40 = vpack.c.bf16 %v478_v32, %v478_v32  ;;  %v471_v41 = vmax.f32 %v411_v33, 0.0  ;;  %v479_v42 = vmax.f32 %v443_v34, 0.0 }
  0xf5   : > { %553 = vst.msk [vmem:[%s937_s8 + $0x8] sm:$0xf] %vm550_vm2, %v734_v35  ;;  %561 = vst.msk [vmem:[%s937_s8 + $0x28] sm:$0xf] %vm550_vm2, %v742_v36  ;;  %v735_v43 = vpack.c.bf16 %v473_v37, %v473_v37  ;;  %v743_v44 = vpack.c.bf16 %v481_v38, %v481_v38 }
  0xf6   : > { %551 = vst.msk [vmem:[%s937_s8] sm:$0xf] %vm550_vm2, %v732_v39  ;;  %559 = vst.msk [vmem:[%s937_s8 + $0x20] sm:$0xf] %vm550_vm2, %v740_v40  ;;  %v733_v45 = vpack.c.bf16 %v471_v41, %v471_v41  ;;  %v741_v46 = vpack.c.bf16 %v479_v42, %v479_v42  ;;  %v777_v47 = vpop.f32.mrb[4].mxu0  ;;  %v785_v48 = vpop.f32.mrb[4].mxu1 }
  0xf7   : > { %554 = vst.msk [vmem:[%s937_s8 + $0xc] sm:$0xf] %vm550_vm2, %v735_v43  ;;  %562 = vst.msk [vmem:[%s937_s8 + $0x2c] sm:$0xf] %vm550_vm2, %v743_v44  ;;  %v432_v49 = vadd.f32 %v777_v47, %v692_v14  ;;  %v464_v50 = vadd.f32 %v785_v48, %v692_v14  ;;  %v423_v51 = vpop.f32.mrb[5].mxu0  ;;  %v455_v52 = vpop.f32.mrb[5].mxu1 }
  0xf8   : > { %552 = vst.msk [vmem:[%s937_s8 + $0x4] sm:$0xf] %vm550_vm2, %v733_v45  ;;  %560 = vst.msk [vmem:[%s937_s8 + $0x24] sm:$0xf] %vm550_vm2, %v741_v46  ;;  %v424_v53 = vadd.f32 %v692_v14, %v423_v51  ;;  %v456_v54 = vadd.f32 %v692_v14, %v455_v52  ;;  %v778_v55 = vpop.f32.mrb[6].mxu0  ;;  %v786_v56 = vpop.f32.mrb[6].mxu1 }
  0xf9   : > { %v476_v57 = vmax.f32 %v432_v49, 0.0  ;;  %v484_v58 = vmax.f32 %v464_v50, 0.0  ;;  %v435_v59 = vadd.f32 %v778_v55, %v692_v14  ;;  %v467_v60 = vadd.f32 %v786_v56, %v692_v14  ;;  %v426_v61 = vpop.f32.mrb[7].mxu0  ;;  %v458_v62 = vpop.f32.mrb[7].mxu1 }
  0xfa   : > { %v474_v63 = vmax.f32 %v424_v53, 0.0  ;;  %v482_v0 = vmax.f32 %v456_v54, 0.0  ;;  %v427_v1 = vadd.f32 %v692_v14, %v426_v61  ;;  %v459_v2 = vadd.f32 %v692_v14, %v458_v62 }
  0xfb   : > { %v738_v3 = vpack.c.bf16 %v476_v57, %v476_v57  ;;  %v746_v4 = vpack.c.bf16 %v484_v58, %v484_v58  ;;  %v477_v5 = vmax.f32 %v435_v59, 0.0  ;;  %v485_v6 = vmax.f32 %v467_v60, 0.0 }
  0xfc   : > { %v736_v7 = vpack.c.bf16 %v474_v63, %v474_v63  ;;  %v744_v8 = vpack.c.bf16 %v482_v0, %v482_v0  ;;  %v475_v9 = vmax.f32 %v427_v1, 0.0  ;;  %v483_v10 = vmax.f32 %v459_v2, 0.0 }
  0xfd   : > { %557 = vst.msk [vmem:[%s937_s8 + $0x18] sm:$0xf] %vm550_vm2, %v738_v3  ;;  %565 = vst.msk [vmem:[%s937_s8 + $0x38] sm:$0xf] %vm550_vm2, %v746_v4  ;;  %v739_v11 = vpack.c.bf16 %v477_v5, %v477_v5  ;;  %v747_v12 = vpack.c.bf16 %v485_v6, %v485_v6 }
  0xfe   : > { %555 = vst.msk [vmem:[%s937_s8 + $0x10] sm:$0xf] %vm550_vm2, %v736_v7  ;;  %563 = vst.msk [vmem:[%s937_s8 + $0x30] sm:$0xf] %vm550_vm2, %v744_v8  ;;  %v737_v13 = vpack.c.bf16 %v475_v9, %v475_v9  ;;  %v745_v14 = vpack.c.bf16 %v483_v10, %v483_v10 }
  0xff   : > { %558 = vst.msk [vmem:[%s937_s8 + $0x1c] sm:$0xf] %vm550_vm2, %v739_v11  ;;  %566 = vst.msk [vmem:[%s937_s8 + $0x3c] sm:$0xf] %vm550_vm2, %v747_v12 }
 0x100   : > { %556 = vst.msk [vmem:[%s937_s8 + $0x14] sm:$0xf] %vm550_vm2, %v737_v13  ;;  %564 = vst.msk [vmem:[%s937_s8 + $0x34] sm:$0xf] %vm550_vm2, %v745_v14 }
 0x101 PF: > { %s13_s14 = sadd.s32 1, %s858_s14   ;;  %s984_s12 = smov %s854_s13 }
 0x102   : > { %p10_p5 = scmp.ge.s32.totalorder %s13_s14, 6   ;;  %s985_s13 = smov %s987_s15 }
 0x104   :  { %12 = sbr.rel (!%p10_p5) target bundleno = 2 (0x2), region = 68 }

// kernel: jointnet_forward.45
= control target key start
LH: loop header
LB: loop body
LE: loop exit
PB: predicated region body
PF: predicated region fallthrough
CT: control target
= control target key end

     0   :  { %s910_s12 = smov 0   ;;  %s912_s13 = smov 0   ;;  %s1026_s0 = inlined_call_operand.vmem [shape: bf16[1,512,100], index: 0, kind: input, shape index: {}]   ;;  %s1027_s1 = inlined_call_operand.vmem [shape: bf16[1,100,32], index: 1, kind: input, shape index: {}]   ;;  %s1028_s2 = inlined_call_operand.vmem [shape: f32[1,1,32], index: 2, kind: input, shape index: {}]   ;;  %s1029_s3 = inlined_call_operand.vmem [shape: bf16[1,512,32], index: 3, kind: output, shape index: {}]  }
   0x1   :  { %s914_s14 = smov 0  }
   0x2 LB: > { %s22_s15 = sadd.s32 1, %s884_s13  ;;  %p703_p0 = scmp.ge.s32.totalorder %s888_s14, 1  ;;  %s888_s14 = sphi %s914_s14, %s13_s14   ;;  %s884_s13 = sphi %s912_s13, %s1031_s13   ;;  %s880_s12 = sphi %s910_s12, %s1030_s12  }
   0x3   : > { %p23_p1 = scmp.ge.s32.totalorder %s22_s15, 4  ;;  %p176_p2 = scmp.lt.s32.totalorder %s888_s14, 5 }
   0x5   : > { %s1033_s15 = smov (%p23_p1, %s22_s15), 0  ;;  %p177_p3 = pnand %p703_p0, %p176_p2 }
   0x6   : > { %v851_v0 = vld [vmem:[%s1027_s1] sm:$0xff] (!%p177_p3)   ;;  %v852_v1 = vld [vmem:[%s1027_s1 + $0x8] sm:$0xff] (!%p177_p3)   ;;  %s704_s20 = sshll.u32 (!%p177_p3), %s880_s12, 4  ;;  %v853_v2 = vld [vmem:[%s1027_s1 + $0x10] sm:$0xff] (!%p177_p3)   ;;  %vm360_vm0 = vcmask (!%p177_p3), 818176   ;;  %vm385_vm1 = vcmask (!%p177_p3), 1041408  }
   0x7   : > { %180 = sbr.rel (%p177_p3) target bundleno = 265 (0x109), region = 32  ;;  %781 = vmatprep.subr.bf16.mxu0 (!%p177_p3), %v851_v0  ;;  %811 = vmatprep.subr.bf16.mxu1 (!%p177_p3), %v851_v0  ;;  %p219_p4 = scmp.lt.s32.totalorder (!%p177_p3), %s704_s20, 63  ;;  %v854_v3 = vld [vmem:[%s1027_s1 + $0x18] sm:$0xff] (!%p177_p3)   ;;  %v855_v6 = vld [vmem:[%s1027_s1 + $0x20] sm:$0xff] (!%p177_p3)   ;;  %v856_v7 = vld [vmem:[%s1027_s1 + $0x28] sm:$0xff] (!%p177_p3)   ;;  %vm566_vm2 = vcmask (!%p177_p3), 257024  }
   0x8   : > { %782 = vmatpush3.bf16.msra.mxu0 (!%p177_p3), %v851_v0  ;;  %818 = vmatpush3.bf16.msra.mxu1 (!%p177_p3), %v851_v0  ;;  %v857_v8 = vld [vmem:[%s1027_s1 + $0x30] ss:$0 sps:$4 sm:$0x33] (!%p177_p3)   ;;  %v708_v16 = vld [vmem:[%s1028_s2] ss:$0 sm:$0xff] (!%p177_p3) }
   0x9   : > { %783 = vmatprep.subr.bf16.mxu0 (!%p177_p3), %v852_v1  ;;  %812 = vmatprep.subr.bf16.mxu1 (!%p177_p3), %v852_v1  ;;  %v387_v9 = vsel (!%p177_p3), %vm385_vm1, %v857_v8, 0 }
   0xc   : > { %784 = vmatpush3.bf16.msra.mxu0 (!%p177_p3), %v852_v1  ;;  %819 = vmatpush3.bf16.msra.mxu1 (!%p177_p3), %v852_v1 }
   0xd   : > { %785 = vmatprep.subr.bf16.mxu0 (!%p177_p3), %v853_v2  ;;  %813 = vmatprep.subr.bf16.mxu1 (!%p177_p3), %v853_v2 }
   0xe   : > { %s1035_s20 = smov (!%p219_p4, %s704_s20), 63 }
   0xf   : > { %s705_s23 = sshll.u32 %s1035_s20, 2 }
  0x10   : > { %s948_s28 = scalar_lea.vmem %s1026_s0, %s705_s23  ;;  %786 = vmatpush3.bf16.msra.mxu0 %v853_v2  ;;  %820 = vmatpush3.bf16.msra.mxu1 %v853_v2  ;;  %s983_s12 = scalar_lea.vmem %s1029_s3, %s705_s23 }
  0x11   : > { %v858_v4 = vld [vmem:[%s948_s28] sm:$0xff]   ;;  %787 = vmatprep.subr.bf16.mxu0 %v854_v3  ;;  %814 = vmatprep.subr.bf16.mxu1 %v854_v3  ;;  %v860_v10 = vld [vmem:[%s948_s28 + $0x8] sm:$0xff]   ;;  %v862_v12 = vld [vmem:[%s948_s28 + $0x10] sm:$0xff]  }
  0x12   : > { %v859_v5 = vld [vmem:[%s948_s28 + $0x20] sm:$0xff]   ;;  %795 = vmatprep.mubr.msk.bf16.mxu0 %vm360_vm0, %v858_v4  ;;  %v861_v11 = vld [vmem:[%s948_s28 + $0x28] sm:$0xff]   ;;  %v863_v13 = vld [vmem:[%s948_s28 + $0x30] sm:$0xff]  }
  0x13   : > { %803 = vmatprep.mubr.msk.bf16.mxu1 %vm360_vm0, %v859_v5  ;;  %v864_v14 = vld [vmem:[%s948_s28 + $0x18] sm:$0xff]  }
  0x14   : > { %788 = vmatpush3.bf16.msra.mxu0 %v854_v3  ;;  %821 = vmatpush3.bf16.msra.mxu1 %v854_v3  ;;  %v865_v15 = vld [vmem:[%s948_s28 + $0x38] sm:$0xff]  }
  0x15   : > { %789 = vmatprep.subr.bf16.mxu0 %v855_v6  ;;  %815 = vmatprep.subr.bf16.mxu1 %v855_v6 }
  0x18   : > { %790 = vmatpush3.bf16.msra.mxu0 %v855_v6  ;;  %822 = vmatpush3.bf16.msra.mxu1 %v855_v6 }
  0x19   : > { %791 = vmatprep.subr.bf16.mxu0 %v856_v7  ;;  %816 = vmatprep.subr.bf16.mxu1 %v856_v7 }
  0x1c   : > { %792 = vmatpush3.bf16.msra.mxu0 %v856_v7  ;;  %823 = vmatpush3.bf16.msra.mxu1 %v856_v7 }
  0x1d   : > { %825 = vmatprep.subr.msk.bf16.mxu0 %vm385_vm1, %v857_v8  ;;  %826 = vmatprep.subr.msk.bf16.mxu1 %vm385_vm1, %v857_v8 }
  0x20   : > { %794 = vmatpush3.bf16.msra.mxu0 %v387_v9  ;;  %824 = vmatpush3.bf16.msra.mxu1 %v387_v9 }
  0x23   : > { %796 = vmatmul.mubr.msk.bf16.vlgmr.msra.gmra.mrb[0].mxu0 %vm360_vm0, %v860_v10  ;;  %804 = vmatmul.mubr.msk.bf16.vlgmr.msra.gmra.mrb[0].mxu1 %vm360_vm0, %v861_v11 }
  0x24   : > { %799 = vmatprep.mubr.msk.bf16.mxu0 %vm360_vm0, %v862_v12  ;;  %807 = vmatprep.mubr.msk.bf16.mxu1 %vm360_vm0, %v863_v13 }
  0x2b   : > { %800 = vmatmul.mubr.msk.bf16.gmra.mrb[4].mxu0 %vm360_vm0, %v864_v14  ;;  %808 = vmatmul.mubr.msk.bf16.gmra.mrb[4].mxu1 %vm360_vm0, %v865_v15 }
  0xf6   : > { %v797_v17 = vpop.f32.mrb[0].mxu0  ;;  %v805_v18 = vpop.f32.mrb[0].mxu1 }
  0xf7   : > { %v432_v19 = vadd.f32 %v797_v17, %v708_v16  ;;  %v464_v20 = vadd.f32 %v805_v18, %v708_v16  ;;  %v423_v21 = vpop.f32.mrb[1].mxu0  ;;  %v455_v22 = vpop.f32.mrb[1].mxu1 }
  0xf8   : > { %v424_v23 = vadd.f32 %v708_v16, %v423_v21  ;;  %v456_v24 = vadd.f32 %v708_v16, %v455_v22  ;;  %v798_v25 = vpop.f32.mrb[2].mxu0  ;;  %v806_v26 = vpop.f32.mrb[2].mxu1 }
  0xf9   : > { %v488_v27 = vmax.f32 %v432_v19, 0.0  ;;  %v496_v28 = vmax.f32 %v464_v20, 0.0  ;;  %v435_v29 = vadd.f32 %v798_v25, %v708_v16  ;;  %v467_v30 = vadd.f32 %v806_v26, %v708_v16  ;;  %v426_v31 = vpop.f32.mrb[3].mxu0  ;;  %v458_v32 = vpop.f32.mrb[3].mxu1 }
  0xfa   : > { %v486_v33 = vmax.f32 %v424_v23, 0.0  ;;  %v494_v34 = vmax.f32 %v456_v24, 0.0  ;;  %v427_v35 = vadd.f32 %v708_v16, %v426_v31  ;;  %v459_v36 = vadd.f32 %v708_v16, %v458_v32 }
  0xfb   : > { %v752_v37 = vpack.c.bf16 %v488_v27, %v488_v27  ;;  %v760_v38 = vpack.c.bf16 %v496_v28, %v496_v28  ;;  %v489_v39 = vmax.f32 %v435_v29, 0.0  ;;  %v497_v40 = vmax.f32 %v467_v30, 0.0 }
  0xfc   : > { %v750_v41 = vpack.c.bf16 %v486_v33, %v486_v33  ;;  %v758_v42 = vpack.c.bf16 %v494_v34, %v494_v34  ;;  %v487_v43 = vmax.f32 %v427_v35, 0.0  ;;  %v495_v44 = vmax.f32 %v459_v36, 0.0 }
  0xfd   : > { %569 = vst.msk [vmem:[%s983_s12 + $0x8] sm:$0xf] %vm566_vm2, %v752_v37  ;;  %577 = vst.msk [vmem:[%s983_s12 + $0x28] sm:$0xf] %vm566_vm2, %v760_v38  ;;  %v753_v45 = vpack.c.bf16 %v489_v39, %v489_v39  ;;  %v761_v46 = vpack.c.bf16 %v497_v40, %v497_v40 }
  0xfe   : > { %567 = vst.msk [vmem:[%s983_s12] sm:$0xf] %vm566_vm2, %v750_v41  ;;  %575 = vst.msk [vmem:[%s983_s12 + $0x20] sm:$0xf] %vm566_vm2, %v758_v42  ;;  %v751_v47 = vpack.c.bf16 %v487_v43, %v487_v43  ;;  %v759_v48 = vpack.c.bf16 %v495_v44, %v495_v44  ;;  %v801_v49 = vpop.f32.mrb[4].mxu0  ;;  %v809_v50 = vpop.f32.mrb[4].mxu1 }
  0xff   : > { %570 = vst.msk [vmem:[%s983_s12 + $0xc] sm:$0xf] %vm566_vm2, %v753_v45  ;;  %578 = vst.msk [vmem:[%s983_s12 + $0x2c] sm:$0xf] %vm566_vm2, %v761_v46  ;;  %v448_v51 = vadd.f32 %v801_v49, %v708_v16  ;;  %v480_v52 = vadd.f32 %v809_v50, %v708_v16  ;;  %v439_v53 = vpop.f32.mrb[5].mxu0  ;;  %v471_v54 = vpop.f32.mrb[5].mxu1 }
 0x100   : > { %568 = vst.msk [vmem:[%s983_s12 + $0x4] sm:$0xf] %vm566_vm2, %v751_v47  ;;  %576 = vst.msk [vmem:[%s983_s12 + $0x24] sm:$0xf] %vm566_vm2, %v759_v48  ;;  %v440_v55 = vadd.f32 %v708_v16, %v439_v53  ;;  %v472_v56 = vadd.f32 %v708_v16, %v471_v54  ;;  %v802_v57 = vpop.f32.mrb[6].mxu0  ;;  %v810_v58 = vpop.f32.mrb[6].mxu1 }
 0x101   : > { %v492_v59 = vmax.f32 %v448_v51, 0.0  ;;  %v500_v60 = vmax.f32 %v480_v52, 0.0  ;;  %v451_v61 = vadd.f32 %v802_v57, %v708_v16  ;;  %v483_v62 = vadd.f32 %v810_v58, %v708_v16  ;;  %v442_v63 = vpop.f32.mrb[7].mxu0  ;;  %v474_v0 = vpop.f32.mrb[7].mxu1 }
 0x102   : > { %v490_v1 = vmax.f32 %v440_v55, 0.0  ;;  %v498_v2 = vmax.f32 %v472_v56, 0.0  ;;  %v443_v3 = vadd.f32 %v708_v16, %v442_v63  ;;  %v475_v4 = vadd.f32 %v708_v16, %v474_v0 }
 0x103   : > { %v756_v5 = vpack.c.bf16 %v492_v59, %v492_v59  ;;  %v764_v6 = vpack.c.bf16 %v500_v60, %v500_v60  ;;  %v493_v7 = vmax.f32 %v451_v61, 0.0  ;;  %v501_v8 = vmax.f32 %v483_v62, 0.0 }
 0x104   : > { %v754_v9 = vpack.c.bf16 %v490_v1, %v490_v1  ;;  %v762_v10 = vpack.c.bf16 %v498_v2, %v498_v2  ;;  %v491_v11 = vmax.f32 %v443_v3, 0.0  ;;  %v499_v12 = vmax.f32 %v475_v4, 0.0 }
 0x105   : > { %573 = vst.msk [vmem:[%s983_s12 + $0x18] sm:$0xf] %vm566_vm2, %v756_v5  ;;  %581 = vst.msk [vmem:[%s983_s12 + $0x38] sm:$0xf] %vm566_vm2, %v764_v6  ;;  %v757_v13 = vpack.c.bf16 %v493_v7, %v493_v7  ;;  %v765_v14 = vpack.c.bf16 %v501_v8, %v501_v8 }
 0x106   : > { %571 = vst.msk [vmem:[%s983_s12 + $0x10] sm:$0xf] %vm566_vm2, %v754_v9  ;;  %579 = vst.msk [vmem:[%s983_s12 + $0x30] sm:$0xf] %vm566_vm2, %v762_v10  ;;  %v755_v15 = vpack.c.bf16 %v491_v11, %v491_v11  ;;  %v763_v16 = vpack.c.bf16 %v499_v12, %v499_v12 }
 0x107   : > { %574 = vst.msk [vmem:[%s983_s12 + $0x1c] sm:$0xf] %vm566_vm2, %v757_v13  ;;  %582 = vst.msk [vmem:[%s983_s12 + $0x3c] sm:$0xf] %vm566_vm2, %v765_v14 }
 0x108   : > { %572 = vst.msk [vmem:[%s983_s12 + $0x14] sm:$0xf] %vm566_vm2, %v755_v15  ;;  %580 = vst.msk [vmem:[%s983_s12 + $0x34] sm:$0xf] %vm566_vm2, %v763_v16 }
 0x109 PF: > { %s13_s14 = sadd.s32 1, %s888_s14   ;;  %s1030_s12 = smov %s884_s13 }
 0x10a   : > { %p10_p5 = scmp.ge.s32.totalorder %s13_s14, 6   ;;  %s1031_s13 = smov %s1033_s15 }
 0x10c   :  { %12 = sbr.rel (!%p10_p5) target bundleno = 2 (0x2), region = 68 }

// kernel: jointnet_forward.47
= control target key start
LH: loop header
LB: loop body
LE: loop exit
PB: predicated region body
PF: predicated region fallthrough
CT: control target
= control target key end

     0   :  { %s898_s12 = smov 0   ;;  %s900_s13 = smov 0   ;;  %s1009_s0 = inlined_call_operand.vmem [shape: bf16[1,512,128], index: 0, kind: input, shape index: {}]   ;;  %s1010_s1 = inlined_call_operand.vmem [shape: bf16[1,128,32], index: 1, kind: input, shape index: {}]   ;;  %s1011_s2 = inlined_call_operand.vmem [shape: f32[1,1,32], index: 2, kind: input, shape index: {}]   ;;  %s1012_s3 = inlined_call_operand.vmem [shape: bf16[1,512,32], index: 3, kind: output, shape index: {}]  }
   0x1   :  { %s902_s14 = smov 0  }
   0x2 LB: > { %s22_s15 = sadd.s32 1, %s872_s13  ;;  %p694_p0 = scmp.ge.s32.totalorder %s876_s14, 1  ;;  %s876_s14 = sphi %s902_s14, %s13_s14   ;;  %s872_s13 = sphi %s900_s13, %s1014_s13   ;;  %s868_s12 = sphi %s898_s12, %s1013_s12  }
   0x3   : > { %p23_p1 = scmp.ge.s32.totalorder %s22_s15, 4  ;;  %p176_p2 = scmp.lt.s32.totalorder %s876_s14, 5 }
   0x5   : > { %s1016_s15 = smov (%p23_p1, %s22_s15), 0  ;;  %p177_p3 = pnand %p694_p0, %p176_p2 }
   0x6   : > { %v838_v0 = vld [vmem:[%s1010_s1] sm:$0xff] (!%p177_p3)   ;;  %s695_s18 = sshll.u32 (!%p177_p3), %s868_s12, 4  ;;  %v839_v1 = vld [vmem:[%s1010_s1 + $0x8] sm:$0xff] (!%p177_p3)   ;;  %v840_v2 = vld [vmem:[%s1010_s1 + $0x10] sm:$0xff] (!%p177_p3)   ;;  %vm557_vm0 = vcmask (!%p177_p3), 257024  }
   0x7   : > { %180 = sbr.rel (%p177_p3) target bundleno = 269 (0x10d), region = 32  ;;  %p219_p4 = scmp.lt.s32.totalorder (!%p177_p3), %s695_s18, 63  ;;  %766 = vmatprep.subr.bf16.mxu0 (!%p177_p3), %v838_v0  ;;  %798 = vmatprep.subr.bf16.mxu1 (!%p177_p3), %v838_v0  ;;  %v841_v3 = vld [vmem:[%s1010_s1 + $0x18] sm:$0xff] (!%p177_p3)   ;;  %v842_v6 = vld [vmem:[%s1010_s1 + $0x20] sm:$0xff] (!%p177_p3)   ;;  %v843_v7 = vld [vmem:[%s1010_s1 + $0x28] sm:$0xff] (!%p177_p3)  }
   0x8   : > { %767 = vmatpush3.bf16.msra.mxu0 (!%p177_p3), %v838_v0  ;;  %806 = vmatpush3.bf16.msra.mxu1 (!%p177_p3), %v838_v0  ;;  %v844_v8 = vld [vmem:[%s1010_s1 + $0x30] sm:$0xff] (!%p177_p3)   ;;  %v845_v9 = vld [vmem:[%s1010_s1 + $0x38] sm:$0xff] (!%p177_p3)   ;;  %v699_v16 = vld [vmem:[%s1011_s2] ss:$0 sm:$0xff] (!%p177_p3) }
   0x9   : > { %768 = vmatprep.subr.bf16.mxu0 (!%p177_p3), %v839_v1  ;;  %799 = vmatprep.subr.bf16.mxu1 (!%p177_p3), %v839_v1 }
   0xc   : > { %769 = vmatpush3.bf16.msra.mxu0 (!%p177_p3), %v839_v1  ;;  %807 = vmatpush3.bf16.msra.mxu1 (!%p177_p3), %v839_v1 }
   0xd   : > { %770 = vmatprep.subr.bf16.mxu0 (!%p177_p3), %v840_v2  ;;  %800 = vmatprep.subr.bf16.mxu1 (!%p177_p3), %v840_v2 }
   0xe   : > { %s1018_s18 = smov (!%p219_p4, %s695_s18), 63 }
   0xf   : > { %s696_s23 = sshll.u32 %s1018_s18, 2 }
  0x10   : > { %s933_s26 = scalar_lea.vmem %s1009_s0, %s696_s23  ;;  %771 = vmatpush3.bf16.msra.mxu0 %v840_v2  ;;  %808 = vmatpush3.bf16.msra.mxu1 %v840_v2  ;;  %s966_s17 = scalar_lea.vmem %s1012_s3, %s696_s23 }
  0x11   : > { %v846_v4 = vld [vmem:[%s933_s26] sm:$0xff]   ;;  %772 = vmatprep.subr.bf16.mxu0 %v841_v3  ;;  %801 = vmatprep.subr.bf16.mxu1 %v841_v3  ;;  %v848_v10 = vld [vmem:[%s933_s26 + $0x8] sm:$0xff]   ;;  %v850_v12 = vld [vmem:[%s933_s26 + $0x10] sm:$0xff]  }
  0x12   : > { %v847_v5 = vld [vmem:[%s933_s26 + $0x20] sm:$0xff]   ;;  %782 = vmatprep.mubr.bf16.mxu0 %v846_v4  ;;  %v849_v11 = vld [vmem:[%s933_s26 + $0x28] sm:$0xff]   ;;  %v851_v13 = vld [vmem:[%s933_s26 + $0x30] sm:$0xff]  }
  0x13   : > { %790 = vmatprep.mubr.bf16.mxu1 %v847_v5  ;;  %v852_v14 = vld [vmem:[%s933_s26 + $0x18] sm:$0xff]  }
  0x14   : > { %773 = vmatpush3.bf16.msra.mxu0 %v841_v3  ;;  %809 = vmatpush3.bf16.msra.mxu1 %v841_v3  ;;  %v853_v15 = vld [vmem:[%s933_s26 + $0x38] sm:$0xff]  }
  0x15   : > { %774 = vmatprep.subr.bf16.mxu0 %v842_v6  ;;  %802 = vmatprep.subr.bf16.mxu1 %v842_v6 }
  0x18   : > { %775 = vmatpush3.bf16.msra.mxu0 %v842_v6  ;;  %810 = vmatpush3.bf16.msra.mxu1 %v842_v6 }
  0x19   : > { %776 = vmatprep.subr.bf16.mxu0 %v843_v7  ;;  %803 = vmatprep.subr.bf16.mxu1 %v843_v7 }
  0x1c   : > { %777 = vmatpush3.bf16.msra.mxu0 %v843_v7  ;;  %811 = vmatpush3.bf16.msra.mxu1 %v843_v7 }
  0x1d   : > { %778 = vmatprep.subr.bf16.mxu0 %v844_v8  ;;  %804 = vmatprep.subr.bf16.mxu1 %v844_v8 }
  0x20   : > { %779 = vmatpush3.bf16.msra.mxu0 %v844_v8  ;;  %812 = vmatpush3.bf16.msra.mxu1 %v844_v8 }
  0x21   : > { %780 = vmatprep.subr.bf16.mxu0 %v845_v9  ;;  %805 = vmatprep.subr.bf16.mxu1 %v845_v9 }
  0x24   : > { %781 = vmatpush3.bf16.msra.mxu0 %v845_v9  ;;  %813 = vmatpush3.bf16.msra.mxu1 %v845_v9 }
  0x27   : > { %783 = vmatmul.mubr.bf16.vlgmr.msra.gmra.mrb[0].mxu0 %v848_v10  ;;  %791 = vmatmul.mubr.bf16.vlgmr.msra.gmra.mrb[0].mxu1 %v849_v11 }
  0x28   : > { %786 = vmatprep.mubr.bf16.mxu0 %v850_v12  ;;  %794 = vmatprep.mubr.bf16.mxu1 %v851_v13 }
  0x2f   : > { %787 = vmatmul.mubr.bf16.gmra.mrb[4].mxu0 %v852_v14  ;;  %795 = vmatmul.mubr.bf16.gmra.mrb[4].mxu1 %v853_v15 }
  0xfa   : > { %v784_v17 = vpop.f32.mrb[0].mxu0  ;;  %v792_v18 = vpop.f32.mrb[0].mxu1 }
  0xfb   : > { %v423_v19 = vadd.f32 %v784_v17, %v699_v16  ;;  %v455_v20 = vadd.f32 %v792_v18, %v699_v16  ;;  %v414_v21 = vpop.f32.mrb[1].mxu0  ;;  %v446_v22 = vpop.f32.mrb[1].mxu1 }
  0xfc   : > { %v415_v23 = vadd.f32 %v699_v16, %v414_v21  ;;  %v447_v24 = vadd.f32 %v699_v16, %v446_v22  ;;  %v785_v25 = vpop.f32.mrb[2].mxu0  ;;  %v793_v26 = vpop.f32.mrb[2].mxu1 }
  0xfd   : > { %v479_v27 = vmax.f32 %v423_v19, 0.0  ;;  %v487_v28 = vmax.f32 %v455_v20, 0.0  ;;  %v426_v29 = vadd.f32 %v785_v25, %v699_v16  ;;  %v458_v30 = vadd.f32 %v793_v26, %v699_v16  ;;  %v417_v31 = vpop.f32.mrb[3].mxu0  ;;  %v449_v32 = vpop.f32.mrb[3].mxu1 }
  0xfe   : > { %v477_v33 = vmax.f32 %v415_v23, 0.0  ;;  %v485_v34 = vmax.f32 %v447_v24, 0.0  ;;  %v418_v35 = vadd.f32 %v699_v16, %v417_v31  ;;  %v450_v36 = vadd.f32 %v699_v16, %v449_v32 }
  0xff   : > { %v736_v37 = vpack.c.bf16 %v479_v27, %v479_v27  ;;  %v744_v38 = vpack.c.bf16 %v487_v28, %v487_v28  ;;  %v480_v39 = vmax.f32 %v426_v29, 0.0  ;;  %v488_v40 = vmax.f32 %v458_v30, 0.0 }
 0x100   : > { %v734_v41 = vpack.c.bf16 %v477_v33, %v477_v33  ;;  %v742_v42 = vpack.c.bf16 %v485_v34, %v485_v34  ;;  %v478_v43 = vmax.f32 %v418_v35, 0.0  ;;  %v486_v44 = vmax.f32 %v450_v36, 0.0 }
 0x101   : > { %560 = vst.msk [vmem:[%s966_s17 + $0x8] sm:$0xf] %vm557_vm0, %v736_v37  ;;  %568 = vst.msk [vmem:[%s966_s17 + $0x28] sm:$0xf] %vm557_vm0, %v744_v38  ;;  %v737_v45 = vpack.c.bf16 %v480_v39, %v480_v39  ;;  %v745_v46 = vpack.c.bf16 %v488_v40, %v488_v40 }
 0x102   : > { %558 = vst.msk [vmem:[%s966_s17] sm:$0xf] %vm557_vm0, %v734_v41  ;;  %566 = vst.msk [vmem:[%s966_s17 + $0x20] sm:$0xf] %vm557_vm0, %v742_v42  ;;  %v735_v47 = vpack.c.bf16 %v478_v43, %v478_v43  ;;  %v743_v48 = vpack.c.bf16 %v486_v44, %v486_v44  ;;  %v788_v49 = vpop.f32.mrb[4].mxu0  ;;  %v796_v50 = vpop.f32.mrb[4].mxu1 }
 0x103   : > { %561 = vst.msk [vmem:[%s966_s17 + $0xc] sm:$0xf] %vm557_vm0, %v737_v45  ;;  %569 = vst.msk [vmem:[%s966_s17 + $0x2c] sm:$0xf] %vm557_vm0, %v745_v46  ;;  %v439_v51 = vadd.f32 %v788_v49, %v699_v16  ;;  %v471_v52 = vadd.f32 %v796_v50, %v699_v16  ;;  %v430_v53 = vpop.f32.mrb[5].mxu0  ;;  %v462_v54 = vpop.f32.mrb[5].mxu1 }
 0x104   : > { %559 = vst.msk [vmem:[%s966_s17 + $0x4] sm:$0xf] %vm557_vm0, %v735_v47  ;;  %567 = vst.msk [vmem:[%s966_s17 + $0x24] sm:$0xf] %vm557_vm0, %v743_v48  ;;  %v431_v55 = vadd.f32 %v699_v16, %v430_v53  ;;  %v463_v56 = vadd.f32 %v699_v16, %v462_v54  ;;  %v789_v57 = vpop.f32.mrb[6].mxu0  ;;  %v797_v58 = vpop.f32.mrb[6].mxu1 }
 0x105   : > { %v483_v59 = vmax.f32 %v439_v51, 0.0  ;;  %v491_v60 = vmax.f32 %v471_v52, 0.0  ;;  %v442_v61 = vadd.f32 %v789_v57, %v699_v16  ;;  %v474_v62 = vadd.f32 %v797_v58, %v699_v16  ;;  %v433_v63 = vpop.f32.mrb[7].mxu0  ;;  %v465_v0 = vpop.f32.mrb[7].mxu1 }
 0x106   : > { %v481_v1 = vmax.f32 %v431_v55, 0.0  ;;  %v489_v2 = vmax.f32 %v463_v56, 0.0  ;;  %v434_v3 = vadd.f32 %v699_v16, %v433_v63  ;;  %v466_v4 = vadd.f32 %v699_v16, %v465_v0 }
 0x107   : > { %v740_v5 = vpack.c.bf16 %v483_v59, %v483_v59  ;;  %v748_v6 = vpack.c.bf16 %v491_v60, %v491_v60  ;;  %v484_v7 = vmax.f32 %v442_v61, 0.0  ;;  %v492_v8 = vmax.f32 %v474_v62, 0.0 }
 0x108   : > { %v738_v9 = vpack.c.bf16 %v481_v1, %v481_v1  ;;  %v746_v10 = vpack.c.bf16 %v489_v2, %v489_v2  ;;  %v482_v11 = vmax.f32 %v434_v3, 0.0  ;;  %v490_v12 = vmax.f32 %v466_v4, 0.0 }
 0x109   : > { %564 = vst.msk [vmem:[%s966_s17 + $0x18] sm:$0xf] %vm557_vm0, %v740_v5  ;;  %572 = vst.msk [vmem:[%s966_s17 + $0x38] sm:$0xf] %vm557_vm0, %v748_v6  ;;  %v741_v13 = vpack.c.bf16 %v484_v7, %v484_v7  ;;  %v749_v14 = vpack.c.bf16 %v492_v8, %v492_v8 }
 0x10a   : > { %562 = vst.msk [vmem:[%s966_s17 + $0x10] sm:$0xf] %vm557_vm0, %v738_v9  ;;  %570 = vst.msk [vmem:[%s966_s17 + $0x30] sm:$0xf] %vm557_vm0, %v746_v10  ;;  %v739_v15 = vpack.c.bf16 %v482_v11, %v482_v11  ;;  %v747_v16 = vpack.c.bf16 %v490_v12, %v490_v12 }
 0x10b   : > { %565 = vst.msk [vmem:[%s966_s17 + $0x1c] sm:$0xf] %vm557_vm0, %v741_v13  ;;  %573 = vst.msk [vmem:[%s966_s17 + $0x3c] sm:$0xf] %vm557_vm0, %v749_v14 }
 0x10c   : > { %563 = vst.msk [vmem:[%s966_s17 + $0x14] sm:$0xf] %vm557_vm0, %v739_v15  ;;  %571 = vst.msk [vmem:[%s966_s17 + $0x34] sm:$0xf] %vm557_vm0, %v747_v16 }
 0x10d PF: > { %s13_s14 = sadd.s32 1, %s876_s14   ;;  %s1013_s12 = smov %s872_s13 }
 0x10e   : > { %p10_p5 = scmp.ge.s32.totalorder %s13_s14, 6   ;;  %s1014_s13 = smov %s1016_s15 }
 0x110   :  { %12 = sbr.rel (!%p10_p5) target bundleno = 2 (0x2), region = 68 }

// kernel: jointnet_forward.48
= control target key start
LH: loop header
LB: loop body
LE: loop exit
PB: predicated region body
PF: predicated region fallthrough
CT: control target
= control target key end

     0   :  { %s673_s12 = smov 0   ;;  %s675_s13 = smov 0   ;;  %s726_s0 = inlined_call_operand.vmem [shape: bf16[1,128,32], index: 0, kind: input, shape index: {}]   ;;  %s727_s1 = inlined_call_operand.vmem [shape: bf16[1,32,64], index: 1, kind: input, shape index: {}]   ;;  %s728_s2 = inlined_call_operand.vmem [shape: f32[1,1,64], index: 2, kind: input, shape index: {}]   ;;  %s729_s3 = inlined_call_operand.vmem [shape: bf16[1,128,64], index: 3, kind: output, shape index: {}]  }
   0x1   :  { %s677_s14 = smov 0  }
   0x2 LB: > { %s22_s15 = sadd.s32 1, %s647_s13  ;;  %p543_p0 = scmp.ge.s32.totalorder %s651_s14, 1  ;;  %s651_s14 = sphi %s677_s14, %s13_s14   ;;  %s647_s13 = sphi %s675_s13, %s731_s13   ;;  %s643_s12 = sphi %s673_s12, %s730_s12  }
   0x3   : > { %p23_p1 = scmp.ge.s32.totalorder %s22_s15, 2  ;;  %p176_p2 = scmp.lt.s32.totalorder %s651_s14, 3 }
   0x5   : > { %s733_s15 = smov (%p23_p1, %s22_s15), 0  ;;  %p177_p3 = pnand %p543_p0, %p176_p2 }
   0x6   : > { %v623_v0 = vld [vmem:[%s727_s1] sm:$0xff] (!%p177_p3)   ;;  %s544_s18 = sshll.u32 (!%p177_p3), %s643_s12, 3  ;;  %v624_v1 = vld [vmem:[%s727_s1 + $0x8] sm:$0xff] (!%p177_p3)   ;;  %vm296_vm0 = vcmask (!%p177_p3), 261120   ;;  %vm414_vm1 = vcmask (!%p177_p3), 519168  }
   0x7   : > { %180 = sbr.rel (%p177_p3) target bundleno = 241 (0xf1), region = 32  ;;  %p219_p4 = scmp.lt.s32.totalorder (!%p177_p3), %s544_s18, 15  ;;  %583 = vmatprep.subr.bf16.mxu0 (!%p177_p3), %v623_v0  ;;  %595 = vmatprep.subr.bf16.mxu1 (!%p177_p3), %v623_v0  ;;  %v548_v6 = vld [vmem:[%s728_s2] ss:$0 sm:$0xff] (!%p177_p3) }
   0x8   : > { %584 = vmatpush3.bf16.msra.mxu0 (!%p177_p3), %v623_v0  ;;  %597 = vmatpush3.bf16.msra.mxu1 (!%p177_p3), %v623_v0 }
   0x9   : > { %585 = vmatprep.subr.bf16.mxu0 (!%p177_p3), %v624_v1  ;;  %596 = vmatprep.subr.bf16.mxu1 (!%p177_p3), %v624_v1 }
   0xc   : > { %586 = vmatpush3.bf16.msra.mxu0 (!%p177_p3), %v624_v1  ;;  %598 = vmatpush3.bf16.msra.mxu1 (!%p177_p3), %v624_v1 }
   0xe   : > { %s735_s18 = smov (!%p219_p4, %s544_s18), 15 }
   0xf   : > { %s545_s21 = sshll.u32 %s735_s18, 2 }
  0x10   : > { %s224_s24 = scalar_lea.vmem %s726_s0, %s545_s21  ;;  %s242_s29 = scalar_lea.vmem %s729_s3, %s545_s21 }
  0x11   : > { %v625_v2 = vld [vmem:[%s224_s24] sm:$0xff]   ;;  %v626_v3 = vld [vmem:[%s224_s24 + $0x10] sm:$0xff]   ;;  %v627_v4 = vld [vmem:[%s224_s24 + $0x8] sm:$0xff]  }
  0x12   : > { %587 = vmatprep.mubr.msk.bf16.mxu0 %vm296_vm0, %v625_v2  ;;  %591 = vmatprep.mubr.msk.bf16.mxu1 %vm296_vm0, %v626_v3  ;;  %v628_v5 = vld [vmem:[%s224_s24 + $0x18] sm:$0xff]  }
  0x13   : > { %588 = vmatmul.mubr.msk.bf16.vlgmr.msra.gmra.mrb[0].mxu0 %vm296_vm0, %v627_v4  ;;  %592 = vmatmul.mubr.msk.bf16.vlgmr.msra.gmra.mrb[0].mxu1 %vm296_vm0, %v628_v5 }
  0xe6   : > { %v589_v7 = vpop.f32.mrb[0].mxu0  ;;  %v593_v9 = vpop.f32.mrb[0].mxu1 }
  0xe7   : > { %v352_v8 = vadd.f32 %v589_v7, %v548_v6  ;;  %v343_v10 = vpop.f32.mrb[1].mxu0  ;;  %v368_v11 = vadd.f32 %v593_v9, %v548_v6  ;;  %v359_v13 = vpop.f32.mrb[1].mxu1 }
  0xe8   : > { %v344_v12 = vadd.f32 %v548_v6, %v343_v10  ;;  %v590_v14 = vpop.f32.mrb[2].mxu0  ;;  %v360_v16 = vadd.f32 %v548_v6, %v359_v13  ;;  %v594_v18 = vpop.f32.mrb[2].mxu1 }
  0xe9   : > { %v376_v15 = vmax.f32 %v352_v8, 0.0  ;;  %v355_v17 = vadd.f32 %v590_v14, %v548_v6  ;;  %v346_v19 = vpop.f32.mrb[3].mxu0  ;;  %v380_v20 = vmax.f32 %v368_v11, 0.0  ;;  %v371_v22 = vadd.f32 %v594_v18, %v548_v6  ;;  %v362_v24 = vpop.f32.mrb[3].mxu1 }
  0xea   : > { %v374_v21 = vmax.f32 %v344_v12, 0.0  ;;  %v347_v23 = vadd.f32 %v548_v6, %v346_v19  ;;  %v378_v26 = vmax.f32 %v360_v16, 0.0  ;;  %v363_v28 = vadd.f32 %v548_v6, %v362_v24 }
  0xeb   : > { %v571_v25 = vpack.c.bf16 %v376_v15, %v376_v15  ;;  %v377_v27 = vmax.f32 %v355_v17, 0.0  ;;  %v575_v29 = vpack.c.bf16 %v380_v20, %v380_v20  ;;  %v381_v31 = vmax.f32 %v371_v22, 0.0 }
  0xec   : > { %v569_v30 = vpack.c.bf16 %v374_v21, %v374_v21  ;;  %v375_v32 = vmax.f32 %v347_v23, 0.0  ;;  %v573_v33 = vpack.c.bf16 %v378_v26, %v378_v26  ;;  %v379_v35 = vmax.f32 %v363_v28, 0.0 }
  0xed   : > { %417 = vst.msk [vmem:[%s242_s29 + $0x8] sm:$0xf] %vm414_vm1, %v571_v25  ;;  %v572_v34 = vpack.c.bf16 %v377_v27, %v377_v27  ;;  %421 = vst.msk [vmem:[%s242_s29 + $0x18] sm:$0xf] %vm414_vm1, %v575_v29  ;;  %v576_v36 = vpack.c.bf16 %v381_v31, %v381_v31 }
  0xee   : > { %415 = vst.msk [vmem:[%s242_s29] sm:$0xf] %vm414_vm1, %v569_v30  ;;  %v570_v37 = vpack.c.bf16 %v375_v32, %v375_v32  ;;  %419 = vst.msk [vmem:[%s242_s29 + $0x10] sm:$0xf] %vm414_vm1, %v573_v33  ;;  %v574_v38 = vpack.c.bf16 %v379_v35, %v379_v35 }
  0xef   : > { %418 = vst.msk [vmem:[%s242_s29 + $0xc] sm:$0xf] %vm414_vm1, %v572_v34  ;;  %422 = vst.msk [vmem:[%s242_s29 + $0x1c] sm:$0xf] %vm414_vm1, %v576_v36 }
  0xf0   : > { %416 = vst.msk [vmem:[%s242_s29 + $0x4] sm:$0xf] %vm414_vm1, %v570_v37  ;;  %420 = vst.msk [vmem:[%s242_s29 + $0x14] sm:$0xf] %vm414_vm1, %v574_v38 }
  0xf1 PF: > { %s13_s14 = sadd.s32 1, %s651_s14   ;;  %s730_s12 = smov %s647_s13 }
  0xf2   : > { %p10_p5 = scmp.ge.s32.totalorder %s13_s14, 4   ;;  %s731_s13 = smov %s733_s15 }
  0xf4   :  { %12 = sbr.rel (!%p10_p5) target bundleno = 2 (0x2), region = 68 }

// kernel: jointnet_forward.49
= control target key start
LH: loop header
LB: loop body
LE: loop exit
PB: predicated region body
PF: predicated region fallthrough
CT: control target
= control target key end

     0   :  { %s876_s12 = smov 0   ;;  %s878_s13 = smov 0   ;;  %s976_s0 = inlined_call_operand.vmem [shape: bf16[8,128,72], index: 0, kind: input, shape index: {}]   ;;  %s977_s1 = inlined_call_operand.vmem [shape: bf16[8,72,8], index: 1, kind: input, shape index: {}]   ;;  %s978_s2 = inlined_call_operand.vmem [shape: f32[8,1,8], index: 2, kind: input, shape index: {}]   ;;  %s979_s3 = inlined_call_operand.vmem [shape: bf16[8,128,8], index: 3, kind: output, shape index: {}]  }
   0x1   :  { %s880_s14 = smov 0  }
   0x2 LB: > { %s25_s15 = sadd.s32 1, %s850_s13  ;;  %p679_p0 = scmp.ge.s32.totalorder %s854_s14, 1  ;;  %s854_s14 = sphi %s880_s14, %s13_s14   ;;  %s850_s13 = sphi %s878_s13, %s981_s13   ;;  %s846_s12 = sphi %s876_s12, %s980_s12  }
   0x3   : > { %p27_p1 = scmp.ge.s32.totalorder %s25_s15, 8  ;;  %p176_p2 = scmp.lt.s32.totalorder %s854_s14, 9 }
   0x5   : > { %s983_s15 = smov (%p27_p1, %s25_s15), 0  ;;  %p177_p3 = pnand %p679_p0, %p176_p2 }
   0x6   : > { %p217_p4 = scmp.lt.s32.totalorder (!%p177_p3), %s846_s12, 7  ;;  %vm344_vm0 = vcmask (!%p177_p3), 588800   ;;  %vm369_vm1 = vcmask (!%p177_p3), 1043456   ;;  %vm550_vm2 = vcmask (!%p177_p3), 60416  }
   0x7   : > { %180 = sbr.rel (%p177_p3) target bundleno = 269 (0x10d), region = 32 }
   0xe   : > { %s985_s12 = smov (!%p217_p4, %s846_s12), 7 }
   0xf   : > { %s725_s16 = sshll.u32 %s985_s12, 6  ;;  %s794_s17 = smul.u32 36, %s985_s12 }
  0x10   : > { %s903_s20 = scalar_lea.vmem %s976_s0, %s725_s16  ;;  %s233_s26 = scalar_lea.vmem %s978_s2, %s985_s12 }
  0x11   : > { %s230_s23 = scalar_lea.vmem %s977_s1, %s794_s17  ;;  %v824_v3 = vld [vmem:[%s903_s20] sm:$0xff]   ;;  %v826_v8 = vld [vmem:[%s903_s20 + $0x8] sm:$0xff]   ;;  %v828_v10 = vld [vmem:[%s903_s20 + $0x10] sm:$0xff]   ;;  %s933_s29 = scalar_lea.vmem %s979_s3, %s725_s16 }
  0x12   : > { %v819_v0 = vld [vmem:[%s230_s23] sm:$0xff]   ;;  %v820_v1 = vld [vmem:[%s230_s23 + $0x8] sm:$0xff]   ;;  %v821_v2 = vld [vmem:[%s230_s23 + $0x10] sm:$0xff]   ;;  %766 = vmatprep.mubr.msk.bf16.mxu0 %vm344_vm0, %v824_v3 }
  0x13   : > { %756 = vmatprep.subr.bf16.mxu0 %v819_v0  ;;  %782 = vmatprep.subr.bf16.mxu1 %v819_v0  ;;  %v825_v4 = vld [vmem:[%s903_s20 + $0x20] sm:$0xff]   ;;  %v822_v5 = vld [vmem:[%s230_s23 + $0x18] sm:$0xff]   ;;  %v827_v9 = vld [vmem:[%s903_s20 + $0x28] sm:$0xff]  }
  0x14   : > { %757 = vmatpush3.bf16.msra.mxu0 %v819_v0  ;;  %787 = vmatpush3.bf16.msra.mxu1 %v819_v0  ;;  %v823_v6 = vld [vmem:[%s230_s23 + $0x20] ss:$0 sps:$4 sm:$0xff]   ;;  %v829_v11 = vld [vmem:[%s903_s20 + $0x30] sm:$0xff]   ;;  %v830_v12 = vld [vmem:[%s903_s20 + $0x18] sm:$0xff]  }
  0x15   : > { %758 = vmatprep.subr.bf16.mxu0 %v820_v1  ;;  %783 = vmatprep.subr.bf16.mxu1 %v820_v1  ;;  %v371_v7 = vsel %vm369_vm1, %v823_v6, 0  ;;  %v831_v13 = vld [vmem:[%s903_s20 + $0x38] sm:$0xff]   ;;  %v685_v14 = vld [vmem:[%s233_s26] ss:$0 sm:$0xff] }
  0x16   : > { %774 = vmatprep.mubr.msk.bf16.mxu1 %vm344_vm0, %v825_v4 }
  0x18   : > { %759 = vmatpush3.bf16.msra.mxu0 %v820_v1  ;;  %788 = vmatpush3.bf16.msra.mxu1 %v820_v1 }
  0x19   : > { %760 = vmatprep.subr.bf16.mxu0 %v821_v2  ;;  %784 = vmatprep.subr.bf16.mxu1 %v821_v2 }
  0x1c   : > { %761 = vmatpush3.bf16.msra.mxu0 %v821_v2  ;;  %789 = vmatpush3.bf16.msra.mxu1 %v821_v2 }
  0x1d   : > { %762 = vmatprep.subr.bf16.mxu0 %v822_v5  ;;  %785 = vmatprep.subr.bf16.mxu1 %v822_v5 }
  0x20   : > { %763 = vmatpush3.bf16.msra.mxu0 %v822_v5  ;;  %790 = vmatpush3.bf16.msra.mxu1 %v822_v5 }
  0x21   : > { %792 = vmatprep.subr.msk.bf16.mxu0 %vm369_vm1, %v823_v6  ;;  %793 = vmatprep.subr.msk.bf16.mxu1 %vm369_vm1, %v823_v6 }
  0x24   : > { %765 = vmatpush3.bf16.msra.mxu0 %v371_v7  ;;  %791 = vmatpush3.bf16.msra.mxu1 %v371_v7 }
  0x27   : > { %767 = vmatmul.mubr.msk.bf16.vlgmr.msra.gmra.mrb[0].mxu0 %vm344_vm0, %v826_v8  ;;  %775 = vmatmul.mubr.msk.bf16.vlgmr.msra.gmra.mrb[0].mxu1 %vm344_vm0, %v827_v9 }
  0x28   : > { %770 = vmatprep.mubr.msk.bf16.mxu0 %vm344_vm0, %v828_v10  ;;  %778 = vmatprep.mubr.msk.bf16.mxu1 %vm344_vm0, %v829_v11 }
  0x2f   : > { %771 = vmatmul.mubr.msk.bf16.gmra.mrb[4].mxu0 %vm344_vm0, %v830_v12  ;;  %779 = vmatmul.mubr.msk.bf16.gmra.mrb[4].mxu1 %vm344_vm0, %v831_v13 }
  0xfa   : > { %v768_v15 = vpop.f32.mrb[0].mxu0  ;;  %v776_v16 = vpop.f32.mrb[0].mxu1 }
  0xfb   : > { %v416_v17 = vadd.f32 %v768_v15, %v685_v14  ;;  %v448_v18 = vadd.f32 %v776_v16, %v685_v14  ;;  %v407_v19 = vpop.f32.mrb[1].mxu0  ;;  %v439_v20 = vpop.f32.mrb[1].mxu1 }
  0xfc   : > { %v408_v21 = vadd.f32 %v685_v14, %v407_v19  ;;  %v440_v22 = vadd.f32 %v685_v14, %v439_v20  ;;  %v769_v23 = vpop.f32.mrb[2].mxu0  ;;  %v777_v24 = vpop.f32.mrb[2].mxu1 }
  0xfd   : > { %v472_v25 = vmax.f32 %v416_v17, 0.0  ;;  %v480_v26 = vmax.f32 %v448_v18, 0.0  ;;  %v419_v27 = vadd.f32 %v769_v23, %v685_v14  ;;  %v451_v28 = vadd.f32 %v777_v24, %v685_v14  ;;  %v410_v29 = vpop.f32.mrb[3].mxu0  ;;  %v442_v30 = vpop.f32.mrb[3].mxu1 }
  0xfe   : > { %v470_v31 = vmax.f32 %v408_v21, 0.0  ;;  %v478_v32 = vmax.f32 %v440_v22, 0.0  ;;  %v411_v33 = vadd.f32 %v685_v14, %v410_v29  ;;  %v443_v34 = vadd.f32 %v685_v14, %v442_v30 }
  0xff   : > { %v729_v35 = vpack.c.bf16 %v472_v25, %v472_v25  ;;  %v737_v36 = vpack.c.bf16 %v480_v26, %v480_v26  ;;  %v473_v37 = vmax.f32 %v419_v27, 0.0  ;;  %v481_v38 = vmax.f32 %v451_v28, 0.0 }
 0x100   : > { %v727_v39 = vpack.c.bf16 %v470_v31, %v470_v31  ;;  %v735_v40 = vpack.c.bf16 %v478_v32, %v478_v32  ;;  %v471_v41 = vmax.f32 %v411_v33, 0.0  ;;  %v479_v42 = vmax.f32 %v443_v34, 0.0 }
 0x101   : > { %553 = vst.msk [vmem:[%s933_s29 + $0x8] sm:$0xf] %vm550_vm2, %v729_v35  ;;  %561 = vst.msk [vmem:[%s933_s29 + $0x28] sm:$0xf] %vm550_vm2, %v737_v36  ;;  %v730_v43 = vpack.c.bf16 %v473_v37, %v473_v37  ;;  %v738_v44 = vpack.c.bf16 %v481_v38, %v481_v38 }
 0x102   : > { %551 = vst.msk [vmem:[%s933_s29] sm:$0xf] %vm550_vm2, %v727_v39  ;;  %559 = vst.msk [vmem:[%s933_s29 + $0x20] sm:$0xf] %vm550_vm2, %v735_v40  ;;  %v728_v45 = vpack.c.bf16 %v471_v41, %v471_v41  ;;  %v736_v46 = vpack.c.bf16 %v479_v42, %v479_v42  ;;  %v772_v47 = vpop.f32.mrb[4].mxu0  ;;  %v780_v48 = vpop.f32.mrb[4].mxu1 }
 0x103   : > { %554 = vst.msk [vmem:[%s933_s29 + $0xc] sm:$0xf] %vm550_vm2, %v730_v43  ;;  %562 = vst.msk [vmem:[%s933_s29 + $0x2c] sm:$0xf] %vm550_vm2, %v738_v44  ;;  %v432_v49 = vadd.f32 %v772_v47, %v685_v14  ;;  %v464_v50 = vadd.f32 %v780_v48, %v685_v14  ;;  %v423_v51 = vpop.f32.mrb[5].mxu0  ;;  %v455_v52 = vpop.f32.mrb[5].mxu1 }
 0x104   : > { %552 = vst.msk [vmem:[%s933_s29 + $0x4] sm:$0xf] %vm550_vm2, %v728_v45  ;;  %560 = vst.msk [vmem:[%s933_s29 + $0x24] sm:$0xf] %vm550_vm2, %v736_v46  ;;  %v424_v53 = vadd.f32 %v685_v14, %v423_v51  ;;  %v456_v54 = vadd.f32 %v685_v14, %v455_v52  ;;  %v773_v55 = vpop.f32.mrb[6].mxu0  ;;  %v781_v56 = vpop.f32.mrb[6].mxu1 }
 0x105   : > { %v476_v57 = vmax.f32 %v432_v49, 0.0  ;;  %v484_v58 = vmax.f32 %v464_v50, 0.0  ;;  %v435_v59 = vadd.f32 %v773_v55, %v685_v14  ;;  %v467_v60 = vadd.f32 %v781_v56, %v685_v14  ;;  %v426_v61 = vpop.f32.mrb[7].mxu0  ;;  %v458_v62 = vpop.f32.mrb[7].mxu1 }
 0x106   : > { %v474_v63 = vmax.f32 %v424_v53, 0.0  ;;  %v482_v0 = vmax.f32 %v456_v54, 0.0  ;;  %v427_v1 = vadd.f32 %v685_v14, %v426_v61  ;;  %v459_v2 = vadd.f32 %v685_v14, %v458_v62 }
 0x107   : > { %v733_v3 = vpack.c.bf16 %v476_v57, %v476_v57  ;;  %v741_v4 = vpack.c.bf16 %v484_v58, %v484_v58  ;;  %v477_v5 = vmax.f32 %v435_v59, 0.0  ;;  %v485_v6 = vmax.f32 %v467_v60, 0.0 }
 0x108   : > { %v731_v7 = vpack.c.bf16 %v474_v63, %v474_v63  ;;  %v739_v8 = vpack.c.bf16 %v482_v0, %v482_v0  ;;  %v475_v9 = vmax.f32 %v427_v1, 0.0  ;;  %v483_v10 = vmax.f32 %v459_v2, 0.0 }
 0x109   : > { %557 = vst.msk [vmem:[%s933_s29 + $0x18] sm:$0xf] %vm550_vm2, %v733_v3  ;;  %565 = vst.msk [vmem:[%s933_s29 + $0x38] sm:$0xf] %vm550_vm2, %v741_v4  ;;  %v734_v11 = vpack.c.bf16 %v477_v5, %v477_v5  ;;  %v742_v12 = vpack.c.bf16 %v485_v6, %v485_v6 }
 0x10a   : > { %555 = vst.msk [vmem:[%s933_s29 + $0x10] sm:$0xf] %vm550_vm2, %v731_v7  ;;  %563 = vst.msk [vmem:[%s933_s29 + $0x30] sm:$0xf] %vm550_vm2, %v739_v8  ;;  %v732_v13 = vpack.c.bf16 %v475_v9, %v475_v9  ;;  %v740_v14 = vpack.c.bf16 %v483_v10, %v483_v10 }
 0x10b   : > { %558 = vst.msk [vmem:[%s933_s29 + $0x1c] sm:$0xf] %vm550_vm2, %v734_v11  ;;  %566 = vst.msk [vmem:[%s933_s29 + $0x3c] sm:$0xf] %vm550_vm2, %v742_v12 }
 0x10c   : > { %556 = vst.msk [vmem:[%s933_s29 + $0x14] sm:$0xf] %vm550_vm2, %v732_v13  ;;  %564 = vst.msk [vmem:[%s933_s29 + $0x34] sm:$0xf] %vm550_vm2, %v740_v14 }
 0x10d PF: > { %s13_s14 = sadd.s32 1, %s854_s14   ;;  %s980_s12 = smov %s850_s13 }
 0x10e   : > { %p10_p5 = scmp.ge.s32.totalorder %s13_s14, 10   ;;  %s981_s13 = smov %s983_s15 }
 0x110   :  { %12 = sbr.rel (!%p10_p5) target bundleno = 2 (0x2), region = 68 }

// kernel: jointnet_forward.50
= control target key start
LH: loop header
LB: loop body
LE: loop exit
PB: predicated region body
PF: predicated region fallthrough
CT: control target
= control target key end

     0   :  { %s733_s12 = smov 0   ;;  %s735_s13 = smov 0   ;;  %s806_s0 = inlined_call_operand.vmem [shape: bf16[1,128,96], index: 0, kind: input, shape index: {}]   ;;  %s807_s1 = inlined_call_operand.vmem [shape: bf16[1,96,64], index: 1, kind: input, shape index: {}]   ;;  %s808_s2 = inlined_call_operand.vmem [shape: f32[1,1,64], index: 2, kind: input, shape index: {}]   ;;  %s809_s3 = inlined_call_operand.vmem [shape: bf16[1,128,64], index: 3, kind: output, shape index: {}]  }
   0x1   :  { %s737_s14 = smov 0  }
   0x2 LB: > { %s22_s15 = sadd.s32 1, %s707_s13  ;;  %p575_p0 = scmp.ge.s32.totalorder %s711_s14, 1  ;;  %s711_s14 = sphi %s737_s14, %s13_s14   ;;  %s707_s13 = sphi %s735_s13, %s811_s13   ;;  %s703_s12 = sphi %s733_s12, %s810_s12  }
   0x3   : > { %p23_p1 = scmp.ge.s32.totalorder %s22_s15, 2  ;;  %p176_p2 = scmp.lt.s32.totalorder %s711_s14, 3 }
   0x5   : > { %s813_s15 = smov (%p23_p1, %s22_s15), 0  ;;  %p177_p3 = pnand %p575_p0, %p176_p2 }
   0x6   : > { %v679_v0 = vld [vmem:[%s807_s1] sm:$0xff] (!%p177_p3)   ;;  %s576_s18 = sshll.u32 (!%p177_p3), %s703_s12, 3  ;;  %v680_v1 = vld [vmem:[%s807_s1 + $0x8] sm:$0xff] (!%p177_p3)   ;;  %v681_v2 = vld [vmem:[%s807_s1 + $0x10] sm:$0xff] (!%p177_p3)   ;;  %vm328_vm0 = vcmask (!%p177_p3), 785408   ;;  %vm446_vm1 = vcmask (!%p177_p3), 519168  }
   0x7   : > { %180 = sbr.rel (%p177_p3) target bundleno = 253 (0xfd), region = 32  ;;  %p219_p4 = scmp.lt.s32.totalorder (!%p177_p3), %s576_s18, 15  ;;  %623 = vmatprep.subr.bf16.mxu0 (!%p177_p3), %v679_v0  ;;  %643 = vmatprep.subr.bf16.mxu1 (!%p177_p3), %v679_v0  ;;  %v682_v3 = vld [vmem:[%s807_s1 + $0x18] sm:$0xff] (!%p177_p3)   ;;  %v683_v6 = vld [vmem:[%s807_s1 + $0x20] sm:$0xff] (!%p177_p3)   ;;  %v684_v7 = vld [vmem:[%s807_s1 + $0x28] sm:$0xff] (!%p177_p3)  }
   0x8   : > { %624 = vmatpush3.bf16.msra.mxu0 (!%p177_p3), %v679_v0  ;;  %649 = vmatpush3.bf16.msra.mxu1 (!%p177_p3), %v679_v0  ;;  %v580_v10 = vld [vmem:[%s808_s2] ss:$0 sm:$0xff] (!%p177_p3) }
   0x9   : > { %625 = vmatprep.subr.bf16.mxu0 (!%p177_p3), %v680_v1  ;;  %644 = vmatprep.subr.bf16.mxu1 (!%p177_p3), %v680_v1 }
   0xc   : > { %626 = vmatpush3.bf16.msra.mxu0 (!%p177_p3), %v680_v1  ;;  %650 = vmatpush3.bf16.msra.mxu1 (!%p177_p3), %v680_v1 }
   0xd   : > { %627 = vmatprep.subr.bf16.mxu0 (!%p177_p3), %v681_v2  ;;  %645 = vmatprep.subr.bf16.mxu1 (!%p177_p3), %v681_v2 }
   0xe   : > { %s815_s18 = smov (!%p219_p4, %s576_s18), 15 }
   0xf   : > { %s577_s23 = sshll.u32 %s815_s18, 2 }
  0x10   : > { %s224_s28 = scalar_lea.vmem %s806_s0, %s577_s23  ;;  %628 = vmatpush3.bf16.msra.mxu0 %v681_v2  ;;  %651 = vmatpush3.bf16.msra.mxu1 %v681_v2  ;;  %s242_s10 = scalar_lea.vmem %s809_s3, %s577_s23 }
  0x11   : > { %v685_v4 = vld [vmem:[%s224_s28] sm:$0xff]   ;;  %v686_v5 = vld [vmem:[%s224_s28 + $0x10] sm:$0xff]   ;;  %629 = vmatprep.subr.bf16.mxu0 %v682_v3  ;;  %646 = vmatprep.subr.bf16.mxu1 %v682_v3  ;;  %v687_v8 = vld [vmem:[%s224_s28 + $0x8] sm:$0xff]  }
  0x12   : > { %635 = vmatprep.mubr.msk.bf16.mxu0 %vm328_vm0, %v685_v4  ;;  %639 = vmatprep.mubr.msk.bf16.mxu1 %vm328_vm0, %v686_v5  ;;  %v688_v9 = vld [vmem:[%s224_s28 + $0x18] sm:$0xff]  }
  0x14   : > { %630 = vmatpush3.bf16.msra.mxu0 %v682_v3  ;;  %652 = vmatpush3.bf16.msra.mxu1 %v682_v3 }
  0x15   : > { %631 = vmatprep.subr.bf16.mxu0 %v683_v6  ;;  %647 = vmatprep.subr.bf16.mxu1 %v683_v6 }
  0x18   : > { %632 = vmatpush3.bf16.msra.mxu0 %v683_v6  ;;  %653 = vmatpush3.bf16.msra.mxu1 %v683_v6 }
  0x19   : > { %633 = vmatprep.subr.bf16.mxu0 %v684_v7  ;;  %648 = vmatprep.subr.bf16.mxu1 %v684_v7 }
  0x1c   : > { %634 = vmatpush3.bf16.msra.mxu0 %v684_v7  ;;  %654 = vmatpush3.bf16.msra.mxu1 %v684_v7 }
  0x1f   : > { %636 = vmatmul.mubr.msk.bf16.vlgmr.msra.gmra.mrb[0].mxu0 %vm328_vm0, %v687_v8  ;;  %640 = vmatmul.mubr.msk.bf16.vlgmr.msra.gmra.mrb[0].mxu1 %vm328_vm0, %v688_v9 }
  0xf2   : > { %v637_v11 = vpop.f32.mrb[0].mxu0  ;;  %v641_v12 = vpop.f32.mrb[0].mxu1 }
  0xf3   : > { %v384_v13 = vadd.f32 %v637_v11, %v580_v10  ;;  %v400_v14 = vadd.f32 %v641_v12, %v580_v10  ;;  %v375_v15 = vpop.f32.mrb[1].mxu0  ;;  %v391_v16 = vpop.f32.mrb[1].mxu1 }
  0xf4   : > { %v376_v17 = vadd.f32 %v580_v10, %v375_v15  ;;  %v392_v18 = vadd.f32 %v580_v10, %v391_v16  ;;  %v638_v19 = vpop.f32.mrb[2].mxu0  ;;  %v642_v20 = vpop.f32.mrb[2].mxu1 }
  0xf5   : > { %v408_v21 = vmax.f32 %v384_v13, 0.0  ;;  %v412_v22 = vmax.f32 %v400_v14, 0.0  ;;  %v387_v23 = vadd.f32 %v638_v19, %v580_v10  ;;  %v403_v24 = vadd.f32 %v642_v20, %v580_v10  ;;  %v378_v25 = vpop.f32.mrb[3].mxu0  ;;  %v394_v26 = vpop.f32.mrb[3].mxu1 }
  0xf6   : > { %v406_v27 = vmax.f32 %v376_v17, 0.0  ;;  %v410_v28 = vmax.f32 %v392_v18, 0.0  ;;  %v379_v29 = vadd.f32 %v580_v10, %v378_v25  ;;  %v395_v30 = vadd.f32 %v580_v10, %v394_v26 }
  0xf7   : > { %v607_v31 = vpack.c.bf16 %v408_v21, %v408_v21  ;;  %v611_v32 = vpack.c.bf16 %v412_v22, %v412_v22  ;;  %v409_v33 = vmax.f32 %v387_v23, 0.0  ;;  %v413_v34 = vmax.f32 %v403_v24, 0.0 }
  0xf8   : > { %v605_v35 = vpack.c.bf16 %v406_v27, %v406_v27  ;;  %v609_v36 = vpack.c.bf16 %v410_v28, %v410_v28  ;;  %v407_v37 = vmax.f32 %v379_v29, 0.0  ;;  %v411_v38 = vmax.f32 %v395_v30, 0.0 }
  0xf9   : > { %449 = vst.msk [vmem:[%s242_s10 + $0x8] sm:$0xf] %vm446_vm1, %v607_v31  ;;  %453 = vst.msk [vmem:[%s242_s10 + $0x18] sm:$0xf] %vm446_vm1, %v611_v32  ;;  %v608_v39 = vpack.c.bf16 %v409_v33, %v409_v33  ;;  %v612_v40 = vpack.c.bf16 %v413_v34, %v413_v34 }
  0xfa   : > { %447 = vst.msk [vmem:[%s242_s10] sm:$0xf] %vm446_vm1, %v605_v35  ;;  %451 = vst.msk [vmem:[%s242_s10 + $0x10] sm:$0xf] %vm446_vm1, %v609_v36  ;;  %v606_v41 = vpack.c.bf16 %v407_v37, %v407_v37  ;;  %v610_v42 = vpack.c.bf16 %v411_v38, %v411_v38 }
  0xfb   : > { %450 = vst.msk [vmem:[%s242_s10 + $0xc] sm:$0xf] %vm446_vm1, %v608_v39  ;;  %454 = vst.msk [vmem:[%s242_s10 + $0x1c] sm:$0xf] %vm446_vm1, %v612_v40 }
  0xfc   : > { %448 = vst.msk [vmem:[%s242_s10 + $0x4] sm:$0xf] %vm446_vm1, %v606_v41  ;;  %452 = vst.msk [vmem:[%s242_s10 + $0x14] sm:$0xf] %vm446_vm1, %v610_v42 }
  0xfd PF: > { %s13_s14 = sadd.s32 1, %s711_s14   ;;  %s810_s12 = smov %s707_s13 }
  0xfe   : > { %p10_p5 = scmp.ge.s32.totalorder %s13_s14, 4   ;;  %s811_s13 = smov %s813_s15 }
 0x100   :  { %12 = sbr.rel (!%p10_p5) target bundleno = 2 (0x2), region = 68 }

// kernel: jointnet_forward.52
= control target key start
LH: loop header
LB: loop body
LE: loop exit
PB: predicated region body
PF: predicated region fallthrough
CT: control target
= control target key end

     0   :  { %s789_s12 = smov 0   ;;  %s791_s13 = smov 0   ;;  %s891_s0 = inlined_call_operand.vmem [shape: bf16[1,128,160], index: 0, kind: input, shape index: {}]   ;;  %s892_s1 = inlined_call_operand.vmem [shape: bf16[1,160,64], index: 1, kind: input, shape index: {}]   ;;  %s893_s2 = inlined_call_operand.vmem [shape: f32[1,1,64], index: 2, kind: input, shape index: {}]   ;;  %s894_s3 = inlined_call_operand.vmem [shape: bf16[1,128,64], index: 3, kind: output, shape index: {}]  }
   0x1   :  { %s793_s14 = smov 0  }
   0x2 LB: > { %s22_s15 = sadd.s32 1, %s762_s13  ;;  %p629_p0 = scmp.ge.s32.totalorder %s766_s14, 1  ;;  %s766_s14 = sphi %s793_s14, %s13_s14   ;;  %s762_s13 = sphi %s791_s13, %s896_s13   ;;  %s758_s12 = sphi %s789_s12, %s895_s12  }
   0x3   : > { %p23_p1 = scmp.ge.s32.totalorder %s22_s15, 2  ;;  %p177_p2 = scmp.lt.s32.totalorder %s766_s14, 3 }
   0x5   : > { %s898_s15 = smov (%p23_p1, %s22_s15), 0  ;;  %p178_p3 = pnand %p629_p0, %p177_p2 }
   0x6   : > { %v722_v0 = vld [vmem:[%s892_s1] sm:$0xff] (!%p178_p3)   ;;  %v768_v1 = vmov (!%p178_p3), 0   ;;  %s630_s18 = sshll.u32 (!%p178_p3), %s758_s12, 3  ;;  %v723_v2 = vld [vmem:[%s892_s1 + $0x8] sm:$0xff] (!%p178_p3)   ;;  %v724_v3 = vld [vmem:[%s892_s1 + $0x10] sm:$0xff] (!%p178_p3)   ;;  %vm379_vm0 = vcmask (!%p178_p3), 261120  }
   0x7   : > { %181 = sbr.rel (%p178_p3) target bundleno = 276 (0x114), region = 32  ;;  %392 = vmatprep.subr.bf16.mxu0 (!%p178_p3), %v768_v1  ;;  %677 = vmatprep.subr.bf16.mxu1 (!%p178_p3), %v768_v1  ;;  %p221_p4 = scmp.lt.s32.totalorder (!%p178_p3), %s630_s18, 15  ;;  %v725_v4 = vld [vmem:[%s892_s1 + $0x18] sm:$0xff] (!%p178_p3)   ;;  %v726_v7 = vld [vmem:[%s892_s1 + $0x20] sm:$0xff] (!%p178_p3)   ;;  %v727_v8 = vld [vmem:[%s892_s1 + $0x28] sm:$0xff] (!%p178_p3)   ;;  %vm497_vm1 = vcmask (!%p178_p3), 519168  }
   0x8   : > { %393 = vmatpush1.bf16.msra.mxu0 (!%p178_p3), %v722_v0  ;;  %687 = vmatpush1.bf16.msra.mxu1 (!%p178_p3), %v722_v0  ;;  %v728_v9 = vld [vmem:[%s892_s1 + $0x30] sm:$0xff] (!%p178_p3)   ;;  %v729_v10 = vld [vmem:[%s892_s1 + $0x38] sm:$0xff] (!%p178_p3)   ;;  %v730_v11 = vld [vmem:[%s892_s1 + $0x40] sm:$0xff] (!%p178_p3)  }
   0x9   : > { %394 = vmatprep.subr.bf16.mxu0 (!%p178_p3), %v768_v1  ;;  %678 = vmatprep.subr.bf16.mxu1 (!%p178_p3), %v768_v1  ;;  %v731_v12 = vld [vmem:[%s892_s1 + $0x48] sm:$0xff] (!%p178_p3)   ;;  %v635_v19 = vld [vmem:[%s893_s2] ss:$0 sm:$0xff] (!%p178_p3) }
   0xc   : > { %395 = vmatpush1.bf16.msra.mxu0 (!%p178_p3), %v723_v2  ;;  %688 = vmatpush1.bf16.msra.mxu1 (!%p178_p3), %v723_v2 }
   0xd   : > { %396 = vmatprep.subr.bf16.mxu0 (!%p178_p3), %v768_v1  ;;  %679 = vmatprep.subr.bf16.mxu1 (!%p178_p3), %v768_v1 }
   0xe   : > { %s900_s18 = smov (!%p221_p4, %s630_s18), 15 }
   0xf   : > { %s668_s23 = sshll.u32 %s900_s18, 3  ;;  %s634_s20 = sshll.u32 %s900_s18, 2 }
  0x10   : > { %s822_s26 = scalar_lea.vmem %s891_s0, %s668_s23  ;;  %397 = vmatpush1.bf16.msra.mxu0 %v724_v3  ;;  %689 = vmatpush1.bf16.msra.mxu1 %v724_v3  ;;  %s864_s23 = scalar_lea.vmem %s894_s3, %s634_s20 }
  0x11   : > { %398 = vmatprep.subr.bf16.mxu0 %v768_v1  ;;  %680 = vmatprep.subr.bf16.mxu1 %v768_v1  ;;  %v734_v5 = vld [vmem:[%s822_s26 + $0x4] ss:$8 sps:$4 sm:$0xff]   ;;  %v732_v13 = vld [vmem:[%s822_s26] ss:$8 sps:$4 sm:$0xff]   ;;  %v738_v15 = vld [vmem:[%s822_s26 + $0x14] ss:$8 sps:$4 sm:$0xff]  }
  0x12   : > { %v737_v6 = vld [vmem:[%s822_s26 + $0x24] ss:$8 sps:$4 sm:$0xff]   ;;  %654 = vmatprep.mubr.msk.bf16.mxu0 %vm379_vm0, %v734_v5  ;;  %v735_v14 = vld [vmem:[%s822_s26 + $0x20] ss:$8 sps:$4 sm:$0xff]   ;;  %v740_v16 = vld [vmem:[%s822_s26 + $0x34] ss:$8 sps:$4 sm:$0xff]  }
  0x13   : > { %656 = vmatprep.mubr.msk.bf16.mxu1 %vm379_vm0, %v737_v6  ;;  %v742_v17 = vld [vmem:[%s822_s26 + $0x10] ss:$8 sps:$4 sm:$0xff]  }
  0x14   : > { %399 = vmatpush1.bf16.msra.mxu0 %v725_v4  ;;  %690 = vmatpush1.bf16.msra.mxu1 %v725_v4  ;;  %v743_v18 = vld [vmem:[%s822_s26 + $0x30] ss:$8 sps:$4 sm:$0xff]  }
  0x15   : > { %400 = vmatprep.subr.bf16.mxu0 %v768_v1  ;;  %681 = vmatprep.subr.bf16.mxu1 %v768_v1 }
  0x18   : > { %401 = vmatpush1.bf16.msra.mxu0 %v726_v7  ;;  %691 = vmatpush1.bf16.msra.mxu1 %v726_v7 }
  0x19   : > { %402 = vmatprep.subr.bf16.mxu0 %v768_v1  ;;  %682 = vmatprep.subr.bf16.mxu1 %v768_v1 }
  0x1c   : > { %403 = vmatpush1.bf16.msra.mxu0 %v727_v8  ;;  %692 = vmatpush1.bf16.msra.mxu1 %v727_v8 }
  0x1d   : > { %404 = vmatprep.subr.bf16.mxu0 %v768_v1  ;;  %683 = vmatprep.subr.bf16.mxu1 %v768_v1 }
  0x20   : > { %405 = vmatpush1.bf16.msra.mxu0 %v728_v9  ;;  %693 = vmatpush1.bf16.msra.mxu1 %v728_v9 }
  0x21   : > { %406 = vmatprep.subr.bf16.mxu0 %v768_v1  ;;  %684 = vmatprep.subr.bf16.mxu1 %v768_v1 }
  0x24   : > { %407 = vmatpush1.bf16.msra.mxu0 %v729_v10  ;;  %694 = vmatpush1.bf16.msra.mxu1 %v729_v10 }
  0x25   : > { %408 = vmatprep.subr.bf16.mxu0 %v768_v1  ;;  %685 = vmatprep.subr.bf16.mxu1 %v768_v1 }
  0x28   : > { %409 = vmatpush1.bf16.msra.mxu0 %v730_v11  ;;  %695 = vmatpush1.bf16.msra.mxu1 %v730_v11 }
  0x29   : > { %410 = vmatprep.subr.bf16.mxu0 %v768_v1  ;;  %686 = vmatprep.subr.bf16.mxu1 %v768_v1 }
  0x2c   : > { %411 = vmatpush1.bf16.msra.mxu0 %v731_v12  ;;  %696 = vmatpush1.bf16.msra.mxu1 %v731_v12 }
  0x2f   : > { %425 = vmatmul.mubr.bf16.vlgmr.msra.gmra.mrb[0].mxu0 %v732_v13  ;;  %441 = vmatmul.mubr.bf16.vlgmr.msra.gmra.mrb[0].mxu1 %v735_v14 }
  0x30   : > { %655 = vmatprep.mubr.msk.bf16.mxu0 %vm379_vm0, %v738_v15  ;;  %657 = vmatprep.mubr.msk.bf16.mxu1 %vm379_vm0, %v740_v16 }
  0x37   : > { %433 = vmatmul.mubr.bf16.gmra.mrb[4].mxu0 %v742_v17  ;;  %449 = vmatmul.mubr.bf16.gmra.mrb[4].mxu1 %v743_v18 }
 0x102   : > { %v426_v20 = vpop.f32.mrb[0].mxu0  ;;  %v442_v21 = vpop.f32.mrb[0].mxu1 }
 0x103   : > { %v427_v22 = vadd.f32 %v635_v19, %v426_v20  ;;  %v443_v23 = vadd.f32 %v635_v19, %v442_v21  ;;  %v428_v24 = vpop.f32.mrb[1].mxu0  ;;  %v444_v25 = vpop.f32.mrb[1].mxu1 }
 0x104   : > { %v429_v26 = vpop.f32.mrb[2].mxu0  ;;  %v445_v27 = vpop.f32.mrb[2].mxu1 }
 0x105   : > { %v457_v28 = vmax.f32 %v427_v22, 0.0  ;;  %v461_v29 = vmax.f32 %v443_v23, 0.0  ;;  %v430_v30 = vadd.f32 %v635_v19, %v429_v26  ;;  %v446_v31 = vadd.f32 %v635_v19, %v445_v27  ;;  %v431_v32 = vpop.f32.mrb[3].mxu0  ;;  %v447_v33 = vpop.f32.mrb[3].mxu1 }
 0x107   : > { %v669_v34 = vpack.c.bf16 %v457_v28, %v457_v28  ;;  %v673_v35 = vpack.c.bf16 %v461_v29, %v461_v29  ;;  %v458_v36 = vmax.f32 %v430_v30, 0.0  ;;  %v462_v37 = vmax.f32 %v446_v31, 0.0 }
 0x109   : > { %498 = vst.msk [vmem:[%s864_s23] sm:$0xf] %vm497_vm1, %v669_v34  ;;  %502 = vst.msk [vmem:[%s864_s23 + $0x10] sm:$0xf] %vm497_vm1, %v673_v35  ;;  %v670_v38 = vpack.c.bf16 %v458_v36, %v458_v36  ;;  %v674_v39 = vpack.c.bf16 %v462_v37, %v462_v37 }
 0x10a   : > { %v434_v40 = vpop.f32.mrb[4].mxu0  ;;  %v450_v41 = vpop.f32.mrb[4].mxu1 }
 0x10b   : > { %499 = vst.msk [vmem:[%s864_s23 + $0x4] sm:$0xf] %vm497_vm1, %v670_v38  ;;  %503 = vst.msk [vmem:[%s864_s23 + $0x14] sm:$0xf] %vm497_vm1, %v674_v39  ;;  %v435_v42 = vadd.f32 %v635_v19, %v434_v40  ;;  %v451_v43 = vadd.f32 %v635_v19, %v450_v41  ;;  %v436_v44 = vpop.f32.mrb[5].mxu0  ;;  %v452_v45 = vpop.f32.mrb[5].mxu1 }
 0x10c   : > { %v437_v46 = vpop.f32.mrb[6].mxu0  ;;  %v453_v47 = vpop.f32.mrb[6].mxu1 }
 0x10d   : > { %v459_v48 = vmax.f32 %v435_v42, 0.0  ;;  %v463_v49 = vmax.f32 %v451_v43, 0.0  ;;  %v438_v50 = vadd.f32 %v635_v19, %v437_v46  ;;  %v454_v51 = vadd.f32 %v635_v19, %v453_v47  ;;  %v439_v52 = vpop.f32.mrb[7].mxu0  ;;  %v455_v53 = vpop.f32.mrb[7].mxu1 }
 0x10f   : > { %v671_v54 = vpack.c.bf16 %v459_v48, %v459_v48  ;;  %v675_v55 = vpack.c.bf16 %v463_v49, %v463_v49  ;;  %v460_v56 = vmax.f32 %v438_v50, 0.0  ;;  %v464_v57 = vmax.f32 %v454_v51, 0.0 }
 0x111   : > { %500 = vst.msk [vmem:[%s864_s23 + $0x8] sm:$0xf] %vm497_vm1, %v671_v54  ;;  %504 = vst.msk [vmem:[%s864_s23 + $0x18] sm:$0xf] %vm497_vm1, %v675_v55  ;;  %v672_v58 = vpack.c.bf16 %v460_v56, %v460_v56  ;;  %v676_v59 = vpack.c.bf16 %v464_v57, %v464_v57 }
 0x113   : > { %501 = vst.msk [vmem:[%s864_s23 + $0xc] sm:$0xf] %vm497_vm1, %v672_v58  ;;  %505 = vst.msk [vmem:[%s864_s23 + $0x1c] sm:$0xf] %vm497_vm1, %v676_v59 }
 0x114 PF: > { %s13_s14 = sadd.s32 1, %s766_s14   ;;  %s895_s12 = smov %s762_s13 }
 0x115   : > { %p10_p5 = scmp.ge.s32.totalorder %s13_s14, 4   ;;  %s896_s13 = smov %s898_s15 }
 0x117   :  { %12 = sbr.rel (!%p10_p5) target bundleno = 2 (0x2), region = 68 }

// kernel: jointnet_forward.54
= control target key start
LH: loop header
LB: loop body
LE: loop exit
PB: predicated region body
PF: predicated region fallthrough
CT: control target
= control target key end

     0   :  { %s837_s12 = smov 0   ;;  %s839_s13 = smov 0   ;;  %s979_s0 = inlined_call_operand.vmem [shape: bf16[1,128,224], index: 0, kind: input, shape index: {}]   ;;  %s980_s1 = inlined_call_operand.vmem [shape: bf16[1,224,64], index: 1, kind: input, shape index: {}]   ;;  %s981_s2 = inlined_call_operand.vmem [shape: f32[1,1,64], index: 2, kind: input, shape index: {}]   ;;  %s982_s3 = inlined_call_operand.vmem [shape: bf16[1,128,64], index: 3, kind: output, shape index: {}]  }
   0x1   :  { %s841_s14 = smov 0  }
   0x2 LB: > { %s22_s15 = sadd.s32 1, %s810_s13  ;;  %p661_p0 = scmp.ge.s32.totalorder %s814_s14, 1  ;;  %s814_s14 = sphi %s841_s14, %s13_s14   ;;  %s810_s13 = sphi %s839_s13, %s984_s13   ;;  %s806_s12 = sphi %s837_s12, %s983_s12  }
   0x3   : > { %p23_p1 = scmp.ge.s32.totalorder %s22_s15, 2  ;;  %p177_p2 = scmp.lt.s32.totalorder %s814_s14, 3 }
   0x5   : > { %s986_s15 = smov (%p23_p1, %s22_s15), 0  ;;  %p178_p3 = pnand %p661_p0, %p177_p2 }
   0x6   : > { %v766_v0 = vld [vmem:[%s980_s1] sm:$0xff] (!%p178_p3)   ;;  %v816_v1 = vmov (!%p178_p3), 0   ;;  %s662_s18 = sshll.u32 (!%p178_p3), %s806_s12, 3  ;;  %v767_v2 = vld [vmem:[%s980_s1 + $0x8] sm:$0xff] (!%p178_p3)   ;;  %v768_v3 = vld [vmem:[%s980_s1 + $0x10] sm:$0xff] (!%p178_p3)   ;;  %vm411_vm0 = vcmask (!%p178_p3), 785408  }
   0x7   : > { %181 = sbr.rel (%p178_p3) target bundleno = 292 (0x124), region = 32  ;;  %424 = vmatprep.subr.bf16.mxu0 (!%p178_p3), %v816_v1  ;;  %713 = vmatprep.subr.bf16.mxu1 (!%p178_p3), %v816_v1  ;;  %p221_p4 = scmp.lt.s32.totalorder (!%p178_p3), %s662_s18, 15  ;;  %v769_v4 = vld [vmem:[%s980_s1 + $0x18] sm:$0xff] (!%p178_p3)   ;;  %v770_v5 = vld [vmem:[%s980_s1 + $0x20] sm:$0xff] (!%p178_p3)   ;;  %v771_v8 = vld [vmem:[%s980_s1 + $0x28] sm:$0xff] (!%p178_p3)   ;;  %vm529_vm1 = vcmask (!%p178_p3), 519168  }
   0x8   : > { %425 = vmatpush1.bf16.msra.mxu0 (!%p178_p3), %v766_v0  ;;  %727 = vmatpush1.bf16.msra.mxu1 (!%p178_p3), %v766_v0  ;;  %v772_v9 = vld [vmem:[%s980_s1 + $0x30] sm:$0xff] (!%p178_p3)   ;;  %v773_v10 = vld [vmem:[%s980_s1 + $0x38] sm:$0xff] (!%p178_p3)   ;;  %v774_v11 = vld [vmem:[%s980_s1 + $0x40] sm:$0xff] (!%p178_p3)  }
   0x9   : > { %426 = vmatprep.subr.bf16.mxu0 (!%p178_p3), %v816_v1  ;;  %714 = vmatprep.subr.bf16.mxu1 (!%p178_p3), %v816_v1  ;;  %v775_v12 = vld [vmem:[%s980_s1 + $0x48] sm:$0xff] (!%p178_p3)   ;;  %v776_v13 = vld [vmem:[%s980_s1 + $0x50] sm:$0xff] (!%p178_p3)   ;;  %v777_v14 = vld [vmem:[%s980_s1 + $0x58] sm:$0xff] (!%p178_p3)  }
   0xa   : > { %v778_v15 = vld [vmem:[%s980_s1 + $0x60] sm:$0xff] (!%p178_p3)   ;;  %v779_v16 = vld [vmem:[%s980_s1 + $0x68] sm:$0xff] (!%p178_p3)  }
   0xb   : > { %v667_v23 = vld [vmem:[%s981_s2] ss:$0 sm:$0xff] (!%p178_p3) }
   0xc   : > { %427 = vmatpush1.bf16.msra.mxu0 (!%p178_p3), %v767_v2  ;;  %728 = vmatpush1.bf16.msra.mxu1 (!%p178_p3), %v767_v2 }
   0xd   : > { %428 = vmatprep.subr.bf16.mxu0 (!%p178_p3), %v816_v1  ;;  %715 = vmatprep.subr.bf16.mxu1 (!%p178_p3), %v816_v1 }
   0xe   : > { %s988_s18 = smov (!%p221_p4, %s662_s18), 15 }
   0xf   : > { %s704_s23 = sshll.u32 %s988_s18, 3  ;;  %s666_s29 = sshll.u32 %s988_s18, 2 }
  0x10   : > { %429 = vmatpush1.bf16.msra.mxu0 %v768_v3  ;;  %729 = vmatpush1.bf16.msra.mxu1 %v768_v3  ;;  %s881_s28 = scalar_lea.vmem %s979_s0, %s704_s23  ;;  %s952_s4 = scalar_lea.vmem %s982_s3, %s666_s29 }
  0x11   : > { %430 = vmatprep.subr.bf16.mxu0 %v816_v1  ;;  %716 = vmatprep.subr.bf16.mxu1 %v816_v1  ;;  %v782_v6 = vld [vmem:[%s881_s28 + $0x4] ss:$8 sps:$4 sm:$0xff]   ;;  %v780_v17 = vld [vmem:[%s881_s28] ss:$8 sps:$4 sm:$0xff]   ;;  %v786_v19 = vld [vmem:[%s881_s28 + $0x14] ss:$8 sps:$4 sm:$0xff]  }
  0x12   : > { %v785_v7 = vld [vmem:[%s881_s28 + $0x24] ss:$8 sps:$4 sm:$0xff]   ;;  %690 = vmatprep.mubr.msk.bf16.mxu0 %vm411_vm0, %v782_v6  ;;  %v783_v18 = vld [vmem:[%s881_s28 + $0x20] ss:$8 sps:$4 sm:$0xff]   ;;  %v788_v20 = vld [vmem:[%s881_s28 + $0x34] ss:$8 sps:$4 sm:$0xff]  }
  0x13   : > { %692 = vmatprep.mubr.msk.bf16.mxu1 %vm411_vm0, %v785_v7  ;;  %v790_v21 = vld [vmem:[%s881_s28 + $0x10] ss:$8 sps:$4 sm:$0xff]  }
  0x14   : > { %431 = vmatpush1.bf16.msra.mxu0 %v769_v4  ;;  %730 = vmatpush1.bf16.msra.mxu1 %v769_v4  ;;  %v791_v22 = vld [vmem:[%s881_s28 + $0x30] ss:$8 sps:$4 sm:$0xff]  }
  0x15   : > { %432 = vmatprep.subr.bf16.mxu0 %v816_v1  ;;  %717 = vmatprep.subr.bf16.mxu1 %v816_v1 }
  0x18   : > { %433 = vmatpush1.bf16.msra.mxu0 %v770_v5  ;;  %731 = vmatpush1.bf16.msra.mxu1 %v770_v5 }
  0x19   : > { %434 = vmatprep.subr.bf16.mxu0 %v816_v1  ;;  %718 = vmatprep.subr.bf16.mxu1 %v816_v1 }
  0x1c   : > { %435 = vmatpush1.bf16.msra.mxu0 %v771_v8  ;;  %732 = vmatpush1.bf16.msra.mxu1 %v771_v8 }
  0x1d   : > { %436 = vmatprep.subr.bf16.mxu0 %v816_v1  ;;  %719 = vmatprep.subr.bf16.mxu1 %v816_v1 }
  0x20   : > { %437 = vmatpush1.bf16.msra.mxu0 %v772_v9  ;;  %733 = vmatpush1.bf16.msra.mxu1 %v772_v9 }
  0x21   : > { %438 = vmatprep.subr.bf16.mxu0 %v816_v1  ;;  %720 = vmatprep.subr.bf16.mxu1 %v816_v1 }
  0x24   : > { %439 = vmatpush1.bf16.msra.mxu0 %v773_v10  ;;  %734 = vmatpush1.bf16.msra.mxu1 %v773_v10 }
  0x25   : > { %440 = vmatprep.subr.bf16.mxu0 %v816_v1  ;;  %721 = vmatprep.subr.bf16.mxu1 %v816_v1 }
  0x28   : > { %441 = vmatpush1.bf16.msra.mxu0 %v774_v11  ;;  %735 = vmatpush1.bf16.msra.mxu1 %v774_v11 }
  0x29   : > { %442 = vmatprep.subr.bf16.mxu0 %v816_v1  ;;  %722 = vmatprep.subr.bf16.mxu1 %v816_v1 }
  0x2c   : > { %443 = vmatpush1.bf16.msra.mxu0 %v775_v12  ;;  %736 = vmatpush1.bf16.msra.mxu1 %v775_v12 }
  0x2d   : > { %444 = vmatprep.subr.bf16.mxu0 %v816_v1  ;;  %723 = vmatprep.subr.bf16.mxu1 %v816_v1 }
  0x30   : > { %445 = vmatpush1.bf16.msra.mxu0 %v776_v13  ;;  %737 = vmatpush1.bf16.msra.mxu1 %v776_v13 }
  0x31   : > { %446 = vmatprep.subr.bf16.mxu0 %v816_v1  ;;  %724 = vmatprep.subr.bf16.mxu1 %v816_v1 }
  0x34   : > { %447 = vmatpush1.bf16.msra.mxu0 %v777_v14  ;;  %738 = vmatpush1.bf16.msra.mxu1 %v777_v14 }
  0x35   : > { %448 = vmatprep.subr.bf16.mxu0 %v816_v1  ;;  %725 = vmatprep.subr.bf16.mxu1 %v816_v1 }
  0x38   : > { %449 = vmatpush1.bf16.msra.mxu0 %v778_v15  ;;  %739 = vmatpush1.bf16.msra.mxu1 %v778_v15 }
  0x39   : > { %450 = vmatprep.subr.bf16.mxu0 %v816_v1  ;;  %726 = vmatprep.subr.bf16.mxu1 %v816_v1 }
  0x3c   : > { %451 = vmatpush1.bf16.msra.mxu0 %v779_v16  ;;  %740 = vmatpush1.bf16.msra.mxu1 %v779_v16 }
  0x3f   : > { %457 = vmatmul.mubr.bf16.vlgmr.msra.gmra.mrb[0].mxu0 %v780_v17  ;;  %473 = vmatmul.mubr.bf16.vlgmr.msra.gmra.mrb[0].mxu1 %v783_v18 }
  0x40   : > { %691 = vmatprep.mubr.msk.bf16.mxu0 %vm411_vm0, %v786_v19  ;;  %693 = vmatprep.mubr.msk.bf16.mxu1 %vm411_vm0, %v788_v20 }
  0x47   : > { %465 = vmatmul.mubr.bf16.gmra.mrb[4].mxu0 %v790_v21  ;;  %481 = vmatmul.mubr.bf16.gmra.mrb[4].mxu1 %v791_v22 }
 0x112   : > { %v458_v24 = vpop.f32.mrb[0].mxu0  ;;  %v474_v25 = vpop.f32.mrb[0].mxu1 }
 0x113   : > { %v459_v26 = vadd.f32 %v667_v23, %v458_v24  ;;  %v475_v27 = vadd.f32 %v667_v23, %v474_v25  ;;  %v460_v28 = vpop.f32.mrb[1].mxu0  ;;  %v476_v29 = vpop.f32.mrb[1].mxu1 }
 0x114   : > { %v461_v30 = vpop.f32.mrb[2].mxu0  ;;  %v477_v31 = vpop.f32.mrb[2].mxu1 }
 0x115   : > { %v489_v32 = vmax.f32 %v459_v26, 0.0  ;;  %v493_v33 = vmax.f32 %v475_v27, 0.0  ;;  %v462_v34 = vadd.f32 %v667_v23, %v461_v30  ;;  %v478_v35 = vadd.f32 %v667_v23, %v477_v31  ;;  %v463_v36 = vpop.f32.mrb[3].mxu0  ;;  %v479_v37 = vpop.f32.mrb[3].mxu1 }
 0x117   : > { %v705_v38 = vpack.c.bf16 %v489_v32, %v489_v32  ;;  %v709_v39 = vpack.c.bf16 %v493_v33, %v493_v33  ;;  %v490_v40 = vmax.f32 %v462_v34, 0.0  ;;  %v494_v41 = vmax.f32 %v478_v35, 0.0 }
 0x119   : > { %530 = vst.msk [vmem:[%s952_s4] sm:$0xf] %vm529_vm1, %v705_v38  ;;  %534 = vst.msk [vmem:[%s952_s4 + $0x10] sm:$0xf] %vm529_vm1, %v709_v39  ;;  %v706_v42 = vpack.c.bf16 %v490_v40, %v490_v40  ;;  %v710_v43 = vpack.c.bf16 %v494_v41, %v494_v41 }
 0x11a   : > { %v466_v44 = vpop.f32.mrb[4].mxu0  ;;  %v482_v45 = vpop.f32.mrb[4].mxu1 }
 0x11b   : > { %531 = vst.msk [vmem:[%s952_s4 + $0x4] sm:$0xf] %vm529_vm1, %v706_v42  ;;  %535 = vst.msk [vmem:[%s952_s4 + $0x14] sm:$0xf] %vm529_vm1, %v710_v43  ;;  %v467_v46 = vadd.f32 %v667_v23, %v466_v44  ;;  %v483_v47 = vadd.f32 %v667_v23, %v482_v45  ;;  %v468_v48 = vpop.f32.mrb[5].mxu0  ;;  %v484_v49 = vpop.f32.mrb[5].mxu1 }
 0x11c   : > { %v469_v50 = vpop.f32.mrb[6].mxu0  ;;  %v485_v51 = vpop.f32.mrb[6].mxu1 }
 0x11d   : > { %v491_v52 = vmax.f32 %v467_v46, 0.0  ;;  %v495_v53 = vmax.f32 %v483_v47, 0.0  ;;  %v470_v54 = vadd.f32 %v667_v23, %v469_v50  ;;  %v486_v55 = vadd.f32 %v667_v23, %v485_v51  ;;  %v471_v56 = vpop.f32.mrb[7].mxu0  ;;  %v487_v57 = vpop.f32.mrb[7].mxu1 }
 0x11f   : > { %v707_v58 = vpack.c.bf16 %v491_v52, %v491_v52  ;;  %v711_v59 = vpack.c.bf16 %v495_v53, %v495_v53  ;;  %v492_v60 = vmax.f32 %v470_v54, 0.0  ;;  %v496_v61 = vmax.f32 %v486_v55, 0.0 }
 0x121   : > { %532 = vst.msk [vmem:[%s952_s4 + $0x8] sm:$0xf] %vm529_vm1, %v707_v58  ;;  %536 = vst.msk [vmem:[%s952_s4 + $0x18] sm:$0xf] %vm529_vm1, %v711_v59  ;;  %v708_v62 = vpack.c.bf16 %v492_v60, %v492_v60  ;;  %v712_v63 = vpack.c.bf16 %v496_v61, %v496_v61 }
 0x123   : > { %533 = vst.msk [vmem:[%s952_s4 + $0xc] sm:$0xf] %vm529_vm1, %v708_v62  ;;  %537 = vst.msk [vmem:[%s952_s4 + $0x1c] sm:$0xf] %vm529_vm1, %v712_v63 }
 0x124 PF: > { %s13_s14 = sadd.s32 1, %s814_s14   ;;  %s983_s12 = smov %s810_s13 }
 0x125   : > { %p10_p5 = scmp.ge.s32.totalorder %s13_s14, 4   ;;  %s984_s13 = smov %s986_s15 }
 0x127   :  { %12 = sbr.rel (!%p10_p5) target bundleno = 2 (0x2), region = 68 }

// kernel: jointnet_forward.56
= control target key start
LH: loop header
LB: loop body
LE: loop exit
PB: predicated region body
PF: predicated region fallthrough
CT: control target
= control target key end

     0   :  { %s870_s12 = smov 0   ;;  %s872_s13 = smov 0   ;;  %s986_s0 = inlined_call_operand.vmem [shape: bf16[1,128,256], index: 0, kind: input, shape index: {}]   ;;  %s987_s1 = inlined_call_operand.vmem [shape: bf16[1,256,64], index: 1, kind: input, shape index: {}]   ;;  %s988_s2 = inlined_call_operand.vmem [shape: f32[1,1,64], index: 2, kind: input, shape index: {}]   ;;  %s989_s3 = inlined_call_operand.vmem [shape: bf16[1,128,64], index: 3, kind: output, shape index: {}]  }
   0x1   :  { %s874_s14 = smov 0  }
   0x2 LB: > { %s22_s15 = sadd.s32 1, %s844_s13  ;;  %p668_p0 = scmp.ge.s32.totalorder %s848_s14, 1  ;;  %s848_s14 = sphi %s874_s14, %s13_s14   ;;  %s844_s13 = sphi %s872_s13, %s991_s13   ;;  %s840_s12 = sphi %s870_s12, %s990_s12  }
   0x3   : > { %p23_p1 = scmp.ge.s32.totalorder %s22_s15, 2  ;;  %p177_p2 = scmp.lt.s32.totalorder %s848_s14, 3 }
   0x5   : > { %s993_s15 = smov (%p23_p1, %s22_s15), 0  ;;  %p178_p3 = pnand %p668_p0, %p177_p2 }
   0x6   : > { %v798_v0 = vld [vmem:[%s987_s1 + $0x40] sm:$0xff] (!%p178_p3)   ;;  %s669_s18 = sshll.u32 (!%p178_p3), %s840_s12, 3  ;;  %v800_v2 = vld [vmem:[%s987_s1 + $0x48] sm:$0xff] (!%p178_p3)   ;;  %v802_v4 = vld [vmem:[%s987_s1 + $0x50] sm:$0xff] (!%p178_p3)   ;;  %vm536_vm0 = vcmask (!%p178_p3), 519168  }
   0x7   : > { %181 = sbr.rel (%p178_p3) target bundleno = 271 (0x10f), region = 32  ;;  %v799_v1 = vld [vmem:[%s987_s1] sm:$0xff] (!%p178_p3)   ;;  %718 = vmatprep.subr.bf16.mxu0 (!%p178_p3), %v798_v0  ;;  %758 = vmatprep.subr.bf16.mxu1 (!%p178_p3), %v798_v0  ;;  %v801_v3 = vld [vmem:[%s987_s1 + $0x8] sm:$0xff] (!%p178_p3)   ;;  %p221_p4 = scmp.lt.s32.totalorder (!%p178_p3), %s669_s18, 15  ;;  %v803_v5 = vld [vmem:[%s987_s1 + $0x10] sm:$0xff] (!%p178_p3)  }
   0x8   : > { %719 = vmatpush3.bf16.msra.mxu0 (!%p178_p3), %v799_v1  ;;  %766 = vmatpush3.bf16.msra.mxu1 (!%p178_p3), %v799_v1  ;;  %v804_v6 = vld [vmem:[%s987_s1 + $0x58] sm:$0xff] (!%p178_p3)   ;;  %v806_v8 = vld [vmem:[%s987_s1 + $0x60] sm:$0xff] (!%p178_p3)   ;;  %v808_v10 = vld [vmem:[%s987_s1 + $0x68] sm:$0xff] (!%p178_p3)  }
   0x9   : > { %720 = vmatprep.subr.bf16.mxu0 (!%p178_p3), %v800_v2  ;;  %759 = vmatprep.subr.bf16.mxu1 (!%p178_p3), %v800_v2  ;;  %v805_v7 = vld [vmem:[%s987_s1 + $0x18] sm:$0xff] (!%p178_p3)   ;;  %v807_v9 = vld [vmem:[%s987_s1 + $0x20] sm:$0xff] (!%p178_p3)   ;;  %v809_v13 = vld [vmem:[%s987_s1 + $0x28] sm:$0xff] (!%p178_p3)  }
   0xa   : > { %v810_v14 = vld [vmem:[%s987_s1 + $0x70] sm:$0xff] (!%p178_p3)   ;;  %v812_v16 = vld [vmem:[%s987_s1 + $0x78] sm:$0xff] (!%p178_p3)   ;;  %v674_v26 = vld [vmem:[%s988_s2] ss:$0 sm:$0xff] (!%p178_p3) }
   0xb   : > { %v811_v15 = vld [vmem:[%s987_s1 + $0x30] sm:$0xff] (!%p178_p3)   ;;  %v813_v17 = vld [vmem:[%s987_s1 + $0x38] sm:$0xff] (!%p178_p3)  }
   0xc   : > { %721 = vmatpush3.bf16.msra.mxu0 (!%p178_p3), %v801_v3  ;;  %767 = vmatpush3.bf16.msra.mxu1 (!%p178_p3), %v801_v3 }
   0xd   : > { %722 = vmatprep.subr.bf16.mxu0 (!%p178_p3), %v802_v4  ;;  %760 = vmatprep.subr.bf16.mxu1 (!%p178_p3), %v802_v4 }
   0xe   : > { %s995_s18 = smov (!%p221_p4, %s669_s18), 15 }
   0xf   : > { %s709_s6 = sshll.u32 %s995_s18, 3  ;;  %s673_s5 = sshll.u32 %s995_s18, 2 }
  0x10   : > { %723 = vmatpush3.bf16.msra.mxu0 %v803_v5  ;;  %768 = vmatpush3.bf16.msra.mxu1 %v803_v5  ;;  %s921_s11 = scalar_lea.vmem %s986_s0, %s709_s6  ;;  %s959_s8 = scalar_lea.vmem %s989_s3, %s673_s5 }
  0x11   : > { %724 = vmatprep.subr.bf16.mxu0 %v804_v6  ;;  %761 = vmatprep.subr.bf16.mxu1 %v804_v6  ;;  %v816_v11 = vld [vmem:[%s921_s11 + $0x4] ss:$8 sps:$4 sm:$0xff]   ;;  %v814_v18 = vld [vmem:[%s921_s11] ss:$8 sps:$4 sm:$0xff]   ;;  %v820_v20 = vld [vmem:[%s921_s11 + $0x14] ss:$8 sps:$4 sm:$0xff]  }
  0x12   : > { %v819_v12 = vld [vmem:[%s921_s11 + $0x24] ss:$8 sps:$4 sm:$0xff]   ;;  %463 = vmatprep.mubr.bf16.mxu0 %v816_v11  ;;  %v817_v19 = vld [vmem:[%s921_s11 + $0x20] ss:$8 sps:$4 sm:$0xff]   ;;  %v822_v21 = vld [vmem:[%s921_s11 + $0x34] ss:$8 sps:$4 sm:$0xff]  }
  0x13   : > { %479 = vmatprep.mubr.bf16.mxu1 %v819_v12  ;;  %v824_v22 = vld [vmem:[%s921_s11 + $0x10] ss:$8 sps:$4 sm:$0xff]  }
  0x14   : > { %725 = vmatpush3.bf16.msra.mxu0 %v805_v7  ;;  %769 = vmatpush3.bf16.msra.mxu1 %v805_v7  ;;  %v825_v23 = vld [vmem:[%s921_s11 + $0x30] ss:$8 sps:$4 sm:$0xff]  }
  0x15   : > { %726 = vmatprep.subr.bf16.mxu0 %v806_v8  ;;  %762 = vmatprep.subr.bf16.mxu1 %v806_v8 }
  0x18   : > { %727 = vmatpush3.bf16.msra.mxu0 %v807_v9  ;;  %770 = vmatpush3.bf16.msra.mxu1 %v807_v9 }
  0x19   : > { %728 = vmatprep.subr.bf16.mxu0 %v808_v10  ;;  %763 = vmatprep.subr.bf16.mxu1 %v808_v10 }
  0x1c   : > { %729 = vmatpush3.bf16.msra.mxu0 %v809_v13  ;;  %771 = vmatpush3.bf16.msra.mxu1 %v809_v13 }
  0x1d   : > { %730 = vmatprep.subr.bf16.mxu0 %v810_v14  ;;  %764 = vmatprep.subr.bf16.mxu1 %v810_v14 }
  0x20   : > { %731 = vmatpush3.bf16.msra.mxu0 %v811_v15  ;;  %772 = vmatpush3.bf16.msra.mxu1 %v811_v15 }
  0x21   : > { %732 = vmatprep.subr.bf16.mxu0 %v812_v16  ;;  %765 = vmatprep.subr.bf16.mxu1 %v812_v16 }
  0x24   : > { %733 = vmatpush3.bf16.msra.mxu0 %v813_v17  ;;  %773 = vmatpush3.bf16.msra.mxu1 %v813_v17 }
  0x27   : > { %464 = vmatmul.mubr.bf16.vlgmr.msra.gmra.mrb[0].mxu0 %v814_v18  ;;  %480 = vmatmul.mubr.bf16.vlgmr.msra.gmra.mrb[0].mxu1 %v817_v19 }
  0x28   : > { %471 = vmatprep.mubr.bf16.mxu0 %v820_v20  ;;  %487 = vmatprep.mubr.bf16.mxu1 %v822_v21 }
  0x2f   : > { %472 = vmatmul.mubr.bf16.gmra.mrb[4].mxu0 %v824_v22  ;;  %488 = vmatmul.mubr.bf16.gmra.mrb[4].mxu1 %v825_v23 }
  0xfa   : > { %v734_v24 = vpop.f32.mrb[0].mxu0  ;;  %v746_v25 = vpop.f32.mrb[0].mxu1 }
  0xfb   : > { %v735_v27 = vpop.f32.mrb[1].mxu0  ;;  %v747_v28 = vpop.f32.mrb[1].mxu1 }
  0xfc   : > { %v736_v29 = vadd.f32 %v735_v27, %v734_v24  ;;  %v748_v30 = vadd.f32 %v747_v28, %v746_v25  ;;  %v737_v31 = vpop.f32.mrb[2].mxu0  ;;  %v749_v32 = vpop.f32.mrb[2].mxu1 }
  0xfd   : > { %v738_v33 = vpop.f32.mrb[3].mxu0  ;;  %v750_v34 = vpop.f32.mrb[3].mxu1 }
  0xfe   : > { %v466_v35 = vadd.f32 %v736_v29, %v674_v26  ;;  %v482_v36 = vadd.f32 %v748_v30, %v674_v26  ;;  %v739_v37 = vadd.f32 %v738_v33, %v737_v31  ;;  %v751_v38 = vadd.f32 %v750_v34, %v749_v32 }
 0x100   : > { %v496_v39 = vmax.f32 %v466_v35, 0.0  ;;  %v500_v40 = vmax.f32 %v482_v36, 0.0  ;;  %v469_v41 = vadd.f32 %v739_v37, %v674_v26  ;;  %v485_v42 = vadd.f32 %v751_v38, %v674_v26 }
 0x102   : > { %v710_v43 = vpack.c.bf16 %v496_v39, %v496_v39  ;;  %v714_v44 = vpack.c.bf16 %v500_v40, %v500_v40  ;;  %v497_v45 = vmax.f32 %v469_v41, 0.0  ;;  %v501_v46 = vmax.f32 %v485_v42, 0.0  ;;  %v740_v47 = vpop.f32.mrb[4].mxu0  ;;  %v752_v48 = vpop.f32.mrb[4].mxu1 }
 0x103   : > { %v741_v49 = vpop.f32.mrb[5].mxu0  ;;  %v753_v50 = vpop.f32.mrb[5].mxu1 }
 0x104   : > { %537 = vst.msk [vmem:[%s959_s8] sm:$0xf] %vm536_vm0, %v710_v43  ;;  %541 = vst.msk [vmem:[%s959_s8 + $0x10] sm:$0xf] %vm536_vm0, %v714_v44  ;;  %v711_v51 = vpack.c.bf16 %v497_v45, %v497_v45  ;;  %v715_v52 = vpack.c.bf16 %v501_v46, %v501_v46  ;;  %v742_v53 = vadd.f32 %v741_v49, %v740_v47  ;;  %v743_v55 = vpop.f32.mrb[6].mxu0  ;;  %v755_v56 = vpop.f32.mrb[6].mxu1 }
 0x105   : > { %v754_v54 = vadd.f32 %v753_v50, %v752_v48  ;;  %v744_v57 = vpop.f32.mrb[7].mxu0  ;;  %v756_v58 = vpop.f32.mrb[7].mxu1 }
 0x106   : > { %538 = vst.msk [vmem:[%s959_s8 + $0x4] sm:$0xf] %vm536_vm0, %v711_v51  ;;  %542 = vst.msk [vmem:[%s959_s8 + $0x14] sm:$0xf] %vm536_vm0, %v715_v52  ;;  %v474_v59 = vadd.f32 %v742_v53, %v674_v26  ;;  %v745_v61 = vadd.f32 %v744_v57, %v743_v55  ;;  %v757_v62 = vadd.f32 %v756_v58, %v755_v56 }
 0x107   : > { %v490_v60 = vadd.f32 %v754_v54, %v674_v26 }
 0x108   : > { %v498_v63 = vmax.f32 %v474_v59, 0.0  ;;  %v477_v1 = vadd.f32 %v745_v61, %v674_v26  ;;  %v493_v2 = vadd.f32 %v757_v62, %v674_v26 }
 0x109   : > { %v502_v0 = vmax.f32 %v490_v60, 0.0 }
 0x10a   : > { %v712_v3 = vpack.c.bf16 %v498_v63, %v498_v63  ;;  %v499_v5 = vmax.f32 %v477_v1, 0.0  ;;  %v503_v6 = vmax.f32 %v493_v2, 0.0 }
 0x10b   : > { %v716_v4 = vpack.c.bf16 %v502_v0, %v502_v0 }
 0x10c   : > { %539 = vst.msk [vmem:[%s959_s8 + $0x8] sm:$0xf] %vm536_vm0, %v712_v3  ;;  %v713_v7 = vpack.c.bf16 %v499_v5, %v499_v5  ;;  %v717_v8 = vpack.c.bf16 %v503_v6, %v503_v6 }
 0x10d   : > { %543 = vst.msk [vmem:[%s959_s8 + $0x18] sm:$0xf] %vm536_vm0, %v716_v4 }
 0x10e   : > { %540 = vst.msk [vmem:[%s959_s8 + $0xc] sm:$0xf] %vm536_vm0, %v713_v7  ;;  %544 = vst.msk [vmem:[%s959_s8 + $0x1c] sm:$0xf] %vm536_vm0, %v717_v8 }
 0x10f PF: > { %s13_s14 = sadd.s32 1, %s848_s14   ;;  %s990_s12 = smov %s844_s13 }
 0x110   : > { %p10_p5 = scmp.ge.s32.totalorder %s13_s14, 4   ;;  %s991_s13 = smov %s993_s15 }
 0x112   :  { %12 = sbr.rel (!%p10_p5) target bundleno = 2 (0x2), region = 68 }

// kernel: jointnet_forward.57
= control target key start
LH: loop header
LB: loop body
LE: loop exit
PB: predicated region body
PF: predicated region fallthrough
CT: control target
= control target key end

     0   :  { %s585_s12 = smov 0   ;;  %s587_s13 = smov 0   ;;  %s633_s0 = inlined_call_operand.vmem [shape: bf16[1,32,64], index: 0, kind: input, shape index: {}]   ;;  %s634_s1 = inlined_call_operand.vmem [shape: bf16[1,64,128], index: 1, kind: input, shape index: {}]   ;;  %s635_s2 = inlined_call_operand.vmem [shape: f32[1,1,128], index: 2, kind: input, shape index: {}]   ;;  %s636_s3 = inlined_call_operand.vmem [shape: bf16[1,32,128], index: 3, kind: output, shape index: {}]  }
   0x1   :  { %s589_s14 = smov 0  }
   0x2 LB: > { %s22_s15 = sadd.s32 1, %s557_s13  ;;  %p468_p0 = scmp.ge.s32.totalorder %s561_s14, 1  ;;  %s561_s14 = sphi %s589_s14, %s13_s14   ;;  %s557_s13 = sphi %s587_s13, %s638_s13   ;;  %s553_s12 = sphi %s585_s12, %s637_s12  }
   0x3   : > { %p23_p1 = scmp.ge.s32.totalorder %s22_s15, 2  ;;  %p176_p2 = scmp.lt.s32.totalorder %s561_s14, 3 }
   0x5   : > { %s640_s15 = smov (%p23_p1, %s22_s15), 0  ;;  %p177_p3 = pnand %p468_p0, %p176_p2 }
   0x6   : > { %v534_v0 = vld [vmem:[%s634_s1] sm:$0xff] (!%p177_p3)   ;;  %v563_v1 = vmov (!%p177_p3), 0.0   ;;  %v535_v2 = vld [vmem:[%s634_s1 + $0x8] sm:$0xff] (!%p177_p3)   ;;  %vm564_vm0 = vmmov (!%p177_p3), 0   ;;  %s469_s20 = sshll.u32 (!%p177_p3), %s553_s12, 1  ;;  %v536_v3 = vld [vmem:[%s634_s1 + $0x10] sm:$0xff] (!%p177_p3)  }
   0x7   : > { %180 = sbr.rel (%p177_p3) target bundleno = 244 (0xf4), region = 32  ;;  %496 = vmatprep.subr.bf16.mxu0 (!%p177_p3), %v563_v1  ;;  %504 = vmatprep.mubr.msk.bf16.mxu0 (!%p177_p3), %vm564_vm0, %v563_v1  ;;  %p219_p4 = scmp.lt.s32.totalorder (!%p177_p3), %s469_s20, 3  ;;  %v537_v4 = vld [vmem:[%s634_s1 + $0x18] sm:$0xff] (!%p177_p3)   ;;  %vm291_vm1 = vcmask (!%p177_p3), 523264   ;;  %v473_v6 = vld [vmem:[%s635_s2] ss:$0 sm:$0xff] (!%p177_p3) }
   0x8   : > { %497 = vmatpush3.bf16.msra.mxu0 (!%p177_p3), %v534_v0 }
   0x9   : > { %498 = vmatprep.subr.bf16.mxu0 (!%p177_p3), %v563_v1 }
   0xc   : > { %499 = vmatpush3.bf16.msra.mxu0 (!%p177_p3), %v535_v2 }
   0xd   : > { %500 = vmatprep.subr.bf16.mxu0 (!%p177_p3), %v563_v1 }
   0xe   : > { %s642_s20 = smov (!%p219_p4, %s469_s20), 3 }
   0xf   : > { %s470_s23 = sshll.u32 %s642_s20, 2 }
  0x10   : > { %s224_s26 = scalar_lea.vmem %s633_s0, %s470_s23  ;;  %501 = vmatpush3.bf16.msra.mxu0 %v536_v3  ;;  %s242_s6 = scalar_lea.vmem %s636_s3, %s470_s23 }
  0x11   : > { %502 = vmatprep.subr.bf16.mxu0 %v563_v1  ;;  %v538_v5 = vld [vmem:[%s224_s26] sm:$0xff]  }
  0x14   : > { %503 = vmatpush3.bf16.msra.mxu0 %v537_v4 }
  0x17   : > { %505 = vmatmul.mubr.msk.bf16.vlgmr.msra.gmra.mrb[0].mxu0 %vm291_vm1, %v538_v5 }
  0xea   : > { %v329_v7 = vpop.f32.mrb[0].mxu0 }
  0xeb   : > { %v330_v8 = vadd.f32 %v473_v6, %v329_v7  ;;  %v506_v9 = vpop.f32.mrb[1].mxu0 }
  0xec   : > { %v332_v10 = vpop.f32.mrb[2].mxu0 }
  0xed   : > { %v333_v11 = vadd.f32 %v473_v6, %v332_v10  ;;  %v507_v12 = vpop.f32.mrb[3].mxu0  ;;  %v336_v13 = vmax.f32 %v330_v8, 0.0 }
  0xef   : > { %v337_v14 = vmax.f32 %v333_v11, 0.0 }
  0xf1   : > { %v489_v15 = vpack.c.bf16 %v337_v14, %v336_v13 }
  0xf3   : > { %490 = vst [vmem:[%s242_s6] sm:$0xff] %v489_v15  }
  0xf4 PF: > { %s13_s14 = sadd.s32 1, %s561_s14   ;;  %s637_s12 = smov %s557_s13 }
  0xf5   : > { %p10_p5 = scmp.ge.s32.totalorder %s13_s14, 4   ;;  %s638_s13 = smov %s640_s15 }
  0xf7   :  { %12 = sbr.rel (!%p10_p5) target bundleno = 2 (0x2), region = 68 }

// kernel: jointnet_forward.58
= control target key start
LH: loop header
LB: loop body
LE: loop exit
PB: predicated region body
PF: predicated region fallthrough
CT: control target
= control target key end

     0   :  { %s683_s12 = smov 0   ;;  %s685_s13 = smov 0   ;;  %s745_s0 = inlined_call_operand.vmem [shape: bf16[8,32,144], index: 0, kind: input, shape index: {}]   ;;  %s746_s1 = inlined_call_operand.vmem [shape: bf16[8,144,16], index: 1, kind: input, shape index: {}]   ;;  %s747_s2 = inlined_call_operand.vmem [shape: f32[8,1,16], index: 2, kind: input, shape index: {}]   ;;  %s748_s3 = inlined_call_operand.vmem [shape: bf16[8,32,16], index: 3, kind: output, shape index: {}]  }
   0x1   :  { %s687_s14 = smov 0  }
   0x2 LB: > { %s25_s15 = sadd.s32 1, %s656_s13  ;;  %p545_p0 = scmp.ge.s32.totalorder %s660_s14, 1  ;;  %s660_s14 = sphi %s687_s14, %s13_s14   ;;  %s656_s13 = sphi %s685_s13, %s750_s13   ;;  %s652_s12 = sphi %s683_s12, %s749_s12  }
   0x3   : > { %p27_p1 = scmp.ge.s32.totalorder %s25_s15, 8  ;;  %p177_p2 = scmp.lt.s32.totalorder %s660_s14, 9 }
   0x5   : > { %s752_s15 = smov (%p27_p1, %s25_s15), 0  ;;  %p178_p3 = pnand %p545_p0, %p177_p2 }
   0x6   : > { %p219_p4 = scmp.lt.s32.totalorder (!%p178_p3), %s652_s12, 7  ;;  %v662_v0 = vmov (!%p178_p3), 0   ;;  %vm349_vm0 = vcmask (!%p178_p3), 130048   ;;  %vm425_vm1 = vcmask (!%p178_p3), 125952  }
   0x7   : > { %181 = sbr.rel (%p178_p3) target bundleno = 275 (0x113), region = 32  ;;  %356 = vmatprep.subr.bf16.mxu0 (!%p178_p3), %v662_v0  ;;  %579 = vmatprep.subr.bf16.mxu1 (!%p178_p3), %v662_v0 }
   0xe   : > { %s754_s12 = smov (!%p219_p4, %s652_s12), 7 }
   0xf   : > { %s597_s16 = smul.u32 72, %s754_s12  ;;  %s573_s17 = sshll.u32 %s754_s12, 5 }
  0x10   : > { %s708_s20 = scalar_lea.vmem %s745_s0, %s573_s17  ;;  %s236_s26 = scalar_lea.vmem %s747_s2, %s754_s12 }
  0x11   : > { %s713_s23 = scalar_lea.vmem %s746_s1, %s597_s16  ;;  %v634_v4 = vld [vmem:[%s708_s20 + $0x4] ss:$8 sps:$4 sm:$0xff]   ;;  %v637_v6 = vld [vmem:[%s708_s20 + $0x14] ss:$8 sps:$4 sm:$0xff]   ;;  %v632_v12 = vld [vmem:[%s708_s20] ss:$8 sps:$4 sm:$0xff]  }
  0x12   : > { %v623_v1 = vld [vmem:[%s713_s23] sm:$0xff]   ;;  %v624_v2 = vld [vmem:[%s713_s23 + $0x8] sm:$0xff]   ;;  %v625_v3 = vld [vmem:[%s713_s23 + $0x10] sm:$0xff]   ;;  %565 = vmatprep.mubr.msk.bf16.mxu0 %vm349_vm0, %v634_v4  ;;  %566 = vmatprep.mubr.msk.bf16.mxu1 %vm349_vm0, %v637_v6  ;;  %s574_s27 = sshll.u32 %s754_s12, 4 }
  0x13   : > { %357 = vmatpush1.bf16.msra.mxu0 %v623_v1  ;;  %588 = vmatpush1.bf16.msra.mxu1 %v623_v1  ;;  %v626_v5 = vld [vmem:[%s713_s23 + $0x18] sm:$0xff]   ;;  %v627_v7 = vld [vmem:[%s713_s23 + $0x20] sm:$0xff]   ;;  %v628_v8 = vld [vmem:[%s713_s23 + $0x28] sm:$0xff]   ;;  %s245_s30 = scalar_lea.vmem %s748_s3, %s574_s27 }
  0x14   : > { %358 = vmatprep.subr.bf16.mxu0 %v662_v0  ;;  %580 = vmatprep.subr.bf16.mxu1 %v662_v0  ;;  %v629_v9 = vld [vmem:[%s713_s23 + $0x30] sm:$0xff]   ;;  %v630_v10 = vld [vmem:[%s713_s23 + $0x38] sm:$0xff]   ;;  %v631_v11 = vld [vmem:[%s713_s23 + $0x40] sm:$0xff]  }
  0x15   : > { %v635_v13 = vld [vmem:[%s708_s20 + $0x10] ss:$8 sps:$4 sm:$0xff]   ;;  %v551_v14 = vld [vmem:[%s236_s26] ss:$0 sm:$0xff] }
  0x17   : > { %359 = vmatpush1.bf16.msra.mxu0 %v624_v2  ;;  %589 = vmatpush1.bf16.msra.mxu1 %v624_v2 }
  0x18   : > { %360 = vmatprep.subr.bf16.mxu0 %v662_v0  ;;  %581 = vmatprep.subr.bf16.mxu1 %v662_v0 }
  0x1b   : > { %361 = vmatpush1.bf16.msra.mxu0 %v625_v3  ;;  %590 = vmatpush1.bf16.msra.mxu1 %v625_v3 }
  0x1c   : > { %362 = vmatprep.subr.bf16.mxu0 %v662_v0  ;;  %582 = vmatprep.subr.bf16.mxu1 %v662_v0 }
  0x1f   : > { %363 = vmatpush1.bf16.msra.mxu0 %v626_v5  ;;  %591 = vmatpush1.bf16.msra.mxu1 %v626_v5 }
  0x20   : > { %364 = vmatprep.subr.bf16.mxu0 %v662_v0  ;;  %583 = vmatprep.subr.bf16.mxu1 %v662_v0 }
  0x23   : > { %365 = vmatpush1.bf16.msra.mxu0 %v627_v7  ;;  %592 = vmatpush1.bf16.msra.mxu1 %v627_v7 }
  0x24   : > { %366 = vmatprep.subr.bf16.mxu0 %v662_v0  ;;  %584 = vmatprep.subr.bf16.mxu1 %v662_v0 }
  0x27   : > { %367 = vmatpush1.bf16.msra.mxu0 %v628_v8  ;;  %593 = vmatpush1.bf16.msra.mxu1 %v628_v8 }
  0x28   : > { %368 = vmatprep.subr.bf16.mxu0 %v662_v0  ;;  %585 = vmatprep.subr.bf16.mxu1 %v662_v0 }
  0x2b   : > { %369 = vmatpush1.bf16.msra.mxu0 %v629_v9  ;;  %594 = vmatpush1.bf16.msra.mxu1 %v629_v9 }
  0x2c   : > { %370 = vmatprep.subr.bf16.mxu0 %v662_v0  ;;  %586 = vmatprep.subr.bf16.mxu1 %v662_v0 }
  0x2f   : > { %371 = vmatpush1.bf16.msra.mxu0 %v630_v10  ;;  %595 = vmatpush1.bf16.msra.mxu1 %v630_v10 }
  0x30   : > { %372 = vmatprep.subr.bf16.mxu0 %v662_v0  ;;  %587 = vmatprep.subr.bf16.mxu1 %v662_v0 }
  0x33   : > { %373 = vmatpush1.bf16.msra.mxu0 %v631_v11  ;;  %596 = vmatpush1.bf16.msra.mxu1 %v631_v11 }
  0x36   : > { %389 = vmatmul.mubr.bf16.vlgmr.msra.gmra.mrb[0].mxu0 %v632_v12  ;;  %397 = vmatmul.mubr.bf16.vlgmr.msra.gmra.mrb[0].mxu1 %v635_v13 }
 0x109   : > { %v390_v15 = vpop.f32.mrb[0].mxu0  ;;  %v398_v16 = vpop.f32.mrb[0].mxu1 }
 0x10a   : > { %v391_v17 = vadd.f32 %v551_v14, %v390_v15  ;;  %v399_v18 = vadd.f32 %v551_v14, %v398_v16  ;;  %v392_v19 = vpop.f32.mrb[1].mxu0  ;;  %v400_v20 = vpop.f32.mrb[1].mxu1 }
 0x10b   : > { %v393_v21 = vpop.f32.mrb[2].mxu0  ;;  %v401_v22 = vpop.f32.mrb[2].mxu1 }
 0x10c   : > { %v405_v23 = vmax.f32 %v391_v17, 0.0  ;;  %v407_v24 = vmax.f32 %v399_v18, 0.0  ;;  %v394_v25 = vadd.f32 %v551_v14, %v393_v21  ;;  %v402_v26 = vadd.f32 %v551_v14, %v401_v22  ;;  %v395_v27 = vpop.f32.mrb[3].mxu0  ;;  %v403_v28 = vpop.f32.mrb[3].mxu1 }
 0x10e   : > { %v575_v29 = vpack.c.bf16 %v405_v23, %v405_v23  ;;  %v577_v30 = vpack.c.bf16 %v407_v24, %v407_v24  ;;  %v406_v31 = vmax.f32 %v394_v25, 0.0  ;;  %v408_v32 = vmax.f32 %v402_v26, 0.0 }
 0x110   : > { %426 = vst.msk [vmem:[%s245_s30] sm:$0xf] %vm425_vm1, %v575_v29  ;;  %428 = vst.msk [vmem:[%s245_s30 + $0x8] sm:$0xf] %vm425_vm1, %v577_v30  ;;  %v576_v33 = vpack.c.bf16 %v406_v31, %v406_v31  ;;  %v578_v34 = vpack.c.bf16 %v408_v32, %v408_v32 }
 0x112   : > { %427 = vst.msk [vmem:[%s245_s30 + $0x4] sm:$0xf] %vm425_vm1, %v576_v33  ;;  %429 = vst.msk [vmem:[%s245_s30 + $0xc] sm:$0xf] %vm425_vm1, %v578_v34 }
 0x113 PF: > { %s13_s14 = sadd.s32 1, %s660_s14   ;;  %s749_s12 = smov %s656_s13 }
 0x114   : > { %p10_p5 = scmp.ge.s32.totalorder %s13_s14, 10   ;;  %s750_s13 = smov %s752_s15 }
 0x116   :  { %12 = sbr.rel (!%p10_p5) target bundleno = 2 (0x2), region = 68 }

// kernel: jointnet_forward.59
= control target key start
LH: loop header
LB: loop body
LE: loop exit
PB: predicated region body
PF: predicated region fallthrough
CT: control target
= control target key end

     0   :  { %s661_s12 = smov 0   ;;  %s663_s13 = smov 0   ;;  %s737_s0 = inlined_call_operand.vmem [shape: bf16[1,32,192], index: 0, kind: input, shape index: {}]   ;;  %s738_s1 = inlined_call_operand.vmem [shape: bf16[1,192,128], index: 1, kind: input, shape index: {}]   ;;  %s739_s2 = inlined_call_operand.vmem [shape: f32[1,1,128], index: 2, kind: input, shape index: {}]   ;;  %s740_s3 = inlined_call_operand.vmem [shape: bf16[1,32,128], index: 3, kind: output, shape index: {}]  }
   0x1   :  { %s665_s14 = smov 0  }
   0x2 LB: > { %s22_s15 = sadd.s32 1, %s634_s13  ;;  %p542_p0 = scmp.ge.s32.totalorder %s638_s14, 1  ;;  %s638_s14 = sphi %s665_s14, %s13_s14   ;;  %s634_s13 = sphi %s663_s13, %s742_s13   ;;  %s630_s12 = sphi %s661_s12, %s741_s12  }
   0x3   : > { %p23_p1 = scmp.ge.s32.totalorder %s22_s15, 2  ;;  %p177_p2 = scmp.lt.s32.totalorder %s638_s14, 3 }
   0x5   : > { %s744_s15 = smov (%p23_p1, %s22_s15), 0  ;;  %p178_p3 = pnand %p542_p0, %p177_p2 }
   0x6   : > { %v601_v0 = vld [vmem:[%s738_s1] sm:$0xff] (!%p178_p3)   ;;  %v640_v1 = vmov (!%p178_p3), 0   ;;  %s543_s18 = sshll.u32 (!%p178_p3), %s630_s12, 1  ;;  %v602_v2 = vld [vmem:[%s738_s1 + $0x8] sm:$0xff] (!%p178_p3)   ;;  %v603_v3 = vld [vmem:[%s738_s1 + $0x10] sm:$0xff] (!%p178_p3)   ;;  %vm362_vm0 = vcmask (!%p178_p3), 523264  }
   0x7   : > { %181 = sbr.rel (%p178_p3) target bundleno = 276 (0x114), region = 32  ;;  %366 = vmatprep.subr.bf16.mxu0 (!%p178_p3), %v640_v1  ;;  %p221_p4 = scmp.lt.s32.totalorder (!%p178_p3), %s543_s18, 3  ;;  %v604_v4 = vld [vmem:[%s738_s1 + $0x18] sm:$0xff] (!%p178_p3)   ;;  %v605_v6 = vld [vmem:[%s738_s1 + $0x20] sm:$0xff] (!%p178_p3)   ;;  %v606_v7 = vld [vmem:[%s738_s1 + $0x28] sm:$0xff] (!%p178_p3)  }
   0x8   : > { %367 = vmatpush1.bf16.msra.mxu0 (!%p178_p3), %v601_v0  ;;  %v607_v8 = vld [vmem:[%s738_s1 + $0x30] sm:$0xff] (!%p178_p3)   ;;  %v608_v9 = vld [vmem:[%s738_s1 + $0x38] sm:$0xff] (!%p178_p3)   ;;  %v609_v10 = vld [vmem:[%s738_s1 + $0x40] sm:$0xff] (!%p178_p3)  }
   0x9   : > { %368 = vmatprep.subr.bf16.mxu0 (!%p178_p3), %v640_v1  ;;  %v610_v11 = vld [vmem:[%s738_s1 + $0x48] sm:$0xff] (!%p178_p3)   ;;  %v611_v12 = vld [vmem:[%s738_s1 + $0x50] sm:$0xff] (!%p178_p3)   ;;  %v612_v13 = vld [vmem:[%s738_s1 + $0x58] sm:$0xff] (!%p178_p3)  }
   0xa   : > { %v548_v15 = vld [vmem:[%s739_s2] ss:$0 sm:$0xff] (!%p178_p3) }
   0xc   : > { %369 = vmatpush1.bf16.msra.mxu0 (!%p178_p3), %v602_v2 }
   0xd   : > { %370 = vmatprep.subr.bf16.mxu0 (!%p178_p3), %v640_v1 }
   0xe   : > { %s746_s18 = smov (!%p221_p4, %s543_s18), 3 }
   0xf   : > { %s568_s23 = sshll.u32 %s746_s18, 3  ;;  %s547_s24 = sshll.u32 %s746_s18, 2 }
  0x10   : > { %371 = vmatpush1.bf16.msra.mxu0 %v603_v3  ;;  %s227_s28 = scalar_lea.vmem %s737_s0, %s568_s23  ;;  %s245_s27 = scalar_lea.vmem %s740_s3, %s547_s24 }
  0x11   : > { %372 = vmatprep.subr.bf16.mxu0 %v640_v1  ;;  %v615_v5 = vld [vmem:[%s227_s28 + $0x4] ss:$8 sps:$4 sm:$0xff]   ;;  %v613_v14 = vld [vmem:[%s227_s28] ss:$8 sps:$4 sm:$0xff]  }
  0x12   : > { %563 = vmatprep.mubr.msk.bf16.mxu0 %vm362_vm0, %v615_v5 }
  0x14   : > { %373 = vmatpush1.bf16.msra.mxu0 %v604_v4 }
  0x15   : > { %374 = vmatprep.subr.bf16.mxu0 %v640_v1 }
  0x18   : > { %375 = vmatpush1.bf16.msra.mxu0 %v605_v6 }
  0x19   : > { %376 = vmatprep.subr.bf16.mxu0 %v640_v1 }
  0x1c   : > { %377 = vmatpush1.bf16.msra.mxu0 %v606_v7 }
  0x1d   : > { %378 = vmatprep.subr.bf16.mxu0 %v640_v1 }
  0x20   : > { %379 = vmatpush1.bf16.msra.mxu0 %v607_v8 }
  0x21   : > { %380 = vmatprep.subr.bf16.mxu0 %v640_v1 }
  0x24   : > { %381 = vmatpush1.bf16.msra.mxu0 %v608_v9 }
  0x25   : > { %382 = vmatprep.subr.bf16.mxu0 %v640_v1 }
  0x28   : > { %383 = vmatpush1.bf16.msra.mxu0 %v609_v10 }
  0x29   : > { %384 = vmatprep.subr.bf16.mxu0 %v640_v1 }
  0x2c   : > { %385 = vmatpush1.bf16.msra.mxu0 %v610_v11 }
  0x2d   : > { %386 = vmatprep.subr.bf16.mxu0 %v640_v1 }
  0x30   : > { %387 = vmatpush1.bf16.msra.mxu0 %v611_v12 }
  0x31   : > { %388 = vmatprep.subr.bf16.mxu0 %v640_v1 }
  0x34   : > { %389 = vmatpush1.bf16.msra.mxu0 %v612_v13 }
  0x37   : > { %399 = vmatmul.mubr.bf16.vlgmr.msra.gmra.mrb[0].mxu0 %v613_v14 }
 0x10a   : > { %v400_v16 = vpop.f32.mrb[0].mxu0 }
 0x10b   : > { %v401_v17 = vadd.f32 %v548_v15, %v400_v16  ;;  %v402_v18 = vpop.f32.mrb[1].mxu0 }
 0x10c   : > { %v403_v19 = vpop.f32.mrb[2].mxu0 }
 0x10d   : > { %v404_v20 = vadd.f32 %v548_v15, %v403_v19  ;;  %v405_v21 = vpop.f32.mrb[3].mxu0  ;;  %v407_v22 = vmax.f32 %v401_v17, 0.0 }
 0x10f   : > { %v408_v23 = vmax.f32 %v404_v20, 0.0 }
 0x111   : > { %v574_v24 = vpack.c.bf16 %v408_v23, %v407_v22 }
 0x113   : > { %575 = vst [vmem:[%s245_s27] sm:$0xff] %v574_v24  }
 0x114 PF: > { %s13_s14 = sadd.s32 1, %s638_s14   ;;  %s741_s12 = smov %s634_s13 }
 0x115   : > { %p10_p5 = scmp.ge.s32.totalorder %s13_s14, 4   ;;  %s742_s13 = smov %s744_s15 }
 0x117   :  { %12 = sbr.rel (!%p10_p5) target bundleno = 2 (0x2), region = 68 }

// kernel: jointnet_forward.61
= control target key start
LH: loop header
LB: loop body
LE: loop exit
PB: predicated region body
PF: predicated region fallthrough
CT: control target
= control target key end

     0   :  { %s832_s12 = smov 0   ;;  %s834_s13 = smov 0   ;;  %s932_s0 = inlined_call_operand.vmem [shape: bf16[1,32,320], index: 0, kind: input, shape index: {}]   ;;  %s933_s1 = inlined_call_operand.vmem [shape: bf16[1,320,128], index: 1, kind: input, shape index: {}]   ;;  %s934_s2 = inlined_call_operand.vmem [shape: f32[1,1,128], index: 2, kind: input, shape index: {}]   ;;  %s935_s3 = inlined_call_operand.vmem [shape: bf16[1,32,128], index: 3, kind: output, shape index: {}]  }
   0x1   :  { %s836_s14 = smov 0  }
   0x2 LB: > { %s22_s15 = sadd.s32 1, %s804_s13  ;;  %p655_p0 = scmp.ge.s32.totalorder %s808_s14, 1  ;;  %s808_s14 = sphi %s836_s14, %s13_s14   ;;  %s804_s13 = sphi %s834_s13, %s937_s13   ;;  %s800_s12 = sphi %s832_s12, %s936_s12  }
   0x3   : > { %p23_p1 = scmp.ge.s32.totalorder %s22_s15, 2  ;;  %p177_p2 = scmp.lt.s32.totalorder %s808_s14, 3 }
   0x5   : > { %s939_s15 = smov (%p23_p1, %s22_s15), 0  ;;  %p178_p3 = pnand %p655_p0, %p177_p2 }
   0x6   : > { %v762_v0 = vld [vmem:[%s933_s1 + $0x40] sm:$0xff] (!%p178_p3)   ;;  %v810_v2 = vmov (!%p178_p3), 0.0   ;;  %v764_v3 = vld [vmem:[%s933_s1 + $0x48] sm:$0xff] (!%p178_p3)   ;;  %s656_s22 = sshll.u32 (!%p178_p3), %s800_s12, 1  ;;  %v766_v5 = vld [vmem:[%s933_s1 + $0x50] sm:$0xff] (!%p178_p3)   ;;  %vm811_vm0 = vmmov (!%p178_p3), 0  }
   0x7   : > { %181 = sbr.rel (%p178_p3) target bundleno = 265 (0x109), region = 32  ;;  %v763_v1 = vld [vmem:[%s933_s1] sm:$0xff] (!%p178_p3)   ;;  %723 = vmatprep.subr.bf16.mxu1 (!%p178_p3), %v810_v2  ;;  %696 = vmatprep.subr.bf16.mxu0 (!%p178_p3), %v762_v0  ;;  %v765_v4 = vld [vmem:[%s933_s1 + $0x8] sm:$0xff] (!%p178_p3)   ;;  %p221_p4 = scmp.lt.s32.totalorder (!%p178_p3), %s656_s22, 3  ;;  %v767_v6 = vld [vmem:[%s933_s1 + $0x10] sm:$0xff] (!%p178_p3)   ;;  %vm434_vm1 = vcmask (!%p178_p3), 523264  }
   0x8   : > { %697 = vmatpush3.bf16.msra.mxu0 (!%p178_p3), %v763_v1  ;;  %731 = vmatprep.mubr.msk.bf16.mxu1 (!%p178_p3), %vm811_vm0, %v810_v2  ;;  %v768_v7 = vld [vmem:[%s933_s1 + $0x58] sm:$0xff] (!%p178_p3)   ;;  %v772_v8 = vld [vmem:[%s933_s1 + $0x80] sm:$0xff] (!%p178_p3)   ;;  %v775_v11 = vld [vmem:[%s933_s1 + $0x88] sm:$0xff] (!%p178_p3)  }
   0x9   : > { %698 = vmatprep.subr.bf16.mxu0 (!%p178_p3), %v764_v3  ;;  %v769_v9 = vld [vmem:[%s933_s1 + $0x18] sm:$0xff] (!%p178_p3)   ;;  %v770_v10 = vld [vmem:[%s933_s1 + $0x60] sm:$0xff] (!%p178_p3)   ;;  %724 = vmatpush3.bf16.msra.mxu1 (!%p178_p3), %v772_v8  ;;  %v773_v13 = vld [vmem:[%s933_s1 + $0x68] sm:$0xff] (!%p178_p3)  }
   0xa   : > { %725 = vmatprep.subr.bf16.mxu1 (!%p178_p3), %v810_v2  ;;  %v771_v12 = vld [vmem:[%s933_s1 + $0x20] sm:$0xff] (!%p178_p3)   ;;  %v778_v14 = vld [vmem:[%s933_s1 + $0x90] sm:$0xff] (!%p178_p3)   ;;  %v774_v15 = vld [vmem:[%s933_s1 + $0x28] sm:$0xff] (!%p178_p3)  }
   0xb   : > { %v776_v16 = vld [vmem:[%s933_s1 + $0x70] sm:$0xff] (!%p178_p3)   ;;  %v784_v18 = vld [vmem:[%s933_s1 + $0x98] sm:$0xff] (!%p178_p3)   ;;  %v660_v30 = vld [vmem:[%s934_s2] ss:$0 sm:$0xff] (!%p178_p3) }
   0xc   : > { %699 = vmatpush3.bf16.msra.mxu0 (!%p178_p3), %v765_v4  ;;  %v777_v19 = vld [vmem:[%s933_s1 + $0x30] sm:$0xff] (!%p178_p3)   ;;  %v779_v21 = vld [vmem:[%s933_s1 + $0x78] sm:$0xff] (!%p178_p3)  }
   0xd   : > { %700 = vmatprep.subr.bf16.mxu0 (!%p178_p3), %v766_v5  ;;  %726 = vmatpush3.bf16.msra.mxu1 (!%p178_p3), %v775_v11  ;;  %v780_v22 = vld [vmem:[%s933_s1 + $0x38] sm:$0xff] (!%p178_p3)  }
   0xe   : > { %s941_s22 = smov (!%p221_p4, %s656_s22), 3  ;;  %727 = vmatprep.subr.bf16.mxu1 %v810_v2 }
   0xf   : > { %s735_s12 = smul.u32 12, %s941_s22  ;;  %s659_s16 = sshll.u32 %s941_s22, 2 }
  0x10   : > { %701 = vmatpush3.bf16.msra.mxu0 %v767_v6  ;;  %s245_s19 = scalar_lea.vmem %s935_s3, %s659_s16 }
  0x11   : > { %702 = vmatprep.subr.bf16.mxu0 %v768_v7  ;;  %s227_s25 = scalar_lea.vmem %s932_s0, %s735_s12  ;;  %728 = vmatpush3.bf16.msra.mxu1 %v778_v14 }
  0x12   : > { %v783_v17 = vld [vmem:[%s227_s25 + $0x4] ss:$12 sps:$4 sm:$0xff]   ;;  %729 = vmatprep.subr.bf16.mxu1 %v810_v2  ;;  %v785_v20 = vld [vmem:[%s227_s25 + $0x8] ss:$12 sps:$4 sm:$0xff]   ;;  %v781_v23 = vld [vmem:[%s227_s25] ss:$12 sps:$4 sm:$0xff]  }
  0x13   : > { %470 = vmatprep.mubr.bf16.mxu0 %v783_v17 }
  0x14   : > { %703 = vmatpush3.bf16.msra.mxu0 %v769_v9 }
  0x15   : > { %704 = vmatprep.subr.bf16.mxu0 %v770_v10  ;;  %730 = vmatpush3.bf16.msra.mxu1 %v784_v18 }
  0x18   : > { %705 = vmatpush3.bf16.msra.mxu0 %v771_v12  ;;  %732 = vmatmul.mubr.msk.bf16.vlgmr.msra.gmra.mrb[0].mxu1 %vm434_vm1, %v785_v20 }
  0x19   : > { %706 = vmatprep.subr.bf16.mxu0 %v773_v13 }
  0x1c   : > { %707 = vmatpush3.bf16.msra.mxu0 %v774_v15 }
  0x1d   : > { %708 = vmatprep.subr.bf16.mxu0 %v776_v16 }
  0x20   : > { %709 = vmatpush3.bf16.msra.mxu0 %v777_v19 }
  0x21   : > { %710 = vmatprep.subr.bf16.mxu0 %v779_v21 }
  0x24   : > { %711 = vmatpush3.bf16.msra.mxu0 %v780_v22 }
  0x27   : > { %471 = vmatmul.mubr.bf16.vlgmr.msra.gmra.mrb[0].mxu0 %v781_v23 }
  0xeb   : > { %v513_v24 = vpop.f32.mrb[0].mxu1 }
  0xec   : > { %v733_v25 = vpop.f32.mrb[1].mxu1 }
  0xed   : > { %v516_v26 = vpop.f32.mrb[2].mxu1 }
  0xee   : > { %v734_v27 = vpop.f32.mrb[3].mxu1 }
  0xfa   : > { %v712_v28 = vpop.f32.mrb[0].mxu0 }
  0xfb   : > { %v713_v29 = vpop.f32.mrb[1].mxu0 }
  0xfc   : > { %v714_v31 = vadd.f32 %v713_v29, %v712_v28  ;;  %v715_v32 = vpop.f32.mrb[2].mxu0 }
  0xfd   : > { %v716_v33 = vpop.f32.mrb[3].mxu0 }
  0xfe   : > { %v473_v34 = vadd.f32 %v714_v31, %v660_v30  ;;  %v717_v35 = vadd.f32 %v716_v33, %v715_v32 }
 0x100   : > { %v514_v36 = vadd.f32 %v513_v24, %v473_v34  ;;  %v476_v37 = vadd.f32 %v717_v35, %v660_v30 }
 0x102   : > { %v517_v38 = vadd.f32 %v516_v26, %v476_v37  ;;  %v520_v39 = vmax.f32 %v514_v36, 0.0 }
 0x104   : > { %v521_v40 = vmax.f32 %v517_v38, 0.0 }
 0x106   : > { %v694_v41 = vpack.c.bf16 %v521_v40, %v520_v39 }
 0x108   : > { %695 = vst [vmem:[%s245_s19] sm:$0xff] %v694_v41  }
 0x109 PF: > { %s13_s14 = sadd.s32 1, %s808_s14   ;;  %s936_s12 = smov %s804_s13 }
 0x10a   : > { %p10_p5 = scmp.ge.s32.totalorder %s13_s14, 4   ;;  %s937_s13 = smov %s939_s15 }
 0x10c   :  { %12 = sbr.rel (!%p10_p5) target bundleno = 2 (0x2), region = 68 }

// kernel: jointnet_forward.63
= control target key start
LH: loop header
LB: loop body
LE: loop exit
PB: predicated region body
PF: predicated region fallthrough
CT: control target
= control target key end

     0   :  { %s901_s12 = smov 0   ;;  %s903_s13 = smov 0   ;;  %s1040_s0 = inlined_call_operand.vmem [shape: bf16[1,32,448], index: 0, kind: input, shape index: {}]   ;;  %s1041_s1 = inlined_call_operand.vmem [shape: bf16[1,448,128], index: 1, kind: input, shape index: {}]   ;;  %s1042_s2 = inlined_call_operand.vmem [shape: f32[1,1,128], index: 2, kind: input, shape index: {}]   ;;  %s1043_s3 = inlined_call_operand.vmem [shape: bf16[1,32,128], index: 3, kind: output, shape index: {}]  }
   0x1   :  { %s905_s14 = smov 0  }
   0x2 LB: > { %s22_s15 = sadd.s32 1, %s874_s13  ;;  %p723_p0 = scmp.ge.s32.totalorder %s878_s14, 1  ;;  %s878_s14 = sphi %s905_s14, %s13_s14   ;;  %s874_s13 = sphi %s903_s13, %s1045_s13   ;;  %s870_s12 = sphi %s901_s12, %s1044_s12  }
   0x3   : > { %p23_p1 = scmp.ge.s32.totalorder %s22_s15, 2  ;;  %p177_p2 = scmp.lt.s32.totalorder %s878_s14, 3 }
   0x5   : > { %s1047_s15 = smov (%p23_p1, %s22_s15), 0  ;;  %p178_p3 = pnand %p723_p0, %p177_p2 }
   0x6   : > { %v822_v0 = vld [vmem:[%s1041_s1 + $0x80] sm:$0xff] (!%p178_p3)   ;;  %v880_v1 = vmov (!%p178_p3), 0   ;;  %v823_v2 = vld [vmem:[%s1041_s1 + $0x88] sm:$0xff] (!%p178_p3)   ;;  %v826_v5 = vld [vmem:[%s1041_s1 + $0x90] sm:$0xff] (!%p178_p3)   ;;  %s724_s9 = sshll.u32 (!%p178_p3), %s870_s12, 1  ;;  %vm502_vm0 = vcmask (!%p178_p3), 523264  }
   0x7   : > { %181 = sbr.rel (%p178_p3) target bundleno = 276 (0x114), region = 32  ;;  %547 = vmatprep.subr.bf16.mxu1 (!%p178_p3), %v880_v1  ;;  %v824_v3 = vld [vmem:[%s1041_s1 + $0x40] sm:$0xff] (!%p178_p3)   ;;  %v827_v6 = vld [vmem:[%s1041_s1 + $0x48] sm:$0xff] (!%p178_p3)   ;;  %v830_v8 = vld [vmem:[%s1041_s1 + $0x50] sm:$0xff] (!%p178_p3)   ;;  %p221_p4 = scmp.lt.s32.totalorder (!%p178_p3), %s724_s9, 3 }
   0x8   : > { %548 = vmatpush1.bf16.msra.mxu1 (!%p178_p3), %v822_v0  ;;  %v825_v4 = vld [vmem:[%s1041_s1] sm:$0xff] (!%p178_p3)   ;;  %775 = vmatprep.subr.bf16.mxu0 (!%p178_p3), %v824_v3  ;;  %v828_v7 = vld [vmem:[%s1041_s1 + $0x8] sm:$0xff] (!%p178_p3)   ;;  %v831_v9 = vld [vmem:[%s1041_s1 + $0x10] sm:$0xff] (!%p178_p3)  }
   0x9   : > { %549 = vmatprep.subr.bf16.mxu1 (!%p178_p3), %v880_v1  ;;  %776 = vmatpush3.bf16.msra.mxu0 (!%p178_p3), %v825_v4  ;;  %v829_v10 = vld [vmem:[%s1041_s1 + $0x98] sm:$0xff] (!%p178_p3)   ;;  %v832_v12 = vld [vmem:[%s1041_s1 + $0xa0] sm:$0xff] (!%p178_p3)   ;;  %v835_v15 = vld [vmem:[%s1041_s1 + $0xa8] sm:$0xff] (!%p178_p3)  }
   0xa   : > { %777 = vmatprep.subr.bf16.mxu0 (!%p178_p3), %v827_v6  ;;  %v833_v11 = vld [vmem:[%s1041_s1 + $0x58] sm:$0xff] (!%p178_p3)   ;;  %v836_v14 = vld [vmem:[%s1041_s1 + $0x60] sm:$0xff] (!%p178_p3)   ;;  %v839_v17 = vld [vmem:[%s1041_s1 + $0x68] sm:$0xff] (!%p178_p3)  }
   0xb   : > { %v834_v13 = vld [vmem:[%s1041_s1 + $0x18] sm:$0xff] (!%p178_p3)   ;;  %v837_v16 = vld [vmem:[%s1041_s1 + $0x20] sm:$0xff] (!%p178_p3)   ;;  %v838_v18 = vld [vmem:[%s1041_s1 + $0xb0] sm:$0xff] (!%p178_p3)  }
   0xc   : > { %550 = vmatpush1.bf16.msra.mxu1 (!%p178_p3), %v823_v2  ;;  %v840_v19 = vld [vmem:[%s1041_s1 + $0x28] sm:$0xff] (!%p178_p3)   ;;  %v842_v20 = vld [vmem:[%s1041_s1 + $0x70] sm:$0xff] (!%p178_p3)   ;;  %v841_v21 = vld [vmem:[%s1041_s1 + $0xb8] sm:$0xff] (!%p178_p3)  }
   0xd   : > { %551 = vmatprep.subr.bf16.mxu1 (!%p178_p3), %v880_v1  ;;  %778 = vmatpush3.bf16.msra.mxu0 (!%p178_p3), %v828_v7  ;;  %v843_v22 = vld [vmem:[%s1041_s1 + $0x30] sm:$0xff] (!%p178_p3)   ;;  %v845_v23 = vld [vmem:[%s1041_s1 + $0x78] sm:$0xff] (!%p178_p3)   ;;  %v844_v26 = vld [vmem:[%s1041_s1 + $0xc0] sm:$0xff] (!%p178_p3)  }
   0xe   : > { %779 = vmatprep.subr.bf16.mxu0 %v830_v8  ;;  %s1049_s9 = smov (!%p221_p4, %s724_s9), 3  ;;  %v846_v25 = vld [vmem:[%s1041_s1 + $0x38] sm:$0xff]   ;;  %v847_v29 = vld [vmem:[%s1041_s1 + $0xc8] sm:$0xff]   ;;  %v851_v30 = vld [vmem:[%s1041_s1 + $0xd0] sm:$0xff]  }
   0xf   : > { %s767_s4 = sshll.u32 %s1049_s9, 4  ;;  %v852_v31 = vld [vmem:[%s1041_s1 + $0xd8] sm:$0xff]   ;;  %v729_v39 = vld [vmem:[%s1042_s2] ss:$0 sm:$0xff]  ;;  %s728_s5 = sshll.u32 %s1049_s9, 2 }
  0x10   : > { %552 = vmatpush1.bf16.msra.mxu1 %v826_v5  ;;  %s227_s16 = scalar_lea.vmem %s1040_s0, %s767_s4  ;;  %s245_s8 = scalar_lea.vmem %s1043_s3, %s728_s5 }
  0x11   : > { %553 = vmatprep.subr.bf16.mxu1 %v880_v1  ;;  %780 = vmatpush3.bf16.msra.mxu0 %v831_v9  ;;  %v850_v24 = vld [vmem:[%s227_s16 + $0x4] ss:$16 sps:$4 sm:$0xff]   ;;  %v855_v27 = vld [vmem:[%s227_s16 + $0xc] ss:$16 sps:$4 sm:$0xff]   ;;  %v848_v28 = vld [vmem:[%s227_s16] ss:$16 sps:$4 sm:$0xff]  }
  0x12   : > { %781 = vmatprep.subr.bf16.mxu0 %v833_v11  ;;  %538 = vmatprep.mubr.bf16.mxu0 %v850_v24  ;;  %v853_v32 = vld [vmem:[%s227_s16 + $0x8] ss:$16 sps:$4 sm:$0xff]  }
  0x13   : > { %762 = vmatprep.mubr.msk.bf16.mxu1 %vm502_vm0, %v855_v27 }
  0x14   : > { %554 = vmatpush1.bf16.msra.mxu1 %v829_v10 }
  0x15   : > { %555 = vmatprep.subr.bf16.mxu1 %v880_v1  ;;  %782 = vmatpush3.bf16.msra.mxu0 %v834_v13 }
  0x16   : > { %783 = vmatprep.subr.bf16.mxu0 %v836_v14 }
  0x18   : > { %556 = vmatpush1.bf16.msra.mxu1 %v832_v12 }
  0x19   : > { %557 = vmatprep.subr.bf16.mxu1 %v880_v1  ;;  %784 = vmatpush3.bf16.msra.mxu0 %v837_v16 }
  0x1a   : > { %785 = vmatprep.subr.bf16.mxu0 %v839_v17 }
  0x1c   : > { %558 = vmatpush1.bf16.msra.mxu1 %v835_v15 }
  0x1d   : > { %559 = vmatprep.subr.bf16.mxu1 %v880_v1  ;;  %786 = vmatpush3.bf16.msra.mxu0 %v840_v19 }
  0x1e   : > { %787 = vmatprep.subr.bf16.mxu0 %v842_v20 }
  0x20   : > { %560 = vmatpush1.bf16.msra.mxu1 %v838_v18 }
  0x21   : > { %561 = vmatprep.subr.bf16.mxu1 %v880_v1  ;;  %788 = vmatpush3.bf16.msra.mxu0 %v843_v22 }
  0x22   : > { %789 = vmatprep.subr.bf16.mxu0 %v845_v23 }
  0x24   : > { %562 = vmatpush1.bf16.msra.mxu1 %v841_v21 }
  0x25   : > { %563 = vmatprep.subr.bf16.mxu1 %v880_v1  ;;  %790 = vmatpush3.bf16.msra.mxu0 %v846_v25 }
  0x28   : > { %564 = vmatpush1.bf16.msra.mxu1 %v844_v26  ;;  %539 = vmatmul.mubr.bf16.vlgmr.msra.gmra.mrb[0].mxu0 %v848_v28 }
  0x29   : > { %565 = vmatprep.subr.bf16.mxu1 %v880_v1 }
  0x2c   : > { %566 = vmatpush1.bf16.msra.mxu1 %v847_v29 }
  0x2d   : > { %567 = vmatprep.subr.bf16.mxu1 %v880_v1 }
  0x30   : > { %568 = vmatpush1.bf16.msra.mxu1 %v851_v30 }
  0x31   : > { %569 = vmatprep.subr.bf16.mxu1 %v880_v1 }
  0x34   : > { %570 = vmatpush1.bf16.msra.mxu1 %v852_v31 }
  0x37   : > { %580 = vmatmul.mubr.bf16.vlgmr.msra.gmra.mrb[0].mxu1 %v853_v32 }
  0xfb   : > { %v791_v33 = vpop.f32.mrb[0].mxu0 }
  0xfc   : > { %v792_v34 = vpop.f32.mrb[1].mxu0 }
  0xfd   : > { %v793_v35 = vadd.f32 %v792_v34, %v791_v33  ;;  %v794_v36 = vpop.f32.mrb[2].mxu0 }
  0xfe   : > { %v795_v37 = vpop.f32.mrb[3].mxu0 }
  0xff   : > { %v796_v38 = vadd.f32 %v795_v37, %v794_v36  ;;  %v541_v40 = vadd.f32 %v793_v35, %v729_v39 }
 0x101   : > { %v544_v44 = vadd.f32 %v796_v38, %v729_v39 }
 0x10a   : > { %v581_v41 = vpop.f32.mrb[0].mxu1 }
 0x10b   : > { %v582_v42 = vadd.f32 %v581_v41, %v541_v40  ;;  %v583_v43 = vpop.f32.mrb[1].mxu1 }
 0x10c   : > { %v584_v45 = vpop.f32.mrb[2].mxu1 }
 0x10d   : > { %v585_v46 = vadd.f32 %v584_v45, %v544_v44  ;;  %v586_v47 = vpop.f32.mrb[3].mxu1  ;;  %v588_v48 = vmax.f32 %v582_v42, 0.0 }
 0x10f   : > { %v589_v49 = vmax.f32 %v585_v46, 0.0 }
 0x111   : > { %v773_v50 = vpack.c.bf16 %v589_v49, %v588_v48 }
 0x113   : > { %774 = vst [vmem:[%s245_s8] sm:$0xff] %v773_v50  }
 0x114 PF: > { %s13_s14 = sadd.s32 1, %s878_s14   ;;  %s1044_s12 = smov %s874_s13 }
 0x115   : > { %p10_p5 = scmp.ge.s32.totalorder %s13_s14, 4   ;;  %s1045_s13 = smov %s1047_s15 }
 0x117   :  { %12 = sbr.rel (!%p10_p5) target bundleno = 2 (0x2), region = 68 }

// kernel: jointnet_forward.65
= control target key start
LH: loop header
LB: loop body
LE: loop exit
PB: predicated region body
PF: predicated region fallthrough
CT: control target
= control target key end

     0   :  { %s957_s12 = smov 0   ;;  %s959_s13 = smov 0   ;;  %s1096_s0 = inlined_call_operand.vmem [shape: bf16[1,32,512], index: 0, kind: input, shape index: {}]   ;;  %s1097_s1 = inlined_call_operand.vmem [shape: bf16[1,512,128], index: 1, kind: input, shape index: {}]   ;;  %s1098_s2 = inlined_call_operand.vmem [shape: f32[1,1,128], index: 2, kind: input, shape index: {}]   ;;  %s1099_s3 = inlined_call_operand.vmem [shape: bf16[1,32,128], index: 3, kind: output, shape index: {}]  }
   0x1   :  { %s961_s14 = smov 0  }
   0x2 LB: > { %s22_s15 = sadd.s32 1, %s931_s13  ;;  %p752_p0 = scmp.ge.s32.totalorder %s935_s14, 1  ;;  %s935_s14 = sphi %s961_s14, %s13_s14   ;;  %s931_s13 = sphi %s959_s13, %s1101_s13   ;;  %s927_s12 = sphi %s957_s12, %s1100_s12  }
   0x3   : > { %p23_p1 = scmp.ge.s32.totalorder %s22_s15, 2  ;;  %p177_p2 = scmp.lt.s32.totalorder %s935_s14, 3 }
   0x5   : > { %s1103_s15 = smov (%p23_p1, %s22_s15), 0  ;;  %p178_p3 = pnand %p752_p0, %p177_p2 }
   0x6   : > { %v875_v0 = vld [vmem:[%s1097_s1 + $0x40] sm:$0xff] (!%p178_p3)   ;;  %v879_v4 = vld [vmem:[%s1097_s1 + $0x48] sm:$0xff] (!%p178_p3)   ;;  %v883_v8 = vld [vmem:[%s1097_s1 + $0x50] sm:$0xff] (!%p178_p3)   ;;  %s753_s25 = sshll.u32 (!%p178_p3), %s927_s12, 1 }
   0x7   : > { %181 = sbr.rel (%p178_p3) target bundleno = 266 (0x10a), region = 32  ;;  %v876_v1 = vld [vmem:[%s1097_s1 + $0xc0] sm:$0xff] (!%p178_p3)   ;;  %807 = vmatprep.subr.bf16.mxu0 (!%p178_p3), %v875_v0  ;;  %v880_v5 = vld [vmem:[%s1097_s1 + $0xc8] sm:$0xff] (!%p178_p3)   ;;  %v884_v9 = vld [vmem:[%s1097_s1 + $0xd0] sm:$0xff] (!%p178_p3)   ;;  %p221_p4 = scmp.lt.s32.totalorder (!%p178_p3), %s753_s25, 3 }
   0x8   : > { %v877_v2 = vld [vmem:[%s1097_s1] sm:$0xff] (!%p178_p3)   ;;  %829 = vmatprep.subr.bf16.mxu1 (!%p178_p3), %v876_v1  ;;  %v881_v6 = vld [vmem:[%s1097_s1 + $0x8] sm:$0xff] (!%p178_p3)   ;;  %v885_v10 = vld [vmem:[%s1097_s1 + $0x10] sm:$0xff] (!%p178_p3)  }
   0x9   : > { %v878_v3 = vld [vmem:[%s1097_s1 + $0x80] sm:$0xff] (!%p178_p3)   ;;  %808 = vmatpush3.bf16.msra.mxu0 (!%p178_p3), %v877_v2  ;;  %v882_v7 = vld [vmem:[%s1097_s1 + $0x88] sm:$0xff] (!%p178_p3)   ;;  %v886_v11 = vld [vmem:[%s1097_s1 + $0x90] sm:$0xff] (!%p178_p3)  }
   0xa   : > { %830 = vmatpush3.bf16.msra.mxu1 (!%p178_p3), %v878_v3  ;;  %809 = vmatprep.subr.bf16.mxu0 (!%p178_p3), %v879_v4  ;;  %v887_v12 = vld [vmem:[%s1097_s1 + $0x58] sm:$0xff] (!%p178_p3)   ;;  %v891_v16 = vld [vmem:[%s1097_s1 + $0x60] sm:$0xff] (!%p178_p3)   ;;  %v895_v20 = vld [vmem:[%s1097_s1 + $0x68] sm:$0xff] (!%p178_p3)  }
   0xb   : > { %831 = vmatprep.subr.bf16.mxu1 (!%p178_p3), %v880_v5  ;;  %v888_v13 = vld [vmem:[%s1097_s1 + $0xd8] sm:$0xff] (!%p178_p3)   ;;  %v892_v17 = vld [vmem:[%s1097_s1 + $0xe0] sm:$0xff] (!%p178_p3)   ;;  %v896_v21 = vld [vmem:[%s1097_s1 + $0xe8] sm:$0xff] (!%p178_p3)  }
   0xc   : > { %v889_v14 = vld [vmem:[%s1097_s1 + $0x18] sm:$0xff] (!%p178_p3)   ;;  %v893_v18 = vld [vmem:[%s1097_s1 + $0x20] sm:$0xff] (!%p178_p3)   ;;  %v897_v22 = vld [vmem:[%s1097_s1 + $0x28] sm:$0xff] (!%p178_p3)  }
   0xd   : > { %810 = vmatpush3.bf16.msra.mxu0 (!%p178_p3), %v881_v6  ;;  %v890_v15 = vld [vmem:[%s1097_s1 + $0x98] sm:$0xff] (!%p178_p3)   ;;  %v894_v19 = vld [vmem:[%s1097_s1 + $0xa0] sm:$0xff] (!%p178_p3)   ;;  %v898_v23 = vld [vmem:[%s1097_s1 + $0xa8] sm:$0xff] (!%p178_p3)  }
   0xe   : > { %832 = vmatpush3.bf16.msra.mxu1 %v882_v7  ;;  %811 = vmatprep.subr.bf16.mxu0 %v883_v8  ;;  %s1105_s25 = smov (!%p221_p4, %s753_s25), 3  ;;  %v899_v24 = vld [vmem:[%s1097_s1 + $0x70] sm:$0xff]   ;;  %v903_v28 = vld [vmem:[%s1097_s1 + $0x78] sm:$0xff]   ;;  %v758_v38 = vld [vmem:[%s1098_s2] ss:$0 sm:$0xff] }
   0xf   : > { %833 = vmatprep.subr.bf16.mxu1 %v884_v9  ;;  %v900_v25 = vld [vmem:[%s1097_s1 + $0xf0] sm:$0xff]   ;;  %s799_s24 = sshll.u32 %s1105_s25, 4  ;;  %v904_v29 = vld [vmem:[%s1097_s1 + $0xf8] sm:$0xff]   ;;  %s757_s17 = sshll.u32 %s1105_s25, 2 }
  0x10   : > { %v901_v26 = vld [vmem:[%s1097_s1 + $0x30] sm:$0xff]   ;;  %s227_s12 = scalar_lea.vmem %s1096_s0, %s799_s24  ;;  %v905_v30 = vld [vmem:[%s1097_s1 + $0x38] sm:$0xff]   ;;  %s245_s20 = scalar_lea.vmem %s1099_s3, %s757_s17 }
  0x11   : > { %812 = vmatpush3.bf16.msra.mxu0 %v885_v10  ;;  %v902_v27 = vld [vmem:[%s1097_s1 + $0xb0] sm:$0xff]   ;;  %v906_v31 = vld [vmem:[%s1097_s1 + $0xb8] sm:$0xff]  }
  0x12   : > { %834 = vmatpush3.bf16.msra.mxu1 %v886_v11  ;;  %813 = vmatprep.subr.bf16.mxu0 %v887_v12  ;;  %v907_v32 = vld [vmem:[%s227_s12] ss:$16 sps:$4 sm:$0xff]   ;;  %v909_v33 = vld [vmem:[%s227_s12 + $0x4] ss:$16 sps:$4 sm:$0xff]   ;;  %v910_v34 = vld [vmem:[%s227_s12 + $0x8] ss:$16 sps:$4 sm:$0xff]  }
  0x13   : > { %835 = vmatprep.subr.bf16.mxu1 %v888_v13  ;;  %v912_v35 = vld [vmem:[%s227_s12 + $0xc] ss:$16 sps:$4 sm:$0xff]   ;;  %567 = vmatprep.mubr.bf16.mxu0 %v909_v33 }
  0x14   : > { %608 = vmatprep.mubr.bf16.mxu1 %v912_v35 }
  0x15   : > { %814 = vmatpush3.bf16.msra.mxu0 %v889_v14 }
  0x16   : > { %836 = vmatpush3.bf16.msra.mxu1 %v890_v15  ;;  %815 = vmatprep.subr.bf16.mxu0 %v891_v16 }
  0x17   : > { %837 = vmatprep.subr.bf16.mxu1 %v892_v17 }
  0x19   : > { %816 = vmatpush3.bf16.msra.mxu0 %v893_v18 }
  0x1a   : > { %838 = vmatpush3.bf16.msra.mxu1 %v894_v19  ;;  %817 = vmatprep.subr.bf16.mxu0 %v895_v20 }
  0x1b   : > { %839 = vmatprep.subr.bf16.mxu1 %v896_v21 }
  0x1d   : > { %818 = vmatpush3.bf16.msra.mxu0 %v897_v22 }
  0x1e   : > { %840 = vmatpush3.bf16.msra.mxu1 %v898_v23  ;;  %819 = vmatprep.subr.bf16.mxu0 %v899_v24 }
  0x1f   : > { %841 = vmatprep.subr.bf16.mxu1 %v900_v25 }
  0x21   : > { %820 = vmatpush3.bf16.msra.mxu0 %v901_v26 }
  0x22   : > { %842 = vmatpush3.bf16.msra.mxu1 %v902_v27  ;;  %821 = vmatprep.subr.bf16.mxu0 %v903_v28 }
  0x23   : > { %843 = vmatprep.subr.bf16.mxu1 %v904_v29 }
  0x25   : > { %822 = vmatpush3.bf16.msra.mxu0 %v905_v30 }
  0x26   : > { %844 = vmatpush3.bf16.msra.mxu1 %v906_v31 }
  0x28   : > { %568 = vmatmul.mubr.bf16.vlgmr.msra.gmra.mrb[0].mxu0 %v907_v32 }
  0x29   : > { %609 = vmatmul.mubr.bf16.vlgmr.msra.gmra.mrb[0].mxu1 %v910_v34 }
  0xfb   : > { %v823_v36 = vpop.f32.mrb[0].mxu0 }
  0xfc   : > { %v845_v37 = vpop.f32.mrb[0].mxu1  ;;  %v824_v39 = vpop.f32.mrb[1].mxu0 }
  0xfd   : > { %v825_v40 = vadd.f32 %v824_v39, %v823_v36  ;;  %v846_v41 = vpop.f32.mrb[1].mxu1  ;;  %v826_v42 = vpop.f32.mrb[2].mxu0 }
  0xfe   : > { %v847_v43 = vadd.f32 %v846_v41, %v845_v37  ;;  %v848_v44 = vpop.f32.mrb[2].mxu1  ;;  %v827_v45 = vpop.f32.mrb[3].mxu0 }
  0xff   : > { %v570_v46 = vadd.f32 %v825_v40, %v758_v38  ;;  %v828_v47 = vadd.f32 %v827_v45, %v826_v42  ;;  %v849_v48 = vpop.f32.mrb[3].mxu1 }
 0x100   : > { %v850_v49 = vadd.f32 %v849_v48, %v848_v44 }
 0x101   : > { %v611_v50 = vadd.f32 %v847_v43, %v570_v46  ;;  %v573_v51 = vadd.f32 %v828_v47, %v758_v38 }
 0x103   : > { %v614_v52 = vadd.f32 %v850_v49, %v573_v51  ;;  %v617_v53 = vmax.f32 %v611_v50, 0.0 }
 0x105   : > { %v618_v54 = vmax.f32 %v614_v52, 0.0 }
 0x107   : > { %v805_v55 = vpack.c.bf16 %v618_v54, %v617_v53 }
 0x109   : > { %806 = vst [vmem:[%s245_s20] sm:$0xff] %v805_v55  }
 0x10a PF: > { %s13_s14 = sadd.s32 1, %s935_s14   ;;  %s1100_s12 = smov %s931_s13 }
 0x10b   : > { %p10_p5 = scmp.ge.s32.totalorder %s13_s14, 4   ;;  %s1101_s13 = smov %s1103_s15 }
 0x10d   :  { %12 = sbr.rel (!%p10_p5) target bundleno = 2 (0x2), region = 68 }

// kernel: jointnet_forward.66
= control target key start
LH: loop header
LB: loop body
LE: loop exit
PB: predicated region body
PF: predicated region fallthrough
CT: control target
= control target key end

     0   :  { %v223_v1 = vmov 0   ;;  %v34_v18 = vlaneseq  ;;  %s301_s1 = inlined_call_operand.vmem [shape: bf16[1,128,256], index: 1, kind: input, shape index: {}]   ;;  %s302_s0 = inlined_call_operand.vmem [shape: bf16[1,8,128], index: 0, kind: input, shape index: {}]   ;;  %s303_s2 = inlined_call_operand.vmem [shape: f32[1,1,256], index: 2, kind: input, shape index: {}]   ;;  %s304_s3 = inlined_call_operand.vmem [shape: bf16[1,8,256], index: 3, kind: output, shape index: {}]  }
   0x1   :  { %v199_v0 = vld [vmem:[%s301_s1 + $0x4] ss:$8 sps:$4 sm:$0xff]   ;;  %156 = vmatprep.mubr.bf16.mxu0 %v223_v1  ;;  %v201_v2 = vld [vmem:[%s301_s1] ss:$8 sps:$4 sm:$0xff]   ;;  %v202_v3 = vld [vmem:[%s301_s1 + $0x14] ss:$8 sps:$4 sm:$0xff]  }
   0x2   :  { %124 = vmatprep.subr.bf16.mxu0 %v199_v0  ;;  %v204_v4 = vld [vmem:[%s301_s1 + $0x10] ss:$8 sps:$4 sm:$0xff]   ;;  %v205_v5 = vld [vmem:[%s301_s1 + $0x24] ss:$8 sps:$4 sm:$0xff]   ;;  %v207_v6 = vld [vmem:[%s301_s1 + $0x20] ss:$8 sps:$4 sm:$0xff]  }
   0x3   :  { %125 = vmatpush1.bf16.msra.mxu0 %v201_v2  ;;  %v208_v7 = vld [vmem:[%s301_s1 + $0x34] ss:$8 sps:$4 sm:$0xff]   ;;  %v210_v8 = vld [vmem:[%s301_s1 + $0x30] ss:$8 sps:$4 sm:$0xff]   ;;  %v211_v9 = vld [vmem:[%s301_s1 + $0x44] ss:$8 sps:$4 sm:$0xff]  }
   0x4   :  { %126 = vmatprep.subr.bf16.mxu0 %v202_v3  ;;  %v213_v10 = vld [vmem:[%s301_s1 + $0x40] ss:$8 sps:$4 sm:$0xff]   ;;  %v214_v11 = vld [vmem:[%s301_s1 + $0x54] ss:$8 sps:$4 sm:$0xff]   ;;  %v216_v12 = vld [vmem:[%s301_s1 + $0x50] ss:$8 sps:$4 sm:$0xff]  }
   0x5   :  { %v217_v13 = vld [vmem:[%s301_s1 + $0x64] ss:$8 sps:$4 sm:$0xff]   ;;  %v219_v14 = vld [vmem:[%s301_s1 + $0x60] ss:$8 sps:$4 sm:$0xff]   ;;  %v220_v15 = vld [vmem:[%s301_s1 + $0x74] ss:$8 sps:$4 sm:$0xff]  }
   0x6   :  { %v222_v16 = vld [vmem:[%s301_s1 + $0x70] ss:$8 sps:$4 sm:$0xff]   ;;  %v15_v17 = vld [vmem:[%s302_s0] sm:$0xf]  ;;  %v35_v19 = vshrl.u32 %v34_v18, 7 }
   0x7   :  { %127 = vmatpush1.bf16.msra.mxu0 %v204_v4  ;;  %v32_v21 = vld [vmem:[%s303_s2] sm:$0x3] }
   0x8   :  { %128 = vmatprep.subr.bf16.mxu0 %v205_v5  ;;  %v36_v20 = vsub.s32 0, %v35_v19  ;;  %v40_v22 = vsub.s32 1, %v35_v19 }
   0xa   :  { %v37_v23 = vrot.slane %v32_v21, %v36_v20  ;;  %v41_v24 = vrot.slane %v32_v21, %v40_v22 }
   0xb   :  { %129 = vmatpush1.bf16.msra.mxu0 %v207_v6 }
   0xc   :  { %130 = vmatprep.subr.bf16.mxu0 %v208_v7 }
   0xf   :  { %131 = vmatpush1.bf16.msra.mxu0 %v210_v8 }
  0x10   :  { %132 = vmatprep.subr.bf16.mxu0 %v211_v9 }
  0x13   :  { %133 = vmatpush1.bf16.msra.mxu0 %v213_v10 }
  0x14   :  { %134 = vmatprep.subr.bf16.mxu0 %v214_v11 }
  0x17   :  { %135 = vmatpush1.bf16.msra.mxu0 %v216_v12 }
  0x18   :  { %136 = vmatprep.subr.bf16.mxu0 %v217_v13 }
  0x1b   :  { %137 = vmatpush1.bf16.msra.mxu0 %v219_v14 }
  0x1c   :  { %138 = vmatprep.subr.bf16.mxu0 %v220_v15 }
  0x1f   :  { %139 = vmatpush1.bf16.msra.mxu0 %v222_v16 }
  0x22   :  { %157 = vmatmul.mubr.bf16.vlgmr.msra.gmra.mrb[0].mxu0 %v15_v17 }
  0xf5   :  { %v158_v25 = vpop.f32.mrb[0].mxu0 }
  0xf6   :  { %v159_v26 = vadd.f32 %v158_v25, %v37_v23  ;;  %v160_v27 = vpop.f32.mrb[1].mxu0 }
  0xf7   :  { %v161_v28 = vadd.f32 %v160_v27, %v41_v24  ;;  %v162_v29 = vpop.f32.mrb[2].mxu0 }
  0xf8   :  { %v165_v30 = vmax.f32 %v159_v26, 0.0  ;;  %v163_v31 = vpop.f32.mrb[3].mxu0 }
  0xf9   :  { %v166_v32 = vmax.f32 %v161_v28, 0.0 }
  0xfb   :  { %v197_v33 = vpack.c.bf16 %v166_v32, %v165_v30 }
  0xfd   :  { %175 = vst [vmem:[%s304_s3] sm:$0xff] %v197_v33 }

// kernel: jointnet_forward.67
= control target key start
LH: loop header
LB: loop body
LE: loop exit
PB: predicated region body
PF: predicated region fallthrough
CT: control target
= control target key end

     0   :  { %s1196_s12 = smov 0   ;;  %s1198_s13 = smov 0   ;;  %s1391_s0 = inlined_call_operand.vmem [shape: bf16[1,32,768], index: 0, kind: input, shape index: {}]   ;;  %s1392_s1 = inlined_call_operand.vmem [shape: bf16[1,768,128], index: 1, kind: input, shape index: {}]   ;;  %s1393_s2 = inlined_call_operand.vmem [shape: f32[1,1,128], index: 2, kind: input, shape index: {}]   ;;  %s1394_s3 = inlined_call_operand.vmem [shape: bf16[1,32,128], index: 3, kind: output, shape index: {}]  }
   0x1   :  { %s1200_s14 = smov 0  }
   0x2 LB: > { %s22_s15 = sadd.s32 1, %s1170_s13  ;;  %p933_p0 = scmp.ge.s32.totalorder %s1174_s14, 1  ;;  %s1174_s14 = sphi %s1200_s14, %s13_s14   ;;  %s1170_s13 = sphi %s1198_s13, %s1396_s13   ;;  %s1166_s12 = sphi %s1196_s12, %s1395_s12  }
   0x3   : > { %p23_p1 = scmp.ge.s32.totalorder %s22_s15, 2  ;;  %p177_p2 = scmp.lt.s32.totalorder %s1174_s14, 3 }
   0x5   : > { %s1398_s15 = smov (%p23_p1, %s22_s15), 0  ;;  %p178_p3 = pnand %p933_p0, %p177_p2 }
   0x6   : > { %v1095_v0 = vld [vmem:[%s1392_s1 + $0x40] sm:$0xff] (!%p178_p3)   ;;  %v1099_v4 = vld [vmem:[%s1392_s1 + $0x48] sm:$0xff] (!%p178_p3)   ;;  %v1103_v8 = vld [vmem:[%s1392_s1 + $0x50] sm:$0xff] (!%p178_p3)   ;;  %s934_s21 = sshll.u32 (!%p178_p3), %s1166_s12, 1 }
   0x7   : > { %181 = sbr.rel (%p178_p3) target bundleno = 295 (0x127), region = 32  ;;  %v1096_v1 = vld [vmem:[%s1392_s1] sm:$0xff] (!%p178_p3)   ;;  %1004 = vmatprep.subr.bf16.mxu0 (!%p178_p3), %v1095_v0  ;;  %v1100_v5 = vld [vmem:[%s1392_s1 + $0x8] sm:$0xff] (!%p178_p3)   ;;  %v1104_v9 = vld [vmem:[%s1392_s1 + $0x10] sm:$0xff] (!%p178_p3)   ;;  %p221_p4 = scmp.lt.s32.totalorder (!%p178_p3), %s934_s21, 3 }
   0x8   : > { %v1097_v2 = vld [vmem:[%s1392_s1 + $0xc0] sm:$0xff] (!%p178_p3)   ;;  %1005 = vmatpush3.bf16.msra.mxu0 (!%p178_p3), %v1096_v1  ;;  %v1101_v6 = vld [vmem:[%s1392_s1 + $0xc8] sm:$0xff] (!%p178_p3)   ;;  %v1105_v10 = vld [vmem:[%s1392_s1 + $0xd0] sm:$0xff] (!%p178_p3)  }
   0x9   : > { %v1098_v3 = vld [vmem:[%s1392_s1 + $0x80] sm:$0xff] (!%p178_p3)   ;;  %1026 = vmatprep.subr.bf16.mxu1 (!%p178_p3), %v1097_v2  ;;  %1006 = vmatprep.subr.bf16.mxu0 (!%p178_p3), %v1099_v4  ;;  %v1102_v7 = vld [vmem:[%s1392_s1 + $0x88] sm:$0xff] (!%p178_p3)   ;;  %v1106_v11 = vld [vmem:[%s1392_s1 + $0x90] sm:$0xff] (!%p178_p3)  }
   0xa   : > { %1027 = vmatpush3.bf16.msra.mxu1 (!%p178_p3), %v1098_v3  ;;  %v1107_v12 = vld [vmem:[%s1392_s1 + $0x58] sm:$0xff] (!%p178_p3)   ;;  %v1111_v16 = vld [vmem:[%s1392_s1 + $0x60] sm:$0xff] (!%p178_p3)   ;;  %v1115_v20 = vld [vmem:[%s1392_s1 + $0x68] sm:$0xff] (!%p178_p3)  }
   0xb   : > { %1028 = vmatprep.subr.bf16.mxu1 (!%p178_p3), %v1101_v6  ;;  %v1108_v13 = vld [vmem:[%s1392_s1 + $0x18] sm:$0xff] (!%p178_p3)   ;;  %v1112_v17 = vld [vmem:[%s1392_s1 + $0x20] sm:$0xff] (!%p178_p3)   ;;  %v1116_v21 = vld [vmem:[%s1392_s1 + $0x28] sm:$0xff] (!%p178_p3)  }
   0xc   : > { %1007 = vmatpush3.bf16.msra.mxu0 (!%p178_p3), %v1100_v5  ;;  %v1109_v14 = vld [vmem:[%s1392_s1 + $0xd8] sm:$0xff] (!%p178_p3)   ;;  %v1113_v18 = vld [vmem:[%s1392_s1 + $0xe0] sm:$0xff] (!%p178_p3)   ;;  %v1117_v22 = vld [vmem:[%s1392_s1 + $0xe8] sm:$0xff] (!%p178_p3)  }
   0xd   : > { %1008 = vmatprep.subr.bf16.mxu0 (!%p178_p3), %v1103_v8  ;;  %v1110_v15 = vld [vmem:[%s1392_s1 + $0x98] sm:$0xff] (!%p178_p3)   ;;  %v1114_v19 = vld [vmem:[%s1392_s1 + $0xa0] sm:$0xff] (!%p178_p3)   ;;  %v1118_v23 = vld [vmem:[%s1392_s1 + $0xa8] sm:$0xff] (!%p178_p3)  }
   0xe   : > { %1029 = vmatpush3.bf16.msra.mxu1 %v1102_v7  ;;  %s1400_s21 = smov (!%p221_p4, %s934_s21), 3  ;;  %v1119_v24 = vld [vmem:[%s1392_s1 + $0x70] sm:$0xff]   ;;  %v1123_v28 = vld [vmem:[%s1392_s1 + $0x78] sm:$0xff]   ;;  %v1130_v34 = vld [vmem:[%s1392_s1 + $0x140] sm:$0xff]  }
   0xf   : > { %1030 = vmatprep.subr.bf16.mxu1 %v1105_v10  ;;  %s1070_s20 = smul.u32 24, %s1400_s21  ;;  %v1120_v25 = vld [vmem:[%s1392_s1 + $0x30] sm:$0xff]   ;;  %v1124_v29 = vld [vmem:[%s1392_s1 + $0x38] sm:$0xff]   ;;  %v1134_v37 = vld [vmem:[%s1392_s1 + $0x100] sm:$0xff]  }
  0x10   : > { %1009 = vmatpush3.bf16.msra.mxu0 %v1104_v9  ;;  %v1121_v26 = vld [vmem:[%s1392_s1 + $0xf0] sm:$0xff]   ;;  %v1125_v30 = vld [vmem:[%s1392_s1 + $0xf8] sm:$0xff]   ;;  %v1135_v38 = vld [vmem:[%s1392_s1 + $0x148] sm:$0xff]  }
  0x11   : > { %1010 = vmatprep.subr.bf16.mxu0 %v1107_v12  ;;  %v1122_v27 = vld [vmem:[%s1392_s1 + $0xb0] sm:$0xff]   ;;  %s1310_s4 = scalar_lea.vmem %s1391_s0, %s1070_s20  ;;  %v1129_v33 = vld [vmem:[%s1392_s1 + $0xb8] sm:$0xff]   ;;  %v1136_v39 = vld [vmem:[%s1392_s1 + $0x108] sm:$0xff]  }
  0x12   : > { %1031 = vmatpush3.bf16.msra.mxu1 %v1106_v11  ;;  %v1126_v31 = vld [vmem:[%s1310_s4] ss:$24 sps:$4 sm:$0xff]   ;;  %v1128_v32 = vld [vmem:[%s1310_s4 + $0x4] ss:$24 sps:$4 sm:$0xff]   ;;  %v1137_v40 = vld [vmem:[%s1392_s1 + $0x150] sm:$0xff]  }
  0x13   : > { %1032 = vmatprep.subr.bf16.mxu1 %v1109_v14  ;;  %707 = vmatprep.mubr.bf16.mxu0 %v1128_v32  ;;  %v1131_v35 = vld [vmem:[%s1310_s4 + $0x8] ss:$24 sps:$4 sm:$0xff]   ;;  %v1133_v36 = vld [vmem:[%s1310_s4 + $0xc] ss:$24 sps:$4 sm:$0xff]   ;;  %v1138_v41 = vld [vmem:[%s1392_s1 + $0x110] sm:$0xff]  }
  0x14   : > { %1011 = vmatpush3.bf16.msra.mxu0 %v1108_v13  ;;  %748 = vmatprep.mubr.bf16.mxu1 %v1133_v36  ;;  %v1139_v42 = vld [vmem:[%s1392_s1 + $0x158] sm:$0xff]   ;;  %v1141_v44 = vld [vmem:[%s1392_s1 + $0x160] sm:$0xff]   ;;  %v1143_v46 = vld [vmem:[%s1392_s1 + $0x168] sm:$0xff]  }
  0x15   : > { %1012 = vmatprep.subr.bf16.mxu0 %v1111_v16  ;;  %v1140_v43 = vld [vmem:[%s1392_s1 + $0x118] sm:$0xff]   ;;  %v1142_v45 = vld [vmem:[%s1392_s1 + $0x120] sm:$0xff]   ;;  %v1151_v47 = vld [vmem:[%s1310_s4 + $0x14] ss:$24 sps:$4 sm:$0xff]  }
  0x16   : > { %1033 = vmatpush3.bf16.msra.mxu1 %v1110_v15  ;;  %v1144_v48 = vld [vmem:[%s1392_s1 + $0x128] sm:$0xff]   ;;  %v1145_v49 = vld [vmem:[%s1392_s1 + $0x170] sm:$0xff]   ;;  %v1147_v51 = vld [vmem:[%s1392_s1 + $0x178] sm:$0xff]  }
  0x17   : > { %1034 = vmatprep.subr.bf16.mxu1 %v1113_v18  ;;  %v1146_v50 = vld [vmem:[%s1392_s1 + $0x130] sm:$0xff]   ;;  %v1148_v52 = vld [vmem:[%s1392_s1 + $0x138] sm:$0xff]   ;;  %v938_v55 = vld [vmem:[%s1393_s2] ss:$0 sm:$0xff] }
  0x18   : > { %1013 = vmatpush3.bf16.msra.mxu0 %v1112_v17  ;;  %v1149_v53 = vld [vmem:[%s1310_s4 + $0x10] ss:$24 sps:$4 sm:$0xff]   ;;  %s937_s4 = sshll.u32 %s1400_s21, 2 }
  0x19   : > { %1014 = vmatprep.subr.bf16.mxu0 %v1115_v20  ;;  %s245_s12 = scalar_lea.vmem %s1394_s3, %s937_s4 }
  0x1a   : > { %1035 = vmatpush3.bf16.msra.mxu1 %v1114_v19 }
  0x1b   : > { %1036 = vmatprep.subr.bf16.mxu1 %v1117_v22 }
  0x1c   : > { %1015 = vmatpush3.bf16.msra.mxu0 %v1116_v21 }
  0x1d   : > { %1016 = vmatprep.subr.bf16.mxu0 %v1119_v24 }
  0x1e   : > { %1037 = vmatpush3.bf16.msra.mxu1 %v1118_v23 }
  0x1f   : > { %1038 = vmatprep.subr.bf16.mxu1 %v1121_v26 }
  0x20   : > { %1017 = vmatpush3.bf16.msra.mxu0 %v1120_v25 }
  0x21   : > { %1018 = vmatprep.subr.bf16.mxu0 %v1123_v28 }
  0x22   : > { %1039 = vmatpush3.bf16.msra.mxu1 %v1122_v27 }
  0x23   : > { %1040 = vmatprep.subr.bf16.mxu1 %v1125_v30 }
  0x24   : > { %1019 = vmatpush3.bf16.msra.mxu0 %v1124_v29 }
  0x25   : > { %1048 = vmatprep.subr.bf16.mxu0 %v1130_v34 }
  0x26   : > { %1041 = vmatpush3.bf16.msra.mxu1 %v1129_v33 }
  0x27   : > { %708 = vmatmul.mubr.bf16.vlgmr.msra.gmra.mrb[0].mxu0 %v1126_v31 }
  0x28   : > { %1049 = vmatpush3.bf16.msra.mxu0 %v1134_v37  ;;  %789 = vmatprep.mubr.bf16.mxu0 %v1151_v47 }
  0x29   : > { %749 = vmatmul.mubr.bf16.vlgmr.msra.gmra.mrb[0].mxu1 %v1131_v35  ;;  %1050 = vmatprep.subr.bf16.mxu0 %v1135_v38 }
  0x2c   : > { %1051 = vmatpush3.bf16.msra.mxu0 %v1136_v39 }
  0x2d   : > { %1052 = vmatprep.subr.bf16.mxu0 %v1137_v40 }
  0x30   : > { %1053 = vmatpush3.bf16.msra.mxu0 %v1138_v41 }
  0x31   : > { %1054 = vmatprep.subr.bf16.mxu0 %v1139_v42 }
  0x34   : > { %1055 = vmatpush3.bf16.msra.mxu0 %v1140_v43 }
  0x35   : > { %1056 = vmatprep.subr.bf16.mxu0 %v1141_v44 }
  0x38   : > { %1057 = vmatpush3.bf16.msra.mxu0 %v1142_v45 }
  0x39   : > { %1058 = vmatprep.subr.bf16.mxu0 %v1143_v46 }
  0x3c   : > { %1059 = vmatpush3.bf16.msra.mxu0 %v1144_v48 }
  0x3d   : > { %1060 = vmatprep.subr.bf16.mxu0 %v1145_v49 }
  0x40   : > { %1061 = vmatpush3.bf16.msra.mxu0 %v1146_v50 }
  0x41   : > { %1062 = vmatprep.subr.bf16.mxu0 %v1147_v51 }
  0x44   : > { %1063 = vmatpush3.bf16.msra.mxu0 %v1148_v52 }
  0x47   : > { %790 = vmatmul.mubr.bf16.vlgmr.msra.gmra.mrb[4].mxu0 %v1149_v53 }
  0xfa   : > { %v1020_v54 = vpop.f32.mrb[0].mxu0 }
  0xfb   : > { %v1021_v56 = vpop.f32.mrb[1].mxu0 }
  0xfc   : > { %v1022_v57 = vadd.f32 %v1021_v56, %v1020_v54  ;;  %v1023_v58 = vpop.f32.mrb[2].mxu0  ;;  %v1042_v59 = vpop.f32.mrb[0].mxu1 }
  0xfd   : > { %v1024_v60 = vpop.f32.mrb[3].mxu0  ;;  %v1043_v63 = vpop.f32.mrb[1].mxu1 }
  0xfe   : > { %v710_v61 = vadd.f32 %v1022_v57, %v938_v55  ;;  %v1025_v62 = vadd.f32 %v1024_v60, %v1023_v58  ;;  %v1044_v0 = vadd.f32 %v1043_v63, %v1042_v59  ;;  %v1045_v1 = vpop.f32.mrb[2].mxu1 }
  0xff   : > { %v1046_v3 = vpop.f32.mrb[3].mxu1 }
 0x100   : > { %v713_v2 = vadd.f32 %v1025_v62, %v938_v55  ;;  %v751_v4 = vadd.f32 %v1044_v0, %v710_v61  ;;  %v1047_v5 = vadd.f32 %v1046_v3, %v1045_v1 }
 0x102   : > { %v754_v6 = vadd.f32 %v1047_v5, %v713_v2 }
 0x11a   : > { %v1064_v7 = vpop.f32.mrb[4].mxu0 }
 0x11b   : > { %v1065_v8 = vpop.f32.mrb[5].mxu0 }
 0x11c   : > { %v1066_v9 = vadd.f32 %v1065_v8, %v1064_v7  ;;  %v1067_v10 = vpop.f32.mrb[6].mxu0 }
 0x11d   : > { %v1068_v11 = vpop.f32.mrb[7].mxu0 }
 0x11e   : > { %v792_v12 = vadd.f32 %v1066_v9, %v751_v4  ;;  %v1069_v13 = vadd.f32 %v1068_v11, %v1067_v10 }
 0x120   : > { %v795_v14 = vadd.f32 %v1069_v13, %v754_v6  ;;  %v798_v15 = vmax.f32 %v792_v12, 0.0 }
 0x122   : > { %v799_v16 = vmax.f32 %v795_v14, 0.0 }
 0x124   : > { %v1002_v17 = vpack.c.bf16 %v799_v16, %v798_v15 }
 0x126   : > { %1003 = vst [vmem:[%s245_s12] sm:$0xff] %v1002_v17  }
 0x127 PF: > { %s13_s14 = sadd.s32 1, %s1174_s14   ;;  %s1395_s12 = smov %s1170_s13 }
 0x128   : > { %p10_p5 = scmp.ge.s32.totalorder %s13_s14, 4   ;;  %s1396_s13 = smov %s1398_s15 }
 0x12a   :  { %12 = sbr.rel (!%p10_p5) target bundleno = 2 (0x2), region = 68 }

// kernel: jointnet_forward.68
= control target key start
LH: loop header
LB: loop body
LE: loop exit
PB: predicated region body
PF: predicated region fallthrough
CT: control target
= control target key end

     0   :  { %s1074_s12 = smov 0   ;;  %s1076_s13 = smov 0   ;;  %s1231_s0 = inlined_call_operand.vmem [shape: bf16[1,128,384], index: 0, kind: input, shape index: {}]   ;;  %s1232_s1 = inlined_call_operand.vmem [shape: bf16[1,384,64], index: 1, kind: input, shape index: {}]   ;;  %s1233_s2 = inlined_call_operand.vmem [shape: f32[1,1,64], index: 2, kind: input, shape index: {}]   ;;  %s1234_s3 = inlined_call_operand.vmem [shape: bf16[1,128,64], index: 3, kind: output, shape index: {}]  }
   0x1   :  { %s1078_s14 = smov 0  }
   0x2 LB: > { %s22_s15 = sadd.s32 1, %s1048_s13  ;;  %p829_p0 = scmp.ge.s32.totalorder %s1052_s14, 1  ;;  %s1052_s14 = sphi %s1078_s14, %s13_s14   ;;  %s1048_s13 = sphi %s1076_s13, %s1236_s13   ;;  %s1044_s12 = sphi %s1074_s12, %s1235_s12  }
   0x3   : > { %p23_p1 = scmp.ge.s32.totalorder %s22_s15, 2  ;;  %p177_p2 = scmp.lt.s32.totalorder %s1052_s14, 3 }
   0x5   : > { %s1238_s15 = smov (%p23_p1, %s22_s15), 0  ;;  %p178_p3 = pnand %p829_p0, %p177_p2 }
   0x6   : > { %v990_v0 = vld [vmem:[%s1232_s1 + $0x40] sm:$0xff] (!%p178_p3)   ;;  %v992_v2 = vld [vmem:[%s1232_s1 + $0x48] sm:$0xff] (!%p178_p3)   ;;  %v995_v5 = vld [vmem:[%s1232_s1 + $0x50] sm:$0xff] (!%p178_p3)   ;;  %s830_s30 = sshll.u32 (!%p178_p3), %s1044_s12, 3  ;;  %vm697_vm0 = vcmask (!%p178_p3), 519168  }
   0x7   : > { %181 = sbr.rel (%p178_p3) target bundleno = 289 (0x121), region = 32  ;;  %v991_v1 = vld [vmem:[%s1232_s1] sm:$0xff] (!%p178_p3)   ;;  %889 = vmatprep.subr.bf16.mxu0 (!%p178_p3), %v990_v0  ;;  %v994_v4 = vld [vmem:[%s1232_s1 + $0x8] sm:$0xff] (!%p178_p3)   ;;  %v997_v7 = vld [vmem:[%s1232_s1 + $0x10] sm:$0xff] (!%p178_p3)   ;;  %p221_p4 = scmp.lt.s32.totalorder (!%p178_p3), %s830_s30, 15 }
   0x8   : > { %890 = vmatpush3.bf16.msra.mxu0 (!%p178_p3), %v991_v1  ;;  %v993_v3 = vld [vmem:[%s1232_s1 + $0x80] sm:$0xff] (!%p178_p3)   ;;  %v996_v6 = vld [vmem:[%s1232_s1 + $0x88] sm:$0xff] (!%p178_p3)   ;;  %v998_v8 = vld [vmem:[%s1232_s1 + $0x58] sm:$0xff] (!%p178_p3)  }
   0x9   : > { %891 = vmatprep.subr.bf16.mxu0 (!%p178_p3), %v992_v2  ;;  %941 = vmatprep.subr.bf16.mxu1 (!%p178_p3), %v993_v3  ;;  %v999_v9 = vld [vmem:[%s1232_s1 + $0x90] sm:$0xff] (!%p178_p3)   ;;  %v1000_v10 = vld [vmem:[%s1232_s1 + $0x18] sm:$0xff] (!%p178_p3)   ;;  %v1001_v11 = vld [vmem:[%s1232_s1 + $0x60] sm:$0xff] (!%p178_p3)  }
   0xa   : > { %942 = vmatpush3.bf16.msra.mxu1 (!%p178_p3), %v993_v3  ;;  %v1002_v12 = vld [vmem:[%s1232_s1 + $0x98] sm:$0xff] (!%p178_p3)   ;;  %v1003_v13 = vld [vmem:[%s1232_s1 + $0x20] sm:$0xff] (!%p178_p3)   ;;  %v1004_v15 = vld [vmem:[%s1232_s1 + $0x68] sm:$0xff] (!%p178_p3)  }
   0xb   : > { %943 = vmatprep.subr.bf16.mxu1 (!%p178_p3), %v996_v6  ;;  %v1005_v14 = vld [vmem:[%s1232_s1 + $0xa0] sm:$0xff] (!%p178_p3)   ;;  %v1006_v16 = vld [vmem:[%s1232_s1 + $0x28] sm:$0xff] (!%p178_p3)   ;;  %v1007_v18 = vld [vmem:[%s1232_s1 + $0x70] sm:$0xff] (!%p178_p3)  }
   0xc   : > { %892 = vmatpush3.bf16.msra.mxu0 (!%p178_p3), %v994_v4  ;;  %v1008_v17 = vld [vmem:[%s1232_s1 + $0xa8] sm:$0xff] (!%p178_p3)   ;;  %v1009_v19 = vld [vmem:[%s1232_s1 + $0x30] sm:$0xff] (!%p178_p3)   ;;  %v1010_v20 = vld [vmem:[%s1232_s1 + $0x78] sm:$0xff] (!%p178_p3)  }
   0xd   : > { %893 = vmatprep.subr.bf16.mxu0 (!%p178_p3), %v995_v5  ;;  %v1011_v21 = vld [vmem:[%s1232_s1 + $0xb0] sm:$0xff] (!%p178_p3)   ;;  %v1012_v23 = vld [vmem:[%s1232_s1 + $0x38] sm:$0xff] (!%p178_p3)   ;;  %v1190_v38 = vld [vmem:[%s1233_s2] ss:$0 sm:$0xff] (!%p178_p3) }
   0xe   : > { %944 = vmatpush3.bf16.msra.mxu1 %v996_v6  ;;  %s1240_s30 = smov (!%p221_p4, %s830_s30), 15  ;;  %v1016_v25 = vld [vmem:[%s1232_s1 + $0xb8] sm:$0xff]  }
   0xf   : > { %945 = vmatprep.subr.bf16.mxu1 %v999_v9  ;;  %s965_s25 = smul.u32 12, %s1240_s30  ;;  %s833_s24 = sshll.u32 %s1240_s30, 2 }
  0x10   : > { %894 = vmatpush3.bf16.msra.mxu0 %v997_v7  ;;  %s1198_s27 = scalar_lea.vmem %s1234_s3, %s833_s24 }
  0x11   : > { %895 = vmatprep.subr.bf16.mxu0 %v998_v8  ;;  %s1161_s10 = scalar_lea.vmem %s1231_s0, %s965_s25 }
  0x12   : > { %946 = vmatpush3.bf16.msra.mxu1 %v999_v9  ;;  %v1015_v22 = vld [vmem:[%s1161_s10 + $0x4] ss:$12 sps:$4 sm:$0xff]   ;;  %v1017_v24 = vld [vmem:[%s1161_s10 + $0x8] ss:$12 sps:$4 sm:$0xff]   ;;  %v1013_v26 = vld [vmem:[%s1161_s10] ss:$12 sps:$4 sm:$0xff]  }
  0x13   : > { %947 = vmatprep.subr.bf16.mxu1 %v1002_v12  ;;  %559 = vmatprep.mubr.bf16.mxu0 %v1015_v22  ;;  %v1019_v27 = vld [vmem:[%s1161_s10 + $0x1c] ss:$12 sps:$4 sm:$0xff]   ;;  %v1018_v28 = vld [vmem:[%s1161_s10 + $0x20] ss:$12 sps:$4 sm:$0xff]   ;;  %v1025_v29 = vld [vmem:[%s1161_s10 + $0x38] ss:$12 sps:$4 sm:$0xff]  }
  0x14   : > { %896 = vmatpush3.bf16.msra.mxu0 %v1000_v10  ;;  %957 = vmatprep.mubr.bf16.mxu1 %v1017_v24  ;;  %v1021_v30 = vld [vmem:[%s1161_s10 + $0x18] ss:$12 sps:$4 sm:$0xff]   ;;  %v1022_v31 = vld [vmem:[%s1161_s10 + $0x34] ss:$12 sps:$4 sm:$0xff]   ;;  %v1026_v32 = vld [vmem:[%s1161_s10 + $0x50] ss:$12 sps:$4 sm:$0xff]  }
  0x15   : > { %897 = vmatprep.subr.bf16.mxu0 %v1001_v11  ;;  %v1024_v33 = vld [vmem:[%s1161_s10 + $0x30] ss:$12 sps:$4 sm:$0xff]   ;;  %v1027_v34 = vld [vmem:[%s1161_s10 + $0x4c] ss:$12 sps:$4 sm:$0xff]   ;;  %v1029_v35 = vld [vmem:[%s1161_s10 + $0x48] ss:$12 sps:$4 sm:$0xff]  }
  0x16   : > { %948 = vmatpush3.bf16.msra.mxu1 %v1002_v12 }
  0x17   : > { %949 = vmatprep.subr.bf16.mxu1 %v1005_v14 }
  0x18   : > { %898 = vmatpush3.bf16.msra.mxu0 %v1003_v13 }
  0x19   : > { %899 = vmatprep.subr.bf16.mxu0 %v1004_v15 }
  0x1a   : > { %950 = vmatpush3.bf16.msra.mxu1 %v1005_v14 }
  0x1b   : > { %951 = vmatprep.subr.bf16.mxu1 %v1008_v17 }
  0x1c   : > { %900 = vmatpush3.bf16.msra.mxu0 %v1006_v16 }
  0x1d   : > { %901 = vmatprep.subr.bf16.mxu0 %v1007_v18 }
  0x1e   : > { %952 = vmatpush3.bf16.msra.mxu1 %v1008_v17 }
  0x1f   : > { %953 = vmatprep.subr.bf16.mxu1 %v1011_v21 }
  0x20   : > { %902 = vmatpush3.bf16.msra.mxu0 %v1009_v19 }
  0x21   : > { %903 = vmatprep.subr.bf16.mxu0 %v1010_v20 }
  0x22   : > { %954 = vmatpush3.bf16.msra.mxu1 %v1011_v21 }
  0x23   : > { %955 = vmatprep.subr.bf16.mxu1 %v1016_v25 }
  0x24   : > { %904 = vmatpush3.bf16.msra.mxu0 %v1012_v23 }
  0x26   : > { %956 = vmatpush3.bf16.msra.mxu1 %v1016_v25 }
  0x27   : > { %560 = vmatmul.mubr.bf16.vlgmr.msra.gmra.mrb[0].mxu0 %v1013_v26 }
  0x28   : > { %567 = vmatprep.mubr.bf16.mxu0 %v1019_v27 }
  0x29   : > { %958 = vmatmul.mubr.bf16.vlgmr.msra.gmra.mrb[0].mxu1 %v1018_v28 }
  0x2a   : > { %961 = vmatprep.mubr.bf16.mxu1 %v1025_v29 }
  0x2f   : > { %568 = vmatmul.mubr.bf16.gmra.mrb[4].mxu0 %v1021_v30 }
  0x30   : > { %575 = vmatprep.mubr.bf16.mxu0 %v1022_v31 }
  0x31   : > { %962 = vmatmul.mubr.bf16.gmra.mrb[4].mxu1 %v1026_v32 }
  0x37   : > { %576 = vmatmul.mubr.bf16.gmra.mrb[8].mxu0 %v1024_v33 }
  0x38   : > { %583 = vmatprep.mubr.bf16.mxu0 %v1027_v34 }
  0x3f   : > { %584 = vmatmul.mubr.bf16.gmra.mrb[12].mxu0 %v1029_v35 }
  0xfa   : > { %v905_v36 = vpop.f32.mrb[0].mxu0 }
  0xfb   : > { %v906_v37 = vpop.f32.mrb[1].mxu0 }
  0xfc   : > { %v907_v39 = vadd.f32 %v906_v37, %v905_v36  ;;  %v908_v40 = vpop.f32.mrb[2].mxu0  ;;  %v959_v42 = vpop.f32.mrb[0].mxu1 }
  0xfd   : > { %v909_v41 = vpop.f32.mrb[3].mxu0  ;;  %v626_v45 = vpop.f32.mrb[1].mxu1 }
  0xfe   : > { %v910_v43 = vadd.f32 %v909_v41, %v908_v40  ;;  %v562_v44 = vadd.f32 %v907_v39, %v1190_v38  ;;  %v960_v46 = vpop.f32.mrb[2].mxu1 }
  0xff   : > { %v629_v49 = vpop.f32.mrb[3].mxu1 }
 0x100   : > { %v627_v47 = vadd.f32 %v626_v45, %v562_v44  ;;  %v565_v48 = vadd.f32 %v910_v43, %v1190_v38 }
 0x102   : > { %v657_v50 = vmax.f32 %v627_v47, 0.0  ;;  %v630_v51 = vadd.f32 %v629_v49, %v565_v48  ;;  %v911_v52 = vpop.f32.mrb[4].mxu0 }
 0x103   : > { %v912_v53 = vpop.f32.mrb[5].mxu0 }
 0x104   : > { %v881_v54 = vpack.c.bf16 %v657_v50, %v657_v50  ;;  %v658_v55 = vmax.f32 %v630_v51, 0.0  ;;  %v913_v56 = vadd.f32 %v912_v53, %v911_v52  ;;  %v914_v57 = vpop.f32.mrb[6].mxu0  ;;  %v963_v59 = vpop.f32.mrb[4].mxu1 }
 0x105   : > { %v915_v58 = vpop.f32.mrb[7].mxu0  ;;  %v642_v63 = vpop.f32.mrb[5].mxu1 }
 0x106   : > { %698 = vst.msk [vmem:[%s1198_s27] sm:$0xf] %vm697_vm0, %v881_v54  ;;  %v882_v60 = vpack.c.bf16 %v658_v55, %v658_v55  ;;  %v570_v61 = vadd.f32 %v913_v56, %v1190_v38  ;;  %v916_v62 = vadd.f32 %v915_v58, %v914_v57  ;;  %v964_v0 = vpop.f32.mrb[6].mxu1 }
 0x107   : > { %v645_v3 = vpop.f32.mrb[7].mxu1 }
 0x108   : > { %699 = vst.msk [vmem:[%s1198_s27 + $0x4] sm:$0xf] %vm697_vm0, %v882_v60  ;;  %v635_v1 = vadd.f32 %v959_v42, %v570_v61  ;;  %v573_v2 = vadd.f32 %v916_v62, %v1190_v38 }
 0x10a   : > { %v659_v4 = vmax.f32 %v635_v1, 0.0  ;;  %v638_v5 = vadd.f32 %v960_v46, %v573_v2  ;;  %v917_v6 = vpop.f32.mrb[8].mxu0 }
 0x10b   : > { %v918_v7 = vpop.f32.mrb[9].mxu0 }
 0x10c   : > { %v883_v8 = vpack.c.bf16 %v659_v4, %v659_v4  ;;  %v660_v9 = vmax.f32 %v638_v5, 0.0  ;;  %v919_v10 = vadd.f32 %v918_v7, %v917_v6  ;;  %v920_v11 = vpop.f32.mrb[10].mxu0 }
 0x10d   : > { %v921_v12 = vpop.f32.mrb[11].mxu0 }
 0x10e   : > { %700 = vst.msk [vmem:[%s1198_s27 + $0x8] sm:$0xf] %vm697_vm0, %v883_v8  ;;  %v884_v13 = vpack.c.bf16 %v660_v9, %v660_v9  ;;  %v922_v14 = vadd.f32 %v921_v12, %v920_v11  ;;  %v578_v15 = vadd.f32 %v919_v10, %v1190_v38 }
 0x110   : > { %701 = vst.msk [vmem:[%s1198_s27 + $0xc] sm:$0xf] %vm697_vm0, %v884_v13  ;;  %v643_v16 = vadd.f32 %v642_v63, %v578_v15  ;;  %v581_v17 = vadd.f32 %v922_v14, %v1190_v38 }
 0x112   : > { %v661_v18 = vmax.f32 %v643_v16, 0.0  ;;  %v646_v19 = vadd.f32 %v645_v3, %v581_v17  ;;  %v923_v20 = vpop.f32.mrb[12].mxu0 }
 0x113   : > { %v924_v21 = vpop.f32.mrb[13].mxu0 }
 0x114   : > { %v885_v22 = vpack.c.bf16 %v661_v18, %v661_v18  ;;  %v662_v23 = vmax.f32 %v646_v19, 0.0  ;;  %v925_v24 = vadd.f32 %v924_v21, %v923_v20  ;;  %v926_v25 = vpop.f32.mrb[14].mxu0 }
 0x115   : > { %v927_v26 = vpop.f32.mrb[15].mxu0 }
 0x116   : > { %702 = vst.msk [vmem:[%s1198_s27 + $0x10] sm:$0xf] %vm697_vm0, %v885_v22  ;;  %v886_v27 = vpack.c.bf16 %v662_v23, %v662_v23  ;;  %v586_v28 = vadd.f32 %v925_v24, %v1190_v38  ;;  %v928_v29 = vadd.f32 %v927_v26, %v926_v25 }
 0x118   : > { %703 = vst.msk [vmem:[%s1198_s27 + $0x14] sm:$0xf] %vm697_vm0, %v886_v27  ;;  %v651_v30 = vadd.f32 %v963_v59, %v586_v28  ;;  %v589_v31 = vadd.f32 %v928_v29, %v1190_v38 }
 0x11a   : > { %v663_v32 = vmax.f32 %v651_v30, 0.0  ;;  %v654_v33 = vadd.f32 %v964_v0, %v589_v31 }
 0x11c   : > { %v887_v34 = vpack.c.bf16 %v663_v32, %v663_v32  ;;  %v664_v35 = vmax.f32 %v654_v33, 0.0 }
 0x11e   : > { %704 = vst.msk [vmem:[%s1198_s27 + $0x18] sm:$0xf] %vm697_vm0, %v887_v34  ;;  %v888_v36 = vpack.c.bf16 %v664_v35, %v664_v35 }
 0x120   : > { %705 = vst.msk [vmem:[%s1198_s27 + $0x1c] sm:$0xf] %vm697_vm0, %v888_v36 }
 0x121 PF: > { %s13_s14 = sadd.s32 1, %s1052_s14   ;;  %s1235_s12 = smov %s1048_s13 }
 0x122   : > { %p10_p5 = scmp.ge.s32.totalorder %s13_s14, 4   ;;  %s1236_s13 = smov %s1238_s15 }
 0x124   :  { %12 = sbr.rel (!%p10_p5) target bundleno = 2 (0x2), region = 68 }

// kernel: jointnet_forward.69
= control target key start
LH: loop header
LB: loop body
LE: loop exit
PB: predicated region body
PF: predicated region fallthrough
CT: control target
= control target key end

     0   :  { %s989_s12 = smov 0   ;;  %s991_s13 = smov 0   ;;  %s1167_s0 = inlined_call_operand.vmem [shape: bf16[1,512,192], index: 0, kind: input, shape index: {}]   ;;  %s1168_s1 = inlined_call_operand.vmem [shape: bf16[1,192,32], index: 1, kind: input, shape index: {}]   ;;  %s1169_s2 = inlined_call_operand.vmem [shape: f32[1,1,32], index: 2, kind: input, shape index: {}]   ;;  %s1170_s3 = inlined_call_operand.vmem [shape: bf16[1,512,32], index: 3, kind: output, shape index: {}]  }
   0x1   :  { %s993_s14 = smov 0  }
   0x2 LB: > { %s22_s15 = sadd.s32 1, %s962_s13  ;;  %p781_p0 = scmp.ge.s32.totalorder %s966_s14, 1  ;;  %s966_s14 = sphi %s993_s14, %s13_s14   ;;  %s962_s13 = sphi %s991_s13, %s1172_s13   ;;  %s958_s12 = sphi %s989_s12, %s1171_s12  }
   0x3   : > { %p23_p1 = scmp.ge.s32.totalorder %s22_s15, 4  ;;  %p177_p2 = scmp.lt.s32.totalorder %s966_s14, 5 }
   0x5   : > { %s1174_s15 = smov (%p23_p1, %s22_s15), 0  ;;  %p178_p3 = pnand %p781_p0, %p177_p2 }
   0x6   : > { %v908_v0 = vld [vmem:[%s1168_s1] sm:$0xff] (!%p178_p3)   ;;  %v968_v1 = vmov (!%p178_p3), 0   ;;  %s782_s18 = sshll.u32 (!%p178_p3), %s958_s12, 4  ;;  %v909_v2 = vld [vmem:[%s1168_s1 + $0x8] sm:$0xff] (!%p178_p3)   ;;  %v910_v3 = vld [vmem:[%s1168_s1 + $0x10] sm:$0xff] (!%p178_p3)   ;;  %vm439_vm0 = vcmask (!%p178_p3), 523264  }
   0x7   : > { %181 = sbr.rel (%p178_p3) target bundleno = 300 (0x12c), region = 32  ;;  %464 = vmatprep.subr.bf16.mxu0 (!%p178_p3), %v968_v1  ;;  %859 = vmatprep.subr.bf16.mxu1 (!%p178_p3), %v968_v1  ;;  %p221_p4 = scmp.lt.s32.totalorder (!%p178_p3), %s782_s18, 63  ;;  %v911_v4 = vld [vmem:[%s1168_s1 + $0x18] sm:$0xff] (!%p178_p3)   ;;  %v912_v6 = vld [vmem:[%s1168_s1 + $0x20] sm:$0xff] (!%p178_p3)   ;;  %v913_v8 = vld [vmem:[%s1168_s1 + $0x28] sm:$0xff] (!%p178_p3)   ;;  %vm641_vm1 = vcmask (!%p178_p3), 257024  }
   0x8   : > { %465 = vmatpush1.bf16.msra.mxu0 (!%p178_p3), %v908_v0  ;;  %871 = vmatpush1.bf16.msra.mxu1 (!%p178_p3), %v908_v0  ;;  %v914_v9 = vld [vmem:[%s1168_s1 + $0x30] sm:$0xff] (!%p178_p3)   ;;  %v915_v10 = vld [vmem:[%s1168_s1 + $0x38] sm:$0xff] (!%p178_p3)   ;;  %v916_v11 = vld [vmem:[%s1168_s1 + $0x40] sm:$0xff] (!%p178_p3)  }
   0x9   : > { %466 = vmatprep.subr.bf16.mxu0 (!%p178_p3), %v968_v1  ;;  %860 = vmatprep.subr.bf16.mxu1 (!%p178_p3), %v968_v1  ;;  %v917_v12 = vld [vmem:[%s1168_s1 + $0x48] sm:$0xff] (!%p178_p3)   ;;  %v918_v13 = vld [vmem:[%s1168_s1 + $0x50] sm:$0xff] (!%p178_p3)   ;;  %v919_v14 = vld [vmem:[%s1168_s1 + $0x58] sm:$0xff] (!%p178_p3)  }
   0xa   : > { %v1102_v29 = vld [vmem:[%s1169_s2] ss:$0 sm:$0xff] (!%p178_p3) }
   0xc   : > { %467 = vmatpush1.bf16.msra.mxu0 (!%p178_p3), %v909_v2  ;;  %872 = vmatpush1.bf16.msra.mxu1 (!%p178_p3), %v909_v2 }
   0xd   : > { %468 = vmatprep.subr.bf16.mxu0 (!%p178_p3), %v968_v1  ;;  %861 = vmatprep.subr.bf16.mxu1 (!%p178_p3), %v968_v1 }
   0xe   : > { %s1176_s18 = smov (!%p221_p4, %s782_s18), 63 }
   0xf   : > { %s842_s23 = sshll.u32 %s1176_s18, 3  ;;  %s786_s24 = sshll.u32 %s1176_s18, 2 }
  0x10   : > { %469 = vmatpush1.bf16.msra.mxu0 %v910_v3  ;;  %873 = vmatpush1.bf16.msra.mxu1 %v910_v3  ;;  %s1031_s28 = scalar_lea.vmem %s1167_s0, %s842_s23  ;;  %s1112_s18 = scalar_lea.vmem %s1170_s3, %s786_s24 }
  0x11   : > { %470 = vmatprep.subr.bf16.mxu0 %v968_v1  ;;  %862 = vmatprep.subr.bf16.mxu1 %v968_v1  ;;  %v922_v5 = vld [vmem:[%s1031_s28 + $0x4] ss:$8 sps:$4 sm:$0xff]   ;;  %v920_v15 = vld [vmem:[%s1031_s28] ss:$8 sps:$4 sm:$0xff]   ;;  %v926_v17 = vld [vmem:[%s1031_s28 + $0x14] ss:$8 sps:$4 sm:$0xff]  }
  0x12   : > { %v925_v7 = vld [vmem:[%s1031_s28 + $0x44] ss:$8 sps:$4 sm:$0xff]   ;;  %816 = vmatprep.mubr.msk.bf16.mxu0 %vm439_vm0, %v922_v5  ;;  %v923_v16 = vld [vmem:[%s1031_s28 + $0x40] ss:$8 sps:$4 sm:$0xff]   ;;  %v928_v18 = vld [vmem:[%s1031_s28 + $0x54] ss:$8 sps:$4 sm:$0xff]  }
  0x13   : > { %820 = vmatprep.mubr.msk.bf16.mxu1 %vm439_vm0, %v925_v7  ;;  %v930_v19 = vld [vmem:[%s1031_s28 + $0x10] ss:$8 sps:$4 sm:$0xff]   ;;  %v932_v21 = vld [vmem:[%s1031_s28 + $0x24] ss:$8 sps:$4 sm:$0xff]   ;;  %v936_v23 = vld [vmem:[%s1031_s28 + $0x20] ss:$8 sps:$4 sm:$0xff]  }
  0x14   : > { %471 = vmatpush1.bf16.msra.mxu0 %v911_v4  ;;  %874 = vmatpush1.bf16.msra.mxu1 %v911_v4  ;;  %v931_v20 = vld [vmem:[%s1031_s28 + $0x50] ss:$8 sps:$4 sm:$0xff]   ;;  %v934_v22 = vld [vmem:[%s1031_s28 + $0x64] ss:$8 sps:$4 sm:$0xff]   ;;  %v937_v24 = vld [vmem:[%s1031_s28 + $0x60] ss:$8 sps:$4 sm:$0xff]  }
  0x15   : > { %472 = vmatprep.subr.bf16.mxu0 %v968_v1  ;;  %863 = vmatprep.subr.bf16.mxu1 %v968_v1  ;;  %v938_v25 = vld [vmem:[%s1031_s28 + $0x34] ss:$8 sps:$4 sm:$0xff]   ;;  %v942_v27 = vld [vmem:[%s1031_s28 + $0x30] ss:$8 sps:$4 sm:$0xff]  }
  0x16   : > { %v940_v26 = vld [vmem:[%s1031_s28 + $0x74] ss:$8 sps:$4 sm:$0xff]   ;;  %v943_v28 = vld [vmem:[%s1031_s28 + $0x70] ss:$8 sps:$4 sm:$0xff]  }
  0x18   : > { %473 = vmatpush1.bf16.msra.mxu0 %v912_v6  ;;  %875 = vmatpush1.bf16.msra.mxu1 %v912_v6 }
  0x19   : > { %474 = vmatprep.subr.bf16.mxu0 %v968_v1  ;;  %864 = vmatprep.subr.bf16.mxu1 %v968_v1 }
  0x1c   : > { %475 = vmatpush1.bf16.msra.mxu0 %v913_v8  ;;  %876 = vmatpush1.bf16.msra.mxu1 %v913_v8 }
  0x1d   : > { %476 = vmatprep.subr.bf16.mxu0 %v968_v1  ;;  %865 = vmatprep.subr.bf16.mxu1 %v968_v1 }
  0x20   : > { %477 = vmatpush1.bf16.msra.mxu0 %v914_v9  ;;  %877 = vmatpush1.bf16.msra.mxu1 %v914_v9 }
  0x21   : > { %478 = vmatprep.subr.bf16.mxu0 %v968_v1  ;;  %866 = vmatprep.subr.bf16.mxu1 %v968_v1 }
  0x24   : > { %479 = vmatpush1.bf16.msra.mxu0 %v915_v10  ;;  %878 = vmatpush1.bf16.msra.mxu1 %v915_v10 }
  0x25   : > { %480 = vmatprep.subr.bf16.mxu0 %v968_v1  ;;  %867 = vmatprep.subr.bf16.mxu1 %v968_v1 }
  0x28   : > { %481 = vmatpush1.bf16.msra.mxu0 %v916_v11  ;;  %879 = vmatpush1.bf16.msra.mxu1 %v916_v11 }
  0x29   : > { %482 = vmatprep.subr.bf16.mxu0 %v968_v1  ;;  %868 = vmatprep.subr.bf16.mxu1 %v968_v1 }
  0x2c   : > { %483 = vmatpush1.bf16.msra.mxu0 %v917_v12  ;;  %880 = vmatpush1.bf16.msra.mxu1 %v917_v12 }
  0x2d   : > { %484 = vmatprep.subr.bf16.mxu0 %v968_v1  ;;  %869 = vmatprep.subr.bf16.mxu1 %v968_v1 }
  0x30   : > { %485 = vmatpush1.bf16.msra.mxu0 %v918_v13  ;;  %881 = vmatpush1.bf16.msra.mxu1 %v918_v13 }
  0x31   : > { %486 = vmatprep.subr.bf16.mxu0 %v968_v1  ;;  %870 = vmatprep.subr.bf16.mxu1 %v968_v1 }
  0x34   : > { %487 = vmatpush1.bf16.msra.mxu0 %v919_v14  ;;  %882 = vmatpush1.bf16.msra.mxu1 %v919_v14 }
  0x37   : > { %497 = vmatmul.mubr.bf16.vlgmr.msra.gmra.mrb[0].mxu0 %v920_v15  ;;  %529 = vmatmul.mubr.bf16.vlgmr.msra.gmra.mrb[0].mxu1 %v923_v16 }
  0x38   : > { %817 = vmatprep.mubr.msk.bf16.mxu0 %vm439_vm0, %v926_v17  ;;  %821 = vmatprep.mubr.msk.bf16.mxu1 %vm439_vm0, %v928_v18 }
  0x3f   : > { %505 = vmatmul.mubr.bf16.gmra.mrb[4].mxu0 %v930_v19  ;;  %537 = vmatmul.mubr.bf16.gmra.mrb[4].mxu1 %v931_v20 }
  0x40   : > { %818 = vmatprep.mubr.msk.bf16.mxu0 %vm439_vm0, %v932_v21  ;;  %822 = vmatprep.mubr.msk.bf16.mxu1 %vm439_vm0, %v934_v22 }
  0x47   : > { %513 = vmatmul.mubr.bf16.gmra.mrb[8].mxu0 %v936_v23  ;;  %545 = vmatmul.mubr.bf16.gmra.mrb[8].mxu1 %v937_v24 }
  0x48   : > { %819 = vmatprep.mubr.msk.bf16.mxu0 %vm439_vm0, %v938_v25  ;;  %823 = vmatprep.mubr.msk.bf16.mxu1 %vm439_vm0, %v940_v26 }
  0x4f   : > { %521 = vmatmul.mubr.bf16.gmra.mrb[12].mxu0 %v942_v27  ;;  %553 = vmatmul.mubr.bf16.gmra.mrb[12].mxu1 %v943_v28 }
 0x10a   : > { %v498_v30 = vpop.f32.mrb[0].mxu0  ;;  %v530_v31 = vpop.f32.mrb[0].mxu1 }
 0x10b   : > { %v499_v32 = vadd.f32 %v1102_v29, %v498_v30  ;;  %v531_v33 = vadd.f32 %v1102_v29, %v530_v31  ;;  %v500_v34 = vpop.f32.mrb[1].mxu0  ;;  %v532_v35 = vpop.f32.mrb[1].mxu1 }
 0x10c   : > { %v501_v36 = vpop.f32.mrb[2].mxu0  ;;  %v533_v37 = vpop.f32.mrb[2].mxu1 }
 0x10d   : > { %v561_v38 = vmax.f32 %v499_v32, 0.0  ;;  %v569_v39 = vmax.f32 %v531_v33, 0.0  ;;  %v502_v40 = vadd.f32 %v1102_v29, %v501_v36  ;;  %v534_v41 = vadd.f32 %v1102_v29, %v533_v37  ;;  %v503_v42 = vpop.f32.mrb[3].mxu0  ;;  %v535_v43 = vpop.f32.mrb[3].mxu1 }
 0x10f   : > { %v843_v44 = vpack.c.bf16 %v561_v38, %v561_v38  ;;  %v851_v45 = vpack.c.bf16 %v569_v39, %v569_v39  ;;  %v562_v46 = vmax.f32 %v502_v40, 0.0  ;;  %v570_v47 = vmax.f32 %v534_v41, 0.0 }
 0x111   : > { %642 = vst.msk [vmem:[%s1112_s18] sm:$0xf] %vm641_vm1, %v843_v44  ;;  %650 = vst.msk [vmem:[%s1112_s18 + $0x20] sm:$0xf] %vm641_vm1, %v851_v45  ;;  %v844_v48 = vpack.c.bf16 %v562_v46, %v562_v46  ;;  %v852_v49 = vpack.c.bf16 %v570_v47, %v570_v47 }
 0x112   : > { %v506_v50 = vpop.f32.mrb[4].mxu0  ;;  %v538_v51 = vpop.f32.mrb[4].mxu1 }
 0x113   : > { %643 = vst.msk [vmem:[%s1112_s18 + $0x4] sm:$0xf] %vm641_vm1, %v844_v48  ;;  %651 = vst.msk [vmem:[%s1112_s18 + $0x24] sm:$0xf] %vm641_vm1, %v852_v49  ;;  %v507_v52 = vadd.f32 %v1102_v29, %v506_v50  ;;  %v539_v53 = vadd.f32 %v1102_v29, %v538_v51  ;;  %v508_v54 = vpop.f32.mrb[5].mxu0  ;;  %v540_v55 = vpop.f32.mrb[5].mxu1 }
 0x114   : > { %v509_v56 = vpop.f32.mrb[6].mxu0  ;;  %v541_v57 = vpop.f32.mrb[6].mxu1 }
 0x115   : > { %v563_v58 = vmax.f32 %v507_v52, 0.0  ;;  %v571_v59 = vmax.f32 %v539_v53, 0.0  ;;  %v510_v60 = vadd.f32 %v1102_v29, %v509_v56  ;;  %v542_v61 = vadd.f32 %v1102_v29, %v541_v57  ;;  %v511_v62 = vpop.f32.mrb[7].mxu0  ;;  %v543_v63 = vpop.f32.mrb[7].mxu1 }
 0x117   : > { %v845_v0 = vpack.c.bf16 %v563_v58, %v563_v58  ;;  %v853_v1 = vpack.c.bf16 %v571_v59, %v571_v59  ;;  %v564_v2 = vmax.f32 %v510_v60, 0.0  ;;  %v572_v3 = vmax.f32 %v542_v61, 0.0 }
 0x119   : > { %644 = vst.msk [vmem:[%s1112_s18 + $0x8] sm:$0xf] %vm641_vm1, %v845_v0  ;;  %652 = vst.msk [vmem:[%s1112_s18 + $0x28] sm:$0xf] %vm641_vm1, %v853_v1  ;;  %v846_v4 = vpack.c.bf16 %v564_v2, %v564_v2  ;;  %v854_v5 = vpack.c.bf16 %v572_v3, %v572_v3 }
 0x11a   : > { %v514_v6 = vpop.f32.mrb[8].mxu0  ;;  %v546_v7 = vpop.f32.mrb[8].mxu1 }
 0x11b   : > { %645 = vst.msk [vmem:[%s1112_s18 + $0xc] sm:$0xf] %vm641_vm1, %v846_v4  ;;  %653 = vst.msk [vmem:[%s1112_s18 + $0x2c] sm:$0xf] %vm641_vm1, %v854_v5  ;;  %v515_v8 = vadd.f32 %v1102_v29, %v514_v6  ;;  %v547_v9 = vadd.f32 %v1102_v29, %v546_v7  ;;  %v516_v10 = vpop.f32.mrb[9].mxu0  ;;  %v548_v11 = vpop.f32.mrb[9].mxu1 }
 0x11c   : > { %v517_v12 = vpop.f32.mrb[10].mxu0  ;;  %v549_v13 = vpop.f32.mrb[10].mxu1 }
 0x11d   : > { %v565_v14 = vmax.f32 %v515_v8, 0.0  ;;  %v573_v15 = vmax.f32 %v547_v9, 0.0  ;;  %v518_v16 = vadd.f32 %v1102_v29, %v517_v12  ;;  %v550_v17 = vadd.f32 %v1102_v29, %v549_v13  ;;  %v519_v18 = vpop.f32.mrb[11].mxu0  ;;  %v551_v19 = vpop.f32.mrb[11].mxu1 }
 0x11f   : > { %v847_v20 = vpack.c.bf16 %v565_v14, %v565_v14  ;;  %v855_v21 = vpack.c.bf16 %v573_v15, %v573_v15  ;;  %v566_v22 = vmax.f32 %v518_v16, 0.0  ;;  %v574_v23 = vmax.f32 %v550_v17, 0.0 }
 0x121   : > { %646 = vst.msk [vmem:[%s1112_s18 + $0x10] sm:$0xf] %vm641_vm1, %v847_v20  ;;  %654 = vst.msk [vmem:[%s1112_s18 + $0x30] sm:$0xf] %vm641_vm1, %v855_v21  ;;  %v848_v24 = vpack.c.bf16 %v566_v22, %v566_v22  ;;  %v856_v25 = vpack.c.bf16 %v574_v23, %v574_v23 }
 0x122   : > { %v522_v26 = vpop.f32.mrb[12].mxu0  ;;  %v554_v27 = vpop.f32.mrb[12].mxu1 }
 0x123   : > { %647 = vst.msk [vmem:[%s1112_s18 + $0x14] sm:$0xf] %vm641_vm1, %v848_v24  ;;  %655 = vst.msk [vmem:[%s1112_s18 + $0x34] sm:$0xf] %vm641_vm1, %v856_v25  ;;  %v523_v28 = vadd.f32 %v1102_v29, %v522_v26  ;;  %v555_v30 = vadd.f32 %v1102_v29, %v554_v27  ;;  %v524_v31 = vpop.f32.mrb[13].mxu0  ;;  %v556_v32 = vpop.f32.mrb[13].mxu1 }
 0x124   : > { %v525_v33 = vpop.f32.mrb[14].mxu0  ;;  %v557_v34 = vpop.f32.mrb[14].mxu1 }
 0x125   : > { %v567_v35 = vmax.f32 %v523_v28, 0.0  ;;  %v575_v36 = vmax.f32 %v555_v30, 0.0  ;;  %v526_v37 = vadd.f32 %v1102_v29, %v525_v33  ;;  %v558_v38 = vadd.f32 %v1102_v29, %v557_v34  ;;  %v527_v39 = vpop.f32.mrb[15].mxu0  ;;  %v559_v40 = vpop.f32.mrb[15].mxu1 }
 0x127   : > { %v849_v41 = vpack.c.bf16 %v567_v35, %v567_v35  ;;  %v857_v42 = vpack.c.bf16 %v575_v36, %v575_v36  ;;  %v568_v43 = vmax.f32 %v526_v37, 0.0  ;;  %v576_v44 = vmax.f32 %v558_v38, 0.0 }
 0x129   : > { %648 = vst.msk [vmem:[%s1112_s18 + $0x18] sm:$0xf] %vm641_vm1, %v849_v41  ;;  %656 = vst.msk [vmem:[%s1112_s18 + $0x38] sm:$0xf] %vm641_vm1, %v857_v42  ;;  %v850_v45 = vpack.c.bf16 %v568_v43, %v568_v43  ;;  %v858_v46 = vpack.c.bf16 %v576_v44, %v576_v44 }
 0x12b   : > { %649 = vst.msk [vmem:[%s1112_s18 + $0x1c] sm:$0xf] %vm641_vm1, %v850_v45  ;;  %657 = vst.msk [vmem:[%s1112_s18 + $0x3c] sm:$0xf] %vm641_vm1, %v858_v46 }
 0x12c PF: > { %s13_s14 = sadd.s32 1, %s966_s14   ;;  %s1171_s12 = smov %s962_s13 }
 0x12d   : > { %p10_p5 = scmp.ge.s32.totalorder %s13_s14, 6   ;;  %s1172_s13 = smov %s1174_s15 }
 0x12f   :  { %12 = sbr.rel (!%p10_p5) target bundleno = 2 (0x2), region = 68 }

// kernel: jointnet_forward.71
= control target key start
LH: loop header
LB: loop body
LE: loop exit
PB: predicated region body
PF: predicated region fallthrough
CT: control target
= control target key end

     0   :  { %s1013_s12 = smov 0   ;;  %s1015_s13 = smov 0   ;;  %s1201_s0 = inlined_call_operand.vmem [shape: bf16[1,512,224], index: 0, kind: input, shape index: {}]   ;;  %s1202_s1 = inlined_call_operand.vmem [shape: bf16[1,224,32], index: 1, kind: input, shape index: {}]   ;;  %s1203_s2 = inlined_call_operand.vmem [shape: f32[1,1,32], index: 2, kind: input, shape index: {}]   ;;  %s1204_s3 = inlined_call_operand.vmem [shape: bf16[1,512,32], index: 3, kind: output, shape index: {}]  }
   0x1   :  { %s1017_s14 = smov 0  }
   0x2 LB: > { %s22_s15 = sadd.s32 1, %s986_s13  ;;  %p797_p0 = scmp.ge.s32.totalorder %s990_s14, 1  ;;  %s990_s14 = sphi %s1017_s14, %s13_s14   ;;  %s986_s13 = sphi %s1015_s13, %s1206_s13   ;;  %s982_s12 = sphi %s1013_s12, %s1205_s12  }
   0x3   : > { %p23_p1 = scmp.ge.s32.totalorder %s22_s15, 4  ;;  %p177_p2 = scmp.lt.s32.totalorder %s990_s14, 5 }
   0x5   : > { %s1208_s15 = smov (%p23_p1, %s22_s15), 0  ;;  %p178_p3 = pnand %p797_p0, %p177_p2 }
   0x6   : > { %v930_v0 = vld [vmem:[%s1202_s1] sm:$0xff] (!%p178_p3)   ;;  %v992_v1 = vmov (!%p178_p3), 0   ;;  %s798_s18 = sshll.u32 (!%p178_p3), %s982_s12, 4  ;;  %v931_v2 = vld [vmem:[%s1202_s1 + $0x8] sm:$0xff] (!%p178_p3)   ;;  %v932_v3 = vld [vmem:[%s1202_s1 + $0x10] sm:$0xff] (!%p178_p3)   ;;  %vm455_vm0 = vcmask (!%p178_p3), 785408  }
   0x7   : > { %181 = sbr.rel (%p178_p3) target bundleno = 308 (0x134), region = 32  ;;  %480 = vmatprep.subr.bf16.mxu0 (!%p178_p3), %v992_v1  ;;  %877 = vmatprep.subr.bf16.mxu1 (!%p178_p3), %v992_v1  ;;  %p221_p4 = scmp.lt.s32.totalorder (!%p178_p3), %s798_s18, 63  ;;  %v933_v4 = vld [vmem:[%s1202_s1 + $0x18] sm:$0xff] (!%p178_p3)   ;;  %v934_v5 = vld [vmem:[%s1202_s1 + $0x20] sm:$0xff] (!%p178_p3)   ;;  %v935_v8 = vld [vmem:[%s1202_s1 + $0x28] sm:$0xff] (!%p178_p3)   ;;  %vm657_vm1 = vcmask (!%p178_p3), 257024  }
   0x8   : > { %481 = vmatpush1.bf16.msra.mxu0 (!%p178_p3), %v930_v0  ;;  %891 = vmatpush1.bf16.msra.mxu1 (!%p178_p3), %v930_v0  ;;  %v936_v9 = vld [vmem:[%s1202_s1 + $0x30] sm:$0xff] (!%p178_p3)   ;;  %v937_v10 = vld [vmem:[%s1202_s1 + $0x38] sm:$0xff] (!%p178_p3)   ;;  %v938_v11 = vld [vmem:[%s1202_s1 + $0x40] sm:$0xff] (!%p178_p3)  }
   0x9   : > { %482 = vmatprep.subr.bf16.mxu0 (!%p178_p3), %v992_v1  ;;  %878 = vmatprep.subr.bf16.mxu1 (!%p178_p3), %v992_v1  ;;  %v939_v12 = vld [vmem:[%s1202_s1 + $0x48] sm:$0xff] (!%p178_p3)   ;;  %v940_v13 = vld [vmem:[%s1202_s1 + $0x50] sm:$0xff] (!%p178_p3)   ;;  %v941_v14 = vld [vmem:[%s1202_s1 + $0x58] sm:$0xff] (!%p178_p3)  }
   0xa   : > { %v942_v15 = vld [vmem:[%s1202_s1 + $0x60] sm:$0xff] (!%p178_p3)   ;;  %v943_v16 = vld [vmem:[%s1202_s1 + $0x68] sm:$0xff] (!%p178_p3)  }
   0xb   : > { %v1136_v31 = vld [vmem:[%s1203_s2] ss:$0 sm:$0xff] (!%p178_p3) }
   0xc   : > { %483 = vmatpush1.bf16.msra.mxu0 (!%p178_p3), %v931_v2  ;;  %892 = vmatpush1.bf16.msra.mxu1 (!%p178_p3), %v931_v2 }
   0xd   : > { %484 = vmatprep.subr.bf16.mxu0 (!%p178_p3), %v992_v1  ;;  %879 = vmatprep.subr.bf16.mxu1 (!%p178_p3), %v992_v1 }
   0xe   : > { %s1210_s18 = smov (!%p221_p4, %s798_s18), 63 }
   0xf   : > { %s860_s23 = sshll.u32 %s1210_s18, 3  ;;  %s802_s29 = sshll.u32 %s1210_s18, 2 }
  0x10   : > { %485 = vmatpush1.bf16.msra.mxu0 %v932_v3  ;;  %893 = vmatpush1.bf16.msra.mxu1 %v932_v3  ;;  %s1057_s28 = scalar_lea.vmem %s1201_s0, %s860_s23  ;;  %s1146_s18 = scalar_lea.vmem %s1204_s3, %s802_s29 }
  0x11   : > { %486 = vmatprep.subr.bf16.mxu0 %v992_v1  ;;  %880 = vmatprep.subr.bf16.mxu1 %v992_v1  ;;  %v946_v6 = vld [vmem:[%s1057_s28 + $0x4] ss:$8 sps:$4 sm:$0xff]   ;;  %v944_v17 = vld [vmem:[%s1057_s28] ss:$8 sps:$4 sm:$0xff]   ;;  %v950_v19 = vld [vmem:[%s1057_s28 + $0x14] ss:$8 sps:$4 sm:$0xff]  }
  0x12   : > { %v949_v7 = vld [vmem:[%s1057_s28 + $0x44] ss:$8 sps:$4 sm:$0xff]   ;;  %834 = vmatprep.mubr.msk.bf16.mxu0 %vm455_vm0, %v946_v6  ;;  %v947_v18 = vld [vmem:[%s1057_s28 + $0x40] ss:$8 sps:$4 sm:$0xff]   ;;  %v952_v20 = vld [vmem:[%s1057_s28 + $0x54] ss:$8 sps:$4 sm:$0xff]  }
  0x13   : > { %838 = vmatprep.mubr.msk.bf16.mxu1 %vm455_vm0, %v949_v7  ;;  %v954_v21 = vld [vmem:[%s1057_s28 + $0x10] ss:$8 sps:$4 sm:$0xff]   ;;  %v956_v23 = vld [vmem:[%s1057_s28 + $0x24] ss:$8 sps:$4 sm:$0xff]   ;;  %v960_v25 = vld [vmem:[%s1057_s28 + $0x20] ss:$8 sps:$4 sm:$0xff]  }
  0x14   : > { %487 = vmatpush1.bf16.msra.mxu0 %v933_v4  ;;  %894 = vmatpush1.bf16.msra.mxu1 %v933_v4  ;;  %v955_v22 = vld [vmem:[%s1057_s28 + $0x50] ss:$8 sps:$4 sm:$0xff]   ;;  %v958_v24 = vld [vmem:[%s1057_s28 + $0x64] ss:$8 sps:$4 sm:$0xff]   ;;  %v961_v26 = vld [vmem:[%s1057_s28 + $0x60] ss:$8 sps:$4 sm:$0xff]  }
  0x15   : > { %488 = vmatprep.subr.bf16.mxu0 %v992_v1  ;;  %881 = vmatprep.subr.bf16.mxu1 %v992_v1  ;;  %v962_v27 = vld [vmem:[%s1057_s28 + $0x34] ss:$8 sps:$4 sm:$0xff]   ;;  %v966_v29 = vld [vmem:[%s1057_s28 + $0x30] ss:$8 sps:$4 sm:$0xff]  }
  0x16   : > { %v964_v28 = vld [vmem:[%s1057_s28 + $0x74] ss:$8 sps:$4 sm:$0xff]   ;;  %v967_v30 = vld [vmem:[%s1057_s28 + $0x70] ss:$8 sps:$4 sm:$0xff]  }
  0x18   : > { %489 = vmatpush1.bf16.msra.mxu0 %v934_v5  ;;  %895 = vmatpush1.bf16.msra.mxu1 %v934_v5 }
  0x19   : > { %490 = vmatprep.subr.bf16.mxu0 %v992_v1  ;;  %882 = vmatprep.subr.bf16.mxu1 %v992_v1 }
  0x1c   : > { %491 = vmatpush1.bf16.msra.mxu0 %v935_v8  ;;  %896 = vmatpush1.bf16.msra.mxu1 %v935_v8 }
  0x1d   : > { %492 = vmatprep.subr.bf16.mxu0 %v992_v1  ;;  %883 = vmatprep.subr.bf16.mxu1 %v992_v1 }
  0x20   : > { %493 = vmatpush1.bf16.msra.mxu0 %v936_v9  ;;  %897 = vmatpush1.bf16.msra.mxu1 %v936_v9 }
  0x21   : > { %494 = vmatprep.subr.bf16.mxu0 %v992_v1  ;;  %884 = vmatprep.subr.bf16.mxu1 %v992_v1 }
  0x24   : > { %495 = vmatpush1.bf16.msra.mxu0 %v937_v10  ;;  %898 = vmatpush1.bf16.msra.mxu1 %v937_v10 }
  0x25   : > { %496 = vmatprep.subr.bf16.mxu0 %v992_v1  ;;  %885 = vmatprep.subr.bf16.mxu1 %v992_v1 }
  0x28   : > { %497 = vmatpush1.bf16.msra.mxu0 %v938_v11  ;;  %899 = vmatpush1.bf16.msra.mxu1 %v938_v11 }
  0x29   : > { %498 = vmatprep.subr.bf16.mxu0 %v992_v1  ;;  %886 = vmatprep.subr.bf16.mxu1 %v992_v1 }
  0x2c   : > { %499 = vmatpush1.bf16.msra.mxu0 %v939_v12  ;;  %900 = vmatpush1.bf16.msra.mxu1 %v939_v12 }
  0x2d   : > { %500 = vmatprep.subr.bf16.mxu0 %v992_v1  ;;  %887 = vmatprep.subr.bf16.mxu1 %v992_v1 }
  0x30   : > { %501 = vmatpush1.bf16.msra.mxu0 %v940_v13  ;;  %901 = vmatpush1.bf16.msra.mxu1 %v940_v13 }
  0x31   : > { %502 = vmatprep.subr.bf16.mxu0 %v992_v1  ;;  %888 = vmatprep.subr.bf16.mxu1 %v992_v1 }
  0x34   : > { %503 = vmatpush1.bf16.msra.mxu0 %v941_v14  ;;  %902 = vmatpush1.bf16.msra.mxu1 %v941_v14 }
  0x35   : > { %504 = vmatprep.subr.bf16.mxu0 %v992_v1  ;;  %889 = vmatprep.subr.bf16.mxu1 %v992_v1 }
  0x38   : > { %505 = vmatpush1.bf16.msra.mxu0 %v942_v15  ;;  %903 = vmatpush1.bf16.msra.mxu1 %v942_v15 }
  0x39   : > { %506 = vmatprep.subr.bf16.mxu0 %v992_v1  ;;  %890 = vmatprep.subr.bf16.mxu1 %v992_v1 }
  0x3c   : > { %507 = vmatpush1.bf16.msra.mxu0 %v943_v16  ;;  %904 = vmatpush1.bf16.msra.mxu1 %v943_v16 }
  0x3f   : > { %513 = vmatmul.mubr.bf16.vlgmr.msra.gmra.mrb[0].mxu0 %v944_v17  ;;  %545 = vmatmul.mubr.bf16.vlgmr.msra.gmra.mrb[0].mxu1 %v947_v18 }
  0x40   : > { %835 = vmatprep.mubr.msk.bf16.mxu0 %vm455_vm0, %v950_v19  ;;  %839 = vmatprep.mubr.msk.bf16.mxu1 %vm455_vm0, %v952_v20 }
  0x47   : > { %521 = vmatmul.mubr.bf16.gmra.mrb[4].mxu0 %v954_v21  ;;  %553 = vmatmul.mubr.bf16.gmra.mrb[4].mxu1 %v955_v22 }
  0x48   : > { %836 = vmatprep.mubr.msk.bf16.mxu0 %vm455_vm0, %v956_v23  ;;  %840 = vmatprep.mubr.msk.bf16.mxu1 %vm455_vm0, %v958_v24 }
  0x4f   : > { %529 = vmatmul.mubr.bf16.gmra.mrb[8].mxu0 %v960_v25  ;;  %561 = vmatmul.mubr.bf16.gmra.mrb[8].mxu1 %v961_v26 }
  0x50   : > { %837 = vmatprep.mubr.msk.bf16.mxu0 %vm455_vm0, %v962_v27  ;;  %841 = vmatprep.mubr.msk.bf16.mxu1 %vm455_vm0, %v964_v28 }
  0x57   : > { %537 = vmatmul.mubr.bf16.gmra.mrb[12].mxu0 %v966_v29  ;;  %569 = vmatmul.mubr.bf16.gmra.mrb[12].mxu1 %v967_v30 }
 0x112   : > { %v514_v32 = vpop.f32.mrb[0].mxu0  ;;  %v546_v33 = vpop.f32.mrb[0].mxu1 }
 0x113   : > { %v515_v34 = vadd.f32 %v1136_v31, %v514_v32  ;;  %v547_v35 = vadd.f32 %v1136_v31, %v546_v33  ;;  %v516_v36 = vpop.f32.mrb[1].mxu0  ;;  %v548_v37 = vpop.f32.mrb[1].mxu1 }
 0x114   : > { %v517_v38 = vpop.f32.mrb[2].mxu0  ;;  %v549_v39 = vpop.f32.mrb[2].mxu1 }
 0x115   : > { %v577_v40 = vmax.f32 %v515_v34, 0.0  ;;  %v585_v41 = vmax.f32 %v547_v35, 0.0  ;;  %v518_v42 = vadd.f32 %v1136_v31, %v517_v38  ;;  %v550_v43 = vadd.f32 %v1136_v31, %v549_v39  ;;  %v519_v44 = vpop.f32.mrb[3].mxu0  ;;  %v551_v45 = vpop.f32.mrb[3].mxu1 }
 0x117   : > { %v861_v46 = vpack.c.bf16 %v577_v40, %v577_v40  ;;  %v869_v47 = vpack.c.bf16 %v585_v41, %v585_v41  ;;  %v578_v48 = vmax.f32 %v518_v42, 0.0  ;;  %v586_v49 = vmax.f32 %v550_v43, 0.0 }
 0x119   : > { %658 = vst.msk [vmem:[%s1146_s18] sm:$0xf] %vm657_vm1, %v861_v46  ;;  %666 = vst.msk [vmem:[%s1146_s18 + $0x20] sm:$0xf] %vm657_vm1, %v869_v47  ;;  %v862_v50 = vpack.c.bf16 %v578_v48, %v578_v48  ;;  %v870_v51 = vpack.c.bf16 %v586_v49, %v586_v49 }
 0x11a   : > { %v522_v52 = vpop.f32.mrb[4].mxu0  ;;  %v554_v53 = vpop.f32.mrb[4].mxu1 }
 0x11b   : > { %659 = vst.msk [vmem:[%s1146_s18 + $0x4] sm:$0xf] %vm657_vm1, %v862_v50  ;;  %667 = vst.msk [vmem:[%s1146_s18 + $0x24] sm:$0xf] %vm657_vm1, %v870_v51  ;;  %v523_v54 = vadd.f32 %v1136_v31, %v522_v52  ;;  %v555_v55 = vadd.f32 %v1136_v31, %v554_v53  ;;  %v524_v56 = vpop.f32.mrb[5].mxu0  ;;  %v556_v57 = vpop.f32.mrb[5].mxu1 }
 0x11c   : > { %v525_v58 = vpop.f32.mrb[6].mxu0  ;;  %v557_v59 = vpop.f32.mrb[6].mxu1 }
 0x11d   : > { %v579_v60 = vmax.f32 %v523_v54, 0.0  ;;  %v587_v61 = vmax.f32 %v555_v55, 0.0  ;;  %v526_v62 = vadd.f32 %v1136_v31, %v525_v58  ;;  %v558_v63 = vadd.f32 %v1136_v31, %v557_v59  ;;  %v527_v0 = vpop.f32.mrb[7].mxu0  ;;  %v559_v1 = vpop.f32.mrb[7].mxu1 }
 0x11f   : > { %v863_v2 = vpack.c.bf16 %v579_v60, %v579_v60  ;;  %v871_v3 = vpack.c.bf16 %v587_v61, %v587_v61  ;;  %v580_v4 = vmax.f32 %v526_v62, 0.0  ;;  %v588_v5 = vmax.f32 %v558_v63, 0.0 }
 0x121   : > { %660 = vst.msk [vmem:[%s1146_s18 + $0x8] sm:$0xf] %vm657_vm1, %v863_v2  ;;  %668 = vst.msk [vmem:[%s1146_s18 + $0x28] sm:$0xf] %vm657_vm1, %v871_v3  ;;  %v864_v6 = vpack.c.bf16 %v580_v4, %v580_v4  ;;  %v872_v7 = vpack.c.bf16 %v588_v5, %v588_v5 }
 0x122   : > { %v530_v8 = vpop.f32.mrb[8].mxu0  ;;  %v562_v9 = vpop.f32.mrb[8].mxu1 }
 0x123   : > { %661 = vst.msk [vmem:[%s1146_s18 + $0xc] sm:$0xf] %vm657_vm1, %v864_v6  ;;  %669 = vst.msk [vmem:[%s1146_s18 + $0x2c] sm:$0xf] %vm657_vm1, %v872_v7  ;;  %v531_v10 = vadd.f32 %v1136_v31, %v530_v8  ;;  %v563_v11 = vadd.f32 %v1136_v31, %v562_v9  ;;  %v532_v12 = vpop.f32.mrb[9].mxu0  ;;  %v564_v13 = vpop.f32.mrb[9].mxu1 }
 0x124   : > { %v533_v14 = vpop.f32.mrb[10].mxu0  ;;  %v565_v15 = vpop.f32.mrb[10].mxu1 }
 0x125   : > { %v581_v16 = vmax.f32 %v531_v10, 0.0  ;;  %v589_v17 = vmax.f32 %v563_v11, 0.0  ;;  %v534_v18 = vadd.f32 %v1136_v31, %v533_v14  ;;  %v566_v19 = vadd.f32 %v1136_v31, %v565_v15  ;;  %v535_v20 = vpop.f32.mrb[11].mxu0  ;;  %v567_v21 = vpop.f32.mrb[11].mxu1 }
 0x127   : > { %v865_v22 = vpack.c.bf16 %v581_v16, %v581_v16  ;;  %v873_v23 = vpack.c.bf16 %v589_v17, %v589_v17  ;;  %v582_v24 = vmax.f32 %v534_v18, 0.0  ;;  %v590_v25 = vmax.f32 %v566_v19, 0.0 }
 0x129   : > { %662 = vst.msk [vmem:[%s1146_s18 + $0x10] sm:$0xf] %vm657_vm1, %v865_v22  ;;  %670 = vst.msk [vmem:[%s1146_s18 + $0x30] sm:$0xf] %vm657_vm1, %v873_v23  ;;  %v866_v26 = vpack.c.bf16 %v582_v24, %v582_v24  ;;  %v874_v27 = vpack.c.bf16 %v590_v25, %v590_v25 }
 0x12a   : > { %v538_v28 = vpop.f32.mrb[12].mxu0  ;;  %v570_v29 = vpop.f32.mrb[12].mxu1 }
 0x12b   : > { %663 = vst.msk [vmem:[%s1146_s18 + $0x14] sm:$0xf] %vm657_vm1, %v866_v26  ;;  %671 = vst.msk [vmem:[%s1146_s18 + $0x34] sm:$0xf] %vm657_vm1, %v874_v27  ;;  %v539_v30 = vadd.f32 %v1136_v31, %v538_v28  ;;  %v571_v32 = vadd.f32 %v1136_v31, %v570_v29  ;;  %v540_v33 = vpop.f32.mrb[13].mxu0  ;;  %v572_v34 = vpop.f32.mrb[13].mxu1 }
 0x12c   : > { %v541_v35 = vpop.f32.mrb[14].mxu0  ;;  %v573_v36 = vpop.f32.mrb[14].mxu1 }
 0x12d   : > { %v583_v37 = vmax.f32 %v539_v30, 0.0  ;;  %v591_v38 = vmax.f32 %v571_v32, 0.0  ;;  %v542_v39 = vadd.f32 %v1136_v31, %v541_v35  ;;  %v574_v40 = vadd.f32 %v1136_v31, %v573_v36  ;;  %v543_v41 = vpop.f32.mrb[15].mxu0  ;;  %v575_v42 = vpop.f32.mrb[15].mxu1 }
 0x12f   : > { %v867_v43 = vpack.c.bf16 %v583_v37, %v583_v37  ;;  %v875_v44 = vpack.c.bf16 %v591_v38, %v591_v38  ;;  %v584_v45 = vmax.f32 %v542_v39, 0.0  ;;  %v592_v46 = vmax.f32 %v574_v40, 0.0 }
 0x131   : > { %664 = vst.msk [vmem:[%s1146_s18 + $0x18] sm:$0xf] %vm657_vm1, %v867_v43  ;;  %672 = vst.msk [vmem:[%s1146_s18 + $0x38] sm:$0xf] %vm657_vm1, %v875_v44  ;;  %v868_v47 = vpack.c.bf16 %v584_v45, %v584_v45  ;;  %v876_v48 = vpack.c.bf16 %v592_v46, %v592_v46 }
 0x133   : > { %665 = vst.msk [vmem:[%s1146_s18 + $0x1c] sm:$0xf] %vm657_vm1, %v868_v47  ;;  %673 = vst.msk [vmem:[%s1146_s18 + $0x3c] sm:$0xf] %vm657_vm1, %v876_v48 }
 0x134 PF: > { %s13_s14 = sadd.s32 1, %s990_s14   ;;  %s1205_s12 = smov %s986_s13 }
 0x135   : > { %p10_p5 = scmp.ge.s32.totalorder %s13_s14, 6   ;;  %s1206_s13 = smov %s1208_s15 }
 0x137   :  { %12 = sbr.rel (!%p10_p5) target bundleno = 2 (0x2), region = 68 }

// kernel: jointnet_forward.73
= control target key start
LH: loop header
LB: loop body
LE: loop exit
PB: predicated region body
PF: predicated region fallthrough
CT: control target
= control target key end

     0   :  { %s1058_s12 = smov 0   ;;  %s1060_s13 = smov 0   ;;  %s1216_s0 = inlined_call_operand.vmem [shape: bf16[1,512,256], index: 0, kind: input, shape index: {}]   ;;  %s1217_s1 = inlined_call_operand.vmem [shape: bf16[1,256,32], index: 1, kind: input, shape index: {}]   ;;  %s1218_s2 = inlined_call_operand.vmem [shape: f32[1,1,32], index: 2, kind: input, shape index: {}]   ;;  %s1219_s3 = inlined_call_operand.vmem [shape: bf16[1,512,32], index: 3, kind: output, shape index: {}]  }
   0x1   :  { %s1062_s14 = smov 0  }
   0x2 LB: > { %s22_s15 = sadd.s32 1, %s1032_s13  ;;  %p796_p0 = scmp.ge.s32.totalorder %s1036_s14, 1  ;;  %s1036_s14 = sphi %s1062_s14, %s13_s14   ;;  %s1032_s13 = sphi %s1060_s13, %s1221_s13   ;;  %s1028_s12 = sphi %s1058_s12, %s1220_s12  }
   0x3   : > { %p23_p1 = scmp.ge.s32.totalorder %s22_s15, 4  ;;  %p177_p2 = scmp.lt.s32.totalorder %s1036_s14, 5 }
   0x5   : > { %s1223_s15 = smov (%p23_p1, %s22_s15), 0  ;;  %p178_p3 = pnand %p796_p0, %p177_p2 }
   0x6   : > { %v974_v0 = vld [vmem:[%s1217_s1 + $0x40] sm:$0xff] (!%p178_p3)   ;;  %s797_s18 = sshll.u32 (!%p178_p3), %s1028_s12, 4  ;;  %v976_v2 = vld [vmem:[%s1217_s1 + $0x48] sm:$0xff] (!%p178_p3)   ;;  %v978_v4 = vld [vmem:[%s1217_s1 + $0x50] sm:$0xff] (!%p178_p3)   ;;  %vm656_vm0 = vcmask (!%p178_p3), 257024  }
   0x7   : > { %181 = sbr.rel (%p178_p3) target bundleno = 287 (0x11f), region = 32  ;;  %v975_v1 = vld [vmem:[%s1217_s1] sm:$0xff] (!%p178_p3)   ;;  %870 = vmatprep.subr.bf16.mxu0 (!%p178_p3), %v974_v0  ;;  %934 = vmatprep.subr.bf16.mxu1 (!%p178_p3), %v974_v0  ;;  %v977_v3 = vld [vmem:[%s1217_s1 + $0x8] sm:$0xff] (!%p178_p3)   ;;  %p221_p4 = scmp.lt.s32.totalorder (!%p178_p3), %s797_s18, 63  ;;  %v979_v5 = vld [vmem:[%s1217_s1 + $0x10] sm:$0xff] (!%p178_p3)  }
   0x8   : > { %871 = vmatpush3.bf16.msra.mxu0 (!%p178_p3), %v975_v1  ;;  %942 = vmatpush3.bf16.msra.mxu1 (!%p178_p3), %v975_v1  ;;  %v980_v6 = vld [vmem:[%s1217_s1 + $0x58] sm:$0xff] (!%p178_p3)   ;;  %v982_v8 = vld [vmem:[%s1217_s1 + $0x60] sm:$0xff] (!%p178_p3)   ;;  %v984_v10 = vld [vmem:[%s1217_s1 + $0x68] sm:$0xff] (!%p178_p3)  }
   0x9   : > { %872 = vmatprep.subr.bf16.mxu0 (!%p178_p3), %v976_v2  ;;  %935 = vmatprep.subr.bf16.mxu1 (!%p178_p3), %v976_v2  ;;  %v981_v7 = vld [vmem:[%s1217_s1 + $0x18] sm:$0xff] (!%p178_p3)   ;;  %v983_v9 = vld [vmem:[%s1217_s1 + $0x20] sm:$0xff] (!%p178_p3)   ;;  %v985_v13 = vld [vmem:[%s1217_s1 + $0x28] sm:$0xff] (!%p178_p3)  }
   0xa   : > { %v986_v14 = vld [vmem:[%s1217_s1 + $0x70] sm:$0xff] (!%p178_p3)   ;;  %v988_v16 = vld [vmem:[%s1217_s1 + $0x78] sm:$0xff] (!%p178_p3)   ;;  %v1151_v34 = vld [vmem:[%s1218_s2] ss:$0 sm:$0xff] (!%p178_p3) }
   0xb   : > { %v987_v15 = vld [vmem:[%s1217_s1 + $0x30] sm:$0xff] (!%p178_p3)   ;;  %v989_v17 = vld [vmem:[%s1217_s1 + $0x38] sm:$0xff] (!%p178_p3)  }
   0xc   : > { %873 = vmatpush3.bf16.msra.mxu0 (!%p178_p3), %v977_v3  ;;  %943 = vmatpush3.bf16.msra.mxu1 (!%p178_p3), %v977_v3 }
   0xd   : > { %874 = vmatprep.subr.bf16.mxu0 (!%p178_p3), %v978_v4  ;;  %936 = vmatprep.subr.bf16.mxu1 (!%p178_p3), %v978_v4 }
   0xe   : > { %s1225_s18 = smov (!%p221_p4, %s797_s18), 63 }
   0xf   : > { %s853_s6 = sshll.u32 %s1225_s18, 3  ;;  %s801_s5 = sshll.u32 %s1225_s18, 2 }
  0x10   : > { %875 = vmatpush3.bf16.msra.mxu0 %v979_v5  ;;  %944 = vmatpush3.bf16.msra.mxu1 %v979_v5  ;;  %s1109_s11 = scalar_lea.vmem %s1216_s0, %s853_s6  ;;  %s1161_s8 = scalar_lea.vmem %s1219_s3, %s801_s5 }
  0x11   : > { %876 = vmatprep.subr.bf16.mxu0 %v980_v6  ;;  %937 = vmatprep.subr.bf16.mxu1 %v980_v6  ;;  %v992_v11 = vld [vmem:[%s1109_s11 + $0x4] ss:$8 sps:$4 sm:$0xff]   ;;  %v990_v18 = vld [vmem:[%s1109_s11] ss:$8 sps:$4 sm:$0xff]   ;;  %v996_v20 = vld [vmem:[%s1109_s11 + $0x14] ss:$8 sps:$4 sm:$0xff]  }
  0x12   : > { %v995_v12 = vld [vmem:[%s1109_s11 + $0x44] ss:$8 sps:$4 sm:$0xff]   ;;  %511 = vmatprep.mubr.bf16.mxu0 %v992_v11  ;;  %v993_v19 = vld [vmem:[%s1109_s11 + $0x40] ss:$8 sps:$4 sm:$0xff]   ;;  %v998_v21 = vld [vmem:[%s1109_s11 + $0x54] ss:$8 sps:$4 sm:$0xff]  }
  0x13   : > { %543 = vmatprep.mubr.bf16.mxu1 %v995_v12  ;;  %v1000_v22 = vld [vmem:[%s1109_s11 + $0x10] ss:$8 sps:$4 sm:$0xff]   ;;  %v1002_v24 = vld [vmem:[%s1109_s11 + $0x24] ss:$8 sps:$4 sm:$0xff]   ;;  %v1006_v26 = vld [vmem:[%s1109_s11 + $0x20] ss:$8 sps:$4 sm:$0xff]  }
  0x14   : > { %877 = vmatpush3.bf16.msra.mxu0 %v981_v7  ;;  %945 = vmatpush3.bf16.msra.mxu1 %v981_v7  ;;  %v1001_v23 = vld [vmem:[%s1109_s11 + $0x50] ss:$8 sps:$4 sm:$0xff]   ;;  %v1004_v25 = vld [vmem:[%s1109_s11 + $0x64] ss:$8 sps:$4 sm:$0xff]   ;;  %v1007_v27 = vld [vmem:[%s1109_s11 + $0x60] ss:$8 sps:$4 sm:$0xff]  }
  0x15   : > { %878 = vmatprep.subr.bf16.mxu0 %v982_v8  ;;  %938 = vmatprep.subr.bf16.mxu1 %v982_v8  ;;  %v1008_v28 = vld [vmem:[%s1109_s11 + $0x34] ss:$8 sps:$4 sm:$0xff]   ;;  %v1012_v30 = vld [vmem:[%s1109_s11 + $0x30] ss:$8 sps:$4 sm:$0xff]  }
  0x16   : > { %v1010_v29 = vld [vmem:[%s1109_s11 + $0x74] ss:$8 sps:$4 sm:$0xff]   ;;  %v1013_v31 = vld [vmem:[%s1109_s11 + $0x70] ss:$8 sps:$4 sm:$0xff]  }
  0x18   : > { %879 = vmatpush3.bf16.msra.mxu0 %v983_v9  ;;  %946 = vmatpush3.bf16.msra.mxu1 %v983_v9 }
  0x19   : > { %880 = vmatprep.subr.bf16.mxu0 %v984_v10  ;;  %939 = vmatprep.subr.bf16.mxu1 %v984_v10 }
  0x1c   : > { %881 = vmatpush3.bf16.msra.mxu0 %v985_v13  ;;  %947 = vmatpush3.bf16.msra.mxu1 %v985_v13 }
  0x1d   : > { %882 = vmatprep.subr.bf16.mxu0 %v986_v14  ;;  %940 = vmatprep.subr.bf16.mxu1 %v986_v14 }
  0x20   : > { %883 = vmatpush3.bf16.msra.mxu0 %v987_v15  ;;  %948 = vmatpush3.bf16.msra.mxu1 %v987_v15 }
  0x21   : > { %884 = vmatprep.subr.bf16.mxu0 %v988_v16  ;;  %941 = vmatprep.subr.bf16.mxu1 %v988_v16 }
  0x24   : > { %885 = vmatpush3.bf16.msra.mxu0 %v989_v17  ;;  %949 = vmatpush3.bf16.msra.mxu1 %v989_v17 }
  0x27   : > { %512 = vmatmul.mubr.bf16.vlgmr.msra.gmra.mrb[0].mxu0 %v990_v18  ;;  %544 = vmatmul.mubr.bf16.vlgmr.msra.gmra.mrb[0].mxu1 %v993_v19 }
  0x28   : > { %519 = vmatprep.mubr.bf16.mxu0 %v996_v20  ;;  %551 = vmatprep.mubr.bf16.mxu1 %v998_v21 }
  0x2f   : > { %520 = vmatmul.mubr.bf16.gmra.mrb[4].mxu0 %v1000_v22  ;;  %552 = vmatmul.mubr.bf16.gmra.mrb[4].mxu1 %v1001_v23 }
  0x30   : > { %527 = vmatprep.mubr.bf16.mxu0 %v1002_v24  ;;  %559 = vmatprep.mubr.bf16.mxu1 %v1004_v25 }
  0x37   : > { %528 = vmatmul.mubr.bf16.gmra.mrb[8].mxu0 %v1006_v26  ;;  %560 = vmatmul.mubr.bf16.gmra.mrb[8].mxu1 %v1007_v27 }
  0x38   : > { %535 = vmatprep.mubr.bf16.mxu0 %v1008_v28  ;;  %567 = vmatprep.mubr.bf16.mxu1 %v1010_v29 }
  0x3f   : > { %536 = vmatmul.mubr.bf16.gmra.mrb[12].mxu0 %v1012_v30  ;;  %568 = vmatmul.mubr.bf16.gmra.mrb[12].mxu1 %v1013_v31 }
  0xfa   : > { %v886_v32 = vpop.f32.mrb[0].mxu0  ;;  %v910_v33 = vpop.f32.mrb[0].mxu1 }
  0xfb   : > { %v887_v35 = vpop.f32.mrb[1].mxu0  ;;  %v911_v36 = vpop.f32.mrb[1].mxu1 }
  0xfc   : > { %v888_v37 = vadd.f32 %v887_v35, %v886_v32  ;;  %v912_v38 = vadd.f32 %v911_v36, %v910_v33  ;;  %v889_v39 = vpop.f32.mrb[2].mxu0  ;;  %v913_v40 = vpop.f32.mrb[2].mxu1 }
  0xfd   : > { %v890_v41 = vpop.f32.mrb[3].mxu0  ;;  %v914_v42 = vpop.f32.mrb[3].mxu1 }
  0xfe   : > { %v514_v43 = vadd.f32 %v888_v37, %v1151_v34  ;;  %v546_v44 = vadd.f32 %v912_v38, %v1151_v34  ;;  %v891_v45 = vadd.f32 %v890_v41, %v889_v39  ;;  %v915_v46 = vadd.f32 %v914_v42, %v913_v40 }
 0x100   : > { %v576_v47 = vmax.f32 %v514_v43, 0.0  ;;  %v584_v48 = vmax.f32 %v546_v44, 0.0  ;;  %v517_v49 = vadd.f32 %v891_v45, %v1151_v34  ;;  %v549_v50 = vadd.f32 %v915_v46, %v1151_v34 }
 0x102   : > { %v854_v51 = vpack.c.bf16 %v576_v47, %v576_v47  ;;  %v862_v52 = vpack.c.bf16 %v584_v48, %v584_v48  ;;  %v577_v53 = vmax.f32 %v517_v49, 0.0  ;;  %v585_v54 = vmax.f32 %v549_v50, 0.0  ;;  %v892_v55 = vpop.f32.mrb[4].mxu0  ;;  %v916_v56 = vpop.f32.mrb[4].mxu1 }
 0x103   : > { %v893_v57 = vpop.f32.mrb[5].mxu0  ;;  %v917_v58 = vpop.f32.mrb[5].mxu1 }
 0x104   : > { %657 = vst.msk [vmem:[%s1161_s8] sm:$0xf] %vm656_vm0, %v854_v51  ;;  %665 = vst.msk [vmem:[%s1161_s8 + $0x20] sm:$0xf] %vm656_vm0, %v862_v52  ;;  %v855_v59 = vpack.c.bf16 %v577_v53, %v577_v53  ;;  %v863_v60 = vpack.c.bf16 %v585_v54, %v585_v54  ;;  %v894_v61 = vadd.f32 %v893_v57, %v892_v55  ;;  %v895_v63 = vpop.f32.mrb[6].mxu0  ;;  %v919_v0 = vpop.f32.mrb[6].mxu1 }
 0x105   : > { %v918_v62 = vadd.f32 %v917_v58, %v916_v56  ;;  %v896_v1 = vpop.f32.mrb[7].mxu0  ;;  %v920_v2 = vpop.f32.mrb[7].mxu1 }
 0x106   : > { %658 = vst.msk [vmem:[%s1161_s8 + $0x4] sm:$0xf] %vm656_vm0, %v855_v59  ;;  %666 = vst.msk [vmem:[%s1161_s8 + $0x24] sm:$0xf] %vm656_vm0, %v863_v60  ;;  %v522_v3 = vadd.f32 %v894_v61, %v1151_v34  ;;  %v897_v5 = vadd.f32 %v896_v1, %v895_v63  ;;  %v921_v6 = vadd.f32 %v920_v2, %v919_v0 }
 0x107   : > { %v554_v4 = vadd.f32 %v918_v62, %v1151_v34 }
 0x108   : > { %v578_v7 = vmax.f32 %v522_v3, 0.0  ;;  %v525_v9 = vadd.f32 %v897_v5, %v1151_v34  ;;  %v557_v10 = vadd.f32 %v921_v6, %v1151_v34 }
 0x109   : > { %v586_v8 = vmax.f32 %v554_v4, 0.0 }
 0x10a   : > { %v856_v11 = vpack.c.bf16 %v578_v7, %v578_v7  ;;  %v579_v13 = vmax.f32 %v525_v9, 0.0  ;;  %v587_v14 = vmax.f32 %v557_v10, 0.0  ;;  %v898_v15 = vpop.f32.mrb[8].mxu0  ;;  %v922_v16 = vpop.f32.mrb[8].mxu1 }
 0x10b   : > { %v864_v12 = vpack.c.bf16 %v586_v8, %v586_v8  ;;  %v899_v17 = vpop.f32.mrb[9].mxu0  ;;  %v923_v18 = vpop.f32.mrb[9].mxu1 }
 0x10c   : > { %659 = vst.msk [vmem:[%s1161_s8 + $0x8] sm:$0xf] %vm656_vm0, %v856_v11  ;;  %v857_v19 = vpack.c.bf16 %v579_v13, %v579_v13  ;;  %v865_v20 = vpack.c.bf16 %v587_v14, %v587_v14  ;;  %v900_v21 = vadd.f32 %v899_v17, %v898_v15  ;;  %v924_v22 = vadd.f32 %v923_v18, %v922_v16  ;;  %v901_v23 = vpop.f32.mrb[10].mxu0  ;;  %v925_v24 = vpop.f32.mrb[10].mxu1 }
 0x10d   : > { %667 = vst.msk [vmem:[%s1161_s8 + $0x28] sm:$0xf] %vm656_vm0, %v864_v12  ;;  %v902_v25 = vpop.f32.mrb[11].mxu0  ;;  %v926_v26 = vpop.f32.mrb[11].mxu1 }
 0x10e   : > { %660 = vst.msk [vmem:[%s1161_s8 + $0xc] sm:$0xf] %vm656_vm0, %v857_v19  ;;  %668 = vst.msk [vmem:[%s1161_s8 + $0x2c] sm:$0xf] %vm656_vm0, %v865_v20  ;;  %v530_v27 = vadd.f32 %v900_v21, %v1151_v34  ;;  %v562_v28 = vadd.f32 %v924_v22, %v1151_v34  ;;  %v903_v29 = vadd.f32 %v902_v25, %v901_v23 }
 0x10f   : > { %v927_v30 = vadd.f32 %v926_v26, %v925_v24 }
 0x110   : > { %v580_v31 = vmax.f32 %v530_v27, 0.0  ;;  %v588_v32 = vmax.f32 %v562_v28, 0.0  ;;  %v533_v33 = vadd.f32 %v903_v29, %v1151_v34 }
 0x111   : > { %v565_v35 = vadd.f32 %v927_v30, %v1151_v34 }
 0x112   : > { %v858_v36 = vpack.c.bf16 %v580_v31, %v580_v31  ;;  %v866_v37 = vpack.c.bf16 %v588_v32, %v588_v32  ;;  %v581_v38 = vmax.f32 %v533_v33, 0.0  ;;  %v904_v40 = vpop.f32.mrb[12].mxu0  ;;  %v928_v41 = vpop.f32.mrb[12].mxu1 }
 0x113   : > { %v589_v39 = vmax.f32 %v565_v35, 0.0  ;;  %v905_v42 = vpop.f32.mrb[13].mxu0  ;;  %v929_v43 = vpop.f32.mrb[13].mxu1 }
 0x114   : > { %661 = vst.msk [vmem:[%s1161_s8 + $0x10] sm:$0xf] %vm656_vm0, %v858_v36  ;;  %669 = vst.msk [vmem:[%s1161_s8 + $0x30] sm:$0xf] %vm656_vm0, %v866_v37  ;;  %v859_v44 = vpack.c.bf16 %v581_v38, %v581_v38  ;;  %v906_v46 = vadd.f32 %v905_v42, %v904_v40  ;;  %v930_v47 = vadd.f32 %v929_v43, %v928_v41  ;;  %v907_v48 = vpop.f32.mrb[14].mxu0  ;;  %v931_v49 = vpop.f32.mrb[14].mxu1 }
 0x115   : > { %v867_v45 = vpack.c.bf16 %v589_v39, %v589_v39  ;;  %v908_v50 = vpop.f32.mrb[15].mxu0  ;;  %v932_v51 = vpop.f32.mrb[15].mxu1 }
 0x116   : > { %662 = vst.msk [vmem:[%s1161_s8 + $0x14] sm:$0xf] %vm656_vm0, %v859_v44  ;;  %v538_v52 = vadd.f32 %v906_v46, %v1151_v34  ;;  %v570_v53 = vadd.f32 %v930_v47, %v1151_v34  ;;  %v909_v54 = vadd.f32 %v908_v50, %v907_v48  ;;  %v933_v55 = vadd.f32 %v932_v51, %v931_v49 }
 0x117   : > { %670 = vst.msk [vmem:[%s1161_s8 + $0x34] sm:$0xf] %vm656_vm0, %v867_v45 }
 0x118   : > { %v582_v56 = vmax.f32 %v538_v52, 0.0  ;;  %v590_v57 = vmax.f32 %v570_v53, 0.0  ;;  %v541_v58 = vadd.f32 %v909_v54, %v1151_v34  ;;  %v573_v59 = vadd.f32 %v933_v55, %v1151_v34 }
 0x11a   : > { %v860_v60 = vpack.c.bf16 %v582_v56, %v582_v56  ;;  %v868_v61 = vpack.c.bf16 %v590_v57, %v590_v57  ;;  %v583_v62 = vmax.f32 %v541_v58, 0.0  ;;  %v591_v63 = vmax.f32 %v573_v59, 0.0 }
 0x11c   : > { %663 = vst.msk [vmem:[%s1161_s8 + $0x18] sm:$0xf] %vm656_vm0, %v860_v60  ;;  %671 = vst.msk [vmem:[%s1161_s8 + $0x38] sm:$0xf] %vm656_vm0, %v868_v61  ;;  %v861_v0 = vpack.c.bf16 %v583_v62, %v583_v62  ;;  %v869_v1 = vpack.c.bf16 %v591_v63, %v591_v63 }
 0x11e   : > { %664 = vst.msk [vmem:[%s1161_s8 + $0x1c] sm:$0xf] %vm656_vm0, %v861_v0  ;;  %672 = vst.msk [vmem:[%s1161_s8 + $0x3c] sm:$0xf] %vm656_vm0, %v869_v1 }
 0x11f PF: > { %s13_s14 = sadd.s32 1, %s1036_s14   ;;  %s1220_s12 = smov %s1032_s13 }
 0x120   : > { %p10_p5 = scmp.ge.s32.totalorder %s13_s14, 6   ;;  %s1221_s13 = smov %s1223_s15 }
 0x122   :  { %12 = sbr.rel (!%p10_p5) target bundleno = 2 (0x2), region = 68 }

// kernel: jointnet_forward.77
= control target key start
LH: loop header
LB: loop body
LE: loop exit
PB: predicated region body
PF: predicated region fallthrough
CT: control target
= control target key end

     0   :  { %s882_s12 = smov 0   ;;  %s884_s13 = smov 0   ;;  %s993_s0 = inlined_call_operand.vmem [shape: bf16[1,512,128], index: 0, kind: input, shape index: {}]   ;;  %s994_s1 = inlined_call_operand.vmem [shape: bf16[1,128,2], index: 1, kind: input, shape index: {}]   ;;  %s995_s2 = inlined_call_operand.vmem [shape: f32[1,1,2], index: 2, kind: input, shape index: {}]   ;;  %s996_s3 = inlined_call_operand.vmem [shape: bf16[1,512,2], index: 3, kind: output, shape index: {}]  }
   0x1   :  { %s886_s14 = smov 0  }
   0x2 LB: > { %s22_s15 = sadd.s32 1, %s856_s13  ;;  %p678_p0 = scmp.ge.s32.totalorder %s860_s14, 1  ;;  %s860_s14 = sphi %s886_s14, %s13_s14   ;;  %s856_s13 = sphi %s884_s13, %s998_s13   ;;  %s852_s12 = sphi %s882_s12, %s997_s12  }
   0x3   : > { %p23_p1 = scmp.ge.s32.totalorder %s22_s15, 4  ;;  %p176_p2 = scmp.lt.s32.totalorder %s860_s14, 5 }
   0x5   : > { %s1000_s15 = smov (%p23_p1, %s22_s15), 0  ;;  %p177_p3 = pnand %p678_p0, %p176_p2 }
   0x6   : > { %v822_v0 = vld [vmem:[%s994_s1] sm:$0xff] (!%p177_p3)   ;;  %s679_s18 = sshll.u32 (!%p177_p3), %s852_s12, 4  ;;  %v823_v1 = vld [vmem:[%s994_s1 + $0x8] sm:$0xff] (!%p177_p3)   ;;  %v824_v2 = vld [vmem:[%s994_s1 + $0x10] sm:$0xff] (!%p177_p3)   ;;  %vm541_vm0 = vcmask (!%p177_p3), 11264  }
   0x7   : > { %180 = sbr.rel (%p177_p3) target bundleno = 267 (0x10b), region = 32  ;;  %p219_p4 = scmp.lt.s32.totalorder (!%p177_p3), %s679_s18, 63  ;;  %750 = vmatprep.subr.bf16.mxu0 (!%p177_p3), %v822_v0  ;;  %782 = vmatprep.subr.bf16.mxu1 (!%p177_p3), %v822_v0  ;;  %v825_v3 = vld [vmem:[%s994_s1 + $0x18] sm:$0xff] (!%p177_p3)   ;;  %v826_v6 = vld [vmem:[%s994_s1 + $0x20] sm:$0xff] (!%p177_p3)   ;;  %v827_v7 = vld [vmem:[%s994_s1 + $0x28] sm:$0xff] (!%p177_p3)  }
   0x8   : > { %751 = vmatpush3.bf16.msra.mxu0 (!%p177_p3), %v822_v0  ;;  %790 = vmatpush3.bf16.msra.mxu1 (!%p177_p3), %v822_v0  ;;  %v828_v8 = vld [vmem:[%s994_s1 + $0x30] sm:$0xff] (!%p177_p3)   ;;  %v829_v9 = vld [vmem:[%s994_s1 + $0x38] sm:$0xff] (!%p177_p3)   ;;  %v683_v16 = vld [vmem:[%s995_s2] ss:$0 sm:$0xff] (!%p177_p3) }
   0x9   : > { %752 = vmatprep.subr.bf16.mxu0 (!%p177_p3), %v823_v1  ;;  %783 = vmatprep.subr.bf16.mxu1 (!%p177_p3), %v823_v1 }
   0xc   : > { %753 = vmatpush3.bf16.msra.mxu0 (!%p177_p3), %v823_v1  ;;  %791 = vmatpush3.bf16.msra.mxu1 (!%p177_p3), %v823_v1 }
   0xd   : > { %754 = vmatprep.subr.bf16.mxu0 (!%p177_p3), %v824_v2  ;;  %784 = vmatprep.subr.bf16.mxu1 (!%p177_p3), %v824_v2 }
   0xe   : > { %s1002_s18 = smov (!%p219_p4, %s679_s18), 63 }
   0xf   : > { %s680_s23 = sshll.u32 %s1002_s18, 2 }
  0x10   : > { %s917_s26 = scalar_lea.vmem %s993_s0, %s680_s23  ;;  %755 = vmatpush3.bf16.msra.mxu0 %v824_v2  ;;  %792 = vmatpush3.bf16.msra.mxu1 %v824_v2  ;;  %s950_s17 = scalar_lea.vmem %s996_s3, %s680_s23 }
  0x11   : > { %v830_v4 = vld [vmem:[%s917_s26] sm:$0xff]   ;;  %756 = vmatprep.subr.bf16.mxu0 %v825_v3  ;;  %785 = vmatprep.subr.bf16.mxu1 %v825_v3  ;;  %v832_v10 = vld [vmem:[%s917_s26 + $0x8] sm:$0xff]   ;;  %v834_v12 = vld [vmem:[%s917_s26 + $0x10] sm:$0xff]  }
  0x12   : > { %v831_v5 = vld [vmem:[%s917_s26 + $0x20] sm:$0xff]   ;;  %766 = vmatprep.mubr.bf16.mxu0 %v830_v4  ;;  %v833_v11 = vld [vmem:[%s917_s26 + $0x28] sm:$0xff]   ;;  %v835_v13 = vld [vmem:[%s917_s26 + $0x30] sm:$0xff]  }
  0x13   : > { %774 = vmatprep.mubr.bf16.mxu1 %v831_v5  ;;  %v836_v14 = vld [vmem:[%s917_s26 + $0x18] sm:$0xff]  }
  0x14   : > { %757 = vmatpush3.bf16.msra.mxu0 %v825_v3  ;;  %793 = vmatpush3.bf16.msra.mxu1 %v825_v3  ;;  %v837_v15 = vld [vmem:[%s917_s26 + $0x38] sm:$0xff]  }
  0x15   : > { %758 = vmatprep.subr.bf16.mxu0 %v826_v6  ;;  %786 = vmatprep.subr.bf16.mxu1 %v826_v6 }
  0x18   : > { %759 = vmatpush3.bf16.msra.mxu0 %v826_v6  ;;  %794 = vmatpush3.bf16.msra.mxu1 %v826_v6 }
  0x19   : > { %760 = vmatprep.subr.bf16.mxu0 %v827_v7  ;;  %787 = vmatprep.subr.bf16.mxu1 %v827_v7 }
  0x1c   : > { %761 = vmatpush3.bf16.msra.mxu0 %v827_v7  ;;  %795 = vmatpush3.bf16.msra.mxu1 %v827_v7 }
  0x1d   : > { %762 = vmatprep.subr.bf16.mxu0 %v828_v8  ;;  %788 = vmatprep.subr.bf16.mxu1 %v828_v8 }
  0x20   : > { %763 = vmatpush3.bf16.msra.mxu0 %v828_v8  ;;  %796 = vmatpush3.bf16.msra.mxu1 %v828_v8 }
  0x21   : > { %764 = vmatprep.subr.bf16.mxu0 %v829_v9  ;;  %789 = vmatprep.subr.bf16.mxu1 %v829_v9 }
  0x24   : > { %765 = vmatpush3.bf16.msra.mxu0 %v829_v9  ;;  %797 = vmatpush3.bf16.msra.mxu1 %v829_v9 }
  0x27   : > { %767 = vmatmul.mubr.bf16.vlgmr.msra.gmra.mrb[0].mxu0 %v832_v10  ;;  %775 = vmatmul.mubr.bf16.vlgmr.msra.gmra.mrb[0].mxu1 %v833_v11 }
  0x28   : > { %770 = vmatprep.mubr.bf16.mxu0 %v834_v12  ;;  %778 = vmatprep.mubr.bf16.mxu1 %v835_v13 }
  0x2f   : > { %771 = vmatmul.mubr.bf16.gmra.mrb[4].mxu0 %v836_v14  ;;  %779 = vmatmul.mubr.bf16.gmra.mrb[4].mxu1 %v837_v15 }
  0xfa   : > { %v768_v17 = vpop.f32.mrb[0].mxu0  ;;  %v776_v18 = vpop.f32.mrb[0].mxu1 }
  0xfb   : > { %v423_v19 = vadd.f32 %v768_v17, %v683_v16  ;;  %v455_v20 = vadd.f32 %v776_v18, %v683_v16  ;;  %v414_v21 = vpop.f32.mrb[1].mxu0  ;;  %v446_v22 = vpop.f32.mrb[1].mxu1 }
  0xfc   : > { %v415_v23 = vadd.f32 %v683_v16, %v414_v21  ;;  %v447_v24 = vadd.f32 %v683_v16, %v446_v22  ;;  %v769_v25 = vpop.f32.mrb[2].mxu0  ;;  %v777_v26 = vpop.f32.mrb[2].mxu1 }
  0xfd   : > { %v720_v27 = vpack.c.bf16 %v423_v19, %v423_v19  ;;  %v728_v28 = vpack.c.bf16 %v455_v20, %v455_v20  ;;  %v426_v29 = vadd.f32 %v769_v25, %v683_v16  ;;  %v458_v30 = vadd.f32 %v777_v26, %v683_v16  ;;  %v417_v31 = vpop.f32.mrb[3].mxu0  ;;  %v449_v32 = vpop.f32.mrb[3].mxu1 }
  0xfe   : > { %v718_v33 = vpack.c.bf16 %v415_v23, %v415_v23  ;;  %v726_v34 = vpack.c.bf16 %v447_v24, %v447_v24  ;;  %v418_v35 = vadd.f32 %v683_v16, %v417_v31  ;;  %v450_v36 = vadd.f32 %v683_v16, %v449_v32 }
  0xff   : > { %544 = vst.msk [vmem:[%s950_s17 + $0x8] sm:$0xf] %vm541_vm0, %v720_v27  ;;  %552 = vst.msk [vmem:[%s950_s17 + $0x28] sm:$0xf] %vm541_vm0, %v728_v28  ;;  %v721_v37 = vpack.c.bf16 %v426_v29, %v426_v29  ;;  %v729_v38 = vpack.c.bf16 %v458_v30, %v458_v30 }
 0x100   : > { %542 = vst.msk [vmem:[%s950_s17] sm:$0xf] %vm541_vm0, %v718_v33  ;;  %550 = vst.msk [vmem:[%s950_s17 + $0x20] sm:$0xf] %vm541_vm0, %v726_v34  ;;  %v719_v39 = vpack.c.bf16 %v418_v35, %v418_v35  ;;  %v727_v40 = vpack.c.bf16 %v450_v36, %v450_v36 }
 0x101   : > { %545 = vst.msk [vmem:[%s950_s17 + $0xc] sm:$0xf] %vm541_vm0, %v721_v37  ;;  %553 = vst.msk [vmem:[%s950_s17 + $0x2c] sm:$0xf] %vm541_vm0, %v729_v38 }
 0x102   : > { %543 = vst.msk [vmem:[%s950_s17 + $0x4] sm:$0xf] %vm541_vm0, %v719_v39  ;;  %551 = vst.msk [vmem:[%s950_s17 + $0x24] sm:$0xf] %vm541_vm0, %v727_v40  ;;  %v772_v41 = vpop.f32.mrb[4].mxu0  ;;  %v780_v42 = vpop.f32.mrb[4].mxu1 }
 0x103   : > { %v439_v43 = vadd.f32 %v772_v41, %v683_v16  ;;  %v471_v44 = vadd.f32 %v780_v42, %v683_v16  ;;  %v430_v45 = vpop.f32.mrb[5].mxu0  ;;  %v462_v46 = vpop.f32.mrb[5].mxu1 }
 0x104   : > { %v431_v47 = vadd.f32 %v683_v16, %v430_v45  ;;  %v463_v48 = vadd.f32 %v683_v16, %v462_v46  ;;  %v773_v49 = vpop.f32.mrb[6].mxu0  ;;  %v781_v50 = vpop.f32.mrb[6].mxu1 }
 0x105   : > { %v724_v51 = vpack.c.bf16 %v439_v43, %v439_v43  ;;  %v732_v52 = vpack.c.bf16 %v471_v44, %v471_v44  ;;  %v442_v53 = vadd.f32 %v773_v49, %v683_v16  ;;  %v474_v54 = vadd.f32 %v781_v50, %v683_v16  ;;  %v433_v55 = vpop.f32.mrb[7].mxu0  ;;  %v465_v56 = vpop.f32.mrb[7].mxu1 }
 0x106   : > { %v722_v57 = vpack.c.bf16 %v431_v47, %v431_v47  ;;  %v730_v58 = vpack.c.bf16 %v463_v48, %v463_v48  ;;  %v434_v59 = vadd.f32 %v683_v16, %v433_v55  ;;  %v466_v60 = vadd.f32 %v683_v16, %v465_v56 }
 0x107   : > { %548 = vst.msk [vmem:[%s950_s17 + $0x18] sm:$0xf] %vm541_vm0, %v724_v51  ;;  %556 = vst.msk [vmem:[%s950_s17 + $0x38] sm:$0xf] %vm541_vm0, %v732_v52  ;;  %v725_v61 = vpack.c.bf16 %v442_v53, %v442_v53  ;;  %v733_v62 = vpack.c.bf16 %v474_v54, %v474_v54 }
 0x108   : > { %546 = vst.msk [vmem:[%s950_s17 + $0x10] sm:$0xf] %vm541_vm0, %v722_v57  ;;  %554 = vst.msk [vmem:[%s950_s17 + $0x30] sm:$0xf] %vm541_vm0, %v730_v58  ;;  %v723_v63 = vpack.c.bf16 %v434_v59, %v434_v59  ;;  %v731_v0 = vpack.c.bf16 %v466_v60, %v466_v60 }
 0x109   : > { %549 = vst.msk [vmem:[%s950_s17 + $0x1c] sm:$0xf] %vm541_vm0, %v725_v61  ;;  %557 = vst.msk [vmem:[%s950_s17 + $0x3c] sm:$0xf] %vm541_vm0, %v733_v62 }
 0x10a   : > { %547 = vst.msk [vmem:[%s950_s17 + $0x14] sm:$0xf] %vm541_vm0, %v723_v63  ;;  %555 = vst.msk [vmem:[%s950_s17 + $0x34] sm:$0xf] %vm541_vm0, %v731_v0 }
 0x10b PF: > { %s13_s14 = sadd.s32 1, %s860_s14   ;;  %s997_s12 = smov %s856_s13 }
 0x10c   : > { %p10_p5 = scmp.ge.s32.totalorder %s13_s14, 6   ;;  %s998_s13 = smov %s1000_s15 }
 0x10e   :  { %12 = sbr.rel (!%p10_p5) target bundleno = 2 (0x2), region = 68 }

// kernel: jointnet_forward.75
= control target key start
LH: loop header
LB: loop body
LE: loop exit
PB: predicated region body
PF: predicated region fallthrough
CT: control target
= control target key end

     0   :  { %s1309_s12 = smov 0   ;;  %s1311_s13 = smov 0   ;;  %s1501_s0 = inlined_call_operand.vmem [shape: bf16[1,512,288], index: 0, kind: input, shape index: {}]   ;;  %s1502_s1 = inlined_call_operand.vmem [shape: bf16[1,288,32], index: 1, kind: input, shape index: {}]   ;;  %s1503_s2 = inlined_call_operand.vmem [shape: f32[1,1,32], index: 2, kind: input, shape index: {}]   ;;  %s1504_s3 = inlined_call_operand.vmem [shape: bf16[1,512,32], index: 3, kind: output, shape index: {}]  }
   0x1   :  { %s1313_s14 = smov 0  }
   0x2 LB: > { %s22_s15 = sadd.s32 1, %s1283_s13  ;;  %p990_p0 = scmp.ge.s32.totalorder %s1287_s14, 1  ;;  %s1287_s14 = sphi %s1313_s14, %s13_s14   ;;  %s1283_s13 = sphi %s1311_s13, %s1506_s13   ;;  %s1279_s12 = sphi %s1309_s12, %s1505_s12  }
   0x3   : > { %p23_p1 = scmp.ge.s32.totalorder %s22_s15, 4  ;;  %p177_p2 = scmp.lt.s32.totalorder %s1287_s14, 5 }
   0x5   : > { %s1508_s15 = smov (%p23_p1, %s22_s15), 0  ;;  %p178_p3 = pnand %p990_p0, %p177_p2 }
   0x6   : > { %v1215_v0 = vld [vmem:[%s1502_s1 + $0x40] sm:$0xff] (!%p178_p3)   ;;  %s991_s18 = sshll.u32 (!%p178_p3), %s1279_s12, 4  ;;  %v1217_v2 = vld [vmem:[%s1502_s1 + $0x48] sm:$0xff] (!%p178_p3)   ;;  %v1219_v4 = vld [vmem:[%s1502_s1 + $0x50] sm:$0xff] (!%p178_p3)   ;;  %vm551_vm0 = vcmask (!%p178_p3), 261120   ;;  %vm850_vm1 = vcmask (!%p178_p3), 257024  }
   0x7   : > { %181 = sbr.rel (%p178_p3) target bundleno = 305 (0x131), region = 32  ;;  %v1216_v1 = vld [vmem:[%s1502_s1] sm:$0xff] (!%p178_p3)   ;;  %1080 = vmatprep.subr.bf16.mxu0 (!%p178_p3), %v1215_v0  ;;  %1174 = vmatprep.subr.bf16.mxu1 (!%p178_p3), %v1215_v0  ;;  %p221_p4 = scmp.lt.s32.totalorder (!%p178_p3), %s991_s18, 63  ;;  %v1218_v3 = vld [vmem:[%s1502_s1 + $0x8] sm:$0xff] (!%p178_p3)   ;;  %v1220_v5 = vld [vmem:[%s1502_s1 + $0x10] sm:$0xff] (!%p178_p3)  }
   0x8   : > { %1081 = vmatpush3.bf16.msra.mxu0 (!%p178_p3), %v1216_v1  ;;  %1182 = vmatpush3.bf16.msra.mxu1 (!%p178_p3), %v1216_v1  ;;  %v1221_v6 = vld [vmem:[%s1502_s1 + $0x58] sm:$0xff] (!%p178_p3)   ;;  %v1223_v8 = vld [vmem:[%s1502_s1 + $0x60] sm:$0xff] (!%p178_p3)   ;;  %v1225_v10 = vld [vmem:[%s1502_s1 + $0x68] sm:$0xff] (!%p178_p3)  }
   0x9   : > { %1082 = vmatprep.subr.bf16.mxu0 (!%p178_p3), %v1217_v2  ;;  %1175 = vmatprep.subr.bf16.mxu1 (!%p178_p3), %v1217_v2  ;;  %v1222_v7 = vld [vmem:[%s1502_s1 + $0x18] sm:$0xff] (!%p178_p3)   ;;  %v1224_v9 = vld [vmem:[%s1502_s1 + $0x20] sm:$0xff] (!%p178_p3)   ;;  %v1226_v13 = vld [vmem:[%s1502_s1 + $0x28] sm:$0xff] (!%p178_p3)  }
   0xa   : > { %v1227_v14 = vld [vmem:[%s1502_s1 + $0x70] sm:$0xff] (!%p178_p3)   ;;  %v1229_v16 = vld [vmem:[%s1502_s1 + $0x78] sm:$0xff] (!%p178_p3)   ;;  %v1237_v19 = vld [vmem:[%s1502_s1 + $0x80] sm:$0xff] (!%p178_p3)  }
   0xb   : > { %v1228_v15 = vld [vmem:[%s1502_s1 + $0x30] sm:$0xff] (!%p178_p3)   ;;  %v1230_v17 = vld [vmem:[%s1502_s1 + $0x38] sm:$0xff] (!%p178_p3)   ;;  %v1244_v23 = vld [vmem:[%s1502_s1 + $0x88] sm:$0xff] (!%p178_p3)  }
   0xc   : > { %1083 = vmatpush3.bf16.msra.mxu0 (!%p178_p3), %v1218_v3  ;;  %1183 = vmatpush3.bf16.msra.mxu1 (!%p178_p3), %v1218_v3  ;;  %v1432_v2 = vld [vmem:[%s1503_s2] ss:$0 sm:$0xff] (!%p178_p3) }
   0xd   : > { %1084 = vmatprep.subr.bf16.mxu0 (!%p178_p3), %v1219_v4  ;;  %1176 = vmatprep.subr.bf16.mxu1 (!%p178_p3), %v1219_v4 }
   0xe   : > { %s1510_s18 = smov (!%p221_p4, %s991_s18), 63 }
   0xf   : > { %s1190_s4 = smul.u32 12, %s1510_s18  ;;  %s994_s9 = sshll.u32 %s1510_s18, 2 }
  0x10   : > { %1085 = vmatpush3.bf16.msra.mxu0 %v1220_v5  ;;  %1184 = vmatpush3.bf16.msra.mxu1 %v1220_v5  ;;  %s1442_s12 = scalar_lea.vmem %s1504_s3, %s994_s9 }
  0x11   : > { %1086 = vmatprep.subr.bf16.mxu0 %v1221_v6  ;;  %1177 = vmatprep.subr.bf16.mxu1 %v1221_v6  ;;  %s1360_s11 = scalar_lea.vmem %s1501_s0, %s1190_s4 }
  0x12   : > { %v1233_v11 = vld [vmem:[%s1360_s11 + $0x4] ss:$12 sps:$4 sm:$0xff]   ;;  %v1236_v12 = vld [vmem:[%s1360_s11 + $0x94] ss:$12 sps:$4 sm:$0xff]   ;;  %v1238_v21 = vld [vmem:[%s1360_s11 + $0x1c] ss:$12 sps:$4 sm:$0xff]  }
  0x13   : > { %608 = vmatprep.mubr.bf16.mxu0 %v1233_v11  ;;  %656 = vmatprep.mubr.bf16.mxu1 %v1236_v12  ;;  %v1231_v18 = vld [vmem:[%s1360_s11] ss:$12 sps:$4 sm:$0xff]   ;;  %v1234_v20 = vld [vmem:[%s1360_s11 + $0x90] ss:$12 sps:$4 sm:$0xff]   ;;  %v1242_v24 = vld [vmem:[%s1360_s11 + $0x18] ss:$12 sps:$4 sm:$0xff]  }
  0x14   : > { %1087 = vmatpush3.bf16.msra.mxu0 %v1222_v7  ;;  %1185 = vmatpush3.bf16.msra.mxu1 %v1222_v7  ;;  %v1240_v22 = vld [vmem:[%s1360_s11 + $0xac] ss:$12 sps:$4 sm:$0xff]   ;;  %v1243_v25 = vld [vmem:[%s1360_s11 + $0xa8] ss:$12 sps:$4 sm:$0xff]   ;;  %v1248_v28 = vld [vmem:[%s1360_s11 + $0x30] ss:$12 sps:$4 sm:$0xff]  }
  0x15   : > { %1088 = vmatprep.subr.bf16.mxu0 %v1223_v8  ;;  %1178 = vmatprep.subr.bf16.mxu1 %v1223_v8  ;;  %v1245_v26 = vld [vmem:[%s1360_s11 + $0x34] ss:$12 sps:$4 sm:$0xff]   ;;  %v1250_v30 = vld [vmem:[%s1360_s11 + $0x4c] ss:$12 sps:$4 sm:$0xff]   ;;  %v1254_v33 = vld [vmem:[%s1360_s11 + $0x50] ss:$12 sps:$4 sm:$0xff]  }
  0x16   : > { %v1247_v27 = vld [vmem:[%s1360_s11 + $0x8] ss:$12 sps:$4 sm:$0xff]   ;;  %v1249_v29 = vld [vmem:[%s1360_s11 + $0x20] ss:$12 sps:$4 sm:$0xff]   ;;  %v1252_v31 = vld [vmem:[%s1360_s11 + $0x38] ss:$12 sps:$4 sm:$0xff]  }
  0x17   : > { %v1253_v32 = vld [vmem:[%s1360_s11 + $0x48] ss:$12 sps:$4 sm:$0xff]   ;;  %v1255_v34 = vld [vmem:[%s1360_s11 + $0x64] ss:$12 sps:$4 sm:$0xff]   ;;  %v1258_v36 = vld [vmem:[%s1360_s11 + $0x60] ss:$12 sps:$4 sm:$0xff]  }
  0x18   : > { %1089 = vmatpush3.bf16.msra.mxu0 %v1224_v9  ;;  %1186 = vmatpush3.bf16.msra.mxu1 %v1224_v9  ;;  %v1257_v35 = vld [vmem:[%s1360_s11 + $0x68] ss:$12 sps:$4 sm:$0xff]   ;;  %v1259_v37 = vld [vmem:[%s1360_s11 + $0x80] ss:$12 sps:$4 sm:$0xff]   ;;  %v1262_v39 = vld [vmem:[%s1360_s11 + $0x98] ss:$12 sps:$4 sm:$0xff]  }
  0x19   : > { %1090 = vmatprep.subr.bf16.mxu0 %v1225_v10  ;;  %1179 = vmatprep.subr.bf16.mxu1 %v1225_v10  ;;  %v1260_v38 = vld [vmem:[%s1360_s11 + $0x7c] ss:$12 sps:$4 sm:$0xff]   ;;  %v1263_v40 = vld [vmem:[%s1360_s11 + $0x78] ss:$12 sps:$4 sm:$0xff]  }
  0x1a   : > { %v1264_v41 = vld [vmem:[%s1360_s11 + $0xb0] ss:$12 sps:$4 sm:$0xff]  }
  0x1c   : > { %1091 = vmatpush3.bf16.msra.mxu0 %v1226_v13  ;;  %1187 = vmatpush3.bf16.msra.mxu1 %v1226_v13 }
  0x1d   : > { %1092 = vmatprep.subr.bf16.mxu0 %v1227_v14  ;;  %1180 = vmatprep.subr.bf16.mxu1 %v1227_v14 }
  0x20   : > { %1093 = vmatpush3.bf16.msra.mxu0 %v1228_v15  ;;  %1188 = vmatpush3.bf16.msra.mxu1 %v1228_v15 }
  0x21   : > { %1094 = vmatprep.subr.bf16.mxu0 %v1229_v16  ;;  %1181 = vmatprep.subr.bf16.mxu1 %v1229_v16 }
  0x24   : > { %1095 = vmatpush3.bf16.msra.mxu0 %v1230_v17  ;;  %1189 = vmatpush3.bf16.msra.mxu1 %v1230_v17 }
  0x25   : > { %1154 = vmatprep.subr.bf16.mxu1 %v1237_v19 }
  0x27   : > { %609 = vmatmul.mubr.bf16.vlgmr.msra.gmra.mrb[0].mxu0 %v1231_v18  ;;  %657 = vmatmul.mubr.bf16.vlgmr.msra.gmra.mrb[0].mxu1 %v1234_v20 }
  0x28   : > { %1155 = vmatpush3.bf16.msra.mxu1 %v1237_v19  ;;  %616 = vmatprep.mubr.bf16.mxu0 %v1238_v21 }
  0x29   : > { %664 = vmatprep.mubr.bf16.mxu1 %v1240_v22  ;;  %1156 = vmatprep.subr.bf16.mxu1 %v1244_v23 }
  0x2c   : > { %1157 = vmatpush3.bf16.msra.mxu1 %v1244_v23 }
  0x2f   : > { %617 = vmatmul.mubr.bf16.gmra.mrb[4].mxu0 %v1242_v24  ;;  %665 = vmatmul.mubr.bf16.gmra.mrb[4].mxu1 %v1243_v25 }
  0x30   : > { %624 = vmatprep.mubr.bf16.mxu0 %v1245_v26  ;;  %1158 = vmatprep.mubr.msk.bf16.mxu1 %vm551_vm0, %v1247_v27 }
  0x37   : > { %625 = vmatmul.mubr.bf16.gmra.mrb[8].mxu0 %v1248_v28  ;;  %1159 = vmatmul.mubr.msk.bf16.vlgmr.msra.gmra.mrb[8].mxu1 %vm551_vm0, %v1249_v29 }
  0x38   : > { %632 = vmatprep.mubr.bf16.mxu0 %v1250_v30  ;;  %1162 = vmatprep.mubr.msk.bf16.mxu1 %vm551_vm0, %v1252_v31 }
  0x3f   : > { %633 = vmatmul.mubr.bf16.gmra.mrb[12].mxu0 %v1253_v32  ;;  %1163 = vmatmul.mubr.msk.bf16.gmra.mrb[12].mxu1 %vm551_vm0, %v1254_v33 }
  0x40   : > { %640 = vmatprep.mubr.bf16.mxu0 %v1255_v34  ;;  %1166 = vmatprep.mubr.msk.bf16.mxu1 %vm551_vm0, %v1257_v35 }
  0x47   : > { %641 = vmatmul.mubr.bf16.gmra.mrb[16].mxu0 %v1258_v36  ;;  %1167 = vmatmul.mubr.msk.bf16.gmra.mrb[16].mxu1 %vm551_vm0, %v1259_v37 }
  0x48   : > { %648 = vmatprep.mubr.bf16.mxu0 %v1260_v38  ;;  %1170 = vmatprep.mubr.msk.bf16.mxu1 %vm551_vm0, %v1262_v39 }
  0x4f   : > { %649 = vmatmul.mubr.bf16.gmra.mrb[20].mxu0 %v1263_v40  ;;  %1171 = vmatmul.mubr.msk.bf16.gmra.mrb[20].mxu1 %vm551_vm0, %v1264_v41 }
  0xfa   : > { %v1096_v42 = vpop.f32.mrb[0].mxu0  ;;  %v1132_v43 = vpop.f32.mrb[0].mxu1 }
  0xfb   : > { %v1097_v44 = vpop.f32.mrb[1].mxu0  ;;  %v1133_v45 = vpop.f32.mrb[1].mxu1 }
  0xfc   : > { %v1098_v46 = vadd.f32 %v1097_v44, %v1096_v42  ;;  %v1099_v47 = vpop.f32.mrb[2].mxu0  ;;  %v1421_v48 = vadd.f32 %v1133_v45, %v1132_v43  ;;  %v1135_v49 = vpop.f32.mrb[2].mxu1 }
  0xfd   : > { %v1100_v50 = vpop.f32.mrb[3].mxu0  ;;  %v1136_v51 = vpop.f32.mrb[3].mxu1 }
  0xfe   : > { %v1101_v52 = vadd.f32 %v1100_v50, %v1099_v47  ;;  %v1423_v53 = vadd.f32 %v1136_v51, %v1135_v49  ;;  %v611_v6 = vadd.f32 %v1098_v46, %v1432_v2 }
 0x100   : > { %v614_v15 = vadd.f32 %v1101_v52, %v1432_v2 }
 0x102   : > { %v1102_v54 = vpop.f32.mrb[4].mxu0  ;;  %v1138_v55 = vpop.f32.mrb[4].mxu1 }
 0x103   : > { %v1103_v56 = vpop.f32.mrb[5].mxu0  ;;  %v1139_v57 = vpop.f32.mrb[5].mxu1 }
 0x104   : > { %v1104_v58 = vadd.f32 %v1103_v56, %v1102_v54  ;;  %v1105_v59 = vpop.f32.mrb[6].mxu0  ;;  %v1425_v60 = vadd.f32 %v1139_v57, %v1138_v55  ;;  %v1141_v61 = vpop.f32.mrb[6].mxu1 }
 0x105   : > { %v1106_v62 = vpop.f32.mrb[7].mxu0  ;;  %v1142_v63 = vpop.f32.mrb[7].mxu1 }
 0x106   : > { %v1107_v0 = vadd.f32 %v1106_v62, %v1105_v59  ;;  %v1427_v1 = vadd.f32 %v1142_v63, %v1141_v61  ;;  %v619_v3 = vadd.f32 %v1104_v58, %v1432_v2 }
 0x108   : > { %v622_v10 = vadd.f32 %v1107_v0, %v1432_v2 }
 0x10a   : > { %v1108_v4 = vpop.f32.mrb[8].mxu0  ;;  %v1160_v5 = vpop.f32.mrb[8].mxu1 }
 0x10b   : > { %v716_v7 = vadd.f32 %v1160_v5, %v619_v3  ;;  %v1109_v8 = vpop.f32.mrb[9].mxu0  ;;  %v707_v9 = vpop.f32.mrb[9].mxu1 }
 0x10c   : > { %v1110_v11 = vadd.f32 %v1109_v8, %v1108_v4  ;;  %v708_v12 = vadd.f32 %v707_v9, %v611_v6  ;;  %v1111_v13 = vpop.f32.mrb[10].mxu0  ;;  %v1161_v14 = vpop.f32.mrb[10].mxu1  ;;  %v667_v9 = vadd.f32 %v1425_v60, %v1432_v2 }
 0x10d   : > { %v772_v16 = vmax.f32 %v716_v7, 0.0  ;;  %v719_v17 = vadd.f32 %v1161_v14, %v622_v10  ;;  %v1112_v18 = vpop.f32.mrb[11].mxu0  ;;  %v710_v19 = vpop.f32.mrb[11].mxu1  ;;  %v659_v14 = vadd.f32 %v1421_v48, %v1432_v2  ;;  %v662_v48 = vadd.f32 %v1423_v53, %v1432_v2 }
 0x10e   : > { %v770_v20 = vmax.f32 %v708_v12, 0.0  ;;  %v1113_v21 = vadd.f32 %v1112_v18, %v1111_v13  ;;  %v711_v22 = vadd.f32 %v710_v19, %v614_v15  ;;  %v627_v31 = vadd.f32 %v1110_v11, %v1432_v2 }
 0x10f   : > { %v1066_v23 = vpack.c.bf16 %v772_v16, %v772_v16  ;;  %v773_v24 = vmax.f32 %v719_v17, 0.0  ;;  %v670_v18 = vadd.f32 %v1427_v1, %v1432_v2 }
 0x110   : > { %v1064_v25 = vpack.c.bf16 %v770_v20, %v770_v20  ;;  %v771_v26 = vmax.f32 %v711_v22, 0.0  ;;  %v630_v38 = vadd.f32 %v1113_v21, %v1432_v2 }
 0x111   : > { %853 = vst.msk [vmem:[%s1442_s12 + $0x8] sm:$0xf] %vm850_vm1, %v1066_v23  ;;  %v1067_v27 = vpack.c.bf16 %v773_v24, %v773_v24 }
 0x112   : > { %851 = vst.msk [vmem:[%s1442_s12] sm:$0xf] %vm850_vm1, %v1064_v25  ;;  %v1065_v28 = vpack.c.bf16 %v771_v26, %v771_v26  ;;  %v1114_v29 = vpop.f32.mrb[12].mxu0  ;;  %v1164_v30 = vpop.f32.mrb[12].mxu1 }
 0x113   : > { %854 = vst.msk [vmem:[%s1442_s12 + $0xc] sm:$0xf] %vm850_vm1, %v1067_v27  ;;  %v1115_v32 = vpop.f32.mrb[13].mxu0  ;;  %v723_v33 = vpop.f32.mrb[13].mxu1 }
 0x114   : > { %852 = vst.msk [vmem:[%s1442_s12 + $0x4] sm:$0xf] %vm850_vm1, %v1065_v28  ;;  %v1116_v34 = vadd.f32 %v1115_v32, %v1114_v29  ;;  %v724_v35 = vadd.f32 %v723_v33, %v627_v31  ;;  %v1117_v36 = vpop.f32.mrb[14].mxu0  ;;  %v1165_v37 = vpop.f32.mrb[14].mxu1 }
 0x115   : > { %v1118_v39 = vpop.f32.mrb[15].mxu0  ;;  %v726_v40 = vpop.f32.mrb[15].mxu1 }
 0x116   : > { %v635_v41 = vadd.f32 %v1116_v34, %v1432_v2  ;;  %v774_v42 = vmax.f32 %v724_v35, 0.0  ;;  %v1119_v43 = vadd.f32 %v1118_v39, %v1117_v36  ;;  %v727_v44 = vadd.f32 %v726_v40, %v630_v38 }
 0x118   : > { %v732_v45 = vadd.f32 %v1164_v30, %v635_v41  ;;  %v1068_v46 = vpack.c.bf16 %v774_v42, %v774_v42  ;;  %v638_v47 = vadd.f32 %v1119_v43, %v1432_v2  ;;  %v775_v49 = vmax.f32 %v727_v44, 0.0 }
 0x11a   : > { %v776_v50 = vmax.f32 %v732_v45, 0.0  ;;  %855 = vst.msk [vmem:[%s1442_s12 + $0x10] sm:$0xf] %vm850_vm1, %v1068_v46  ;;  %v735_v51 = vadd.f32 %v1165_v37, %v638_v47  ;;  %v1069_v52 = vpack.c.bf16 %v775_v49, %v775_v49  ;;  %v1120_v54 = vpop.f32.mrb[16].mxu0  ;;  %v1168_v55 = vpop.f32.mrb[16].mxu1 }
 0x11b   : > { %v1121_v56 = vpop.f32.mrb[17].mxu0  ;;  %v739_v57 = vpop.f32.mrb[17].mxu1 }
 0x11c   : > { %v1070_v58 = vpack.c.bf16 %v776_v50, %v776_v50  ;;  %v777_v59 = vmax.f32 %v735_v51, 0.0  ;;  %856 = vst.msk [vmem:[%s1442_s12 + $0x14] sm:$0xf] %vm850_vm1, %v1069_v52  ;;  %v1122_v61 = vadd.f32 %v1121_v56, %v1120_v54  ;;  %v1123_v62 = vpop.f32.mrb[18].mxu0  ;;  %v1169_v63 = vpop.f32.mrb[18].mxu1 }
 0x11d   : > { %v1124_v0 = vpop.f32.mrb[19].mxu0  ;;  %v742_v3 = vpop.f32.mrb[19].mxu1 }
 0x11e   : > { %857 = vst.msk [vmem:[%s1442_s12 + $0x18] sm:$0xf] %vm850_vm1, %v1070_v58  ;;  %v1071_v4 = vpack.c.bf16 %v777_v59, %v777_v59  ;;  %v643_v5 = vadd.f32 %v1122_v61, %v1432_v2  ;;  %v1125_v6 = vadd.f32 %v1124_v0, %v1123_v62 }
 0x120   : > { %858 = vst.msk [vmem:[%s1442_s12 + $0x1c] sm:$0xf] %vm850_vm1, %v1071_v4  ;;  %v740_v7 = vadd.f32 %v739_v57, %v643_v5  ;;  %v646_v8 = vadd.f32 %v1125_v6, %v1432_v2 }
 0x122   : > { %v778_v10 = vmax.f32 %v740_v7, 0.0  ;;  %v743_v11 = vadd.f32 %v742_v3, %v646_v8  ;;  %v1126_v12 = vpop.f32.mrb[20].mxu0  ;;  %v1172_v13 = vpop.f32.mrb[20].mxu1 }
 0x123   : > { %v764_v15 = vadd.f32 %v1172_v13, %v667_v9  ;;  %v1127_v16 = vpop.f32.mrb[21].mxu0  ;;  %v755_v17 = vpop.f32.mrb[21].mxu1 }
 0x124   : > { %v1072_v19 = vpack.c.bf16 %v778_v10, %v778_v10  ;;  %v779_v20 = vmax.f32 %v743_v11, 0.0  ;;  %v1128_v21 = vadd.f32 %v1127_v16, %v1126_v12  ;;  %v756_v22 = vadd.f32 %v755_v17, %v659_v14  ;;  %v1129_v60 = vpop.f32.mrb[22].mxu0  ;;  %v1173_v23 = vpop.f32.mrb[22].mxu1 }
 0x125   : > { %v784_v24 = vmax.f32 %v764_v15, 0.0  ;;  %v767_v25 = vadd.f32 %v1173_v23, %v670_v18  ;;  %v1130_v26 = vpop.f32.mrb[23].mxu0  ;;  %v758_v27 = vpop.f32.mrb[23].mxu1 }
 0x126   : > { %859 = vst.msk [vmem:[%s1442_s12 + $0x20] sm:$0xf] %vm850_vm1, %v1072_v19  ;;  %v1073_v28 = vpack.c.bf16 %v779_v20, %v779_v20  ;;  %v651_v1 = vadd.f32 %v1128_v21, %v1432_v2  ;;  %v782_v29 = vmax.f32 %v756_v22, 0.0  ;;  %v1131_v30 = vadd.f32 %v1130_v26, %v1129_v60 }
 0x127   : > { %v1078_v31 = vpack.c.bf16 %v784_v24, %v784_v24  ;;  %v785_v32 = vmax.f32 %v767_v25, 0.0  ;;  %v759_v33 = vadd.f32 %v758_v27, %v662_v48 }
 0x128   : > { %860 = vst.msk [vmem:[%s1442_s12 + $0x24] sm:$0xf] %vm850_vm1, %v1073_v28  ;;  %v748_v34 = vadd.f32 %v1168_v55, %v651_v1  ;;  %v1076_v53 = vpack.c.bf16 %v782_v29, %v782_v29  ;;  %v654_v35 = vadd.f32 %v1131_v30, %v1432_v2 }
 0x129   : > { %865 = vst.msk [vmem:[%s1442_s12 + $0x38] sm:$0xf] %vm850_vm1, %v1078_v31  ;;  %v1079_v36 = vpack.c.bf16 %v785_v32, %v785_v32  ;;  %v783_v37 = vmax.f32 %v759_v33, 0.0 }
 0x12a   : > { %v780_v38 = vmax.f32 %v748_v34, 0.0  ;;  %863 = vst.msk [vmem:[%s1442_s12 + $0x30] sm:$0xf] %vm850_vm1, %v1076_v53  ;;  %v751_v39 = vadd.f32 %v1169_v63, %v654_v35 }
 0x12b   : > { %866 = vst.msk [vmem:[%s1442_s12 + $0x3c] sm:$0xf] %vm850_vm1, %v1079_v36  ;;  %v1077_v40 = vpack.c.bf16 %v783_v37, %v783_v37 }
 0x12c   : > { %v1074_v41 = vpack.c.bf16 %v780_v38, %v780_v38  ;;  %v781_v42 = vmax.f32 %v751_v39, 0.0 }
 0x12d   : > { %864 = vst.msk [vmem:[%s1442_s12 + $0x34] sm:$0xf] %vm850_vm1, %v1077_v40 }
 0x12e   : > { %861 = vst.msk [vmem:[%s1442_s12 + $0x28] sm:$0xf] %vm850_vm1, %v1074_v41  ;;  %v1075_v43 = vpack.c.bf16 %v781_v42, %v781_v42 }
 0x130   : > { %862 = vst.msk [vmem:[%s1442_s12 + $0x2c] sm:$0xf] %vm850_vm1, %v1075_v43 }
 0x131 PF: > { %s13_s14 = sadd.s32 1, %s1287_s14   ;;  %s1505_s12 = smov %s1283_s13 }
 0x132   : > { %p10_p5 = scmp.ge.s32.totalorder %s13_s14, 6   ;;  %s1506_s13 = smov %s1508_s15 }
 0x134   :  { %12 = sbr.rel (!%p10_p5) target bundleno = 2 (0x2), region = 68 }

</bundles_post_ra>
